<compile_context>
chip_gen: v6e
topology: v6e:2x2x1
jax: 0.10.0
libtpu: 0.0.40
codegen_flags: <defaults>
</compile_context>

<pallas_src>
import functools

import jax
import jax.numpy as jnp
from jax import lax
from jax.experimental import pallas as pl
from jax.experimental.pallas import tpu as pltpu

H_PAD = 128     # lanes per gate per direction
O_PAD = 128     # lane-dense head output width
_UNROLL = 8     # bounded unroll for the recurrent loops

_VMEM_SPEC = pl.BlockSpec(memory_space=pltpu.MemorySpace.VMEM)


# ----------------------------------------------------------------------------
# In-kernel building block: one fused bidirectional LSTM layer
# ----------------------------------------------------------------------------
def _bilstm_layer(x_val, wih_ref, b_ref, whhf_ref, whhb_ref, g_ref, h_ref):
    """x_val: (T, Din) f32 value.  Writes h_ref: (T, 2*H_PAD) [fwd | bwd].

    wih_ref : (Din, 8*H_PAD) bf16   [fwd i|f|g|o | bwd i|f|g|o], 128 lanes/gate
    b_ref   : (1, 8*H_PAD)   f32    bias_ih + bias_hh, same layout
    whhf_ref: (H_PAD, 4*H_PAD) bf16 forward recurrent weights (rows >= H zero)
    whhb_ref: (H_PAD, 4*H_PAD) bf16 backward recurrent weights
    g_ref   : (T, 8*H_PAD)   f32 scratch: hoisted input projection (both dirs)
    h_ref   : (T, 2*H_PAD)   f32: fwd hidden in lanes 0:128, bwd in 128:256
    PyTorch gate order i, f, g, o.  Padded lanes stay exactly zero.
    """
    T = x_val.shape[0]
    G4 = 4 * H_PAD

    # Hoisted input projection: ONE bf16 MXU matmul covering both directions.
    g_ref[...] = (jnp.dot(x_val.astype(jnp.bfloat16), wih_ref[...],
                          preferred_element_type=jnp.float32) + b_ref[...])

    def cell(gates, c):
        i = jax.nn.sigmoid(gates[:, 0:H_PAD])
        f = jax.nn.sigmoid(gates[:, H_PAD:2 * H_PAD])
        g = jnp.tanh(gates[:, 2 * H_PAD:3 * H_PAD])
        o = jax.nn.sigmoid(gates[:, 3 * H_PAD:4 * H_PAD])
        c_new = f * c + i * g
        return o * jnp.tanh(c_new), c_new

    def step(t, carry):
        h_f, c_f, h_b, c_b = carry                    # each (1, H_PAD) f32
        # Per-direction recurrence: two (1,128)x(128,512) bf16 dots (no concat,
        # no zero half of a block-diagonal matrix).
        rec_f = jnp.dot(h_f.astype(jnp.bfloat16), whhf_ref[...],
                        preferred_element_type=jnp.float32)
        rec_b = jnp.dot(h_b.astype(jnp.bfloat16), whhb_ref[...],
                        preferred_element_type=jnp.float32)
        tb = T - 1 - t
        gates_f = g_ref[pl.ds(t, 1), 0:G4] + rec_f
        gates_b = g_ref[pl.ds(tb, 1), G4:2 * G4] + rec_b

        h_f, c_f = cell(gates_f, c_f)
        h_b, c_b = cell(gates_b, c_b)

        h_ref[pl.ds(t, 1), 0:H_PAD] = h_f             # lane-aligned 128-wide
        h_ref[pl.ds(tb, 1), H_PAD:2 * H_PAD] = h_b
        return (h_f, c_f, h_b, c_b)

    z = jnp.zeros((1, H_PAD), jnp.float32)
    lax.fori_loop(0, T, step, (z, z, z, z), unroll=min(T, _UNROLL))


# ----------------------------------------------------------------------------
# Fused whole-model kernel
# ----------------------------------------------------------------------------
def _model_kernel(x_ref,
                  wih_w_ref, b_w_ref, whhf_w_ref, whhb_w_ref,
                  wih_s_ref, b_s_ref, whhf_s_ref, whhb_s_ref,
                  w12_ref, w34_ref, bo_ref,
                  out_ref,
                  gw_ref, hw_ref, gs_ref, hs_ref,
                  *, sent_idx, o_valid):
    # ---- Encoder.word_level_lstm over the whole document (Dropout(0) = id)
    _bilstm_layer(x_ref[...], wih_w_ref, b_w_ref, whhf_w_ref, whhb_w_ref,
                  gw_ref, hw_ref)

    # ---- sentence_embedding_type == 'last': gather rows eos-1 (static idx),
    #      fused in-kernel => no HBM round trip, layout already matches the
    #      sentence layer's packed input rows [fwd 0:128 | bwd 128:256].
    sent_in = jnp.concatenate(
        [hw_ref[pl.ds(i, 1), :] for i in sent_idx], axis=0)       # (S, 2*H_PAD)

    # ---- Encoder.sentence_level_lstm
    _bilstm_layer(sent_in, wih_s_ref, b_s_ref, whhf_s_ref, whhb_s_ref,
                  gs_ref, hs_ref)

    # ---- adjacent sentence pairs -> self.out -> LogSoftmax, two K=256 dots
    S = len(sent_idx)
    P = S - 1
    s_prev = hs_ref[pl.ds(0, P), :].astype(jnp.bfloat16)
    s_next = hs_ref[pl.ds(1, P), :].astype(jnp.bfloat16)
    logits = (jnp.dot(s_prev, w12_ref[...], preferred_element_type=jnp.float32)
              + jnp.dot(s_next, w34_ref[...], preferred_element_type=jnp.float32)
              + bo_ref[...])                                       # (P, O_PAD)
    lane = lax.broadcasted_iota(jnp.int32, logits.shape, 1)
    masked = jnp.where(lane < o_valid, logits, jnp.full_like(logits, -1e30))
    m = jnp.max(masked, axis=-1, keepdims=True)
    shifted = masked - m
    lse = jnp.log(jnp.sum(jnp.exp(shifted), axis=-1, keepdims=True))
    out_ref[...] = shifted - lse


def _fused_forward(x, packed, sent_idx, output_size):
    """x: (T, Din) f32. Returns (len(sent_idx)-1, output_size) log-probs."""
    T, Din = x.shape
    S = len(sent_idx)
    P = S - 1
    w, s, h = packed["word"], packed["sent"], packed["head"]

    # Resident VMEM footprint (everything whole-array; no grid pipelining).
    vmem_bytes = (
        4 * T * Din                                            # x
        + 2 * (Din * 8 * H_PAD + 2 * H_PAD * 8 * H_PAD)        # wih (bf16)
        + 4 * 2 * 8 * H_PAD                                    # biases (f32)
        + 2 * 4 * H_PAD * 4 * H_PAD                            # whh blocks (bf16)
        + 2 * 2 * 2 * H_PAD * O_PAD + 4 * O_PAD                # head w (bf16) + b
        + 4 * T * (8 + 2) * H_PAD                              # word gate+hidden
        + 4 * S * (8 + 2) * H_PAD                              # sent gate+hidden
        + 4 * P * O_PAD)                                       # output
    vmem_limit = int(min(max(2 * vmem_bytes, 32 << 20), 64 << 20))

    cost = pl.CostEstimate(
        flops=(2 * T * Din * 8 * H_PAD                         # word projection
               + 2 * T * 2 * H_PAD * 4 * H_PAD                 # word recurrence
               + 2 * S * 2 * H_PAD * 8 * H_PAD                 # sent projection
               + 2 * S * 2 * H_PAD * 4 * H_PAD                 # sent recurrence
               + 2 * P * 2 * 2 * H_PAD * O_PAD),               # head
        transcendentals=10 * H_PAD * (T + S) + P * O_PAD,
        bytes_accessed=vmem_bytes,
    )

    out_pad = pl.pallas_call(
        functools.partial(_model_kernel, sent_idx=sent_idx, o_valid=output_size),
        out_shape=jax.ShapeDtypeStruct((P, O_PAD), jnp.float32),
        in_specs=[_VMEM_SPEC] * 12,
        out_specs=_VMEM_SPEC,
        scratch_shapes=[
            pltpu.VMEM((T, 8 * H_PAD), jnp.float32),   # word gates (fwd|bwd)
            pltpu.VMEM((T, 2 * H_PAD), jnp.float32),   # word hidden (fwd|bwd)
            pltpu.VMEM((S, 8 * H_PAD), jnp.float32),   # sentence gates
            pltpu.VMEM((S, 2 * H_PAD), jnp.float32),   # sentence hidden
        ],
        compiler_params=pltpu.CompilerParams(vmem_limit_bytes=vmem_limit),
        cost_estimate=cost,
    )(x, w["wih"], w["b"], w["whhf"], w["whhb"],
      s["wih"], s["b"], s["whhf"], s["whhb"],
      h["w12"], h["w34"], h["b"])
    return out_pad[:, :output_size]


# ----------------------------------------------------------------------------
# BaseSequenceLabeling forward
# ----------------------------------------------------------------------------
@functools.partial(jax.jit, static_argnums=(2, 3))
def base_sequence_labeling_forward(packed, x_btd, eos_positions, output_size):
    """x_btd: (1, T, input_size); returns (len(eos)-1, output_size) log-probs."""
    x = x_btd[0]                                               # batch_size == 1
    T = x.shape[0]
    assert len(eos_positions) >= 2, "need at least two sentences"
    assert all(1 <= int(e) <= T for e in eos_positions), "eos must be in [1, T]"
    sent_idx = tuple(int(e) - 1 for e in eos_positions)        # static gather idx
    return _fused_forward(x, packed, sent_idx, output_size)


# ----------------------------------------------------------------------------
# Parameter init (logical, follows nn.LSTM / nn.Linear) + lane-aligned packing
# ----------------------------------------------------------------------------
def _init_bilstm(key, D, H, scale=0.1):
    ks = jax.random.split(key, 6)
    return {
        "wih_f": scale * jax.random.normal(ks[0], (D, 4 * H), jnp.float32),
        "whh_f": scale * jax.random.normal(ks[1], (H, 4 * H), jnp.float32),
        "b_f":   scale * jax.random.normal(ks[2], (1, 4 * H), jnp.float32),
        "wih_b": scale * jax.random.normal(ks[3], (D, 4 * H), jnp.float32),
        "whh_b": scale * jax.random.normal(ks[4], (H, 4 * H), jnp.float32),
        "b_b":   scale * jax.random.normal(ks[5], (1, 4 * H), jnp.float32),
    }


def init_params(key, input_size, hidden_size, output_size):
    unit = hidden_size // 2          # bidirectional -> lstm_unit = hidden // 2
    k1, k2, k3, k4 = jax.random.split(key, 4)
    return {
        "word": _init_bilstm(k1, input_size, unit),
        "sent": _init_bilstm(k2, hidden_size, unit),
        "out_w": 0.1 * jax.random.normal(k3, (2 * hidden_size, output_size),
                                         jnp.float32),
        "out_b": 0.1 * jax.random.normal(k4, (1, output_size), jnp.float32),
    }


def _gate_cols(w, H):
    """(R, 4H) -> (R, 4*H_PAD): gate g placed at lanes [g*H_PAD, g*H_PAD+H)."""
    R = w.shape[0]
    out = jnp.zeros((R, 4 * H_PAD), jnp.float32)
    for g in range(4):
        out = out.at[:, g * H_PAD:g * H_PAD + H].set(w[:, g * H:(g + 1) * H])
    return out


def _pack_bilstm(p, H, din_pad, row_map):
    """Pack one BiLSTM layer: bf16 matmul weights, lane-aligned gate layout.

    row_map: list of (src_row_start, n_rows, dst_row_start) describing where the
    logical input-feature rows live in the (possibly padded) kernel input.
    """
    def place_rows(w_cols):
        out = jnp.zeros((din_pad, w_cols.shape[1]), jnp.float32)
        for (src, n, dst) in row_map:
            out = out.at[dst:dst + n, :].set(w_cols[src:src + n, :])
        return out

    wih = jnp.concatenate([place_rows(_gate_cols(p["wih_f"], H)),
                           place_rows(_gate_cols(p["wih_b"], H))], axis=1)
    b = jnp.concatenate([_gate_cols(p["b_f"], H),
                         _gate_cols(p["b_b"], H)], axis=1)
    whhf = jnp.zeros((H_PAD, 4 * H_PAD), jnp.float32
                     ).at[0:H].set(_gate_cols(p["whh_f"], H))
    whhb = jnp.zeros((H_PAD, 4 * H_PAD), jnp.float32
                     ).at[0:H].set(_gate_cols(p["whh_b"], H))
    return {"wih": wih.astype(jnp.bfloat16), "b": b,
            "whhf": whhf.astype(jnp.bfloat16),
            "whhb": whhb.astype(jnp.bfloat16)}


def _pack_head(out_w, out_b, H, O):
    """self.out weight split by sentence (prev/next), rows laid out to match the
    fused (fwd 0:H | bwd H_PAD:H_PAD+H) sentence-hidden layout; bf16."""
    def pair_block(rows_fwd, rows_bwd):
        w = jnp.zeros((2 * H_PAD, O_PAD), jnp.float32)
        w = w.at[0:H, 0:O].set(rows_fwd)
        w = w.at[H_PAD:H_PAD + H, 0:O].set(rows_bwd)
        return w.astype(jnp.bfloat16)
    return {
        "w12": pair_block(out_w[0:H], out_w[H:2 * H]),              # × s[:-1]
        "w34": pair_block(out_w[2 * H:3 * H], out_w[3 * H:4 * H]),  # × s[1:]
        "b": jnp.zeros((1, O_PAD), jnp.float32).at[:, 0:O].set(out_b),
    }


def pack_params(logical, input_size, hidden_size, output_size):
    H = hidden_size // 2
    return {
        # word level: dense input rows (input_size features)
        "word": _pack_bilstm(logical["word"], H, din_pad=input_size,
                             row_map=[(0, input_size, 0)]),
        # sentence level: input is the fused word hidden [fwd(128) | bwd(128)];
        # logical rows 0:H sit at padded rows 0:H, rows H:2H at H_PAD:H_PAD+H
        "sent": _pack_bilstm(logical["sent"], H, din_pad=2 * H_PAD,
                             row_map=[(0, H, 0), (H, H, H_PAD)]),
        "head": _pack_head(logical["out_w"], logical["out_b"], H, output_size),
    }


# ----------------------------------------------------------------------------
# Pure-JAX f32 reference (for correctness check)
# ----------------------------------------------------------------------------
def _lstm_ref(x, wih, whh, b):
    H = whh.shape[0]

    def step(carry, x_t):
        h, c = carry
        gates = x_t @ wih + h @ whh + b[0]
        i = jax.nn.sigmoid(gates[0:H])
        f = jax.nn.sigmoid(gates[H:2 * H])
        g = jnp.tanh(gates[2 * H:3 * H])
        o = jax.nn.sigmoid(gates[3 * H:4 * H])
        c = f * c + i * g
        h = o * jnp.tanh(c)
        return (h, c), h

    _, hs = lax.scan(step, (jnp.zeros(H), jnp.zeros(H)), x)
    return hs


def _bilstm_ref(x, p):
    hf = _lstm_ref(x, p["wih_f"], p["whh_f"], p["b_f"])
    hb = _lstm_ref(x[::-1], p["wih_b"], p["whh_b"], p["b_b"])[::-1]
    return jnp.concatenate([hf, hb], axis=1)


def reference_forward(params, x_btd, eos_position_list):
    x = x_btd[0]
    word_out = _bilstm_ref(x, params["word"])
    idx = jnp.asarray([e - 1 for e in eos_position_list], jnp.int32)
    sent_out = _bilstm_ref(word_out[idx], params["sent"])
    feats = jnp.concatenate([sent_out[:-1], sent_out[1:]], axis=1)
    logits = feats @ params["out_w"] + params["out_b"]
    return jax.nn.log_softmax(logits, axis=1)


# ----------------------------------------------------------------------------
if __name__ == "__main__":
    input_size, hidden_size, output_size = 32, 32, 4
    T = 8
    eos_position_list = (3, 6, 8)           # 3 sentences -> 2 adjacent pairs

    key = jax.random.PRNGKey(0)
    k_param, k_in = jax.random.split(key)
    logical = init_params(k_param, input_size, hidden_size, output_size)
    packed = pack_params(logical, input_size, hidden_size, output_size)
    x = jax.random.normal(k_in, (1, T, input_size), jnp.float32)

    out = base_sequence_labeling_forward(packed, x, eos_position_list,
                                         output_size)
    out = jax.block_until_ready(out)

    ref = jax.block_until_ready(
        reference_forward(logical, x, list(eos_position_list)))
    assert out.shape == (len(eos_position_list) - 1, output_size)
    # bf16 MXU operands (f32 accumulate) -> slightly looser tolerance vs f32 ref.
    assert jnp.allclose(out, ref, atol=2e-2, rtol=2e-2), (out, ref)

    print("KERNEL_OK")
</pallas_src>

<mosaic_0001>
module attributes {stable_mosaic.version = 11 : i64} {
  func.func @_model_kernel(%arg0: memref<8x32xf32, #tpu.memory_space<vmem>>, %arg1: memref<32x1024xbf16, #tpu.memory_space<vmem>>, %arg2: memref<1x1024xf32, #tpu.memory_space<vmem>>, %arg3: memref<128x512xbf16, #tpu.memory_space<vmem>>, %arg4: memref<128x512xbf16, #tpu.memory_space<vmem>>, %arg5: memref<256x1024xbf16, #tpu.memory_space<vmem>>, %arg6: memref<1x1024xf32, #tpu.memory_space<vmem>>, %arg7: memref<128x512xbf16, #tpu.memory_space<vmem>>, %arg8: memref<128x512xbf16, #tpu.memory_space<vmem>>, %arg9: memref<256x128xbf16, #tpu.memory_space<vmem>>, %arg10: memref<256x128xbf16, #tpu.memory_space<vmem>>, %arg11: memref<1x128xf32, #tpu.memory_space<vmem>>, %arg12: memref<2x128xf32, #tpu.memory_space<vmem>>, %arg13: memref<8x1024xf32, #tpu.memory_space<vmem>>, %arg14: memref<8x256xf32, #tpu.memory_space<vmem>>, %arg15: memref<3x1024xf32, #tpu.memory_space<vmem>>, %arg16: memref<3x256xf32, #tpu.memory_space<vmem>>) attributes {dimension_semantics = [], scalar_prefetch = 0 : i64, scratch_operands = 4 : i64, tpu.core_type = #tpu.core_type<tc>} {
    %c0 = arith.constant 0 : index
    %c0_0 = arith.constant 0 : index
    %0 = vector.load %arg0[%c0, %c0_0] : memref<8x32xf32, #tpu.memory_space<vmem>>, vector<8x32xf32>
    %1 = arith.truncf %0 : vector<8x32xf32> to vector<8x32xbf16>
    %c0_1 = arith.constant 0 : index
    %c0_2 = arith.constant 0 : index
    %2 = vector.load %arg1[%c0_1, %c0_2] : memref<32x1024xbf16, #tpu.memory_space<vmem>>, vector<32x1024xbf16>
    %cst = arith.constant dense<0.000000e+00> : vector<8x1024xf32>
    %3 = tpu.matmul %1, %2, %cst {dimension_numbers = #tpu.dot_dimension_numbers<[1], [0], [0], [1], [0, 0, 1, 1], [], []>} : vector<8x32xbf16>, vector<32x1024xbf16>, vector<8x1024xf32> -> vector<8x1024xf32>
    %c0_3 = arith.constant 0 : index
    %c0_4 = arith.constant 0 : index
    %4 = vector.load %arg2[%c0_3, %c0_4] : memref<1x1024xf32, #tpu.memory_space<vmem>>, vector<1x1024xf32>
    %5 = vector.broadcast %4 : vector<1x1024xf32> to vector<8x1024xf32>
    %6 = arith.addf %3, %5 : vector<8x1024xf32>
    %c0_5 = arith.constant 0 : index
    %c0_6 = arith.constant 0 : index
    %7 = vector.load %arg13[%c0_5, %c0_6] : memref<8x1024xf32, #tpu.memory_space<vmem>>, vector<8x1024xf32>
    tpu.vector_store %arg13[%c0_5, %c0_6], %6 {strides = array<i32>} : memref<8x1024xf32, #tpu.memory_space<vmem>>, vector<8x1024xf32>,
    %cst_7 = arith.constant 0.000000e+00 : f32
    %8 = vector.broadcast %cst_7 : f32 to vector<1x128xf32>
    %c0_i32 = arith.constant 0 : i32
    %9 = arith.truncf %8 : vector<1x128xf32> to vector<1x128xbf16>
    %c0_8 = arith.constant 0 : index
    %c0_9 = arith.constant 0 : index
    %10 = vector.load %arg3[%c0_8, %c0_9] : memref<128x512xbf16, #tpu.memory_space<vmem>>, vector<128x512xbf16>
    %cst_10 = arith.constant dense<0.000000e+00> : vector<1x512xf32>
    %11 = tpu.matmul %9, %10, %cst_10 {dimension_numbers = #tpu.dot_dimension_numbers<[1], [0], [0], [1], [0, 0, 1, 1], [], []>} : vector<1x128xbf16>, vector<128x512xbf16>, vector<1x512xf32> -> vector<1x512xf32>
    %12 = arith.truncf %8 : vector<1x128xf32> to vector<1x128xbf16>
    %c0_11 = arith.constant 0 : index
    %c0_12 = arith.constant 0 : index
    %13 = vector.load %arg4[%c0_11, %c0_12] : memref<128x512xbf16, #tpu.memory_space<vmem>>, vector<128x512xbf16>
    %cst_13 = arith.constant dense<0.000000e+00> : vector<1x512xf32>
    %14 = tpu.matmul %12, %13, %cst_13 {dimension_numbers = #tpu.dot_dimension_numbers<[1], [0], [0], [1], [0, 0, 1, 1], [], []>} : vector<1x128xbf16>, vector<128x512xbf16>, vector<1x512xf32> -> vector<1x512xf32>
    %c7_i32 = arith.constant 7 : i32
    %15 = arith.subi %c7_i32, %c0_i32 : i32
    %16 = arith.index_cast %c0_i32 : i32 to index
    %c0_14 = arith.constant 0 : index
    %17 = vector.load %arg13[%16, %c0_14] : memref<8x1024xf32, #tpu.memory_space<vmem>>, vector<1x512xf32>
    %18 = arith.addf %17, %11 : vector<1x512xf32>
    %19 = arith.index_cast %15 : i32 to index
    %c512 = arith.constant 512 : index
    %20 = vector.load %arg13[%19, %c512] : memref<8x1024xf32, #tpu.memory_space<vmem>>, vector<1x512xf32>
    %21 = arith.addf %20, %14 : vector<1x512xf32>
    %22 = vector.extract_strided_slice %18 {offsets = [0, 0], sizes = [1, 128], strides = [1, 1]} : vector<1x512xf32> to vector<1x128xf32>
    %23 = arith.negf %22 : vector<1x128xf32>
    %24 = math.exp %23 : vector<1x128xf32>
    %cst_15 = arith.constant 1.000000e+00 : f32
    %25 = vector.broadcast %cst_15 : f32 to vector<1x128xf32>
    %26 = arith.addf %25, %24 : vector<1x128xf32>
    %27 = arith.divf %25, %26 : vector<1x128xf32>
    %28 = vector.extract_strided_slice %18 {offsets = [0, 128], sizes = [1, 128], strides = [1, 1]} : vector<1x512xf32> to vector<1x128xf32>
    %29 = arith.negf %28 : vector<1x128xf32>
    %30 = math.exp %29 : vector<1x128xf32>
    %cst_16 = arith.constant 1.000000e+00 : f32
    %31 = vector.broadcast %cst_16 : f32 to vector<1x128xf32>
    %32 = arith.addf %31, %30 : vector<1x128xf32>
    %33 = arith.divf %31, %32 : vector<1x128xf32>
    %34 = vector.extract_strided_slice %18 {offsets = [0, 256], sizes = [1, 128], strides = [1, 1]} : vector<1x512xf32> to vector<1x128xf32>
    %35 = math.tanh %34 : vector<1x128xf32>
    %36 = vector.extract_strided_slice %18 {offsets = [0, 384], sizes = [1, 128], strides = [1, 1]} : vector<1x512xf32> to vector<1x128xf32>
    %37 = arith.negf %36 : vector<1x128xf32>
    %38 = math.exp %37 : vector<1x128xf32>
    %cst_17 = arith.constant 1.000000e+00 : f32
    %39 = vector.broadcast %cst_17 : f32 to vector<1x128xf32>
    %40 = arith.addf %39, %38 : vector<1x128xf32>
    %41 = arith.divf %39, %40 : vector<1x128xf32>
    %42 = arith.mulf %33, %8 : vector<1x128xf32>
    %43 = arith.mulf %27, %35 : vector<1x128xf32>
    %44 = arith.addf %42, %43 : vector<1x128xf32>
    %45 = math.tanh %44 : vector<1x128xf32>
    %46 = arith.mulf %41, %45 : vector<1x128xf32>
    %47 = vector.extract_strided_slice %21 {offsets = [0, 0], sizes = [1, 128], strides = [1, 1]} : vector<1x512xf32> to vector<1x128xf32>
    %48 = arith.negf %47 : vector<1x128xf32>
    %49 = math.exp %48 : vector<1x128xf32>
    %cst_18 = arith.constant 1.000000e+00 : f32
    %50 = vector.broadcast %cst_18 : f32 to vector<1x128xf32>
    %51 = arith.addf %50, %49 : vector<1x128xf32>
    %52 = arith.divf %50, %51 : vector<1x128xf32>
    %53 = vector.extract_strided_slice %21 {offsets = [0, 128], sizes = [1, 128], strides = [1, 1]} : vector<1x512xf32> to vector<1x128xf32>
    %54 = arith.negf %53 : vector<1x128xf32>
    %55 = math.exp %54 : vector<1x128xf32>
    %cst_19 = arith.constant 1.000000e+00 : f32
    %56 = vector.broadcast %cst_19 : f32 to vector<1x128xf32>
    %57 = arith.addf %56, %55 : vector<1x128xf32>
    %58 = arith.divf %56, %57 : vector<1x128xf32>
    %59 = vector.extract_strided_slice %21 {offsets = [0, 256], sizes = [1, 128], strides = [1, 1]} : vector<1x512xf32> to vector<1x128xf32>
    %60 = math.tanh %59 : vector<1x128xf32>
    %61 = vector.extract_strided_slice %21 {offsets = [0, 384], sizes = [1, 128], strides = [1, 1]} : vector<1x512xf32> to vector<1x128xf32>
    %62 = arith.negf %61 : vector<1x128xf32>
    %63 = math.exp %62 : vector<1x128xf32>
    %cst_20 = arith.constant 1.000000e+00 : f32
    %64 = vector.broadcast %cst_20 : f32 to vector<1x128xf32>
    %65 = arith.addf %64, %63 : vector<1x128xf32>
    %66 = arith.divf %64, %65 : vector<1x128xf32>
    %67 = arith.mulf %58, %8 : vector<1x128xf32>
    %68 = arith.mulf %52, %60 : vector<1x128xf32>
    %69 = arith.addf %67, %68 : vector<1x128xf32>
    %70 = math.tanh %69 : vector<1x128xf32>
    %71 = arith.mulf %66, %70 : vector<1x128xf32>
    %72 = arith.index_cast %c0_i32 : i32 to index
    %c0_21 = arith.constant 0 : index
    %73 = vector.load %arg14[%72, %c0_21] : memref<8x256xf32, #tpu.memory_space<vmem>>, vector<1x128xf32>
    tpu.vector_store %arg14[%72, %c0_21], %46 {strides = array<i32>} : memref<8x256xf32, #tpu.memory_space<vmem>>, vector<1x128xf32>,
    %74 = arith.index_cast %15 : i32 to index
    %c128 = arith.constant 128 : index
    %75 = vector.load %arg14[%74, %c128] : memref<8x256xf32, #tpu.memory_space<vmem>>, vector<1x128xf32>
    tpu.vector_store %arg14[%74, %c128], %71 {strides = array<i32>} : memref<8x256xf32, #tpu.memory_space<vmem>>, vector<1x128xf32>,
    %c1_i32 = arith.constant 1 : i32
    %76 = arith.truncf %46 : vector<1x128xf32> to vector<1x128xbf16>
    %c0_22 = arith.constant 0 : index
    %c0_23 = arith.constant 0 : index
    %77 = vector.load %arg3[%c0_22, %c0_23] : memref<128x512xbf16, #tpu.memory_space<vmem>>, vector<128x512xbf16>
    %cst_24 = arith.constant dense<0.000000e+00> : vector<1x512xf32>
    %78 = tpu.matmul %76, %77, %cst_24 {dimension_numbers = #tpu.dot_dimension_numbers<[1], [0], [0], [1], [0, 0, 1, 1], [], []>} : vector<1x128xbf16>, vector<128x512xbf16>, vector<1x512xf32> -> vector<1x512xf32>
    %79 = arith.truncf %71 : vector<1x128xf32> to vector<1x128xbf16>
    %c0_25 = arith.constant 0 : index
    %c0_26 = arith.constant 0 : index
    %80 = vector.load %arg4[%c0_25, %c0_26] : memref<128x512xbf16, #tpu.memory_space<vmem>>, vector<128x512xbf16>
    %cst_27 = arith.constant dense<0.000000e+00> : vector<1x512xf32>
    %81 = tpu.matmul %79, %80, %cst_27 {dimension_numbers = #tpu.dot_dimension_numbers<[1], [0], [0], [1], [0, 0, 1, 1], [], []>} : vector<1x128xbf16>, vector<128x512xbf16>, vector<1x512xf32> -> vector<1x512xf32>
    %c7_i32_28 = arith.constant 7 : i32
    %82 = arith.subi %c7_i32_28, %c1_i32 : i32
    %83 = arith.index_cast %c1_i32 : i32 to index
    %c0_29 = arith.constant 0 : index
    %84 = vector.load %arg13[%83, %c0_29] : memref<8x1024xf32, #tpu.memory_space<vmem>>, vector<1x512xf32>
    %85 = arith.addf %84, %78 : vector<1x512xf32>
    %86 = arith.index_cast %82 : i32 to index
    %c512_30 = arith.constant 512 : index
    %87 = vector.load %arg13[%86, %c512_30] : memref<8x1024xf32, #tpu.memory_space<vmem>>, vector<1x512xf32>
    %88 = arith.addf %87, %81 : vector<1x512xf32>
    %89 = vector.extract_strided_slice %85 {offsets = [0, 0], sizes = [1, 128], strides = [1, 1]} : vector<1x512xf32> to vector<1x128xf32>
    %90 = arith.negf %89 : vector<1x128xf32>
    %91 = math.exp %90 : vector<1x128xf32>
    %cst_31 = arith.constant 1.000000e+00 : f32
    %92 = vector.broadcast %cst_31 : f32 to vector<1x128xf32>
    %93 = arith.addf %92, %91 : vector<1x128xf32>
    %94 = arith.divf %92, %93 : vector<1x128xf32>
    %95 = vector.extract_strided_slice %85 {offsets = [0, 128], sizes = [1, 128], strides = [1, 1]} : vector<1x512xf32> to vector<1x128xf32>
    %96 = arith.negf %95 : vector<1x128xf32>
    %97 = math.exp %96 : vector<1x128xf32>
    %cst_32 = arith.constant 1.000000e+00 : f32
    %98 = vector.broadcast %cst_32 : f32 to vector<1x128xf32>
    %99 = arith.addf %98, %97 : vector<1x128xf32>
    %100 = arith.divf %98, %99 : vector<1x128xf32>
    %101 = vector.extract_strided_slice %85 {offsets = [0, 256], sizes = [1, 128], strides = [1, 1]} : vector<1x512xf32> to vector<1x128xf32>
    %102 = math.tanh %101 : vector<1x128xf32>
    %103 = vector.extract_strided_slice %85 {offsets = [0, 384], sizes = [1, 128], strides = [1, 1]} : vector<1x512xf32> to vector<1x128xf32>
    %104 = arith.negf %103 : vector<1x128xf32>
    %105 = math.exp %104 : vector<1x128xf32>
    %cst_33 = arith.constant 1.000000e+00 : f32
    %106 = vector.broadcast %cst_33 : f32 to vector<1x128xf32>
    %107 = arith.addf %106, %105 : vector<1x128xf32>
    %108 = arith.divf %106, %107 : vector<1x128xf32>
    %109 = arith.mulf %100, %44 : vector<1x128xf32>
    %110 = arith.mulf %94, %102 : vector<1x128xf32>
    %111 = arith.addf %109, %110 : vector<1x128xf32>
    %112 = math.tanh %111 : vector<1x128xf32>
    %113 = arith.mulf %108, %112 : vector<1x128xf32>
    %114 = vector.extract_strided_slice %88 {offsets = [0, 0], sizes = [1, 128], strides = [1, 1]} : vector<1x512xf32> to vector<1x128xf32>
    %115 = arith.negf %114 : vector<1x128xf32>
    %116 = math.exp %115 : vector<1x128xf32>
    %cst_34 = arith.constant 1.000000e+00 : f32
    %117 = vector.broadcast %cst_34 : f32 to vector<1x128xf32>
    %118 = arith.addf %117, %116 : vector<1x128xf32>
    %119 = arith.divf %117, %118 : vector<1x128xf32>
    %120 = vector.extract_strided_slice %88 {offsets = [0, 128], sizes = [1, 128], strides = [1, 1]} : vector<1x512xf32> to vector<1x128xf32>
    %121 = arith.negf %120 : vector<1x128xf32>
    %122 = math.exp %121 : vector<1x128xf32>
    %cst_35 = arith.constant 1.000000e+00 : f32
    %123 = vector.broadcast %cst_35 : f32 to vector<1x128xf32>
    %124 = arith.addf %123, %122 : vector<1x128xf32>
    %125 = arith.divf %123, %124 : vector<1x128xf32>
    %126 = vector.extract_strided_slice %88 {offsets = [0, 256], sizes = [1, 128], strides = [1, 1]} : vector<1x512xf32> to vector<1x128xf32>
    %127 = math.tanh %126 : vector<1x128xf32>
    %128 = vector.extract_strided_slice %88 {offsets = [0, 384], sizes = [1, 128], strides = [1, 1]} : vector<1x512xf32> to vector<1x128xf32>
    %129 = arith.negf %128 : vector<1x128xf32>
    %130 = math.exp %129 : vector<1x128xf32>
    %cst_36 = arith.constant 1.000000e+00 : f32
    %131 = vector.broadcast %cst_36 : f32 to vector<1x128xf32>
    %132 = arith.addf %131, %130 : vector<1x128xf32>
    %133 = arith.divf %131, %132 : vector<1x128xf32>
    %134 = arith.mulf %125, %69 : vector<1x128xf32>
    %135 = arith.mulf %119, %127 : vector<1x128xf32>
    %136 = arith.addf %134, %135 : vector<1x128xf32>
    %137 = math.tanh %136 : vector<1x128xf32>
    %138 = arith.mulf %133, %137 : vector<1x128xf32>
    %139 = arith.index_cast %c1_i32 : i32 to index
    %c0_37 = arith.constant 0 : index
    %140 = vector.load %arg14[%139, %c0_37] : memref<8x256xf32, #tpu.memory_space<vmem>>, vector<1x128xf32>
    tpu.vector_store %arg14[%139, %c0_37], %113 {strides = array<i32>} : memref<8x256xf32, #tpu.memory_space<vmem>>, vector<1x128xf32>,
    %141 = arith.index_cast %82 : i32 to index
    %c128_38 = arith.constant 128 : index
    %142 = vector.load %arg14[%141, %c128_38] : memref<8x256xf32, #tpu.memory_space<vmem>>, vector<1x128xf32>
    tpu.vector_store %arg14[%141, %c128_38], %138 {strides = array<i32>} : memref<8x256xf32, #tpu.memory_space<vmem>>, vector<1x128xf32>,
    %c2_i32 = arith.constant 2 : i32
    %143 = arith.truncf %113 : vector<1x128xf32> to vector<1x128xbf16>
    %c0_39 = arith.constant 0 : index
    %c0_40 = arith.constant 0 : index
    %144 = vector.load %arg3[%c0_39, %c0_40] : memref<128x512xbf16, #tpu.memory_space<vmem>>, vector<128x512xbf16>
    %cst_41 = arith.constant dense<0.000000e+00> : vector<1x512xf32>
    %145 = tpu.matmul %143, %144, %cst_41 {dimension_numbers = #tpu.dot_dimension_numbers<[1], [0], [0], [1], [0, 0, 1, 1], [], []>} : vector<1x128xbf16>, vector<128x512xbf16>, vector<1x512xf32> -> vector<1x512xf32>
    %146 = arith.truncf %138 : vector<1x128xf32> to vector<1x128xbf16>
    %c0_42 = arith.constant 0 : index
    %c0_43 = arith.constant 0 : index
    %147 = vector.load %arg4[%c0_42, %c0_43] : memref<128x512xbf16, #tpu.memory_space<vmem>>, vector<128x512xbf16>
    %cst_44 = arith.constant dense<0.000000e+00> : vector<1x512xf32>
    %148 = tpu.matmul %146, %147, %cst_44 {dimension_numbers = #tpu.dot_dimension_numbers<[1], [0], [0], [1], [0, 0, 1, 1], [], []>} : vector<1x128xbf16>, vector<128x512xbf16>, vector<1x512xf32> -> vector<1x512xf32>
    %c7_i32_45 = arith.constant 7 : i32
    %149 = arith.subi %c7_i32_45, %c2_i32 : i32
    %150 = arith.index_cast %c2_i32 : i32 to index
    %c0_46 = arith.constant 0 : index
    %151 = vector.load %arg13[%150, %c0_46] : memref<8x1024xf32, #tpu.memory_space<vmem>>, vector<1x512xf32>
    %152 = arith.addf %151, %145 : vector<1x512xf32>
    %153 = arith.index_cast %149 : i32 to index
    %c512_47 = arith.constant 512 : index
    %154 = vector.load %arg13[%153, %c512_47] : memref<8x1024xf32, #tpu.memory_space<vmem>>, vector<1x512xf32>
    %155 = arith.addf %154, %148 : vector<1x512xf32>
    %156 = vector.extract_strided_slice %152 {offsets = [0, 0], sizes = [1, 128], strides = [1, 1]} : vector<1x512xf32> to vector<1x128xf32>
    %157 = arith.negf %156 : vector<1x128xf32>
    %158 = math.exp %157 : vector<1x128xf32>
    %cst_48 = arith.constant 1.000000e+00 : f32
    %159 = vector.broadcast %cst_48 : f32 to vector<1x128xf32>
    %160 = arith.addf %159, %158 : vector<1x128xf32>
    %161 = arith.divf %159, %160 : vector<1x128xf32>
    %162 = vector.extract_strided_slice %152 {offsets = [0, 128], sizes = [1, 128], strides = [1, 1]} : vector<1x512xf32> to vector<1x128xf32>
    %163 = arith.negf %162 : vector<1x128xf32>
    %164 = math.exp %163 : vector<1x128xf32>
    %cst_49 = arith.constant 1.000000e+00 : f32
    %165 = vector.broadcast %cst_49 : f32 to vector<1x128xf32>
    %166 = arith.addf %165, %164 : vector<1x128xf32>
    %167 = arith.divf %165, %166 : vector<1x128xf32>
    %168 = vector.extract_strided_slice %152 {offsets = [0, 256], sizes = [1, 128], strides = [1, 1]} : vector<1x512xf32> to vector<1x128xf32>
    %169 = math.tanh %168 : vector<1x128xf32>
    %170 = vector.extract_strided_slice %152 {offsets = [0, 384], sizes = [1, 128], strides = [1, 1]} : vector<1x512xf32> to vector<1x128xf32>
    %171 = arith.negf %170 : vector<1x128xf32>
    %172 = math.exp %171 : vector<1x128xf32>
    %cst_50 = arith.constant 1.000000e+00 : f32
    %173 = vector.broadcast %cst_50 : f32 to vector<1x128xf32>
    %174 = arith.addf %173, %172 : vector<1x128xf32>
    %175 = arith.divf %173, %174 : vector<1x128xf32>
    %176 = arith.mulf %167, %111 : vector<1x128xf32>
    %177 = arith.mulf %161, %169 : vector<1x128xf32>
    %178 = arith.addf %176, %177 : vector<1x128xf32>
    %179 = math.tanh %178 : vector<1x128xf32>
    %180 = arith.mulf %175, %179 : vector<1x128xf32>
    %181 = vector.extract_strided_slice %155 {offsets = [0, 0], sizes = [1, 128], strides = [1, 1]} : vector<1x512xf32> to vector<1x128xf32>
    %182 = arith.negf %181 : vector<1x128xf32>
    %183 = math.exp %182 : vector<1x128xf32>
    %cst_51 = arith.constant 1.000000e+00 : f32
    %184 = vector.broadcast %cst_51 : f32 to vector<1x128xf32>
    %185 = arith.addf %184, %183 : vector<1x128xf32>
    %186 = arith.divf %184, %185 : vector<1x128xf32>
    %187 = vector.extract_strided_slice %155 {offsets = [0, 128], sizes = [1, 128], strides = [1, 1]} : vector<1x512xf32> to vector<1x128xf32>
    %188 = arith.negf %187 : vector<1x128xf32>
    %189 = math.exp %188 : vector<1x128xf32>
    %cst_52 = arith.constant 1.000000e+00 : f32
    %190 = vector.broadcast %cst_52 : f32 to vector<1x128xf32>
    %191 = arith.addf %190, %189 : vector<1x128xf32>
    %192 = arith.divf %190, %191 : vector<1x128xf32>
    %193 = vector.extract_strided_slice %155 {offsets = [0, 256], sizes = [1, 128], strides = [1, 1]} : vector<1x512xf32> to vector<1x128xf32>
    %194 = math.tanh %193 : vector<1x128xf32>
    %195 = vector.extract_strided_slice %155 {offsets = [0, 384], sizes = [1, 128], strides = [1, 1]} : vector<1x512xf32> to vector<1x128xf32>
    %196 = arith.negf %195 : vector<1x128xf32>
    %197 = math.exp %196 : vector<1x128xf32>
    %cst_53 = arith.constant 1.000000e+00 : f32
    %198 = vector.broadcast %cst_53 : f32 to vector<1x128xf32>
    %199 = arith.addf %198, %197 : vector<1x128xf32>
    %200 = arith.divf %198, %199 : vector<1x128xf32>
    %201 = arith.mulf %192, %136 : vector<1x128xf32>
    %202 = arith.mulf %186, %194 : vector<1x128xf32>
    %203 = arith.addf %201, %202 : vector<1x128xf32>
    %204 = math.tanh %203 : vector<1x128xf32>
    %205 = arith.mulf %200, %204 : vector<1x128xf32>
    %206 = arith.index_cast %c2_i32 : i32 to index
    %c0_54 = arith.constant 0 : index
    %207 = vector.load %arg14[%206, %c0_54] : memref<8x256xf32, #tpu.memory_space<vmem>>, vector<1x128xf32>
    tpu.vector_store %arg14[%206, %c0_54], %180 {strides = array<i32>} : memref<8x256xf32, #tpu.memory_space<vmem>>, vector<1x128xf32>,
    %208 = arith.index_cast %149 : i32 to index
    %c128_55 = arith.constant 128 : index
    %209 = vector.load %arg14[%208, %c128_55] : memref<8x256xf32, #tpu.memory_space<vmem>>, vector<1x128xf32>
    tpu.vector_store %arg14[%208, %c128_55], %205 {strides = array<i32>} : memref<8x256xf32, #tpu.memory_space<vmem>>, vector<1x128xf32>,
    %c3_i32 = arith.constant 3 : i32
    %210 = arith.truncf %180 : vector<1x128xf32> to vector<1x128xbf16>
    %c0_56 = arith.constant 0 : index
    %c0_57 = arith.constant 0 : index
    %211 = vector.load %arg3[%c0_56, %c0_57] : memref<128x512xbf16, #tpu.memory_space<vmem>>, vector<128x512xbf16>
    %cst_58 = arith.constant dense<0.000000e+00> : vector<1x512xf32>
    %212 = tpu.matmul %210, %211, %cst_58 {dimension_numbers = #tpu.dot_dimension_numbers<[1], [0], [0], [1], [0, 0, 1, 1], [], []>} : vector<1x128xbf16>, vector<128x512xbf16>, vector<1x512xf32> -> vector<1x512xf32>
    %213 = arith.truncf %205 : vector<1x128xf32> to vector<1x128xbf16>
    %c0_59 = arith.constant 0 : index
    %c0_60 = arith.constant 0 : index
    %214 = vector.load %arg4[%c0_59, %c0_60] : memref<128x512xbf16, #tpu.memory_space<vmem>>, vector<128x512xbf16>
    %cst_61 = arith.constant dense<0.000000e+00> : vector<1x512xf32>
    %215 = tpu.matmul %213, %214, %cst_61 {dimension_numbers = #tpu.dot_dimension_numbers<[1], [0], [0], [1], [0, 0, 1, 1], [], []>} : vector<1x128xbf16>, vector<128x512xbf16>, vector<1x512xf32> -> vector<1x512xf32>
    %c7_i32_62 = arith.constant 7 : i32
    %216 = arith.subi %c7_i32_62, %c3_i32 : i32
    %217 = arith.index_cast %c3_i32 : i32 to index
    %c0_63 = arith.constant 0 : index
    %218 = vector.load %arg13[%217, %c0_63] : memref<8x1024xf32, #tpu.memory_space<vmem>>, vector<1x512xf32>
    %219 = arith.addf %218, %212 : vector<1x512xf32>
    %220 = arith.index_cast %216 : i32 to index
    %c512_64 = arith.constant 512 : index
    %221 = vector.load %arg13[%220, %c512_64] : memref<8x1024xf32, #tpu.memory_space<vmem>>, vector<1x512xf32>
    %222 = arith.addf %221, %215 : vector<1x512xf32>
    %223 = vector.extract_strided_slice %219 {offsets = [0, 0], sizes = [1, 128], strides = [1, 1]} : vector<1x512xf32> to vector<1x128xf32>
    %224 = arith.negf %223 : vector<1x128xf32>
    %225 = math.exp %224 : vector<1x128xf32>
    %cst_65 = arith.constant 1.000000e+00 : f32
    %226 = vector.broadcast %cst_65 : f32 to vector<1x128xf32>
    %227 = arith.addf %226, %225 : vector<1x128xf32>
    %228 = arith.divf %226, %227 : vector<1x128xf32>
    %229 = vector.extract_strided_slice %219 {offsets = [0, 128], sizes = [1, 128], strides = [1, 1]} : vector<1x512xf32> to vector<1x128xf32>
    %230 = arith.negf %229 : vector<1x128xf32>
    %231 = math.exp %230 : vector<1x128xf32>
    %cst_66 = arith.constant 1.000000e+00 : f32
    %232 = vector.broadcast %cst_66 : f32 to vector<1x128xf32>
    %233 = arith.addf %232, %231 : vector<1x128xf32>
    %234 = arith.divf %232, %233 : vector<1x128xf32>
    %235 = vector.extract_strided_slice %219 {offsets = [0, 256], sizes = [1, 128], strides = [1, 1]} : vector<1x512xf32> to vector<1x128xf32>
    %236 = math.tanh %235 : vector<1x128xf32>
    %237 = vector.extract_strided_slice %219 {offsets = [0, 384], sizes = [1, 128], strides = [1, 1]} : vector<1x512xf32> to vector<1x128xf32>
    %238 = arith.negf %237 : vector<1x128xf32>
    %239 = math.exp %238 : vector<1x128xf32>
    %cst_67 = arith.constant 1.000000e+00 : f32
    %240 = vector.broadcast %cst_67 : f32 to vector<1x128xf32>
    %241 = arith.addf %240, %239 : vector<1x128xf32>
    %242 = arith.divf %240, %241 : vector<1x128xf32>
    %243 = arith.mulf %234, %178 : vector<1x128xf32>
    %244 = arith.mulf %228, %236 : vector<1x128xf32>
    %245 = arith.addf %243, %244 : vector<1x128xf32>
    %246 = math.tanh %245 : vector<1x128xf32>
    %247 = arith.mulf %242, %246 : vector<1x128xf32>
    %248 = vector.extract_strided_slice %222 {offsets = [0, 0], sizes = [1, 128], strides = [1, 1]} : vector<1x512xf32> to vector<1x128xf32>
    %249 = arith.negf %248 : vector<1x128xf32>
    %250 = math.exp %249 : vector<1x128xf32>
    %cst_68 = arith.constant 1.000000e+00 : f32
    %251 = vector.broadcast %cst_68 : f32 to vector<1x128xf32>
    %252 = arith.addf %251, %250 : vector<1x128xf32>
    %253 = arith.divf %251, %252 : vector<1x128xf32>
    %254 = vector.extract_strided_slice %222 {offsets = [0, 128], sizes = [1, 128], strides = [1, 1]} : vector<1x512xf32> to vector<1x128xf32>
    %255 = arith.negf %254 : vector<1x128xf32>
    %256 = math.exp %255 : vector<1x128xf32>
    %cst_69 = arith.constant 1.000000e+00 : f32
    %257 = vector.broadcast %cst_69 : f32 to vector<1x128xf32>
    %258 = arith.addf %257, %256 : vector<1x128xf32>
    %259 = arith.divf %257, %258 : vector<1x128xf32>
    %260 = vector.extract_strided_slice %222 {offsets = [0, 256], sizes = [1, 128], strides = [1, 1]} : vector<1x512xf32> to vector<1x128xf32>
    %261 = math.tanh %260 : vector<1x128xf32>
    %262 = vector.extract_strided_slice %222 {offsets = [0, 384], sizes = [1, 128], strides = [1, 1]} : vector<1x512xf32> to vector<1x128xf32>
    %263 = arith.negf %262 : vector<1x128xf32>
    %264 = math.exp %263 : vector<1x128xf32>
    %cst_70 = arith.constant 1.000000e+00 : f32
    %265 = vector.broadcast %cst_70 : f32 to vector<1x128xf32>
    %266 = arith.addf %265, %264 : vector<1x128xf32>
    %267 = arith.divf %265, %266 : vector<1x128xf32>
    %268 = arith.mulf %259, %203 : vector<1x128xf32>
    %269 = arith.mulf %253, %261 : vector<1x128xf32>
    %270 = arith.addf %268, %269 : vector<1x128xf32>
    %271 = math.tanh %270 : vector<1x128xf32>
    %272 = arith.mulf %267, %271 : vector<1x128xf32>
    %273 = arith.index_cast %c3_i32 : i32 to index
    %c0_71 = arith.constant 0 : index
    %274 = vector.load %arg14[%273, %c0_71] : memref<8x256xf32, #tpu.memory_space<vmem>>, vector<1x128xf32>
    tpu.vector_store %arg14[%273, %c0_71], %247 {strides = array<i32>} : memref<8x256xf32, #tpu.memory_space<vmem>>, vector<1x128xf32>,
    %275 = arith.index_cast %216 : i32 to index
    %c128_72 = arith.constant 128 : index
    %276 = vector.load %arg14[%275, %c128_72] : memref<8x256xf32, #tpu.memory_space<vmem>>, vector<1x128xf32>
    tpu.vector_store %arg14[%275, %c128_72], %272 {strides = array<i32>} : memref<8x256xf32, #tpu.memory_space<vmem>>, vector<1x128xf32>,
    %c4_i32 = arith.constant 4 : i32
    %277 = arith.truncf %247 : vector<1x128xf32> to vector<1x128xbf16>
    %c0_73 = arith.constant 0 : index
    %c0_74 = arith.constant 0 : index
    %278 = vector.load %arg3[%c0_73, %c0_74] : memref<128x512xbf16, #tpu.memory_space<vmem>>, vector<128x512xbf16>
    %cst_75 = arith.constant dense<0.000000e+00> : vector<1x512xf32>
    %279 = tpu.matmul %277, %278, %cst_75 {dimension_numbers = #tpu.dot_dimension_numbers<[1], [0], [0], [1], [0, 0, 1, 1], [], []>} : vector<1x128xbf16>, vector<128x512xbf16>, vector<1x512xf32> -> vector<1x512xf32>
    %280 = arith.truncf %272 : vector<1x128xf32> to vector<1x128xbf16>
    %c0_76 = arith.constant 0 : index
    %c0_77 = arith.constant 0 : index
    %281 = vector.load %arg4[%c0_76, %c0_77] : memref<128x512xbf16, #tpu.memory_space<vmem>>, vector<128x512xbf16>
    %cst_78 = arith.constant dense<0.000000e+00> : vector<1x512xf32>
    %282 = tpu.matmul %280, %281, %cst_78 {dimension_numbers = #tpu.dot_dimension_numbers<[1], [0], [0], [1], [0, 0, 1, 1], [], []>} : vector<1x128xbf16>, vector<128x512xbf16>, vector<1x512xf32> -> vector<1x512xf32>
    %c7_i32_79 = arith.constant 7 : i32
    %283 = arith.subi %c7_i32_79, %c4_i32 : i32
    %284 = arith.index_cast %c4_i32 : i32 to index
    %c0_80 = arith.constant 0 : index
    %285 = vector.load %arg13[%284, %c0_80] : memref<8x1024xf32, #tpu.memory_space<vmem>>, vector<1x512xf32>
    %286 = arith.addf %285, %279 : vector<1x512xf32>
    %287 = arith.index_cast %283 : i32 to index
    %c512_81 = arith.constant 512 : index
    %288 = vector.load %arg13[%287, %c512_81] : memref<8x1024xf32, #tpu.memory_space<vmem>>, vector<1x512xf32>
    %289 = arith.addf %288, %282 : vector<1x512xf32>
    %290 = vector.extract_strided_slice %286 {offsets = [0, 0], sizes = [1, 128], strides = [1, 1]} : vector<1x512xf32> to vector<1x128xf32>
    %291 = arith.negf %290 : vector<1x128xf32>
    %292 = math.exp %291 : vector<1x128xf32>
    %cst_82 = arith.constant 1.000000e+00 : f32
    %293 = vector.broadcast %cst_82 : f32 to vector<1x128xf32>
    %294 = arith.addf %293, %292 : vector<1x128xf32>
    %295 = arith.divf %293, %294 : vector<1x128xf32>
    %296 = vector.extract_strided_slice %286 {offsets = [0, 128], sizes = [1, 128], strides = [1, 1]} : vector<1x512xf32> to vector<1x128xf32>
    %297 = arith.negf %296 : vector<1x128xf32>
    %298 = math.exp %297 : vector<1x128xf32>
    %cst_83 = arith.constant 1.000000e+00 : f32
    %299 = vector.broadcast %cst_83 : f32 to vector<1x128xf32>
    %300 = arith.addf %299, %298 : vector<1x128xf32>
    %301 = arith.divf %299, %300 : vector<1x128xf32>
    %302 = vector.extract_strided_slice %286 {offsets = [0, 256], sizes = [1, 128], strides = [1, 1]} : vector<1x512xf32> to vector<1x128xf32>
    %303 = math.tanh %302 : vector<1x128xf32>
    %304 = vector.extract_strided_slice %286 {offsets = [0, 384], sizes = [1, 128], strides = [1, 1]} : vector<1x512xf32> to vector<1x128xf32>
    %305 = arith.negf %304 : vector<1x128xf32>
    %306 = math.exp %305 : vector<1x128xf32>
    %cst_84 = arith.constant 1.000000e+00 : f32
    %307 = vector.broadcast %cst_84 : f32 to vector<1x128xf32>
    %308 = arith.addf %307, %306 : vector<1x128xf32>
    %309 = arith.divf %307, %308 : vector<1x128xf32>
    %310 = arith.mulf %301, %245 : vector<1x128xf32>
    %311 = arith.mulf %295, %303 : vector<1x128xf32>
    %312 = arith.addf %310, %311 : vector<1x128xf32>
    %313 = math.tanh %312 : vector<1x128xf32>
    %314 = arith.mulf %309, %313 : vector<1x128xf32>
    %315 = vector.extract_strided_slice %289 {offsets = [0, 0], sizes = [1, 128], strides = [1, 1]} : vector<1x512xf32> to vector<1x128xf32>
    %316 = arith.negf %315 : vector<1x128xf32>
    %317 = math.exp %316 : vector<1x128xf32>
    %cst_85 = arith.constant 1.000000e+00 : f32
    %318 = vector.broadcast %cst_85 : f32 to vector<1x128xf32>
    %319 = arith.addf %318, %317 : vector<1x128xf32>
    %320 = arith.divf %318, %319 : vector<1x128xf32>
    %321 = vector.extract_strided_slice %289 {offsets = [0, 128], sizes = [1, 128], strides = [1, 1]} : vector<1x512xf32> to vector<1x128xf32>
    %322 = arith.negf %321 : vector<1x128xf32>
    %323 = math.exp %322 : vector<1x128xf32>
    %cst_86 = arith.constant 1.000000e+00 : f32
    %324 = vector.broadcast %cst_86 : f32 to vector<1x128xf32>
    %325 = arith.addf %324, %323 : vector<1x128xf32>
    %326 = arith.divf %324, %325 : vector<1x128xf32>
    %327 = vector.extract_strided_slice %289 {offsets = [0, 256], sizes = [1, 128], strides = [1, 1]} : vector<1x512xf32> to vector<1x128xf32>
    %328 = math.tanh %327 : vector<1x128xf32>
    %329 = vector.extract_strided_slice %289 {offsets = [0, 384], sizes = [1, 128], strides = [1, 1]} : vector<1x512xf32> to vector<1x128xf32>
    %330 = arith.negf %329 : vector<1x128xf32>
    %331 = math.exp %330 : vector<1x128xf32>
    %cst_87 = arith.constant 1.000000e+00 : f32
    %332 = vector.broadcast %cst_87 : f32 to vector<1x128xf32>
    %333 = arith.addf %332, %331 : vector<1x128xf32>
    %334 = arith.divf %332, %333 : vector<1x128xf32>
    %335 = arith.mulf %326, %270 : vector<1x128xf32>
    %336 = arith.mulf %320, %328 : vector<1x128xf32>
    %337 = arith.addf %335, %336 : vector<1x128xf32>
    %338 = math.tanh %337 : vector<1x128xf32>
    %339 = arith.mulf %334, %338 : vector<1x128xf32>
    %340 = arith.index_cast %c4_i32 : i32 to index
    %c0_88 = arith.constant 0 : index
    %341 = vector.load %arg14[%340, %c0_88] : memref<8x256xf32, #tpu.memory_space<vmem>>, vector<1x128xf32>
    tpu.vector_store %arg14[%340, %c0_88], %314 {strides = array<i32>} : memref<8x256xf32, #tpu.memory_space<vmem>>, vector<1x128xf32>,
    %342 = arith.index_cast %283 : i32 to index
    %c128_89 = arith.constant 128 : index
    %343 = vector.load %arg14[%342, %c128_89] : memref<8x256xf32, #tpu.memory_space<vmem>>, vector<1x128xf32>
    tpu.vector_store %arg14[%342, %c128_89], %339 {strides = array<i32>} : memref<8x256xf32, #tpu.memory_space<vmem>>, vector<1x128xf32>,
    %c5_i32 = arith.constant 5 : i32
    %344 = arith.truncf %314 : vector<1x128xf32> to vector<1x128xbf16>
    %c0_90 = arith.constant 0 : index
    %c0_91 = arith.constant 0 : index
    %345 = vector.load %arg3[%c0_90, %c0_91] : memref<128x512xbf16, #tpu.memory_space<vmem>>, vector<128x512xbf16>
    %cst_92 = arith.constant dense<0.000000e+00> : vector<1x512xf32>
    %346 = tpu.matmul %344, %345, %cst_92 {dimension_numbers = #tpu.dot_dimension_numbers<[1], [0], [0], [1], [0, 0, 1, 1], [], []>} : vector<1x128xbf16>, vector<128x512xbf16>, vector<1x512xf32> -> vector<1x512xf32>
    %347 = arith.truncf %339 : vector<1x128xf32> to vector<1x128xbf16>
    %c0_93 = arith.constant 0 : index
    %c0_94 = arith.constant 0 : index
    %348 = vector.load %arg4[%c0_93, %c0_94] : memref<128x512xbf16, #tpu.memory_space<vmem>>, vector<128x512xbf16>
    %cst_95 = arith.constant dense<0.000000e+00> : vector<1x512xf32>
    %349 = tpu.matmul %347, %348, %cst_95 {dimension_numbers = #tpu.dot_dimension_numbers<[1], [0], [0], [1], [0, 0, 1, 1], [], []>} : vector<1x128xbf16>, vector<128x512xbf16>, vector<1x512xf32> -> vector<1x512xf32>
    %c7_i32_96 = arith.constant 7 : i32
    %350 = arith.subi %c7_i32_96, %c5_i32 : i32
    %351 = arith.index_cast %c5_i32 : i32 to index
    %c0_97 = arith.constant 0 : index
    %352 = vector.load %arg13[%351, %c0_97] : memref<8x1024xf32, #tpu.memory_space<vmem>>, vector<1x512xf32>
    %353 = arith.addf %352, %346 : vector<1x512xf32>
    %354 = arith.index_cast %350 : i32 to index
    %c512_98 = arith.constant 512 : index
    %355 = vector.load %arg13[%354, %c512_98] : memref<8x1024xf32, #tpu.memory_space<vmem>>, vector<1x512xf32>
    %356 = arith.addf %355, %349 : vector<1x512xf32>
    %357 = vector.extract_strided_slice %353 {offsets = [0, 0], sizes = [1, 128], strides = [1, 1]} : vector<1x512xf32> to vector<1x128xf32>
    %358 = arith.negf %357 : vector<1x128xf32>
    %359 = math.exp %358 : vector<1x128xf32>
    %cst_99 = arith.constant 1.000000e+00 : f32
    %360 = vector.broadcast %cst_99 : f32 to vector<1x128xf32>
    %361 = arith.addf %360, %359 : vector<1x128xf32>
    %362 = arith.divf %360, %361 : vector<1x128xf32>
    %363 = vector.extract_strided_slice %353 {offsets = [0, 128], sizes = [1, 128], strides = [1, 1]} : vector<1x512xf32> to vector<1x128xf32>
    %364 = arith.negf %363 : vector<1x128xf32>
    %365 = math.exp %364 : vector<1x128xf32>
    %cst_100 = arith.constant 1.000000e+00 : f32
    %366 = vector.broadcast %cst_100 : f32 to vector<1x128xf32>
    %367 = arith.addf %366, %365 : vector<1x128xf32>
    %368 = arith.divf %366, %367 : vector<1x128xf32>
    %369 = vector.extract_strided_slice %353 {offsets = [0, 256], sizes = [1, 128], strides = [1, 1]} : vector<1x512xf32> to vector<1x128xf32>
    %370 = math.tanh %369 : vector<1x128xf32>
    %371 = vector.extract_strided_slice %353 {offsets = [0, 384], sizes = [1, 128], strides = [1, 1]} : vector<1x512xf32> to vector<1x128xf32>
    %372 = arith.negf %371 : vector<1x128xf32>
    %373 = math.exp %372 : vector<1x128xf32>
    %cst_101 = arith.constant 1.000000e+00 : f32
    %374 = vector.broadcast %cst_101 : f32 to vector<1x128xf32>
    %375 = arith.addf %374, %373 : vector<1x128xf32>
    %376 = arith.divf %374, %375 : vector<1x128xf32>
    %377 = arith.mulf %368, %312 : vector<1x128xf32>
    %378 = arith.mulf %362, %370 : vector<1x128xf32>
    %379 = arith.addf %377, %378 : vector<1x128xf32>
    %380 = math.tanh %379 : vector<1x128xf32>
    %381 = arith.mulf %376, %380 : vector<1x128xf32>
    %382 = vector.extract_strided_slice %356 {offsets = [0, 0], sizes = [1, 128], strides = [1, 1]} : vector<1x512xf32> to vector<1x128xf32>
    %383 = arith.negf %382 : vector<1x128xf32>
    %384 = math.exp %383 : vector<1x128xf32>
    %cst_102 = arith.constant 1.000000e+00 : f32
    %385 = vector.broadcast %cst_102 : f32 to vector<1x128xf32>
    %386 = arith.addf %385, %384 : vector<1x128xf32>
    %387 = arith.divf %385, %386 : vector<1x128xf32>
    %388 = vector.extract_strided_slice %356 {offsets = [0, 128], sizes = [1, 128], strides = [1, 1]} : vector<1x512xf32> to vector<1x128xf32>
    %389 = arith.negf %388 : vector<1x128xf32>
    %390 = math.exp %389 : vector<1x128xf32>
    %cst_103 = arith.constant 1.000000e+00 : f32
    %391 = vector.broadcast %cst_103 : f32 to vector<1x128xf32>
    %392 = arith.addf %391, %390 : vector<1x128xf32>
    %393 = arith.divf %391, %392 : vector<1x128xf32>
    %394 = vector.extract_strided_slice %356 {offsets = [0, 256], sizes = [1, 128], strides = [1, 1]} : vector<1x512xf32> to vector<1x128xf32>
    %395 = math.tanh %394 : vector<1x128xf32>
    %396 = vector.extract_strided_slice %356 {offsets = [0, 384], sizes = [1, 128], strides = [1, 1]} : vector<1x512xf32> to vector<1x128xf32>
    %397 = arith.negf %396 : vector<1x128xf32>
    %398 = math.exp %397 : vector<1x128xf32>
    %cst_104 = arith.constant 1.000000e+00 : f32
    %399 = vector.broadcast %cst_104 : f32 to vector<1x128xf32>
    %400 = arith.addf %399, %398 : vector<1x128xf32>
    %401 = arith.divf %399, %400 : vector<1x128xf32>
    %402 = arith.mulf %393, %337 : vector<1x128xf32>
    %403 = arith.mulf %387, %395 : vector<1x128xf32>
    %404 = arith.addf %402, %403 : vector<1x128xf32>
    %405 = math.tanh %404 : vector<1x128xf32>
    %406 = arith.mulf %401, %405 : vector<1x128xf32>
    %407 = arith.index_cast %c5_i32 : i32 to index
    %c0_105 = arith.constant 0 : index
    %408 = vector.load %arg14[%407, %c0_105] : memref<8x256xf32, #tpu.memory_space<vmem>>, vector<1x128xf32>
    tpu.vector_store %arg14[%407, %c0_105], %381 {strides = array<i32>} : memref<8x256xf32, #tpu.memory_space<vmem>>, vector<1x128xf32>,
    %409 = arith.index_cast %350 : i32 to index
    %c128_106 = arith.constant 128 : index
    %410 = vector.load %arg14[%409, %c128_106] : memref<8x256xf32, #tpu.memory_space<vmem>>, vector<1x128xf32>
    tpu.vector_store %arg14[%409, %c128_106], %406 {strides = array<i32>} : memref<8x256xf32, #tpu.memory_space<vmem>>, vector<1x128xf32>,
    %c6_i32 = arith.constant 6 : i32
    %411 = arith.truncf %381 : vector<1x128xf32> to vector<1x128xbf16>
    %c0_107 = arith.constant 0 : index
    %c0_108 = arith.constant 0 : index
    %412 = vector.load %arg3[%c0_107, %c0_108] : memref<128x512xbf16, #tpu.memory_space<vmem>>, vector<128x512xbf16>
    %cst_109 = arith.constant dense<0.000000e+00> : vector<1x512xf32>
    %413 = tpu.matmul %411, %412, %cst_109 {dimension_numbers = #tpu.dot_dimension_numbers<[1], [0], [0], [1], [0, 0, 1, 1], [], []>} : vector<1x128xbf16>, vector<128x512xbf16>, vector<1x512xf32> -> vector<1x512xf32>
    %414 = arith.truncf %406 : vector<1x128xf32> to vector<1x128xbf16>
    %c0_110 = arith.constant 0 : index
    %c0_111 = arith.constant 0 : index
    %415 = vector.load %arg4[%c0_110, %c0_111] : memref<128x512xbf16, #tpu.memory_space<vmem>>, vector<128x512xbf16>
    %cst_112 = arith.constant dense<0.000000e+00> : vector<1x512xf32>
    %416 = tpu.matmul %414, %415, %cst_112 {dimension_numbers = #tpu.dot_dimension_numbers<[1], [0], [0], [1], [0, 0, 1, 1], [], []>} : vector<1x128xbf16>, vector<128x512xbf16>, vector<1x512xf32> -> vector<1x512xf32>
    %c7_i32_113 = arith.constant 7 : i32
    %417 = arith.subi %c7_i32_113, %c6_i32 : i32
    %418 = arith.index_cast %c6_i32 : i32 to index
    %c0_114 = arith.constant 0 : index
    %419 = vector.load %arg13[%418, %c0_114] : memref<8x1024xf32, #tpu.memory_space<vmem>>, vector<1x512xf32>
    %420 = arith.addf %419, %413 : vector<1x512xf32>
    %421 = arith.index_cast %417 : i32 to index
    %c512_115 = arith.constant 512 : index
    %422 = vector.load %arg13[%421, %c512_115] : memref<8x1024xf32, #tpu.memory_space<vmem>>, vector<1x512xf32>
    %423 = arith.addf %422, %416 : vector<1x512xf32>
    %424 = vector.extract_strided_slice %420 {offsets = [0, 0], sizes = [1, 128], strides = [1, 1]} : vector<1x512xf32> to vector<1x128xf32>
    %425 = arith.negf %424 : vector<1x128xf32>
    %426 = math.exp %425 : vector<1x128xf32>
    %cst_116 = arith.constant 1.000000e+00 : f32
    %427 = vector.broadcast %cst_116 : f32 to vector<1x128xf32>
    %428 = arith.addf %427, %426 : vector<1x128xf32>
    %429 = arith.divf %427, %428 : vector<1x128xf32>
    %430 = vector.extract_strided_slice %420 {offsets = [0, 128], sizes = [1, 128], strides = [1, 1]} : vector<1x512xf32> to vector<1x128xf32>
    %431 = arith.negf %430 : vector<1x128xf32>
    %432 = math.exp %431 : vector<1x128xf32>
    %cst_117 = arith.constant 1.000000e+00 : f32
    %433 = vector.broadcast %cst_117 : f32 to vector<1x128xf32>
    %434 = arith.addf %433, %432 : vector<1x128xf32>
    %435 = arith.divf %433, %434 : vector<1x128xf32>
    %436 = vector.extract_strided_slice %420 {offsets = [0, 256], sizes = [1, 128], strides = [1, 1]} : vector<1x512xf32> to vector<1x128xf32>
    %437 = math.tanh %436 : vector<1x128xf32>
    %438 = vector.extract_strided_slice %420 {offsets = [0, 384], sizes = [1, 128], strides = [1, 1]} : vector<1x512xf32> to vector<1x128xf32>
    %439 = arith.negf %438 : vector<1x128xf32>
    %440 = math.exp %439 : vector<1x128xf32>
    %cst_118 = arith.constant 1.000000e+00 : f32
    %441 = vector.broadcast %cst_118 : f32 to vector<1x128xf32>
    %442 = arith.addf %441, %440 : vector<1x128xf32>
    %443 = arith.divf %441, %442 : vector<1x128xf32>
    %444 = arith.mulf %435, %379 : vector<1x128xf32>
    %445 = arith.mulf %429, %437 : vector<1x128xf32>
    %446 = arith.addf %444, %445 : vector<1x128xf32>
    %447 = math.tanh %446 : vector<1x128xf32>
    %448 = arith.mulf %443, %447 : vector<1x128xf32>
    %449 = vector.extract_strided_slice %423 {offsets = [0, 0], sizes = [1, 128], strides = [1, 1]} : vector<1x512xf32> to vector<1x128xf32>
    %450 = arith.negf %449 : vector<1x128xf32>
    %451 = math.exp %450 : vector<1x128xf32>
    %cst_119 = arith.constant 1.000000e+00 : f32
    %452 = vector.broadcast %cst_119 : f32 to vector<1x128xf32>
    %453 = arith.addf %452, %451 : vector<1x128xf32>
    %454 = arith.divf %452, %453 : vector<1x128xf32>
    %455 = vector.extract_strided_slice %423 {offsets = [0, 128], sizes = [1, 128], strides = [1, 1]} : vector<1x512xf32> to vector<1x128xf32>
    %456 = arith.negf %455 : vector<1x128xf32>
    %457 = math.exp %456 : vector<1x128xf32>
    %cst_120 = arith.constant 1.000000e+00 : f32
    %458 = vector.broadcast %cst_120 : f32 to vector<1x128xf32>
    %459 = arith.addf %458, %457 : vector<1x128xf32>
    %460 = arith.divf %458, %459 : vector<1x128xf32>
    %461 = vector.extract_strided_slice %423 {offsets = [0, 256], sizes = [1, 128], strides = [1, 1]} : vector<1x512xf32> to vector<1x128xf32>
    %462 = math.tanh %461 : vector<1x128xf32>
    %463 = vector.extract_strided_slice %423 {offsets = [0, 384], sizes = [1, 128], strides = [1, 1]} : vector<1x512xf32> to vector<1x128xf32>
    %464 = arith.negf %463 : vector<1x128xf32>
    %465 = math.exp %464 : vector<1x128xf32>
    %cst_121 = arith.constant 1.000000e+00 : f32
    %466 = vector.broadcast %cst_121 : f32 to vector<1x128xf32>
    %467 = arith.addf %466, %465 : vector<1x128xf32>
    %468 = arith.divf %466, %467 : vector<1x128xf32>
    %469 = arith.mulf %460, %404 : vector<1x128xf32>
    %470 = arith.mulf %454, %462 : vector<1x128xf32>
    %471 = arith.addf %469, %470 : vector<1x128xf32>
    %472 = math.tanh %471 : vector<1x128xf32>
    %473 = arith.mulf %468, %472 : vector<1x128xf32>
    %474 = arith.index_cast %c6_i32 : i32 to index
    %c0_122 = arith.constant 0 : index
    %475 = vector.load %arg14[%474, %c0_122] : memref<8x256xf32, #tpu.memory_space<vmem>>, vector<1x128xf32>
    tpu.vector_store %arg14[%474, %c0_122], %448 {strides = array<i32>} : memref<8x256xf32, #tpu.memory_space<vmem>>, vector<1x128xf32>,
    %476 = arith.index_cast %417 : i32 to index
    %c128_123 = arith.constant 128 : index
    %477 = vector.load %arg14[%476, %c128_123] : memref<8x256xf32, #tpu.memory_space<vmem>>, vector<1x128xf32>
    tpu.vector_store %arg14[%476, %c128_123], %473 {strides = array<i32>} : memref<8x256xf32, #tpu.memory_space<vmem>>, vector<1x128xf32>,
    %c7_i32_124 = arith.constant 7 : i32
    %478 = arith.truncf %448 : vector<1x128xf32> to vector<1x128xbf16>
    %c0_125 = arith.constant 0 : index
    %c0_126 = arith.constant 0 : index
    %479 = vector.load %arg3[%c0_125, %c0_126] : memref<128x512xbf16, #tpu.memory_space<vmem>>, vector<128x512xbf16>
    %cst_127 = arith.constant dense<0.000000e+00> : vector<1x512xf32>
    %480 = tpu.matmul %478, %479, %cst_127 {dimension_numbers = #tpu.dot_dimension_numbers<[1], [0], [0], [1], [0, 0, 1, 1], [], []>} : vector<1x128xbf16>, vector<128x512xbf16>, vector<1x512xf32> -> vector<1x512xf32>
    %481 = arith.truncf %473 : vector<1x128xf32> to vector<1x128xbf16>
    %c0_128 = arith.constant 0 : index
    %c0_129 = arith.constant 0 : index
    %482 = vector.load %arg4[%c0_128, %c0_129] : memref<128x512xbf16, #tpu.memory_space<vmem>>, vector<128x512xbf16>
    %cst_130 = arith.constant dense<0.000000e+00> : vector<1x512xf32>
    %483 = tpu.matmul %481, %482, %cst_130 {dimension_numbers = #tpu.dot_dimension_numbers<[1], [0], [0], [1], [0, 0, 1, 1], [], []>} : vector<1x128xbf16>, vector<128x512xbf16>, vector<1x512xf32> -> vector<1x512xf32>
    %c7_i32_131 = arith.constant 7 : i32
    %484 = arith.subi %c7_i32_131, %c7_i32_124 : i32
    %485 = arith.index_cast %c7_i32_124 : i32 to index
    %c0_132 = arith.constant 0 : index
    %486 = vector.load %arg13[%485, %c0_132] : memref<8x1024xf32, #tpu.memory_space<vmem>>, vector<1x512xf32>
    %487 = arith.addf %486, %480 : vector<1x512xf32>
    %488 = arith.index_cast %484 : i32 to index
    %c512_133 = arith.constant 512 : index
    %489 = vector.load %arg13[%488, %c512_133] : memref<8x1024xf32, #tpu.memory_space<vmem>>, vector<1x512xf32>
    %490 = arith.addf %489, %483 : vector<1x512xf32>
    %491 = vector.extract_strided_slice %487 {offsets = [0, 0], sizes = [1, 128], strides = [1, 1]} : vector<1x512xf32> to vector<1x128xf32>
    %492 = arith.negf %491 : vector<1x128xf32>
    %493 = math.exp %492 : vector<1x128xf32>
    %cst_134 = arith.constant 1.000000e+00 : f32
    %494 = vector.broadcast %cst_134 : f32 to vector<1x128xf32>
    %495 = arith.addf %494, %493 : vector<1x128xf32>
    %496 = arith.divf %494, %495 : vector<1x128xf32>
    %497 = vector.extract_strided_slice %487 {offsets = [0, 128], sizes = [1, 128], strides = [1, 1]} : vector<1x512xf32> to vector<1x128xf32>
    %498 = arith.negf %497 : vector<1x128xf32>
    %499 = math.exp %498 : vector<1x128xf32>
    %cst_135 = arith.constant 1.000000e+00 : f32
    %500 = vector.broadcast %cst_135 : f32 to vector<1x128xf32>
    %501 = arith.addf %500, %499 : vector<1x128xf32>
    %502 = arith.divf %500, %501 : vector<1x128xf32>
    %503 = vector.extract_strided_slice %487 {offsets = [0, 256], sizes = [1, 128], strides = [1, 1]} : vector<1x512xf32> to vector<1x128xf32>
    %504 = math.tanh %503 : vector<1x128xf32>
    %505 = vector.extract_strided_slice %487 {offsets = [0, 384], sizes = [1, 128], strides = [1, 1]} : vector<1x512xf32> to vector<1x128xf32>
    %506 = arith.negf %505 : vector<1x128xf32>
    %507 = math.exp %506 : vector<1x128xf32>
    %cst_136 = arith.constant 1.000000e+00 : f32
    %508 = vector.broadcast %cst_136 : f32 to vector<1x128xf32>
    %509 = arith.addf %508, %507 : vector<1x128xf32>
    %510 = arith.divf %508, %509 : vector<1x128xf32>
    %511 = arith.mulf %502, %446 : vector<1x128xf32>
    %512 = arith.mulf %496, %504 : vector<1x128xf32>
    %513 = arith.addf %511, %512 : vector<1x128xf32>
    %514 = math.tanh %513 : vector<1x128xf32>
    %515 = arith.mulf %510, %514 : vector<1x128xf32>
    %516 = vector.extract_strided_slice %490 {offsets = [0, 0], sizes = [1, 128], strides = [1, 1]} : vector<1x512xf32> to vector<1x128xf32>
    %517 = arith.negf %516 : vector<1x128xf32>
    %518 = math.exp %517 : vector<1x128xf32>
    %cst_137 = arith.constant 1.000000e+00 : f32
    %519 = vector.broadcast %cst_137 : f32 to vector<1x128xf32>
    %520 = arith.addf %519, %518 : vector<1x128xf32>
    %521 = arith.divf %519, %520 : vector<1x128xf32>
    %522 = vector.extract_strided_slice %490 {offsets = [0, 128], sizes = [1, 128], strides = [1, 1]} : vector<1x512xf32> to vector<1x128xf32>
    %523 = arith.negf %522 : vector<1x128xf32>
    %524 = math.exp %523 : vector<1x128xf32>
    %cst_138 = arith.constant 1.000000e+00 : f32
    %525 = vector.broadcast %cst_138 : f32 to vector<1x128xf32>
    %526 = arith.addf %525, %524 : vector<1x128xf32>
    %527 = arith.divf %525, %526 : vector<1x128xf32>
    %528 = vector.extract_strided_slice %490 {offsets = [0, 256], sizes = [1, 128], strides = [1, 1]} : vector<1x512xf32> to vector<1x128xf32>
    %529 = math.tanh %528 : vector<1x128xf32>
    %530 = vector.extract_strided_slice %490 {offsets = [0, 384], sizes = [1, 128], strides = [1, 1]} : vector<1x512xf32> to vector<1x128xf32>
    %531 = arith.negf %530 : vector<1x128xf32>
    %532 = math.exp %531 : vector<1x128xf32>
    %cst_139 = arith.constant 1.000000e+00 : f32
    %533 = vector.broadcast %cst_139 : f32 to vector<1x128xf32>
    %534 = arith.addf %533, %532 : vector<1x128xf32>
    %535 = arith.divf %533, %534 : vector<1x128xf32>
    %536 = arith.mulf %527, %471 : vector<1x128xf32>
    %537 = arith.mulf %521, %529 : vector<1x128xf32>
    %538 = arith.addf %536, %537 : vector<1x128xf32>
    %539 = math.tanh %538 : vector<1x128xf32>
    %540 = arith.mulf %535, %539 : vector<1x128xf32>
    %541 = arith.index_cast %c7_i32_124 : i32 to index
    %c0_140 = arith.constant 0 : index
    %542 = vector.load %arg14[%541, %c0_140] : memref<8x256xf32, #tpu.memory_space<vmem>>, vector<1x128xf32>
    tpu.vector_store %arg14[%541, %c0_140], %515 {strides = array<i32>} : memref<8x256xf32, #tpu.memory_space<vmem>>, vector<1x128xf32>,
    %543 = arith.index_cast %484 : i32 to index
    %c128_141 = arith.constant 128 : index
    %544 = vector.load %arg14[%543, %c128_141] : memref<8x256xf32, #tpu.memory_space<vmem>>, vector<1x128xf32>
    tpu.vector_store %arg14[%543, %c128_141], %540 {strides = array<i32>} : memref<8x256xf32, #tpu.memory_space<vmem>>, vector<1x128xf32>,
    %c8_i32 = arith.constant 8 : i32
    %c2 = arith.constant 2 : index
    %c0_142 = arith.constant 0 : index
    %545 = vector.load %arg14[%c2, %c0_142] : memref<8x256xf32, #tpu.memory_space<vmem>>, vector<1x256xf32>
    %c5 = arith.constant 5 : index
    %c0_143 = arith.constant 0 : index
    %546 = vector.load %arg14[%c5, %c0_143] : memref<8x256xf32, #tpu.memory_space<vmem>>, vector<1x256xf32>
    %c7 = arith.constant 7 : index
    %c0_144 = arith.constant 0 : index
    %547 = vector.load %arg14[%c7, %c0_144] : memref<8x256xf32, #tpu.memory_space<vmem>>, vector<1x256xf32>
    %548 = tpu.concatenate %545, %546, %547 in 0 : vector<1x256xf32>, vector<1x256xf32>, vector<1x256xf32> -> vector<3x256xf32>
    %549 = arith.truncf %548 : vector<3x256xf32> to vector<3x256xbf16>
    %c0_145 = arith.constant 0 : index
    %c0_146 = arith.constant 0 : index
    %550 = vector.load %arg5[%c0_145, %c0_146] : memref<256x1024xbf16, #tpu.memory_space<vmem>>, vector<256x1024xbf16>
    %cst_147 = arith.constant dense<0.000000e+00> : vector<3x1024xf32>
    %551 = tpu.matmul %549, %550, %cst_147 {dimension_numbers = #tpu.dot_dimension_numbers<[1], [0], [0], [1], [0, 0, 1, 1], [], []>} : vector<3x256xbf16>, vector<256x1024xbf16>, vector<3x1024xf32> -> vector<3x1024xf32>
    %c0_148 = arith.constant 0 : index
    %c0_149 = arith.constant 0 : index
    %552 = vector.load %arg6[%c0_148, %c0_149] : memref<1x1024xf32, #tpu.memory_space<vmem>>, vector<1x1024xf32>
    %553 = vector.broadcast %552 : vector<1x1024xf32> to vector<3x1024xf32>
    %554 = arith.addf %551, %553 : vector<3x1024xf32>
    %c0_150 = arith.constant 0 : index
    %c0_151 = arith.constant 0 : index
    %555 = vector.load %arg15[%c0_150, %c0_151] : memref<3x1024xf32, #tpu.memory_space<vmem>>, vector<3x1024xf32>
    tpu.vector_store %arg15[%c0_150, %c0_151], %554 {strides = array<i32>} : memref<3x1024xf32, #tpu.memory_space<vmem>>, vector<3x1024xf32>,
    %cst_152 = arith.constant 0.000000e+00 : f32
    %556 = vector.broadcast %cst_152 : f32 to vector<1x128xf32>
    %c0_i32_153 = arith.constant 0 : i32
    %557 = arith.truncf %556 : vector<1x128xf32> to vector<1x128xbf16>
    %c0_154 = arith.constant 0 : index
    %c0_155 = arith.constant 0 : index
    %558 = vector.load %arg7[%c0_154, %c0_155] : memref<128x512xbf16, #tpu.memory_space<vmem>>, vector<128x512xbf16>
    %cst_156 = arith.constant dense<0.000000e+00> : vector<1x512xf32>
    %559 = tpu.matmul %557, %558, %cst_156 {dimension_numbers = #tpu.dot_dimension_numbers<[1], [0], [0], [1], [0, 0, 1, 1], [], []>} : vector<1x128xbf16>, vector<128x512xbf16>, vector<1x512xf32> -> vector<1x512xf32>
    %560 = arith.truncf %556 : vector<1x128xf32> to vector<1x128xbf16>
    %c0_157 = arith.constant 0 : index
    %c0_158 = arith.constant 0 : index
    %561 = vector.load %arg8[%c0_157, %c0_158] : memref<128x512xbf16, #tpu.memory_space<vmem>>, vector<128x512xbf16>
    %cst_159 = arith.constant dense<0.000000e+00> : vector<1x512xf32>
    %562 = tpu.matmul %560, %561, %cst_159 {dimension_numbers = #tpu.dot_dimension_numbers<[1], [0], [0], [1], [0, 0, 1, 1], [], []>} : vector<1x128xbf16>, vector<128x512xbf16>, vector<1x512xf32> -> vector<1x512xf32>
    %c2_i32_160 = arith.constant 2 : i32
    %563 = arith.subi %c2_i32_160, %c0_i32_153 : i32
    %564 = arith.index_cast %c0_i32_153 : i32 to index
    %c0_161 = arith.constant 0 : index
    %565 = vector.load %arg15[%564, %c0_161] : memref<3x1024xf32, #tpu.memory_space<vmem>>, vector<1x512xf32>
    %566 = arith.addf %565, %559 : vector<1x512xf32>
    %567 = arith.index_cast %563 : i32 to index
    %c512_162 = arith.constant 512 : index
    %568 = vector.load %arg15[%567, %c512_162] : memref<3x1024xf32, #tpu.memory_space<vmem>>, vector<1x512xf32>
    %569 = arith.addf %568, %562 : vector<1x512xf32>
    %570 = vector.extract_strided_slice %566 {offsets = [0, 0], sizes = [1, 128], strides = [1, 1]} : vector<1x512xf32> to vector<1x128xf32>
    %571 = arith.negf %570 : vector<1x128xf32>
    %572 = math.exp %571 : vector<1x128xf32>
    %cst_163 = arith.constant 1.000000e+00 : f32
    %573 = vector.broadcast %cst_163 : f32 to vector<1x128xf32>
    %574 = arith.addf %573, %572 : vector<1x128xf32>
    %575 = arith.divf %573, %574 : vector<1x128xf32>
    %576 = vector.extract_strided_slice %566 {offsets = [0, 128], sizes = [1, 128], strides = [1, 1]} : vector<1x512xf32> to vector<1x128xf32>
    %577 = arith.negf %576 : vector<1x128xf32>
    %578 = math.exp %577 : vector<1x128xf32>
    %cst_164 = arith.constant 1.000000e+00 : f32
    %579 = vector.broadcast %cst_164 : f32 to vector<1x128xf32>
    %580 = arith.addf %579, %578 : vector<1x128xf32>
    %581 = arith.divf %579, %580 : vector<1x128xf32>
    %582 = vector.extract_strided_slice %566 {offsets = [0, 256], sizes = [1, 128], strides = [1, 1]} : vector<1x512xf32> to vector<1x128xf32>
    %583 = math.tanh %582 : vector<1x128xf32>
    %584 = vector.extract_strided_slice %566 {offsets = [0, 384], sizes = [1, 128], strides = [1, 1]} : vector<1x512xf32> to vector<1x128xf32>
    %585 = arith.negf %584 : vector<1x128xf32>
    %586 = math.exp %585 : vector<1x128xf32>
    %cst_165 = arith.constant 1.000000e+00 : f32
    %587 = vector.broadcast %cst_165 : f32 to vector<1x128xf32>
    %588 = arith.addf %587, %586 : vector<1x128xf32>
    %589 = arith.divf %587, %588 : vector<1x128xf32>
    %590 = arith.mulf %581, %556 : vector<1x128xf32>
    %591 = arith.mulf %575, %583 : vector<1x128xf32>
    %592 = arith.addf %590, %591 : vector<1x128xf32>
    %593 = math.tanh %592 : vector<1x128xf32>
    %594 = arith.mulf %589, %593 : vector<1x128xf32>
    %595 = vector.extract_strided_slice %569 {offsets = [0, 0], sizes = [1, 128], strides = [1, 1]} : vector<1x512xf32> to vector<1x128xf32>
    %596 = arith.negf %595 : vector<1x128xf32>
    %597 = math.exp %596 : vector<1x128xf32>
    %cst_166 = arith.constant 1.000000e+00 : f32
    %598 = vector.broadcast %cst_166 : f32 to vector<1x128xf32>
    %599 = arith.addf %598, %597 : vector<1x128xf32>
    %600 = arith.divf %598, %599 : vector<1x128xf32>
    %601 = vector.extract_strided_slice %569 {offsets = [0, 128], sizes = [1, 128], strides = [1, 1]} : vector<1x512xf32> to vector<1x128xf32>
    %602 = arith.negf %601 : vector<1x128xf32>
    %603 = math.exp %602 : vector<1x128xf32>
    %cst_167 = arith.constant 1.000000e+00 : f32
    %604 = vector.broadcast %cst_167 : f32 to vector<1x128xf32>
    %605 = arith.addf %604, %603 : vector<1x128xf32>
    %606 = arith.divf %604, %605 : vector<1x128xf32>
    %607 = vector.extract_strided_slice %569 {offsets = [0, 256], sizes = [1, 128], strides = [1, 1]} : vector<1x512xf32> to vector<1x128xf32>
    %608 = math.tanh %607 : vector<1x128xf32>
    %609 = vector.extract_strided_slice %569 {offsets = [0, 384], sizes = [1, 128], strides = [1, 1]} : vector<1x512xf32> to vector<1x128xf32>
    %610 = arith.negf %609 : vector<1x128xf32>
    %611 = math.exp %610 : vector<1x128xf32>
    %cst_168 = arith.constant 1.000000e+00 : f32
    %612 = vector.broadcast %cst_168 : f32 to vector<1x128xf32>
    %613 = arith.addf %612, %611 : vector<1x128xf32>
    %614 = arith.divf %612, %613 : vector<1x128xf32>
    %615 = arith.mulf %606, %556 : vector<1x128xf32>
    %616 = arith.mulf %600, %608 : vector<1x128xf32>
    %617 = arith.addf %615, %616 : vector<1x128xf32>
    %618 = math.tanh %617 : vector<1x128xf32>
    %619 = arith.mulf %614, %618 : vector<1x128xf32>
    %620 = arith.index_cast %c0_i32_153 : i32 to index
    %c0_169 = arith.constant 0 : index
    %621 = vector.load %arg16[%620, %c0_169] : memref<3x256xf32, #tpu.memory_space<vmem>>, vector<1x128xf32>
    tpu.vector_store %arg16[%620, %c0_169], %594 {strides = array<i32>} : memref<3x256xf32, #tpu.memory_space<vmem>>, vector<1x128xf32>,
    %622 = arith.index_cast %563 : i32 to index
    %c128_170 = arith.constant 128 : index
    %623 = vector.load %arg16[%622, %c128_170] : memref<3x256xf32, #tpu.memory_space<vmem>>, vector<1x128xf32>
    tpu.vector_store %arg16[%622, %c128_170], %619 {strides = array<i32>} : memref<3x256xf32, #tpu.memory_space<vmem>>, vector<1x128xf32>,
    %c1_i32_171 = arith.constant 1 : i32
    %624 = arith.truncf %594 : vector<1x128xf32> to vector<1x128xbf16>
    %c0_172 = arith.constant 0 : index
    %c0_173 = arith.constant 0 : index
    %625 = vector.load %arg7[%c0_172, %c0_173] : memref<128x512xbf16, #tpu.memory_space<vmem>>, vector<128x512xbf16>
    %cst_174 = arith.constant dense<0.000000e+00> : vector<1x512xf32>
    %626 = tpu.matmul %624, %625, %cst_174 {dimension_numbers = #tpu.dot_dimension_numbers<[1], [0], [0], [1], [0, 0, 1, 1], [], []>} : vector<1x128xbf16>, vector<128x512xbf16>, vector<1x512xf32> -> vector<1x512xf32>
    %627 = arith.truncf %619 : vector<1x128xf32> to vector<1x128xbf16>
    %c0_175 = arith.constant 0 : index
    %c0_176 = arith.constant 0 : index
    %628 = vector.load %arg8[%c0_175, %c0_176] : memref<128x512xbf16, #tpu.memory_space<vmem>>, vector<128x512xbf16>
    %cst_177 = arith.constant dense<0.000000e+00> : vector<1x512xf32>
    %629 = tpu.matmul %627, %628, %cst_177 {dimension_numbers = #tpu.dot_dimension_numbers<[1], [0], [0], [1], [0, 0, 1, 1], [], []>} : vector<1x128xbf16>, vector<128x512xbf16>, vector<1x512xf32> -> vector<1x512xf32>
    %c2_i32_178 = arith.constant 2 : i32
    %630 = arith.subi %c2_i32_178, %c1_i32_171 : i32
    %631 = arith.index_cast %c1_i32_171 : i32 to index
    %c0_179 = arith.constant 0 : index
    %632 = vector.load %arg15[%631, %c0_179] : memref<3x1024xf32, #tpu.memory_space<vmem>>, vector<1x512xf32>
    %633 = arith.addf %632, %626 : vector<1x512xf32>
    %634 = arith.index_cast %630 : i32 to index
    %c512_180 = arith.constant 512 : index
    %635 = vector.load %arg15[%634, %c512_180] : memref<3x1024xf32, #tpu.memory_space<vmem>>, vector<1x512xf32>
    %636 = arith.addf %635, %629 : vector<1x512xf32>
    %637 = vector.extract_strided_slice %633 {offsets = [0, 0], sizes = [1, 128], strides = [1, 1]} : vector<1x512xf32> to vector<1x128xf32>
    %638 = arith.negf %637 : vector<1x128xf32>
    %639 = math.exp %638 : vector<1x128xf32>
    %cst_181 = arith.constant 1.000000e+00 : f32
    %640 = vector.broadcast %cst_181 : f32 to vector<1x128xf32>
    %641 = arith.addf %640, %639 : vector<1x128xf32>
    %642 = arith.divf %640, %641 : vector<1x128xf32>
    %643 = vector.extract_strided_slice %633 {offsets = [0, 128], sizes = [1, 128], strides = [1, 1]} : vector<1x512xf32> to vector<1x128xf32>
    %644 = arith.negf %643 : vector<1x128xf32>
    %645 = math.exp %644 : vector<1x128xf32>
    %cst_182 = arith.constant 1.000000e+00 : f32
    %646 = vector.broadcast %cst_182 : f32 to vector<1x128xf32>
    %647 = arith.addf %646, %645 : vector<1x128xf32>
    %648 = arith.divf %646, %647 : vector<1x128xf32>
    %649 = vector.extract_strided_slice %633 {offsets = [0, 256], sizes = [1, 128], strides = [1, 1]} : vector<1x512xf32> to vector<1x128xf32>
    %650 = math.tanh %649 : vector<1x128xf32>
    %651 = vector.extract_strided_slice %633 {offsets = [0, 384], sizes = [1, 128], strides = [1, 1]} : vector<1x512xf32> to vector<1x128xf32>
    %652 = arith.negf %651 : vector<1x128xf32>
    %653 = math.exp %652 : vector<1x128xf32>
    %cst_183 = arith.constant 1.000000e+00 : f32
    %654 = vector.broadcast %cst_183 : f32 to vector<1x128xf32>
    %655 = arith.addf %654, %653 : vector<1x128xf32>
    %656 = arith.divf %654, %655 : vector<1x128xf32>
    %657 = arith.mulf %648, %592 : vector<1x128xf32>
    %658 = arith.mulf %642, %650 : vector<1x128xf32>
    %659 = arith.addf %657, %658 : vector<1x128xf32>
    %660 = math.tanh %659 : vector<1x128xf32>
    %661 = arith.mulf %656, %660 : vector<1x128xf32>
    %662 = vector.extract_strided_slice %636 {offsets = [0, 0], sizes = [1, 128], strides = [1, 1]} : vector<1x512xf32> to vector<1x128xf32>
    %663 = arith.negf %662 : vector<1x128xf32>
    %664 = math.exp %663 : vector<1x128xf32>
    %cst_184 = arith.constant 1.000000e+00 : f32
    %665 = vector.broadcast %cst_184 : f32 to vector<1x128xf32>
    %666 = arith.addf %665, %664 : vector<1x128xf32>
    %667 = arith.divf %665, %666 : vector<1x128xf32>
    %668 = vector.extract_strided_slice %636 {offsets = [0, 128], sizes = [1, 128], strides = [1, 1]} : vector<1x512xf32> to vector<1x128xf32>
    %669 = arith.negf %668 : vector<1x128xf32>
    %670 = math.exp %669 : vector<1x128xf32>
    %cst_185 = arith.constant 1.000000e+00 : f32
    %671 = vector.broadcast %cst_185 : f32 to vector<1x128xf32>
    %672 = arith.addf %671, %670 : vector<1x128xf32>
    %673 = arith.divf %671, %672 : vector<1x128xf32>
    %674 = vector.extract_strided_slice %636 {offsets = [0, 256], sizes = [1, 128], strides = [1, 1]} : vector<1x512xf32> to vector<1x128xf32>
    %675 = math.tanh %674 : vector<1x128xf32>
    %676 = vector.extract_strided_slice %636 {offsets = [0, 384], sizes = [1, 128], strides = [1, 1]} : vector<1x512xf32> to vector<1x128xf32>
    %677 = arith.negf %676 : vector<1x128xf32>
    %678 = math.exp %677 : vector<1x128xf32>
    %cst_186 = arith.constant 1.000000e+00 : f32
    %679 = vector.broadcast %cst_186 : f32 to vector<1x128xf32>
    %680 = arith.addf %679, %678 : vector<1x128xf32>
    %681 = arith.divf %679, %680 : vector<1x128xf32>
    %682 = arith.mulf %673, %617 : vector<1x128xf32>
    %683 = arith.mulf %667, %675 : vector<1x128xf32>
    %684 = arith.addf %682, %683 : vector<1x128xf32>
    %685 = math.tanh %684 : vector<1x128xf32>
    %686 = arith.mulf %681, %685 : vector<1x128xf32>
    %687 = arith.index_cast %c1_i32_171 : i32 to index
    %c0_187 = arith.constant 0 : index
    %688 = vector.load %arg16[%687, %c0_187] : memref<3x256xf32, #tpu.memory_space<vmem>>, vector<1x128xf32>
    tpu.vector_store %arg16[%687, %c0_187], %661 {strides = array<i32>} : memref<3x256xf32, #tpu.memory_space<vmem>>, vector<1x128xf32>,
    %689 = arith.index_cast %630 : i32 to index
    %c128_188 = arith.constant 128 : index
    %690 = vector.load %arg16[%689, %c128_188] : memref<3x256xf32, #tpu.memory_space<vmem>>, vector<1x128xf32>
    tpu.vector_store %arg16[%689, %c128_188], %686 {strides = array<i32>} : memref<3x256xf32, #tpu.memory_space<vmem>>, vector<1x128xf32>,
    %c2_i32_189 = arith.constant 2 : i32
    %691 = arith.truncf %661 : vector<1x128xf32> to vector<1x128xbf16>
    %c0_190 = arith.constant 0 : index
    %c0_191 = arith.constant 0 : index
    %692 = vector.load %arg7[%c0_190, %c0_191] : memref<128x512xbf16, #tpu.memory_space<vmem>>, vector<128x512xbf16>
    %cst_192 = arith.constant dense<0.000000e+00> : vector<1x512xf32>
    %693 = tpu.matmul %691, %692, %cst_192 {dimension_numbers = #tpu.dot_dimension_numbers<[1], [0], [0], [1], [0, 0, 1, 1], [], []>} : vector<1x128xbf16>, vector<128x512xbf16>, vector<1x512xf32> -> vector<1x512xf32>
    %694 = arith.truncf %686 : vector<1x128xf32> to vector<1x128xbf16>
    %c0_193 = arith.constant 0 : index
    %c0_194 = arith.constant 0 : index
    %695 = vector.load %arg8[%c0_193, %c0_194] : memref<128x512xbf16, #tpu.memory_space<vmem>>, vector<128x512xbf16>
    %cst_195 = arith.constant dense<0.000000e+00> : vector<1x512xf32>
    %696 = tpu.matmul %694, %695, %cst_195 {dimension_numbers = #tpu.dot_dimension_numbers<[1], [0], [0], [1], [0, 0, 1, 1], [], []>} : vector<1x128xbf16>, vector<128x512xbf16>, vector<1x512xf32> -> vector<1x512xf32>
    %c2_i32_196 = arith.constant 2 : i32
    %697 = arith.subi %c2_i32_196, %c2_i32_189 : i32
    %698 = arith.index_cast %c2_i32_189 : i32 to index
    %c0_197 = arith.constant 0 : index
    %699 = vector.load %arg15[%698, %c0_197] : memref<3x1024xf32, #tpu.memory_space<vmem>>, vector<1x512xf32>
    %700 = arith.addf %699, %693 : vector<1x512xf32>
    %701 = arith.index_cast %697 : i32 to index
    %c512_198 = arith.constant 512 : index
    %702 = vector.load %arg15[%701, %c512_198] : memref<3x1024xf32, #tpu.memory_space<vmem>>, vector<1x512xf32>
    %703 = arith.addf %702, %696 : vector<1x512xf32>
    %704 = vector.extract_strided_slice %700 {offsets = [0, 0], sizes = [1, 128], strides = [1, 1]} : vector<1x512xf32> to vector<1x128xf32>
    %705 = arith.negf %704 : vector<1x128xf32>
    %706 = math.exp %705 : vector<1x128xf32>
    %cst_199 = arith.constant 1.000000e+00 : f32
    %707 = vector.broadcast %cst_199 : f32 to vector<1x128xf32>
    %708 = arith.addf %707, %706 : vector<1x128xf32>
    %709 = arith.divf %707, %708 : vector<1x128xf32>
    %710 = vector.extract_strided_slice %700 {offsets = [0, 128], sizes = [1, 128], strides = [1, 1]} : vector<1x512xf32> to vector<1x128xf32>
    %711 = arith.negf %710 : vector<1x128xf32>
    %712 = math.exp %711 : vector<1x128xf32>
    %cst_200 = arith.constant 1.000000e+00 : f32
    %713 = vector.broadcast %cst_200 : f32 to vector<1x128xf32>
    %714 = arith.addf %713, %712 : vector<1x128xf32>
    %715 = arith.divf %713, %714 : vector<1x128xf32>
    %716 = vector.extract_strided_slice %700 {offsets = [0, 256], sizes = [1, 128], strides = [1, 1]} : vector<1x512xf32> to vector<1x128xf32>
    %717 = math.tanh %716 : vector<1x128xf32>
    %718 = vector.extract_strided_slice %700 {offsets = [0, 384], sizes = [1, 128], strides = [1, 1]} : vector<1x512xf32> to vector<1x128xf32>
    %719 = arith.negf %718 : vector<1x128xf32>
    %720 = math.exp %719 : vector<1x128xf32>
    %cst_201 = arith.constant 1.000000e+00 : f32
    %721 = vector.broadcast %cst_201 : f32 to vector<1x128xf32>
    %722 = arith.addf %721, %720 : vector<1x128xf32>
    %723 = arith.divf %721, %722 : vector<1x128xf32>
    %724 = arith.mulf %715, %659 : vector<1x128xf32>
    %725 = arith.mulf %709, %717 : vector<1x128xf32>
    %726 = arith.addf %724, %725 : vector<1x128xf32>
    %727 = math.tanh %726 : vector<1x128xf32>
    %728 = arith.mulf %723, %727 : vector<1x128xf32>
    %729 = vector.extract_strided_slice %703 {offsets = [0, 0], sizes = [1, 128], strides = [1, 1]} : vector<1x512xf32> to vector<1x128xf32>
    %730 = arith.negf %729 : vector<1x128xf32>
    %731 = math.exp %730 : vector<1x128xf32>
    %cst_202 = arith.constant 1.000000e+00 : f32
    %732 = vector.broadcast %cst_202 : f32 to vector<1x128xf32>
    %733 = arith.addf %732, %731 : vector<1x128xf32>
    %734 = arith.divf %732, %733 : vector<1x128xf32>
    %735 = vector.extract_strided_slice %703 {offsets = [0, 128], sizes = [1, 128], strides = [1, 1]} : vector<1x512xf32> to vector<1x128xf32>
    %736 = arith.negf %735 : vector<1x128xf32>
    %737 = math.exp %736 : vector<1x128xf32>
    %cst_203 = arith.constant 1.000000e+00 : f32
    %738 = vector.broadcast %cst_203 : f32 to vector<1x128xf32>
    %739 = arith.addf %738, %737 : vector<1x128xf32>
    %740 = arith.divf %738, %739 : vector<1x128xf32>
    %741 = vector.extract_strided_slice %703 {offsets = [0, 256], sizes = [1, 128], strides = [1, 1]} : vector<1x512xf32> to vector<1x128xf32>
    %742 = math.tanh %741 : vector<1x128xf32>
    %743 = vector.extract_strided_slice %703 {offsets = [0, 384], sizes = [1, 128], strides = [1, 1]} : vector<1x512xf32> to vector<1x128xf32>
    %744 = arith.negf %743 : vector<1x128xf32>
    %745 = math.exp %744 : vector<1x128xf32>
    %cst_204 = arith.constant 1.000000e+00 : f32
    %746 = vector.broadcast %cst_204 : f32 to vector<1x128xf32>
    %747 = arith.addf %746, %745 : vector<1x128xf32>
    %748 = arith.divf %746, %747 : vector<1x128xf32>
    %749 = arith.mulf %740, %684 : vector<1x128xf32>
    %750 = arith.mulf %734, %742 : vector<1x128xf32>
    %751 = arith.addf %749, %750 : vector<1x128xf32>
    %752 = math.tanh %751 : vector<1x128xf32>
    %753 = arith.mulf %748, %752 : vector<1x128xf32>
    %754 = arith.index_cast %c2_i32_189 : i32 to index
    %c0_205 = arith.constant 0 : index
    %755 = vector.load %arg16[%754, %c0_205] : memref<3x256xf32, #tpu.memory_space<vmem>>, vector<1x128xf32>
    tpu.vector_store %arg16[%754, %c0_205], %728 {strides = array<i32>} : memref<3x256xf32, #tpu.memory_space<vmem>>, vector<1x128xf32>,
    %756 = arith.index_cast %697 : i32 to index
    %c128_206 = arith.constant 128 : index
    %757 = vector.load %arg16[%756, %c128_206] : memref<3x256xf32, #tpu.memory_space<vmem>>, vector<1x128xf32>
    tpu.vector_store %arg16[%756, %c128_206], %753 {strides = array<i32>} : memref<3x256xf32, #tpu.memory_space<vmem>>, vector<1x128xf32>,
    %c3_i32_207 = arith.constant 3 : i32
    %c0_208 = arith.constant 0 : index
    %c0_209 = arith.constant 0 : index
    %758 = vector.load %arg16[%c0_208, %c0_209] : memref<3x256xf32, #tpu.memory_space<vmem>>, vector<2x256xf32>
    %759 = arith.truncf %758 : vector<2x256xf32> to vector<2x256xbf16>
    %c1 = arith.constant 1 : index
    %c0_210 = arith.constant 0 : index
    %760 = vector.load %arg16[%c1, %c0_210] : memref<3x256xf32, #tpu.memory_space<vmem>>, vector<2x256xf32>
    %761 = arith.truncf %760 : vector<2x256xf32> to vector<2x256xbf16>
    %c0_211 = arith.constant 0 : index
    %c0_212 = arith.constant 0 : index
    %762 = vector.load %arg9[%c0_211, %c0_212] : memref<256x128xbf16, #tpu.memory_space<vmem>>, vector<256x128xbf16>
    %cst_213 = arith.constant dense<0.000000e+00> : vector<2x128xf32>
    %763 = tpu.matmul %759, %762, %cst_213 {dimension_numbers = #tpu.dot_dimension_numbers<[1], [0], [0], [1], [0, 0, 1, 1], [], []>} : vector<2x256xbf16>, vector<256x128xbf16>, vector<2x128xf32> -> vector<2x128xf32>
    %c0_214 = arith.constant 0 : index
    %c0_215 = arith.constant 0 : index
    %764 = vector.load %arg10[%c0_214, %c0_215] : memref<256x128xbf16, #tpu.memory_space<vmem>>, vector<256x128xbf16>
    %cst_216 = arith.constant dense<0.000000e+00> : vector<2x128xf32>
    %765 = tpu.matmul %761, %764, %cst_216 {dimension_numbers = #tpu.dot_dimension_numbers<[1], [0], [0], [1], [0, 0, 1, 1], [], []>} : vector<2x256xbf16>, vector<256x128xbf16>, vector<2x128xf32> -> vector<2x128xf32>
    %766 = arith.addf %763, %765 : vector<2x128xf32>
    %c0_217 = arith.constant 0 : index
    %c0_218 = arith.constant 0 : index
    %767 = vector.load %arg11[%c0_217, %c0_218] : memref<1x128xf32, #tpu.memory_space<vmem>>, vector<1x128xf32>
    %768 = vector.broadcast %767 : vector<1x128xf32> to vector<2x128xf32>
    %769 = arith.addf %766, %768 : vector<2x128xf32>
    %770 = tpu.iota {dimensions = array<i32: 1>} : vector<2x128xi32>
    %c4_i32_219 = arith.constant 4 : i32
    %771 = vector.broadcast %c4_i32_219 : i32 to vector<2x128xi32>
    %772 = arith.cmpi slt, %770, %771 : vector<2x128xi32>
    %cst_220 = arith.constant -1.000000e+30 : f32
    %773 = vector.broadcast %cst_220 : f32 to vector<2x128xf32>
    %774 = arith.select %772, %769, %773 : vector<2x128xi1>, vector<2x128xf32>
    %cst_221 = arith.constant dense<0xFF800000> : vector<2xf32>
    %775 = vector.multi_reduction <maximumf>, %774, %cst_221 [1] : vector<2x128xf32> to vector<2xf32>
    %776 = vector.shape_cast %775 : vector<2xf32> to vector<2x1xf32>
    %777 = vector.broadcast %776 : vector<2x1xf32> to vector<2x128xf32>
    %778 = arith.subf %774, %777 : vector<2x128xf32>
    %779 = math.exp %778 : vector<2x128xf32>
    %cst_222 = arith.constant dense<0.000000e+00> : vector<2xf32>
    %780 = vector.multi_reduction <add>, %779, %cst_222 [1] : vector<2x128xf32> to vector<2xf32>
    %781 = vector.shape_cast %780 : vector<2xf32> to vector<2x1xf32>
    %782 = math.log %781 : vector<2x1xf32>
    %783 = vector.broadcast %782 : vector<2x1xf32> to vector<2x128xf32>
    %784 = arith.subf %778, %783 : vector<2x128xf32>
    %c0_223 = arith.constant 0 : index
    %c0_224 = arith.constant 0 : index
    %785 = vector.load %arg12[%c0_223, %c0_224] : memref<2x128xf32, #tpu.memory_space<vmem>>, vector<2x128xf32>
    tpu.vector_store %arg12[%c0_223, %c0_224], %784 {strides = array<i32>} : memref<2x128xf32, #tpu.memory_space<vmem>>, vector<2x128xf32>,
    return
  }
}

</mosaic_0001>

<bundles_post_ra>
// kernel: base_sequence_labeling_forward.1
= control target key start
LH: loop header
LB: loop body
LE: loop exit
PB: predicated region body
PF: predicated region fallthrough
CT: control target
= control target key end

     0   :  { %17 = vsyncpa [#allocation7], 0  ;;  %s13227_s0 = inlined_call_operand.vmem [shape: f32[8,32], index: 0, kind: input, shape index: {}]   ;;  %s13228_s1 = inlined_call_operand.hbm [shape: bf16[32,1024], index: 1, kind: input, shape index: {}]   ;;  %s13229_s2 = inlined_call_operand.vmem [shape: f32[1,1024], index: 2, kind: input, shape index: {}]   ;;  %s13230_s3 = inlined_call_operand.hbm [shape: bf16[128,512], index: 3, kind: input, shape index: {}]   ;;  %s13231_s4 = inlined_call_operand.hbm [shape: bf16[128,512], index: 4, kind: input, shape index: {}]   ;;  %s13232_s5 = inlined_call_operand.hbm [shape: bf16[256,1024], index: 5, kind: input, shape index: {}]   ;;  %s13233_s6 = inlined_call_operand.hbm [shape: f32[1,1024], index: 6, kind: input, shape index: {}]   ;;  %s13234_s7 = inlined_call_operand.hbm [shape: bf16[128,512], index: 7, kind: input, shape index: {}]   ;;  %s13235_s8 = inlined_call_operand.hbm [shape: bf16[128,512], index: 8, kind: input, shape index: {}]   ;;  %s13236_s9 = inlined_call_operand.hbm [shape: bf16[256,128], index: 9, kind: input, shape index: {}]   ;;  %s13237_s10 = inlined_call_operand.hbm [shape: bf16[256,128], index: 10, kind: input, shape index: {}]   ;;  %s13238_s11 = inlined_call_operand.hbm [shape: f32[1,128], index: 11, kind: input, shape index: {}]   ;;  %s13239_s12 = inlined_call_operand.hbm [shape: f32[2,128], index: 12, kind: output, shape index: {}]  }
   0x1   :  { %18 = vsyncpa [#allocation10], 0 }
   0x2   :  { %19 = vsyncpa [#allocation13], 0 }
   0x3   :  { %20 = vsyncpa [#allocation16], 0 }
   0x4   :  { %21 = vsyncpa [#allocation19], 0 }
   0x5   :  { %22 = vsyncpa [#allocation22], 0 }
   0x6   :  { %23 = vsyncpa [#allocation8], 0  ;;  %s11637_s21 = smov [#allocation9]  }
   0x7   :  { %s45_s22 = sshll.u32 %s11637_s21, 4  ;;  %s46_s22 = int_to_ptr.vmem [resolvable:$true] %s45_s22 }
   0x8   :  { %s11411_s23 = scalar_lea.vmem %s46_s22, 4096  ;;  %p11416_p1 = scmp.lt.s32.totalorder %s46_s22, %s46_s22 }
   0x9   :  { %p11412_p0 = scmp.ne.s32.totalorder %s46_s22, %s11411_s23  ;;  %p11417_p2 = scmp.lt.s32.totalorder %s11411_s23, %s11411_s23 }
   0xb   :  { %p11418_p3 = por %p11417_p2, %p11416_p1 }
   0xd   :  { %p11419_p4 = pnand %p11418_p3, %p11412_p0 }
   0xf   :  { %11422 = shalt.err (!%p11419_p4)
}
  0x10   :  { %s11638_s24 = smov 256   ;;  %s11639_s25 = smov 16  }
  0x11   :  { %51 = dma.hbm_to_vmem [thread:$0]  %s13230_s3, 4096, %s46_s22, [#allocation10], %s11638_s24, %s11638_s24, %s11639_s25  }
  0x12   :  { %s11640_s28 = smov [#allocation12]   ;;  %s11641_s30 = smov [#allocation15]  }
  0x13   :  { %s69_s29 = sshll.u32 %s11640_s28, 4  ;;  %s91_s13 = sshll.u32 %s11641_s30, 4  ;;  %s70_s29 = int_to_ptr.vmem [resolvable:$true] %s69_s29  ;;  %s92_s13 = int_to_ptr.vmem [resolvable:$true] %s91_s13 }
  0x14   :  { %s11431_s14 = scalar_lea.vmem %s70_s29, 16384  ;;  %p11436_p6 = scmp.lt.s32.totalorder %s70_s29, %s70_s29 }
  0x15   :  { %p11432_p5 = scmp.ne.s32.totalorder %s70_s29, %s11431_s14  ;;  %p11437_p7 = scmp.lt.s32.totalorder %s11431_s14, %s11431_s14 }
  0x17   :  { %p11438_p8 = por %p11437_p7, %p11436_p6 }
  0x19   :  { %p11439_p9 = pnand %p11438_p8, %p11432_p5 }
  0x1b   :  { %11442 = shalt.err (!%p11439_p9)
}
  0x1c   :  { %s11642_s15 = smov 512   ;;  %s11643_s16 = smov 32  }
  0x1d   :  { %75 = dma.hbm_to_vmem [thread:$0]  %s13232_s5, 16384, %s70_s29, [#allocation13], %s11642_s15, %s11642_s15, %s11643_s16  }
  0x1e   :  { %s11451_s3 = scalar_lea.vmem %s92_s13, 4096  ;;  %p11456_p11 = scmp.lt.s32.totalorder %s92_s13, %s92_s13 }
  0x1f   :  { %p11452_p10 = scmp.ne.s32.totalorder %s92_s13, %s11451_s3  ;;  %p11457_p12 = scmp.lt.s32.totalorder %s11451_s3, %s11451_s3 }
  0x21   :  { %p11458_p13 = por %p11457_p12, %p11456_p11 }
  0x23   :  { %p11459_p0 = pnand %p11458_p13, %p11452_p10 }
  0x25   :  { %11462 = shalt.err (!%p11459_p0)
}
  0x26   :  { %97 = dma.hbm_to_vmem [thread:$0]  %s13234_s7, 4096, %s92_s13, [#allocation16], %s11638_s24, %s11638_s24, %s11639_s25  }
  0x27   :  { %s11644_s21 = smov [#allocation18]  }
  0x28   :  { %s115_s22 = sshll.u32 %s11644_s21, 4  ;;  %s116_s22 = int_to_ptr.vmem [resolvable:$true] %s115_s22 }
  0x29   :  { %s11471_s23 = scalar_lea.vmem %s116_s22, 2048  ;;  %p11476_p2 = scmp.lt.s32.totalorder %s116_s22, %s116_s22 }
  0x2a   :  { %p11472_p1 = scmp.ne.s32.totalorder %s116_s22, %s11471_s23  ;;  %p11477_p3 = scmp.lt.s32.totalorder %s11471_s23, %s11471_s23 }
  0x2c   :  { %p11478_p4 = por %p11477_p3, %p11476_p2 }
  0x2e   :  { %p11479_p5 = pnand %p11478_p4, %p11472_p1 }
  0x30   :  { %11482 = shalt.err (!%p11479_p5)
}
  0x31   :  { %s11645_s5 = smov 64   ;;  %s11646_s26 = smov 4  }
  0x32   :  { %121 = dma.hbm_to_vmem [thread:$0]  %s13236_s9, 2048, %s116_s22, [#allocation19], %s11645_s5, %s11645_s5, %s11646_s26  }
  0x33   :  { %s11647_s7 = smov [#allocation6]   ;;  %s11648_s30 = smov [#allocation11]  }
  0x34   :  { %s31_s29 = sshll.u32 %s11647_s7, 4  ;;  %s57_s13 = sshll.u32 %s11648_s30, 4  ;;  %s32_s29 = int_to_ptr.vmem [resolvable:$true] %s31_s29  ;;  %s58_s13 = int_to_ptr.vmem [resolvable:$true] %s57_s13 }
  0x35   :  { %s11491_s14 = scalar_lea.vmem %s32_s29, 2048  ;;  %p11496_p7 = scmp.lt.s32.totalorder %s32_s29, %s32_s29 }
  0x36   :  { %p11492_p6 = scmp.ne.s32.totalorder %s32_s29, %s11491_s14  ;;  %p11497_p8 = scmp.lt.s32.totalorder %s11491_s14, %s11491_s14 }
  0x38   :  { %p11498_p9 = por %p11497_p8, %p11496_p7 }
  0x3a   :  { %p11499_p10 = pnand %p11498_p9, %p11492_p6 }
  0x3c   :  { %11502 = shalt.err (!%p11499_p10)
}
  0x3d   :  { %37 = dma.hbm_to_vmem [thread:$0]  %s13228_s1, 2048, %s32_s29, [#allocation7], %s11642_s15, %s11642_s15, %s11643_s16  }
  0x3e   :  { %s11511_s9 = scalar_lea.vmem %s58_s13, 4096  ;;  %p11516_p12 = scmp.lt.s32.totalorder %s58_s13, %s58_s13 }
  0x3f   :  { %p11512_p11 = scmp.ne.s32.totalorder %s58_s13, %s11511_s9  ;;  %p11517_p13 = scmp.lt.s32.totalorder %s11511_s9, %s11511_s9 }
  0x41   :  { %p11518_p0 = por %p11517_p13, %p11516_p12 }
  0x43   :  { %p11519_p1 = pnand %p11518_p0, %p11512_p11 }
  0x45   :  { %11522 = shalt.err (!%p11519_p1)
}
  0x46   :  { %63 = dma.hbm_to_vmem [thread:$0]  %s13231_s4, 4096, %s58_s13, [#allocation10], %s11638_s24, %s11638_s24, %s11639_s25  }
  0x47   :  { %s11649_s20 = smov [#allocation14]   ;;  %s11650_s22 = smov [#allocation17]  }
  0x48   :  { %s82_s21 = sshll.u32 %s11649_s20, 4  ;;  %s103_s23 = sshll.u32 %s11650_s22, 4  ;;  %s83_s21 = int_to_ptr.vmem [resolvable:$true] %s82_s21  ;;  %s104_s23 = int_to_ptr.vmem [resolvable:$true] %s103_s23 }
  0x49   :  { %s11531_s1 = scalar_lea.vmem %s83_s21, 128  ;;  %p11536_p3 = scmp.lt.s32.totalorder %s83_s21, %s83_s21 }
  0x4a   :  { %p11532_p2 = scmp.ne.s32.totalorder %s83_s21, %s11531_s1  ;;  %p11537_p4 = scmp.lt.s32.totalorder %s11531_s1, %s11531_s1 }
  0x4c   :  { %p11538_p5 = por %p11537_p4, %p11536_p3 }
  0x4e   :  { %p11539_p6 = pnand %p11538_p5, %p11532_p2 }
  0x50   :  { %11542 = shalt.err (!%p11539_p6)
}
  0x51   :  { %85 = dma.hbm_to_vmem [thread:$0]  %s13233_s6, 128, %s83_s21, [#allocation13]  }
  0x52   :  { %s11551_s27 = scalar_lea.vmem %s104_s23, 4096  ;;  %p11556_p8 = scmp.lt.s32.totalorder %s104_s23, %s104_s23 }
  0x53   :  { %p11552_p7 = scmp.ne.s32.totalorder %s104_s23, %s11551_s27  ;;  %p11557_p9 = scmp.lt.s32.totalorder %s11551_s27, %s11551_s27 }
  0x55   :  { %p11558_p10 = por %p11557_p9, %p11556_p8 }
  0x57   :  { %p11559_p11 = pnand %p11558_p10, %p11552_p7 }
  0x59   :  { %11562 = shalt.err (!%p11559_p11)
}
  0x5a   :  { %109 = dma.hbm_to_vmem [thread:$0]  %s13235_s8, 4096, %s104_s23, [#allocation16], %s11638_s24, %s11638_s24, %s11639_s25  }
  0x5b   :  { %s11651_s7 = smov [#allocation20]   ;;  %s11652_s30 = smov [#allocation21]  }
  0x5c   :  { %s127_s29 = sshll.u32 %s11651_s7, 4  ;;  %s140_s13 = sshll.u32 %s11652_s30, 4  ;;  %s128_s29 = int_to_ptr.vmem [resolvable:$true] %s127_s29  ;;  %s141_s13 = int_to_ptr.vmem [resolvable:$true] %s140_s13 }
  0x5d   :  { %s11571_s6 = scalar_lea.vmem %s128_s29, 2048  ;;  %p11576_p13 = scmp.lt.s32.totalorder %s128_s29, %s128_s29 }
  0x5e   :  { %p11572_p12 = scmp.ne.s32.totalorder %s128_s29, %s11571_s6  ;;  %p11577_p0 = scmp.lt.s32.totalorder %s11571_s6, %s11571_s6 }
  0x60   :  { %p11578_p1 = por %p11577_p0, %p11576_p13 }
  0x62   :  { %p11579_p2 = pnand %p11578_p1, %p11572_p12 }
  0x64   :  { %11582 = shalt.err (!%p11579_p2)
}
  0x65   :  { %133 = dma.hbm_to_vmem [thread:$0]  %s13237_s10, 2048, %s128_s29, [#allocation19], %s11645_s5, %s11645_s5, %s11646_s26  }
  0x66   :  { %s11591_s8 = scalar_lea.vmem %s141_s13, 16  ;;  %s11595_s24 = scalar_lea.vmem %s141_s13, 32 }
  0x67   :  { %p11592_p3 = scmp.ne.s32.totalorder %s141_s13, %s11591_s8  ;;  %p11596_p4 = scmp.lt.s32.totalorder %s141_s13, %s141_s13 }
  0x68   :  { %p11597_p5 = scmp.lt.s32.totalorder %s11595_s24, %s11591_s8 }
  0x6a   :  { %p11598_p6 = por %p11597_p5, %p11596_p4 }
  0x6c   :  { %p11599_p7 = pnand %p11598_p6, %p11592_p3 }
  0x6e   :  { %11602 = shalt.err (!%p11599_p7)
}
  0x6f   :  { %143 = dma.hbm_to_vmem [thread:$0]  %s13238_s11, 16, %s141_s13, [#allocation22]  }
  0x70   :  { %11623 = dma.done.wait [#allocation7], 2048  }
  0x71   :  { %11624 = vsyncadd [#allocation7], 4294965248 }
  0x72   :  { %11625 = dma.done.wait [#allocation10], 8192  }
  0x73   :  { %11626 = vsyncadd [#allocation10], 4294959104 }
  0x74   :  { %11627 = dma.done.wait [#allocation13], 16512  }
  0x75   :  { %11628 = vsyncadd [#allocation13], 4294950784 }
  0x76   :  { %11629 = dma.done.wait [#allocation16], 8192  }
  0x77   :  { %11630 = vsyncadd [#allocation16], 4294959104 }
  0x78   :  { %11631 = dma.done.wait [#allocation19], 4096  }
  0x79   :  { %11632 = vsyncadd [#allocation19], 4294963200 }
  0x7a   :  { %11633 = dma.done.wait [#allocation22], 16  }
  0x7b   :  { %11634 = vsyncadd [#allocation22], 4294967280  ;;  %v13247_v0 = vmov 0   ;;  %v185_v1 = vld [vmem:[#allocation6 + $0x40] sm:$0xff]  ;;  %v186_v3 = vld [vmem:[#allocation6 + $0x48] sm:$0xff]  ;;  %vm315_vm0 = vcmask 261120  }
  0x7c   :  { %351 = vmatprep.mubr.bf16.mxu0 %v13247_v0  ;;  %392 = vmatprep.mubr.bf16.mxu1 %v13247_v0  ;;  %v189_v2 = vld [vmem:[#allocation6 + $0x60] sm:$0xff]  ;;  %v190_v5 = vld [vmem:[#allocation6 + $0x68] sm:$0xff]  ;;  %v187_v15 = vld [vmem:[#allocation6 + $0x50] sm:$0xff]  ;;  %vm5951_vm1 = vcmask 1040384   ;;  %vm5954_vm2 = vcmask 1041408  }
  0x7d   :  { %v9402_v4 = vcombine.high %v185_v1, %v189_v2  ;;  %v9401_v6 = vcombine.low %v185_v1, %v189_v2  ;;  %v177_v7 = vld [vmem:[#allocation6] sm:$0xff]  ;;  %v9404_v9 = vcombine.high %v186_v3, %v190_v5  ;;  %v9403_v10 = vcombine.low %v186_v3, %v190_v5  ;;  %v178_v12 = vld [vmem:[#allocation6 + $0x8] sm:$0xff]  ;;  %v191_v16 = vld [vmem:[#allocation6 + $0x70] sm:$0xff] }
  0x7e   :  { %v181_v8 = vld [vmem:[#allocation6 + $0x20] sm:$0xff]  ;;  %v182_v13 = vld [vmem:[#allocation6 + $0x28] sm:$0xff]  ;;  %v188_v17 = vld [vmem:[#allocation6 + $0x58] sm:$0xff]  ;;  %v9406_v22 = vcombine.high %v187_v15, %v191_v16  ;;  %v9405_v29 = vcombine.low %v187_v15, %v191_v16 }
  0x7f   :  { %v9394_v11 = vcombine.high %v177_v7, %v181_v8  ;;  %331 = vmatprep.subr.bf16.mxu0 %v9402_v4  ;;  %v9396_v14 = vcombine.high %v178_v12, %v182_v13  ;;  %372 = vmatprep.subr.bf16.mxu1 %v9404_v9  ;;  %v9393_v18 = vcombine.low %v177_v7, %v181_v8  ;;  %v175_v19 = vld [vmem:[%s13227_s0] sm:$0xff]  ;;  %v192_v20 = vld [vmem:[#allocation6 + $0x78] sm:$0xff]  ;;  %v179_v23 = vld [vmem:[#allocation6 + $0x10] sm:$0xff] }
  0x80   :  { %332 = vmatpush1.bf16.msra.mxu0 %v9401_v6  ;;  %373 = vmatpush1.bf16.msra.mxu1 %v9403_v10  ;;  %v9395_v21 = vcombine.low %v178_v12, %v182_v13  ;;  %v9408_v24 = vcombine.high %v188_v17, %v192_v20  ;;  %v183_v25 = vld [vmem:[#allocation6 + $0x30] sm:$0xff]  ;;  %v180_v26 = vld [vmem:[#allocation6 + $0x18] sm:$0xff]  ;;  %v176_v27 = vpack.c.bf16 %v175_v19, %v175_v19 }
  0x81   :  { %333 = vmatprep.subr.bf16.mxu0 %v9394_v11  ;;  %374 = vmatprep.subr.bf16.mxu1 %v9396_v14  ;;  %v184_v28 = vld [vmem:[#allocation6 + $0x38] sm:$0xff]  ;;  %v9407_v30 = vcombine.low %v188_v17, %v192_v20  ;;  %v9398_v31 = vcombine.high %v179_v23, %v183_v25  ;;  %v9397_v33 = vcombine.low %v179_v23, %v183_v25  ;;  %v11782_v35 = vld [vmem:[#allocation9 + $0xe4] ss:$16 sps:$4 sm:$0xff]   ;;  %v11788_v37 = vld [vmem:[#allocation9 + $0xe0] ss:$16 sps:$4 sm:$0xff]  }
  0x82   :  { %v9400_v32 = vcombine.high %v180_v26, %v184_v28  ;;  %v9399_v34 = vcombine.low %v180_v26, %v184_v28  ;;  %v11785_v36 = vld [vmem:[#allocation9 + $0xec] ss:$16 sps:$4 sm:$0xff]   ;;  %v11791_v38 = vld [vmem:[#allocation9 + $0xe8] ss:$16 sps:$4 sm:$0xff]   ;;  %v11793_v39 = vld [vmem:[#allocation9 + $0xc4] ss:$16 sps:$4 sm:$0xff]  }
  0x83   :  { %v11796_v40 = vld [vmem:[#allocation9 + $0xcc] ss:$16 sps:$4 sm:$0xff]   ;;  %v11801_v41 = vld [vmem:[#allocation9 + $0xc0] ss:$16 sps:$4 sm:$0xff]   ;;  %v11805_v42 = vld [vmem:[#allocation9 + $0xc8] ss:$16 sps:$4 sm:$0xff]  }
  0x84   :  { %334 = vmatpush1.bf16.msra.mxu0 %v9393_v18  ;;  %375 = vmatpush1.bf16.msra.mxu1 %v9395_v21  ;;  %v11807_v43 = vld [vmem:[#allocation9 + $0xa4] ss:$16 sps:$4 sm:$0xff]   ;;  %v11810_v44 = vld [vmem:[#allocation9 + $0xac] ss:$16 sps:$4 sm:$0xff]   ;;  %v11815_v45 = vld [vmem:[#allocation9 + $0xa0] ss:$16 sps:$4 sm:$0xff]  }
  0x85   :  { %413 = vmatprep.subr.bf16.mxu0 %v9406_v22  ;;  %454 = vmatprep.subr.bf16.mxu1 %v9408_v24  ;;  %v11819_v46 = vld [vmem:[#allocation9 + $0xa8] ss:$16 sps:$4 sm:$0xff]   ;;  %v11821_v47 = vld [vmem:[#allocation9 + $0x84] ss:$16 sps:$4 sm:$0xff]   ;;  %v11824_v48 = vld [vmem:[#allocation9 + $0x8c] ss:$16 sps:$4 sm:$0xff]  }
  0x86   :  { %v11827_v49 = vld [vmem:[#allocation9 + $0x80] ss:$16 sps:$4 sm:$0xff]   ;;  %v11831_v50 = vld [vmem:[#allocation9 + $0x88] ss:$16 sps:$4 sm:$0xff]   ;;  %v11833_v51 = vld [vmem:[#allocation9 + $0x64] ss:$16 sps:$4 sm:$0xff]  }
  0x87   :  { %9409 = vmatmul.mubr.msk.bf16.vlgmr.msra.gmra.mxu0 %vm315_vm0, %v176_v27  ;;  %9410 = vmatmul.mubr.msk.bf16.vlgmr.msra.gmra.mxu1 %vm315_vm0, %v176_v27  ;;  %v11836_v52 = vld [vmem:[#allocation9 + $0x6c] ss:$16 sps:$4 sm:$0xff]   ;;  %v11839_v53 = vld [vmem:[#allocation9 + $0x60] ss:$16 sps:$4 sm:$0xff]   ;;  %v11843_v54 = vld [vmem:[#allocation9 + $0x68] ss:$16 sps:$4 sm:$0xff]  }
  0x88   :  { %414 = vmatpush1.bf16.msra.mxu0 %v9405_v29  ;;  %455 = vmatpush1.bf16.msra.mxu1 %v9407_v30  ;;  %v11845_v55 = vld [vmem:[#allocation9 + $0x44] ss:$16 sps:$4 sm:$0xff]   ;;  %v11848_v56 = vld [vmem:[#allocation9 + $0x4c] ss:$16 sps:$4 sm:$0xff]   ;;  %v11851_v57 = vld [vmem:[#allocation9 + $0x40] ss:$16 sps:$4 sm:$0xff]  }
  0x89   :  { %415 = vmatprep.subr.bf16.mxu0 %v9398_v31  ;;  %456 = vmatprep.subr.bf16.mxu1 %v9400_v32  ;;  %v11855_v58 = vld [vmem:[#allocation9 + $0x48] ss:$16 sps:$4 sm:$0xff]   ;;  %v11857_v59 = vld [vmem:[#allocation9 + $0x24] ss:$16 sps:$4 sm:$0xff]   ;;  %v11860_v60 = vld [vmem:[#allocation9 + $0x2c] ss:$16 sps:$4 sm:$0xff]  }
  0x8a   :  { %433 = vmatprep.mubr.bf16.mxu0 %v13247_v0  ;;  %474 = vmatprep.mubr.bf16.mxu1 %v13247_v0  ;;  %v11863_v61 = vld [vmem:[#allocation9 + $0x20] ss:$16 sps:$4 sm:$0xff]   ;;  %v11867_v62 = vld [vmem:[#allocation9 + $0x28] ss:$16 sps:$4 sm:$0xff]   ;;  %v11869_v63 = vld [vmem:[#allocation9 + $0x4] ss:$16 sps:$4 sm:$0xff]  }
  0x8b   :  { %v11872_v1 = vld [vmem:[#allocation9 + $0xc] ss:$16 sps:$4 sm:$0xff]   ;;  %v11875_v2 = vld [vmem:[#allocation9] ss:$16 sps:$4 sm:$0xff]   ;;  %v11879_v3 = vld [vmem:[#allocation9 + $0x8] ss:$16 sps:$4 sm:$0xff]  }
  0x8c   :  { %416 = vmatpush1.bf16.msra.mxu0 %v9397_v33  ;;  %457 = vmatpush1.bf16.msra.mxu1 %v9399_v34  ;;  %v11881_v4 = vld [vmem:[#allocation11 + $0xe4] ss:$16 sps:$4 sm:$0xff]   ;;  %v10455_v5 = vld [vmem:[#allocation11 + $0xe0] ss:$16 sps:$4 sm:$0xff]   ;;  %v11884_v6 = vld [vmem:[#allocation11 + $0xec] ss:$16 sps:$4 sm:$0xff]  }
  0x8d   :  { %683 = vmatprep.subr.bf16.mxu0 %v11782_v35  ;;  %724 = vmatprep.subr.bf16.mxu1 %v11785_v36  ;;  %v10458_v7 = vld [vmem:[#allocation11 + $0xe8] ss:$16 sps:$4 sm:$0xff]   ;;  %v10463_v8 = vld [vmem:[#allocation11 + $0xc4] ss:$16 sps:$4 sm:$0xff]   ;;  %v10466_v9 = vld [vmem:[#allocation11 + $0xcc] ss:$16 sps:$4 sm:$0xff]  }
  0x8e   :  { %v10461_v10 = vld [vmem:[#allocation11 + $0xc0] ss:$16 sps:$4 sm:$0xff]   ;;  %v10464_v11 = vld [vmem:[#allocation11 + $0xc8] ss:$16 sps:$4 sm:$0xff]   ;;  %v10469_v12 = vld [vmem:[#allocation11 + $0xa4] ss:$16 sps:$4 sm:$0xff]  }
  0x8f   :  { %9411 = vmatmul.mubr.msk.bf16.vlgmr.msra.gmra.mxu0 %vm315_vm0, %v176_v27  ;;  %9412 = vmatmul.mubr.msk.bf16.vlgmr.msra.gmra.mxu1 %vm315_vm0, %v176_v27  ;;  %v10472_v13 = vld [vmem:[#allocation11 + $0xac] ss:$16 sps:$4 sm:$0xff]   ;;  %v10467_v14 = vld [vmem:[#allocation11 + $0xa0] ss:$16 sps:$4 sm:$0xff]   ;;  %v10470_v15 = vld [vmem:[#allocation11 + $0xa8] ss:$16 sps:$4 sm:$0xff]  }
  0x90   :  { %684 = vmatpush1.bf16.msra.mxu0 %v11788_v37  ;;  %725 = vmatpush1.bf16.msra.mxu1 %v11791_v38  ;;  %v10475_v16 = vld [vmem:[#allocation11 + $0x84] ss:$16 sps:$4 sm:$0xff]   ;;  %v10478_v17 = vld [vmem:[#allocation11 + $0x8c] ss:$16 sps:$4 sm:$0xff]   ;;  %v10473_v18 = vld [vmem:[#allocation11 + $0x80] ss:$16 sps:$4 sm:$0xff]  }
  0x91   :  { %685 = vmatprep.subr.bf16.mxu0 %v11793_v39  ;;  %726 = vmatprep.subr.bf16.mxu1 %v11796_v40  ;;  %v10476_v19 = vld [vmem:[#allocation11 + $0x88] ss:$16 sps:$4 sm:$0xff]   ;;  %v10481_v20 = vld [vmem:[#allocation11 + $0x64] ss:$16 sps:$4 sm:$0xff]   ;;  %v10484_v21 = vld [vmem:[#allocation11 + $0x6c] ss:$16 sps:$4 sm:$0xff]  }
  0x92   :  { %715 = vmatprep.mubr.bf16.mxu0 %v13247_v0  ;;  %756 = vmatprep.mubr.bf16.mxu1 %v13247_v0  ;;  %v10479_v22 = vld [vmem:[#allocation11 + $0x60] ss:$16 sps:$4 sm:$0xff]   ;;  %v10482_v23 = vld [vmem:[#allocation11 + $0x68] ss:$16 sps:$4 sm:$0xff]   ;;  %v10487_v24 = vld [vmem:[#allocation11 + $0x44] ss:$16 sps:$4 sm:$0xff]  }
  0x93   :  { %v10490_v25 = vld [vmem:[#allocation11 + $0x4c] ss:$16 sps:$4 sm:$0xff]   ;;  %v10485_v26 = vld [vmem:[#allocation11 + $0x40] ss:$16 sps:$4 sm:$0xff]   ;;  %v10488_v27 = vld [vmem:[#allocation11 + $0x48] ss:$16 sps:$4 sm:$0xff]  }
  0x94   :  { %686 = vmatpush1.bf16.msra.mxu0 %v11801_v41  ;;  %727 = vmatpush1.bf16.msra.mxu1 %v11805_v42  ;;  %v10493_v28 = vld [vmem:[#allocation11 + $0x24] ss:$16 sps:$4 sm:$0xff]   ;;  %v10496_v29 = vld [vmem:[#allocation11 + $0x2c] ss:$16 sps:$4 sm:$0xff]   ;;  %v10491_v30 = vld [vmem:[#allocation11 + $0x20] ss:$16 sps:$4 sm:$0xff]  }
  0x95   :  { %687 = vmatprep.subr.bf16.mxu0 %v11807_v43  ;;  %728 = vmatprep.subr.bf16.mxu1 %v11810_v44  ;;  %v10494_v31 = vld [vmem:[#allocation11 + $0x28] ss:$16 sps:$4 sm:$0xff]   ;;  %v10499_v32 = vld [vmem:[#allocation11 + $0x4] ss:$16 sps:$4 sm:$0xff]   ;;  %v10502_v33 = vld [vmem:[#allocation11 + $0xc] ss:$16 sps:$4 sm:$0xff]  }
  0x96   :  { %v10497_v34 = vld [vmem:[#allocation11] ss:$16 sps:$4 sm:$0xff]  }
  0x98   :  { %688 = vmatpush1.bf16.msra.mxu0 %v11815_v45  ;;  %729 = vmatpush1.bf16.msra.mxu1 %v11819_v46 }
  0x99   :  { %689 = vmatprep.subr.bf16.mxu0 %v11821_v47  ;;  %730 = vmatprep.subr.bf16.mxu1 %v11824_v48 }
  0x9c   :  { %690 = vmatpush1.bf16.msra.mxu0 %v11827_v49  ;;  %731 = vmatpush1.bf16.msra.mxu1 %v11831_v50 }
  0x9d   :  { %691 = vmatprep.subr.bf16.mxu0 %v11833_v51  ;;  %732 = vmatprep.subr.bf16.mxu1 %v11836_v52 }
  0xa0   :  { %692 = vmatpush1.bf16.msra.mxu0 %v11839_v53  ;;  %733 = vmatpush1.bf16.msra.mxu1 %v11843_v54 }
  0xa1   :  { %693 = vmatprep.subr.bf16.mxu0 %v11845_v55  ;;  %734 = vmatprep.subr.bf16.mxu1 %v11848_v56 }
  0xa4   :  { %694 = vmatpush1.bf16.msra.mxu0 %v11851_v57  ;;  %735 = vmatpush1.bf16.msra.mxu1 %v11855_v58 }
  0xa5   :  { %695 = vmatprep.subr.bf16.mxu0 %v11857_v59  ;;  %736 = vmatprep.subr.bf16.mxu1 %v11860_v60 }
  0xa8   :  { %696 = vmatpush1.bf16.msra.mxu0 %v11863_v61  ;;  %737 = vmatpush1.bf16.msra.mxu1 %v11867_v62 }
  0xa9   :  { %697 = vmatprep.subr.bf16.mxu0 %v11869_v63  ;;  %738 = vmatprep.subr.bf16.mxu1 %v11872_v1 }
  0xac   :  { %698 = vmatpush1.bf16.msra.mxu0 %v11875_v2  ;;  %739 = vmatpush1.bf16.msra.mxu1 %v11879_v3 }
  0xad   :  { %957 = vmatprep.subr.bf16.mxu0 %v11881_v4  ;;  %998 = vmatprep.subr.bf16.mxu1 %v11884_v6 }
  0xaf   :  { %716 = vmatmul.mubr.bf16.vlgmr.msra.gmra.mxu0 %v13247_v0  ;;  %757 = vmatmul.mubr.bf16.vlgmr.msra.gmra.mxu1 %v13247_v0 }
  0xb0   :  { %958 = vmatpush1.bf16.msra.mxu0 %v10455_v5  ;;  %999 = vmatpush1.bf16.msra.mxu1 %v10458_v7  ;;  %v10500_v5 = vld [vmem:[#allocation11 + $0x8] ss:$16 sps:$4 sm:$0xff]  }
  0xb1   :  { %959 = vmatprep.subr.bf16.mxu0 %v10463_v8  ;;  %1000 = vmatprep.subr.bf16.mxu1 %v10466_v9 }
  0xb2   :  { %989 = vmatprep.mubr.bf16.mxu0 %v13247_v0  ;;  %1030 = vmatprep.mubr.bf16.mxu1 %v13247_v0 }
  0xb4   :  { %960 = vmatpush1.bf16.msra.mxu0 %v10461_v10  ;;  %1001 = vmatpush1.bf16.msra.mxu1 %v10464_v11 }
  0xb5   :  { %961 = vmatprep.subr.bf16.mxu0 %v10469_v12  ;;  %1002 = vmatprep.subr.bf16.mxu1 %v10472_v13 }
  0xb8   :  { %962 = vmatpush1.bf16.msra.mxu0 %v10467_v14  ;;  %1003 = vmatpush1.bf16.msra.mxu1 %v10470_v15 }
  0xb9   :  { %963 = vmatprep.subr.bf16.mxu0 %v10475_v16  ;;  %1004 = vmatprep.subr.bf16.mxu1 %v10478_v17  ;;  %v11654_v16 = vmov 1966171168  }
  0xba   :  { %v1047_v17 = vunpack.c.l.s4 %v11654_v16 }
  0xbc   :  { %964 = vmatpush1.bf16.msra.mxu0 %v10473_v18  ;;  %1005 = vmatpush1.bf16.msra.mxu1 %v10476_v19  ;;  %v1048_v18 = vunpack.c.0.s8 %v1047_v17 }
  0xbd   :  { %965 = vmatprep.subr.bf16.mxu0 %v10481_v20  ;;  %1006 = vmatprep.subr.bf16.mxu1 %v10484_v21 }
  0xc0   :  { %966 = vmatpush1.bf16.msra.mxu0 %v10479_v22  ;;  %1007 = vmatpush1.bf16.msra.mxu1 %v10482_v23 }
  0xc1   :  { %967 = vmatprep.subr.bf16.mxu0 %v10487_v24  ;;  %1008 = vmatprep.subr.bf16.mxu1 %v10490_v25 }
  0xc4   :  { %968 = vmatpush1.bf16.msra.mxu0 %v10485_v26  ;;  %1009 = vmatpush1.bf16.msra.mxu1 %v10488_v27 }
  0xc5   :  { %969 = vmatprep.subr.bf16.mxu0 %v10493_v28  ;;  %1010 = vmatprep.subr.bf16.mxu1 %v10496_v29 }
  0xc8   :  { %970 = vmatpush1.bf16.msra.mxu0 %v10491_v30  ;;  %1011 = vmatpush1.bf16.msra.mxu1 %v10494_v31 }
  0xc9   :  { %971 = vmatprep.subr.bf16.mxu0 %v10499_v32  ;;  %1012 = vmatprep.subr.bf16.mxu1 %v10502_v33 }
  0xcc   :  { %972 = vmatpush1.bf16.msra.mxu0 %v10497_v34  ;;  %1013 = vmatpush1.bf16.msra.mxu1 %v10500_v5 }
  0xcd   :  { %1359 = vmatprep.subr.bf16.mxu0 %v11782_v35  ;;  %1400 = vmatprep.subr.bf16.mxu1 %v11785_v36  ;;  %v13240_v35 = vlaneseq }
  0xcf   :  { %990 = vmatmul.mubr.bf16.vlgmr.msra.gmra.mxu0 %v13247_v0  ;;  %1031 = vmatmul.mubr.bf16.vlgmr.msra.gmra.mxu1 %v13247_v0  ;;  %v11933_v36 = vshrl.u32 %v13240_v35, 7 }
  0xd0   :  { %1360 = vmatpush1.bf16.msra.mxu0 %v11788_v37  ;;  %1401 = vmatpush1.bf16.msra.mxu1 %v11791_v38  ;;  %v193_v38 = vld [vmem:[%s13229_s2] sm:$0xff]  ;;  %s11655_s2 = smov [#allocation23]  }
  0xd1   :  { %1361 = vmatprep.subr.bf16.mxu0 %v11793_v39  ;;  %1402 = vmatprep.subr.bf16.mxu1 %v11796_v40  ;;  %13282 = vst [vmem:[#allocation31_spill] sm:$0xff] %v11933_v36  ;;  %v11936_v37 = vsub.s32 0, %v11933_v36  ;;  %v13246_v39 = vsub.s32 2, %v11933_v36  ;;  %v11943_v40 = vsub.s32 1, %v11933_v36  ;;  %v11965_v20 = vsub.s32 %v1048_v18, %v11933_v36  ;;  %s9379_s26 = sshll.u32 %s11655_s2, 4  ;;  %s9380_s26 = int_to_ptr.vmem [resolvable:$true] %s9379_s26 }
  0xd2   :  { %1391 = vmatprep.mubr.bf16.mxu0 %v13247_v0  ;;  %1432 = vmatprep.mubr.bf16.mxu1 %v13247_v0  ;;  %s11603_s9 = scalar_lea.vmem %s9380_s26, 32  ;;  %p11608_p9 = scmp.lt.s32.totalorder %s9380_s26, %s9380_s26 }
  0xd3   :  { %13283 = vst [vmem:[#allocation32_spill] sm:$0xff] %v11936_v37  ;;  %13284 = vst [vmem:[#allocation33_spill] sm:$0xff] %v11943_v40  ;;  %p11604_p8 = scmp.ne.s32.totalorder %s9380_s26, %s11603_s9  ;;  %p11609_p10 = scmp.lt.s32.totalorder %s11603_s9, %s11603_s9 }
  0xd4   :  { %1362 = vmatpush1.bf16.msra.mxu0 %v11801_v41  ;;  %1403 = vmatpush1.bf16.msra.mxu1 %v11805_v42  ;;  %v13245_v41 = vsub.s32 3, %v11933_v36  ;;  %v198_v42 = vrot.slane %v193_v38, %v11936_v37  ;;  %v12152_v37 = vld [vmem:[#allocation11 + $0x44] ss:$16 sps:$4 sm:$0xff]  }
  0xd5   :  { %1363 = vmatprep.subr.bf16.mxu0 %v11807_v43  ;;  %1404 = vmatprep.subr.bf16.mxu1 %v11810_v44  ;;  %v206_v43 = vrot.slane %v193_v38, %v13246_v39  ;;  %v202_v44 = vrot.slane %v193_v38, %v11943_v40  ;;  %13286 = vst [vmem:[#allocation35_spill] sm:$0xff] %v12152_v37  ;;  %v12154_v40 = vld [vmem:[#allocation11 + $0x4c] ss:$16 sps:$4 sm:$0xff]   ;;  %p11610_p11 = por %p11609_p10, %p11608_p9 }
  0xd6   :  { %13287 = vst [vmem:[#allocation36_spill] sm:$0xff] %v12154_v40 }
  0xd7   :  { %p11611_p12 = pnand %p11610_p11, %p11604_p8 }
  0xd8   :  { %1364 = vmatpush1.bf16.msra.mxu0 %v11815_v45  ;;  %1405 = vmatpush1.bf16.msra.mxu1 %v11819_v46  ;;  %v210_v46 = vrot.slane %v193_v38, %v13245_v41 }
  0xd9   :  { %1365 = vmatprep.subr.bf16.mxu0 %v11821_v47  ;;  %1406 = vmatprep.subr.bf16.mxu1 %v11824_v48 }
  0xdc   :  { %1366 = vmatpush1.bf16.msra.mxu0 %v11827_v49  ;;  %1407 = vmatpush1.bf16.msra.mxu1 %v11831_v50  ;;  %v13244_v49 = vsub.s32 4, %v11933_v36 }
  0xdd   :  { %1367 = vmatprep.subr.bf16.mxu0 %v11833_v51  ;;  %1408 = vmatprep.subr.bf16.mxu1 %v11836_v52  ;;  %v13243_v52 = vsub.s32 6, %v11933_v36 }
  0xe0   :  { %1368 = vmatpush1.bf16.msra.mxu0 %v11839_v53  ;;  %1409 = vmatpush1.bf16.msra.mxu1 %v11843_v54 }
  0xe1   :  { %1369 = vmatprep.subr.bf16.mxu0 %v11845_v55  ;;  %1410 = vmatprep.subr.bf16.mxu1 %v11848_v56  ;;  %v13242_v55 = vsub.s32 5, %v11933_v36 }
  0xe4   :  { %1370 = vmatpush1.bf16.msra.mxu0 %v11851_v57  ;;  %1411 = vmatpush1.bf16.msra.mxu1 %v11855_v58  ;;  %v13241_v58 = vsub.s32 7, %v11933_v36  ;;  %v12148_v36 = vld [vmem:[#allocation11 + $0x68] ss:$16 sps:$4 sm:$0xff]  }
  0xe5   :  { %1371 = vmatprep.subr.bf16.mxu0 %v11857_v59  ;;  %1412 = vmatprep.subr.bf16.mxu1 %v11860_v60  ;;  %v214_v60 = vrot.slane %v193_v38, %v13244_v49  ;;  %13285 = vst [vmem:[#allocation34_spill] sm:$0xff] %v12148_v36 }
  0xe8   :  { %1372 = vmatpush1.bf16.msra.mxu0 %v11863_v61  ;;  %1413 = vmatpush1.bf16.msra.mxu1 %v11867_v62  ;;  %v222_v62 = vrot.slane %v193_v38, %v13243_v52 }
  0xe9   :  { %1373 = vmatprep.subr.bf16.mxu0 %v11869_v63  ;;  %1414 = vmatprep.subr.bf16.mxu1 %v11872_v1  ;;  %v218_v1 = vrot.slane %v193_v38, %v13242_v55 }
  0xec   :  { %1374 = vmatpush1.bf16.msra.mxu0 %v11875_v2  ;;  %1415 = vmatpush1.bf16.msra.mxu1 %v11879_v3  ;;  %v226_v3 = vrot.slane %v193_v38, %v13241_v58 }
  0xed   :  { %1634 = vmatprep.subr.bf16.mxu0 %v11881_v4  ;;  %1675 = vmatprep.subr.bf16.mxu1 %v11884_v6 }
 0x147   :  { %v353_v45 = vpop.f32.mrf.mxu0  ;;  %v394_v48 = vpop.f32.mrf.mxu1 }
 0x148   :  { %v354_v47 = vadd.f32 %v353_v45, %v198_v42  ;;  %v395_v50 = vadd.f32 %v394_v48, %v206_v43 }
 0x149   :  { %v355_v51 = vpop.f32.mrf.mxu0  ;;  %v396_v54 = vpop.f32.mrf.mxu1 }
 0x14a   :  { %483 = vst [vmem:[#allocation2] sm:$0xff] %v354_v47  ;;  %v356_v53 = vadd.f32 %v355_v51, %v202_v44  ;;  %485 = vst [vmem:[#allocation2 + $0x10] sm:$0xff] %v395_v50  ;;  %v397_v56 = vadd.f32 %v396_v54, %v210_v46 }
 0x14b   :  { %v357_v57 = vpop.f32.mrf.mxu0  ;;  %v398_v59 = vpop.f32.mrf.mxu1 }
 0x14c   :  { %484 = vst [vmem:[#allocation2 + $0x8] sm:$0xff] %v356_v53  ;;  %486 = vst [vmem:[#allocation2 + $0x18] sm:$0xff] %v397_v56 }
 0x14d   :  { %v358_v61 = vpop.f32.mrf.mxu0  ;;  %v399_v63 = vpop.f32.mrf.mxu1 }
 0x14f   :  { %v435_v2 = vpop.f32.mrf.mxu0  ;;  %v476_v6 = vpop.f32.mrf.mxu1 }
 0x150   :  { %v436_v4 = vadd.f32 %v435_v2, %v214_v60  ;;  %v477_v7 = vadd.f32 %v476_v6, %v222_v62 }
 0x151   :  { %v437_v8 = vpop.f32.mrf.mxu0  ;;  %v478_v10 = vpop.f32.mrf.mxu1 }
 0x152   :  { %487 = vst [vmem:[#allocation2 + $0x20] sm:$0xff] %v436_v4  ;;  %v438_v9 = vadd.f32 %v437_v8, %v218_v1  ;;  %489 = vst [vmem:[#allocation2 + $0x30] sm:$0xff] %v477_v7  ;;  %v479_v11 = vadd.f32 %v478_v10, %v226_v3 }
 0x153   :  { %v439_v12 = vpop.f32.mrf.mxu0  ;;  %v480_v13 = vpop.f32.mrf.mxu1  ;;  %v1039_v34 = vld [vmem:[#allocation2] ss:$8 sm:$0xf] }
 0x154   :  { %488 = vst [vmem:[#allocation2 + $0x28] sm:$0xff] %v438_v9  ;;  %490 = vst [vmem:[#allocation2 + $0x38] sm:$0xff] %v479_v11 }
 0x155   :  { %v440_v14 = vpop.f32.mrf.mxu0  ;;  %v481_v15 = vpop.f32.mrf.mxu1 }
 0x15b   :  { %v1071_v7 = vld [vmem:[#allocation2 + $0x27] ss:$8 sm:$0xf] }
 0x16f   :  { %v717_v19 = vpop.f32.mrf.mxu0  ;;  %v758_v21 = vpop.f32.mrf.mxu1 }
 0x171   :  { %v719_v22 = vpop.f32.mrf.mxu0  ;;  %v760_v24 = vpop.f32.mrf.mxu1 }
 0x172   :  { %v1044_v23 = vcombine.low %v717_v19, %v719_v22  ;;  %v1045_v25 = vcombine.low %v758_v21, %v760_v24 }
 0x173   :  { %v721_v26 = vpop.f32.mrf.mxu0  ;;  %v762_v28 = vpop.f32.mrf.mxu1 }
 0x174   :  { %v1052_v27 = vrot.slane %v1044_v23, %v11965_v20  ;;  %v1059_v29 = vrot.slane %v1045_v25, %v11965_v20 }
 0x175   :  { %v722_v30 = vpop.f32.mrf.mxu0  ;;  %v763_v31 = vpop.f32.mrf.mxu1 }
 0x176   :  { %v1060_v32 = vcombine.low %v1052_v27, %v1059_v29 }
 0x178   :  { %v1067_v33 = vrot.slane %v1060_v32, %v11965_v20  ;;  %v11373_v32 = vld [vmem:[#allocation11 + $0xe0] ss:$16 sps:$4 sm:$0xff]  }
 0x17a   :  { %v1069_v5 = vadd.f32 %v1067_v33, %v1039_v34  ;;  %v11374_v33 = vld [vmem:[#allocation11 + $0xe8] ss:$16 sps:$4 sm:$0xff]   ;;  %v11375_v34 = vld [vmem:[#allocation11 + $0xc4] ss:$16 sps:$4 sm:$0xff]  }
 0x17c   :  { %v9477_v38 = vmul.f32 -1.442695, %v1069_v5  ;;  %v1109_v42 = vrot.slane %v1069_v5, 1  ;;  %v1120_v44 = vrot.slane %v1069_v5, 3  ;;  %v1117_v47 = vrot.slane %v1069_v5, 2 }
 0x17d   :  { %v11376_v5 = vld [vmem:[#allocation11 + $0xcc] ss:$16 sps:$4 sm:$0xff]  }
 0x17e   :  { %11017 = vpow2.f32 %v9477_v38  ;;  %v9478_v43 = vmul.f32 -1.442695, %v1109_v42  ;;  %v9479_v45 = vmul.f32 -1.442695, %v1120_v44  ;;  %v11377_v38 = vld [vmem:[#allocation11 + $0xc0] ss:$16 sps:$4 sm:$0xff]  }
 0x17f   :  { %v11378_v42 = vld [vmem:[#allocation11 + $0xc8] ss:$16 sps:$4 sm:$0xff]   ;;  %v11379_v44 = vld [vmem:[#allocation11 + $0xa4] ss:$16 sps:$4 sm:$0xff]  }
 0x180   :  { %11019 = vpow2.f32 %v9478_v43 }
 0x181   :  { %11021 = vpow2.f32 %v9479_v45  ;;  %v11380_v45 = vld [vmem:[#allocation11 + $0xac] ss:$16 sps:$4 sm:$0xff]  }
 0x18b   :  { %v11018_v46 = vpop.eup %11017 }
 0x18c   :  { %v1105_v48 = vadd.f32 1.0, %v11018_v46 }
 0x18d   :  { %v11020_v50 = vpop.eup %11019 }
 0x18e   :  { %11023 = vrcp.f32 %v1105_v48  ;;  %v1114_v51 = vadd.f32 1.0, %v11020_v50  ;;  %v11022_v8 = vpop.eup %11021 }
 0x18f   :  { %v991_v53 = vpop.f32.mrf.mxu0  ;;  %11025 = vtanh.f32 %v1117_v47  ;;  %v1032_v54 = vpop.f32.mrf.mxu1  ;;  %v1125_v15 = vadd.f32 1.0, %v11022_v8  ;;  %v11394_v8 = vld [vmem:[#allocation11 + $0x48] ss:$16 sps:$4 sm:$0xff]  }
 0x190   :  { %11027 = vrcp.f32 %v1114_v51  ;;  %v11381_v51 = vld [vmem:[#allocation11 + $0xa0] ss:$16 sps:$4 sm:$0xff]  }
 0x191   :  { %v993_v56 = vpop.f32.mrf.mxu0  ;;  %v1034_v59 = vpop.f32.mrf.mxu1 }
 0x192   :  { %v1076_v57 = vcombine.low %v991_v53, %v993_v56  ;;  %v1077_v60 = vcombine.low %v1032_v54, %v1034_v59  ;;  %v11382_v53 = vld [vmem:[#allocation11 + $0xa8] ss:$16 sps:$4 sm:$0xff]   ;;  %v11383_v56 = vld [vmem:[#allocation11 + $0x84] ss:$16 sps:$4 sm:$0xff]  }
 0x193   :  { %v995_v61 = vpop.f32.mrf.mxu0  ;;  %v1036_v63 = vpop.f32.mrf.mxu1 }
 0x194   :  { %v1084_v62 = vrot.slane %v1076_v57, %v11965_v20  ;;  %v1091_v1 = vrot.slane %v1077_v60, %v11965_v20  ;;  %v11384_v57 = vld [vmem:[#allocation11 + $0x8c] ss:$16 sps:$4 sm:$0xff]   ;;  %v11385_v61 = vld [vmem:[#allocation11 + $0x80] ss:$16 sps:$4 sm:$0xff]   ;;  %v11387_v63 = vld [vmem:[#allocation11 + $0x64] ss:$16 sps:$4 sm:$0xff]  }
 0x195   :  { %v996_v2 = vpop.f32.mrf.mxu0  ;;  %v1037_v3 = vpop.f32.mrf.mxu1 }
 0x196   :  { %v1092_v4 = vcombine.low %v1084_v62, %v1091_v1  ;;  %v11386_v62 = vld [vmem:[#allocation11 + $0x88] ss:$16 sps:$4 sm:$0xff]   ;;  %v11388_v1 = vld [vmem:[#allocation11 + $0x6c] ss:$16 sps:$4 sm:$0xff]   ;;  %v11389_v2 = vld [vmem:[#allocation11 + $0x60] ss:$16 sps:$4 sm:$0xff]  }
 0x197   :  { %v11390_v3 = vld [vmem:[#allocation11 + $0x68] ss:$16 sps:$4 sm:$0xff]  }
 0x198   :  { %v1099_v6 = vrot.slane %v1092_v4, %v11965_v20  ;;  %v11391_v4 = vld [vmem:[#allocation11 + $0x44] ss:$16 sps:$4 sm:$0xff]  }
 0x19a   :  { %v1101_v9 = vadd.f32 %v1099_v6, %v1071_v7  ;;  %v11392_v6 = vld [vmem:[#allocation11 + $0x4c] ss:$16 sps:$4 sm:$0xff]   ;;  %v11393_v7 = vld [vmem:[#allocation11 + $0x40] ss:$16 sps:$4 sm:$0xff]  }
 0x19b   :  { %v11024_v10 = vpop.eup %11023 }
 0x19c   :  { %v11026_v11 = vpop.eup %11025  ;;  %v9480_v12 = vmul.f32 -1.442695, %v1101_v9  ;;  %v1140_v13 = vrot.slane %v1101_v9, 1  ;;  %v1151_v21 = vrot.slane %v1101_v9, 3  ;;  %v1148_v24 = vrot.slane %v1101_v9, 2 }
 0x19d   :  { %v11028_v14 = vpop.eup %11027  ;;  %v1129_v18 = vmul.f32 %v11026_v11, %v11024_v10  ;;  %v11395_v9 = vld [vmem:[#allocation11 + $0x24] ss:$16 sps:$4 sm:$0xff]   ;;  %v11396_v10 = vld [vmem:[#allocation11 + $0x2c] ss:$16 sps:$4 sm:$0xff]   ;;  %v11397_v11 = vld [vmem:[#allocation11 + $0x20] ss:$16 sps:$4 sm:$0xff]  }
 0x19e   :  { %v1128_v16 = vmul.f32 0.0, %v11028_v14  ;;  %11029 = vpow2.f32 %v9480_v12  ;;  %v9481_v17 = vmul.f32 -1.442695, %v1140_v13  ;;  %v9482_v22 = vmul.f32 -1.442695, %v1151_v21 }
 0x19f   :  { %v11398_v12 = vld [vmem:[#allocation11 + $0x28] ss:$16 sps:$4 sm:$0xff]   ;;  %v11399_v14 = vld [vmem:[#allocation11 + $0x4] ss:$16 sps:$4 sm:$0xff]  }
 0x1a0   :  { %11031 = vpow2.f32 %v9481_v17  ;;  %v11973_v19 = vadd.f32 %v1129_v18, %v1128_v16  ;;  %v11401_v18 = vld [vmem:[#allocation11] ss:$16 sps:$4 sm:$0xff]   ;;  %v11402_v21 = vld [vmem:[#allocation11 + $0x8] ss:$16 sps:$4 sm:$0xff]  }
 0x1a1   :  { %11033 = vrcp.f32 %v1125_v15  ;;  %v11400_v15 = vld [vmem:[#allocation11 + $0xc] ss:$16 sps:$4 sm:$0xff]  }
 0x1a2   :  { %11035 = vtanh.f32 %v11973_v19 }
 0x1a3   :  { %11037 = vpow2.f32 %v9482_v22 }
 0x1ab   :  { %v11030_v23 = vpop.eup %11029 }
 0x1ac   :  { %v1136_v25 = vadd.f32 1.0, %v11030_v23  ;;  %v11983_v23 = vld [vmem:[#allocation9 + $0xe4] ss:$16 sps:$4 sm:$0xff]  }
 0x1ad   :  { %v11032_v26 = vpop.eup %11031 }
 0x1ae   :  { %v11034_v27 = vpop.eup %11033  ;;  %11039 = vrcp.f32 %v1136_v25  ;;  %v1145_v28 = vadd.f32 1.0, %v11032_v26  ;;  %v11987_v25 = vld [vmem:[#allocation9 + $0xe0] ss:$16 sps:$4 sm:$0xff]   ;;  %v11989_v26 = vld [vmem:[#allocation9 + $0xe8] ss:$16 sps:$4 sm:$0xff]  }
 0x1af   :  { %v11036_v29 = vpop.eup %11035  ;;  %11041 = vtanh.f32 %v1148_v24  ;;  %v11985_v24 = vld [vmem:[#allocation9 + $0xec] ss:$16 sps:$4 sm:$0xff]  }
 0x1b0   :  { %11043 = vrcp.f32 %v1145_v28  ;;  %v1132_v30 = vmul.f32 %v11036_v29, %v11034_v27  ;;  %v11038_v43 = vpop.eup %11037  ;;  %v11995_v27 = vld [vmem:[#allocation9 + $0xc4] ss:$16 sps:$4 sm:$0xff]   ;;  %v11997_v28 = vld [vmem:[#allocation9 + $0xcc] ss:$16 sps:$4 sm:$0xff]   ;;  %v11999_v29 = vld [vmem:[#allocation9 + $0xc0] ss:$16 sps:$4 sm:$0xff]  }
 0x1b1   :  { %v1156_v50 = vadd.f32 1.0, %v11038_v43  ;;  %v12025_v43 = vld [vmem:[#allocation9 + $0x88] ss:$16 sps:$4 sm:$0xff]  }
 0x1b2   :  { %v1166_v31 = vpack.c.bf16 %v1132_v30, %v1132_v30  ;;  %v12001_v30 = vld [vmem:[#allocation9 + $0xc8] ss:$16 sps:$4 sm:$0xff]  }
 0x1b3   :  { %11045 = vrcp.f32 %v1156_v50  ;;  %v12045_v50 = vld [vmem:[#allocation9 + $0x4c] ss:$16 sps:$4 sm:$0xff]  }
 0x1b4   :  { %1392 = vmatmul.mubr.bf16.vlgmr.msra.gmra.mxu0 %v1166_v31  ;;  %1433 = vmatmul.mubr.bf16.vlgmr.msra.gmra.mxu1 %v1166_v31  ;;  %v12007_v31 = vld [vmem:[#allocation9 + $0xa4] ss:$16 sps:$4 sm:$0xff]  }
 0x1b5   :  { %1635 = vmatpush1.bf16.msra.mxu0 %v11373_v32  ;;  %1676 = vmatpush1.bf16.msra.mxu1 %v11374_v33  ;;  %v12009_v32 = vld [vmem:[#allocation9 + $0xac] ss:$16 sps:$4 sm:$0xff]   ;;  %v12011_v33 = vld [vmem:[#allocation9 + $0xa0] ss:$16 sps:$4 sm:$0xff]  }
 0x1b6   :  { %1636 = vmatprep.subr.bf16.mxu0 %v11375_v34  ;;  %1677 = vmatprep.subr.bf16.mxu1 %v11376_v5  ;;  %v12013_v34 = vld [vmem:[#allocation9 + $0xa8] ss:$16 sps:$4 sm:$0xff]   ;;  %v12019_v5 = vld [vmem:[#allocation9 + $0x84] ss:$16 sps:$4 sm:$0xff]  }
 0x1b7   :  { %1666 = vmatprep.mubr.bf16.mxu0 %v13247_v0  ;;  %1707 = vmatprep.mubr.bf16.mxu1 %v13247_v0 }
 0x1b9   :  { %1637 = vmatpush1.bf16.msra.mxu0 %v11377_v38  ;;  %1678 = vmatpush1.bf16.msra.mxu1 %v11378_v42  ;;  %v12021_v38 = vld [vmem:[#allocation9 + $0x8c] ss:$16 sps:$4 sm:$0xff]   ;;  %v12023_v42 = vld [vmem:[#allocation9 + $0x80] ss:$16 sps:$4 sm:$0xff]  }
 0x1ba   :  { %1638 = vmatprep.subr.bf16.mxu0 %v11379_v44  ;;  %1679 = vmatprep.subr.bf16.mxu1 %v11380_v45  ;;  %v12031_v44 = vld [vmem:[#allocation9 + $0x64] ss:$16 sps:$4 sm:$0xff]   ;;  %v12033_v45 = vld [vmem:[#allocation9 + $0x6c] ss:$16 sps:$4 sm:$0xff]  }
 0x1bb   :  { %v11040_v46 = vpop.eup %11039 }
 0x1bc   :  { %v11042_v47 = vpop.eup %11041 }
 0x1bd   :  { %v11044_v48 = vpop.eup %11043  ;;  %1639 = vmatpush1.bf16.msra.mxu0 %v11381_v51  ;;  %1680 = vmatpush1.bf16.msra.mxu1 %v11382_v53  ;;  %v1160_v59 = vmul.f32 %v11042_v47, %v11040_v46  ;;  %v12035_v46 = vld [vmem:[#allocation9 + $0x60] ss:$16 sps:$4 sm:$0xff]   ;;  %v12037_v47 = vld [vmem:[#allocation9 + $0x68] ss:$16 sps:$4 sm:$0xff]  }
 0x1be   :  { %v1159_v54 = vmul.f32 0.0, %v11044_v48  ;;  %1640 = vmatprep.subr.bf16.mxu0 %v11383_v56  ;;  %1681 = vmatprep.subr.bf16.mxu1 %v11384_v57  ;;  %v12043_v48 = vld [vmem:[#allocation9 + $0x44] ss:$16 sps:$4 sm:$0xff]   ;;  %v12047_v51 = vld [vmem:[#allocation9 + $0x40] ss:$16 sps:$4 sm:$0xff]  }
 0x1bf   :  { %v12049_v53 = vld [vmem:[#allocation9 + $0x48] ss:$16 sps:$4 sm:$0xff]   ;;  %v12057_v56 = vld [vmem:[#allocation9 + $0x2c] ss:$16 sps:$4 sm:$0xff]   ;;  %v12059_v57 = vld [vmem:[#allocation9 + $0x20] ss:$16 sps:$4 sm:$0xff]  }
 0x1c0   :  { %v11978_v60 = vadd.f32 %v1160_v59, %v1159_v54  ;;  %v11046_v13 = vpop.eup %11045  ;;  %v12055_v54 = vld [vmem:[#allocation9 + $0x24] ss:$16 sps:$4 sm:$0xff]   ;;  %v12061_v59 = vld [vmem:[#allocation9 + $0x28] ss:$16 sps:$4 sm:$0xff]  }
 0x1c1   :  { %1641 = vmatpush1.bf16.msra.mxu0 %v11385_v61  ;;  %1682 = vmatpush1.bf16.msra.mxu1 %v11386_v62  ;;  %v12067_v61 = vld [vmem:[#allocation9 + $0x4] ss:$16 sps:$4 sm:$0xff]   ;;  %v12069_v62 = vld [vmem:[#allocation9 + $0xc] ss:$16 sps:$4 sm:$0xff]  }
 0x1c2   :  { %1642 = vmatprep.subr.bf16.mxu0 %v11387_v63  ;;  %1683 = vmatprep.subr.bf16.mxu1 %v11388_v1  ;;  %11047 = vtanh.f32 %v11978_v60  ;;  %v12071_v63 = vld [vmem:[#allocation9] ss:$16 sps:$4 sm:$0xff]   ;;  %v12073_v1 = vld [vmem:[#allocation9 + $0x8] ss:$16 sps:$4 sm:$0xff]  }
 0x1c5   :  { %1643 = vmatpush1.bf16.msra.mxu0 %v11389_v2  ;;  %1684 = vmatpush1.bf16.msra.mxu1 %v11390_v3  ;;  %v12079_v2 = vld [vmem:[#allocation11 + $0xe4] ss:$16 sps:$4 sm:$0xff]   ;;  %v12081_v3 = vld [vmem:[#allocation11 + $0xec] ss:$16 sps:$4 sm:$0xff]  }
 0x1c6   :  { %1644 = vmatprep.subr.bf16.mxu0 %v11391_v4  ;;  %1685 = vmatprep.subr.bf16.mxu1 %v11392_v6 }
 0x1c9   :  { %1645 = vmatpush1.bf16.msra.mxu0 %v11393_v7  ;;  %1686 = vmatpush1.bf16.msra.mxu1 %v11394_v8 }
 0x1ca   :  { %1646 = vmatprep.subr.bf16.mxu0 %v11395_v9  ;;  %1687 = vmatprep.subr.bf16.mxu1 %v11396_v10 }
 0x1cd   :  { %1647 = vmatpush1.bf16.msra.mxu0 %v11397_v11  ;;  %1688 = vmatpush1.bf16.msra.mxu1 %v11398_v12 }
 0x1ce   :  { %1648 = vmatprep.subr.bf16.mxu0 %v11399_v14  ;;  %1689 = vmatprep.subr.bf16.mxu1 %v11400_v15 }
 0x1cf   :  { %v11048_v16 = vpop.eup %11047 }
 0x1d0   :  { %v1163_v17 = vmul.f32 %v11048_v16, %v11046_v13 }
 0x1d1   :  { %1649 = vmatpush1.bf16.msra.mxu0 %v11401_v18  ;;  %1690 = vmatpush1.bf16.msra.mxu1 %v11402_v21  ;;  %v1717_v21 = vld [vmem:[#allocation2 + $0x1] ss:$8 sm:$0xf] }
 0x1d2   :  { %1165 = vst [vmem:[#allocation3 + $0xf] sm:$0x1] %v1163_v17  ;;  %v1441_v22 = vpack.c.bf16 %v1163_v17, %v1163_v17  ;;  %2037 = vmatprep.subr.bf16.mxu0 %v11983_v23  ;;  %2078 = vmatprep.subr.bf16.mxu1 %v11985_v24 }
 0x1d4   :  { %1667 = vmatmul.mubr.bf16.vlgmr.msra.gmra.mxu0 %v1441_v22  ;;  %1708 = vmatmul.mubr.bf16.vlgmr.msra.gmra.mxu1 %v1441_v22 }
 0x1d5   :  { %2069 = vmatprep.mubr.bf16.mxu0 %v13247_v0  ;;  %2110 = vmatprep.mubr.bf16.mxu1 %v13247_v0 }
 0x1d6   :  { %2038 = vmatpush1.bf16.msra.mxu0 %v11987_v25  ;;  %2079 = vmatpush1.bf16.msra.mxu1 %v11989_v26 }
 0x1d7   :  { %2039 = vmatprep.subr.bf16.mxu0 %v11995_v27  ;;  %2080 = vmatprep.subr.bf16.mxu1 %v11997_v28 }
 0x1da   :  { %2040 = vmatpush1.bf16.msra.mxu0 %v11999_v29  ;;  %2081 = vmatpush1.bf16.msra.mxu1 %v12001_v30 }
 0x1db   :  { %2041 = vmatprep.subr.bf16.mxu0 %v12007_v31  ;;  %2082 = vmatprep.subr.bf16.mxu1 %v12009_v32 }
 0x1de   :  { %2042 = vmatpush1.bf16.msra.mxu0 %v12011_v33  ;;  %2083 = vmatpush1.bf16.msra.mxu1 %v12013_v34 }
 0x1df   :  { %2043 = vmatprep.subr.bf16.mxu0 %v12019_v5  ;;  %2084 = vmatprep.subr.bf16.mxu1 %v12021_v38 }
 0x1e2   :  { %2044 = vmatpush1.bf16.msra.mxu0 %v12023_v42  ;;  %2085 = vmatpush1.bf16.msra.mxu1 %v12025_v43 }
 0x1e3   :  { %2045 = vmatprep.subr.bf16.mxu0 %v12031_v44  ;;  %2086 = vmatprep.subr.bf16.mxu1 %v12033_v45 }
 0x1e6   :  { %2046 = vmatpush1.bf16.msra.mxu0 %v12035_v46  ;;  %2087 = vmatpush1.bf16.msra.mxu1 %v12037_v47 }
 0x1e7   :  { %2047 = vmatprep.subr.bf16.mxu0 %v12043_v48  ;;  %2088 = vmatprep.subr.bf16.mxu1 %v12045_v50 }
 0x1ea   :  { %2048 = vmatpush1.bf16.msra.mxu0 %v12047_v51  ;;  %2089 = vmatpush1.bf16.msra.mxu1 %v12049_v53 }
 0x1eb   :  { %2049 = vmatprep.subr.bf16.mxu0 %v12055_v54  ;;  %2090 = vmatprep.subr.bf16.mxu1 %v12057_v56 }
 0x1ee   :  { %2050 = vmatpush1.bf16.msra.mxu0 %v12059_v57  ;;  %2091 = vmatpush1.bf16.msra.mxu1 %v12061_v59 }
 0x1ef   :  { %2051 = vmatprep.subr.bf16.mxu0 %v12067_v61  ;;  %2092 = vmatprep.subr.bf16.mxu1 %v12069_v62 }
 0x1f2   :  { %2052 = vmatpush1.bf16.msra.mxu0 %v12071_v63  ;;  %2093 = vmatpush1.bf16.msra.mxu1 %v12073_v1 }
 0x1f3   :  { %2312 = vmatprep.subr.bf16.mxu0 %v12079_v2  ;;  %2353 = vmatprep.subr.bf16.mxu1 %v12081_v3 }
 0x274   :  { %v1393_v4 = vpop.f32.mrf.mxu0  ;;  %v1434_v6 = vpop.f32.mrf.mxu1 }
 0x276   :  { %v1395_v7 = vpop.f32.mrf.mxu0  ;;  %v1436_v8 = vpop.f32.mrf.mxu1 }
 0x277   :  { %v1722_v9 = vcombine.low %v1393_v4, %v1395_v7  ;;  %v1723_v10 = vcombine.low %v1434_v6, %v1436_v8 }
 0x278   :  { %v1397_v11 = vpop.f32.mrf.mxu0  ;;  %v1438_v12 = vpop.f32.mrf.mxu1 }
 0x279   :  { %v1730_v13 = vrot.slane %v1722_v9, %v11965_v20  ;;  %v1737_v14 = vrot.slane %v1723_v10, %v11965_v20 }
 0x27a   :  { %v1398_v15 = vpop.f32.mrf.mxu0  ;;  %v1439_v16 = vpop.f32.mrf.mxu1 }
 0x27b   :  { %v1738_v17 = vcombine.low %v1730_v13, %v1737_v14 }
 0x27d   :  { %v1745_v18 = vrot.slane %v1738_v17, %v11965_v20 }
 0x27f   :  { %v1747_v22 = vadd.f32 %v1745_v18, %v1717_v21 }
 0x281   :  { %v9547_v35 = vmul.f32 -1.442695, %v1747_v22  ;;  %v1787_v58 = vrot.slane %v1747_v22, 1  ;;  %v1798_v4 = vrot.slane %v1747_v22, 3  ;;  %v1795_v8 = vrot.slane %v1747_v22, 2 }
 0x283   :  { %11049 = vpow2.f32 %v9547_v35  ;;  %v9548_v55 = vmul.f32 -1.442695, %v1787_v58  ;;  %v9549_v6 = vmul.f32 -1.442695, %v1798_v4 }
 0x285   :  { %11051 = vpow2.f32 %v9548_v55 }
 0x286   :  { %11053 = vpow2.f32 %v9549_v6 }
 0x290   :  { %v11050_v7 = vpop.eup %11049 }
 0x291   :  { %v1783_v11 = vadd.f32 1.0, %v11050_v7  ;;  %v1749_v7 = vld [vmem:[#allocation2 + $0x26] ss:$8 sm:$0xf] }
 0x292   :  { %v11052_v9 = vpop.eup %11051 }
 0x293   :  { %11055 = vrcp.f32 %v1783_v11  ;;  %v1792_v10 = vadd.f32 1.0, %v11052_v9 }
 0x294   :  { %11057 = vtanh.f32 %v1795_v8  ;;  %v1668_v12 = vpop.f32.mrf.mxu0  ;;  %v1709_v13 = vpop.f32.mrf.mxu1 }
 0x295   :  { %11059 = vrcp.f32 %v1792_v10  ;;  %v11054_v8 = vpop.eup %11053 }
 0x296   :  { %v1670_v14 = vpop.f32.mrf.mxu0  ;;  %v1711_v15 = vpop.f32.mrf.mxu1 }
 0x297   :  { %v1754_v16 = vcombine.low %v1668_v12, %v1670_v14  ;;  %v1755_v17 = vcombine.low %v1709_v13, %v1711_v15  ;;  %v1803_v13 = vadd.f32 1.0, %v11054_v8 }
 0x298   :  { %v1672_v35 = vpop.f32.mrf.mxu0  ;;  %v1713_v58 = vpop.f32.mrf.mxu1 }
 0x299   :  { %v1762_v55 = vrot.slane %v1754_v16, %v11965_v20  ;;  %v1769_v18 = vrot.slane %v1755_v17, %v11965_v20 }
 0x29a   :  { %v1673_v21 = vpop.f32.mrf.mxu0  ;;  %v1714_v22 = vpop.f32.mrf.mxu1 }
 0x29b   :  { %v1770_v4 = vcombine.low %v1762_v55, %v1769_v18 }
 0x29d   :  { %v1777_v6 = vrot.slane %v1770_v4, %v11965_v20 }
 0x29f   :  { %v1779_v11 = vadd.f32 %v1777_v6, %v1749_v7  ;;  %v12095_v6 = vld [vmem:[#allocation11 + $0xe0] ss:$16 sps:$4 sm:$0xff]   ;;  %v12097_v7 = vld [vmem:[#allocation11 + $0xe8] ss:$16 sps:$4 sm:$0xff]  }
 0x2a0   :  { %v11056_v9 = vpop.eup %11055 }
 0x2a1   :  { %v11058_v10 = vpop.eup %11057  ;;  %v9550_v52 = vmul.f32 -1.442695, %v1779_v11  ;;  %v1818_v49 = vrot.slane %v1779_v11, 1  ;;  %v1829_v35 = vrot.slane %v1779_v11, 3  ;;  %v1826_v18 = vrot.slane %v1779_v11, 2 }
 0x2a2   :  { %v11060_v12 = vpop.eup %11059  ;;  %v1807_v16 = vmul.f32 %v11058_v10, %v11056_v9  ;;  %v12099_v9 = vld [vmem:[#allocation11 + $0xc4] ss:$16 sps:$4 sm:$0xff]   ;;  %v12101_v10 = vld [vmem:[#allocation11 + $0xcc] ss:$16 sps:$4 sm:$0xff]   ;;  %v12105_v11 = vld [vmem:[#allocation11 + $0xc0] ss:$16 sps:$4 sm:$0xff]  }
 0x2a3   :  { %11061 = vpow2.f32 %v9550_v52  ;;  %v9551_v14 = vmul.f32 -1.442695, %v1818_v49  ;;  %v1806_v15 = vmul.f32 %v11060_v12, %v11973_v19  ;;  %v9552_v58 = vmul.f32 -1.442695, %v1829_v35  ;;  %v12107_v12 = vld [vmem:[#allocation11 + $0xc8] ss:$16 sps:$4 sm:$0xff]  }
 0x2a5   :  { %11063 = vpow2.f32 %v9551_v14  ;;  %v12092_v17 = vadd.f32 %v1807_v16, %v1806_v15  ;;  %v12113_v14 = vld [vmem:[#allocation11 + $0xac] ss:$16 sps:$4 sm:$0xff]   ;;  %v12119_v15 = vld [vmem:[#allocation11 + $0xa0] ss:$16 sps:$4 sm:$0xff]   ;;  %v12121_v16 = vld [vmem:[#allocation11 + $0xa8] ss:$16 sps:$4 sm:$0xff]  }
 0x2a6   :  { %11065 = vrcp.f32 %v1803_v13  ;;  %v12111_v13 = vld [vmem:[#allocation11 + $0xa4] ss:$16 sps:$4 sm:$0xff]  }
 0x2a7   :  { %11067 = vtanh.f32 %v12092_v17 }
 0x2a8   :  { %11069 = vpow2.f32 %v9552_v58  ;;  %v12125_v58 = vld [vmem:[#allocation11 + $0x84] ss:$16 sps:$4 sm:$0xff]  }
 0x2b0   :  { %v11062_v55 = vpop.eup %11061 }
 0x2b1   :  { %v1814_v21 = vadd.f32 1.0, %v11062_v55  ;;  %v12127_v55 = vld [vmem:[#allocation11 + $0x8c] ss:$16 sps:$4 sm:$0xff]  }
 0x2b2   :  { %v11064_v22 = vpop.eup %11063 }
 0x2b3   :  { %v11066_v4 = vpop.eup %11065  ;;  %11071 = vrcp.f32 %v1814_v21  ;;  %v1823_v52 = vadd.f32 1.0, %v11064_v22 }
 0x2b4   :  { %v11068_v49 = vpop.eup %11067  ;;  %11073 = vtanh.f32 %v1826_v18 }
 0x2b5   :  { %11075 = vrcp.f32 %v1823_v52  ;;  %v1810_v19 = vmul.f32 %v11068_v49, %v11066_v4  ;;  %v11070_v35 = vpop.eup %11069  ;;  %v12131_v52 = vld [vmem:[#allocation11 + $0x80] ss:$16 sps:$4 sm:$0xff]   ;;  %v12133_v49 = vld [vmem:[#allocation11 + $0x88] ss:$16 sps:$4 sm:$0xff]  }
 0x2b6   :  { %v1834_v4 = vadd.f32 1.0, %v11070_v35 }
 0x2b7   :  { %v1844_v8 = vpack.c.bf16 %v1810_v19, %v1810_v19  ;;  %v12137_v19 = vld [vmem:[#allocation11 + $0x64] ss:$16 sps:$4 sm:$0xff]  }
 0x2b8   :  { %11077 = vrcp.f32 %v1834_v4  ;;  %v12177_v4 = vld [vmem:[#allocation11 + $0x4] ss:$16 sps:$4 sm:$0xff]  }
 0x2b9   :  { %2070 = vmatmul.mubr.bf16.vlgmr.msra.gmra.mxu0 %v1844_v8  ;;  %2111 = vmatmul.mubr.bf16.vlgmr.msra.gmra.mxu1 %v1844_v8  ;;  %v12139_v8 = vld [vmem:[#allocation11 + $0x6c] ss:$16 sps:$4 sm:$0xff]  }
 0x2ba   :  { %2313 = vmatpush1.bf16.msra.mxu0 %v12095_v6  ;;  %2354 = vmatpush1.bf16.msra.mxu1 %v12097_v7 }
 0x2bb   :  { %2314 = vmatprep.subr.bf16.mxu0 %v12099_v9  ;;  %2355 = vmatprep.subr.bf16.mxu1 %v12101_v10 }
 0x2bc   :  { %2344 = vmatprep.mubr.bf16.mxu0 %v13247_v0  ;;  %2385 = vmatprep.mubr.bf16.mxu1 %v13247_v0  ;;  %v12146_v0 = vld [vmem:[#allocation11 + $0x60] ss:$16 sps:$4 sm:$0xff]  }
 0x2be   :  { %2315 = vmatpush1.bf16.msra.mxu0 %v12105_v11  ;;  %2356 = vmatpush1.bf16.msra.mxu1 %v12107_v12 }
 0x2bf   :  { %2316 = vmatprep.subr.bf16.mxu0 %v12111_v13  ;;  %2357 = vmatprep.subr.bf16.mxu1 %v12113_v14 }
 0x2c0   :  { %v11072_v18 = vpop.eup %11071 }
 0x2c1   :  { %v11074_v21 = vpop.eup %11073 }
 0x2c2   :  { %v11076_v22 = vpop.eup %11075  ;;  %2317 = vmatpush1.bf16.msra.mxu0 %v12119_v15  ;;  %2358 = vmatpush1.bf16.msra.mxu1 %v12121_v16  ;;  %v1838_v39 = vmul.f32 %v11074_v21, %v11072_v18  ;;  %v12167_v18 = vld [vmem:[#allocation11 + $0x2c] ss:$16 sps:$4 sm:$0xff]   ;;  %v12171_v21 = vld [vmem:[#allocation11 + $0x20] ss:$16 sps:$4 sm:$0xff]  }
 0x2c3   :  { %2318 = vmatprep.subr.bf16.mxu0 %v12125_v58  ;;  %2359 = vmatprep.subr.bf16.mxu1 %v12127_v55  ;;  %v1837_v41 = vmul.f32 %v11076_v22, %v11978_v60  ;;  %v12165_v60 = vld [vmem:[#allocation11 + $0x24] ss:$16 sps:$4 sm:$0xff]   ;;  %13291 = vst [vmem:[#allocation40_spill] sm:$0xff] %v12167_v18  ;;  %v12173_v22 = vld [vmem:[#allocation11 + $0x28] ss:$16 sps:$4 sm:$0xff]  }
 0x2c4   :  { %13290 = vst [vmem:[#allocation39_spill] sm:$0xff] %v12165_v60 }
 0x2c5   :  { %v12142_v35 = vadd.f32 %v1838_v39, %v1837_v41  ;;  %v12159_v39 = vld [vmem:[#allocation11 + $0x40] ss:$16 sps:$4 sm:$0xff]   ;;  %v12161_v41 = vld [vmem:[#allocation11 + $0x48] ss:$16 sps:$4 sm:$0xff]  }
 0x2c6   :  { %2319 = vmatpush1.bf16.msra.mxu0 %v12131_v52  ;;  %2360 = vmatpush1.bf16.msra.mxu1 %v12133_v49  ;;  %13288 = vst [vmem:[#allocation37_spill] sm:$0xff] %v12159_v39  ;;  %13289 = vst [vmem:[#allocation38_spill] sm:$0xff] %v12161_v41 }
 0x2c7   :  { %2320 = vmatprep.subr.bf16.mxu0 %v12137_v19  ;;  %2361 = vmatprep.subr.bf16.mxu1 %v12139_v8  ;;  %11079 = vtanh.f32 %v12142_v35 }
 0x2ca   :  { %2321 = vmatpush1.bf16.msra.mxu0 %v12146_v0  ;;  %2362 = vmatpush1.bf16.msra.mxu1 %v12148_v36 }
 0x2cb   :  { %2322 = vmatprep.subr.bf16.mxu0 %v12152_v37  ;;  %2363 = vmatprep.subr.bf16.mxu1 %v12154_v40  ;;  %v12179_v37 = vld [vmem:[#allocation11 + $0xc] ss:$16 sps:$4 sm:$0xff]   ;;  %v12183_v40 = vld [vmem:[#allocation11] ss:$16 sps:$4 sm:$0xff]  }
 0x2ce   :  { %2323 = vmatpush1.bf16.msra.mxu0 %v12159_v39  ;;  %2364 = vmatpush1.bf16.msra.mxu1 %v12161_v41  ;;  %v12185_v39 = vld [vmem:[#allocation11 + $0x8] ss:$16 sps:$4 sm:$0xff]   ;;  %v11078_v41 = vpop.eup %11077 }
 0x2cf   :  { %2324 = vmatprep.subr.bf16.mxu0 %v12165_v60  ;;  %2365 = vmatprep.subr.bf16.mxu1 %v12167_v18 }
 0x2d2   :  { %2325 = vmatpush1.bf16.msra.mxu0 %v12171_v21  ;;  %2366 = vmatpush1.bf16.msra.mxu1 %v12173_v22 }
 0x2d3   :  { %2326 = vmatprep.subr.bf16.mxu0 %v12177_v4  ;;  %2367 = vmatprep.subr.bf16.mxu1 %v12179_v37 }
 0x2d4   :  { %v11080_v60 = vpop.eup %11079 }
 0x2d5   :  { %v1841_v36 = vmul.f32 %v11080_v60, %v11078_v41  ;;  %v13292_v41 = vmov 0  }
 0x2d6   :  { %2327 = vmatpush1.bf16.msra.mxu0 %v12183_v40  ;;  %2368 = vmatpush1.bf16.msra.mxu1 %v12185_v39 }
 0x2d7   :  { %v2119_v18 = vpack.c.bf16 %v1841_v36, %v1841_v36  ;;  %2715 = vmatprep.subr.bf16.mxu0 %v11983_v23  ;;  %2756 = vmatprep.subr.bf16.mxu1 %v11985_v24 }
 0x2d9   :  { %2345 = vmatmul.mubr.bf16.vlgmr.msra.gmra.mxu0 %v2119_v18  ;;  %2386 = vmatmul.mubr.bf16.vlgmr.msra.gmra.mxu1 %v2119_v18 }
 0x2da   :  { %2716 = vmatpush1.bf16.msra.mxu0 %v11987_v25  ;;  %2757 = vmatpush1.bf16.msra.mxu1 %v11989_v26 }
 0x2db   :  { %2717 = vmatprep.subr.bf16.mxu0 %v11995_v27  ;;  %2758 = vmatprep.subr.bf16.mxu1 %v11997_v28 }
 0x2dc   :  { %2747 = vmatprep.mubr.bf16.mxu0 %v13292_v41  ;;  %2788 = vmatprep.mubr.bf16.mxu1 %v13292_v41 }
 0x2de   :  { %2718 = vmatpush1.bf16.msra.mxu0 %v11999_v29  ;;  %2759 = vmatpush1.bf16.msra.mxu1 %v12001_v30 }
 0x2df   :  { %2719 = vmatprep.subr.bf16.mxu0 %v12007_v31  ;;  %2760 = vmatprep.subr.bf16.mxu1 %v12009_v32 }
 0x2e2   :  { %2720 = vmatpush1.bf16.msra.mxu0 %v12011_v33  ;;  %2761 = vmatpush1.bf16.msra.mxu1 %v12013_v34 }
 0x2e3   :  { %2721 = vmatprep.subr.bf16.mxu0 %v12019_v5  ;;  %2762 = vmatprep.subr.bf16.mxu1 %v12021_v38  ;;  %v2395_v38 = vld [vmem:[#allocation2 + $0x2] ss:$8 sm:$0xf] }
 0x2e6   :  { %2722 = vmatpush1.bf16.msra.mxu0 %v12023_v42  ;;  %2763 = vmatpush1.bf16.msra.mxu1 %v12025_v43 }
 0x2e7   :  { %2723 = vmatprep.subr.bf16.mxu0 %v12031_v44  ;;  %2764 = vmatprep.subr.bf16.mxu1 %v12033_v45 }
 0x2ea   :  { %2724 = vmatpush1.bf16.msra.mxu0 %v12035_v46  ;;  %2765 = vmatpush1.bf16.msra.mxu1 %v12037_v47 }
 0x2eb   :  { %2725 = vmatprep.subr.bf16.mxu0 %v12043_v48  ;;  %2766 = vmatprep.subr.bf16.mxu1 %v12045_v50 }
 0x2ee   :  { %2726 = vmatpush1.bf16.msra.mxu0 %v12047_v51  ;;  %2767 = vmatpush1.bf16.msra.mxu1 %v12049_v53 }
 0x2ef   :  { %2727 = vmatprep.subr.bf16.mxu0 %v12055_v54  ;;  %2768 = vmatprep.subr.bf16.mxu1 %v12057_v56 }
 0x2f2   :  { %2728 = vmatpush1.bf16.msra.mxu0 %v12059_v57  ;;  %2769 = vmatpush1.bf16.msra.mxu1 %v12061_v59 }
 0x2f3   :  { %2729 = vmatprep.subr.bf16.mxu0 %v12067_v61  ;;  %2770 = vmatprep.subr.bf16.mxu1 %v12069_v62 }
 0x2f6   :  { %2730 = vmatpush1.bf16.msra.mxu0 %v12071_v63  ;;  %2771 = vmatpush1.bf16.msra.mxu1 %v12073_v1 }
 0x2f7   :  { %2990 = vmatprep.subr.bf16.mxu0 %v12079_v2  ;;  %3031 = vmatprep.subr.bf16.mxu1 %v12081_v3 }
 0x379   :  { %v2071_v36 = vpop.f32.mrf.mxu0  ;;  %v2112_v23 = vpop.f32.mrf.mxu1 }
 0x37b   :  { %v2073_v24 = vpop.f32.mrf.mxu0  ;;  %v2114_v25 = vpop.f32.mrf.mxu1 }
 0x37c   :  { %v2400_v26 = vcombine.low %v2071_v36, %v2073_v24  ;;  %v2401_v27 = vcombine.low %v2112_v23, %v2114_v25  ;;  %v2427_v25 = vld [vmem:[#allocation2 + $0x25] ss:$8 sm:$0xf] }
 0x37d   :  { %v2075_v28 = vpop.f32.mrf.mxu0  ;;  %v2116_v29 = vpop.f32.mrf.mxu1 }
 0x37e   :  { %v2408_v30 = vrot.slane %v2400_v26, %v11965_v20  ;;  %v2415_v31 = vrot.slane %v2401_v27, %v11965_v20 }
 0x37f   :  { %v2076_v32 = vpop.f32.mrf.mxu0  ;;  %v2117_v33 = vpop.f32.mrf.mxu1 }
 0x380   :  { %v2416_v34 = vcombine.low %v2408_v30, %v2415_v31 }
 0x382   :  { %v2423_v5 = vrot.slane %v2416_v34, %v11965_v20 }
 0x384   :  { %v2425_v42 = vadd.f32 %v2423_v5, %v2395_v38 }
 0x386   :  { %v9617_v43 = vmul.f32 -1.442695, %v2425_v42  ;;  %v2465_v44 = vrot.slane %v2425_v42, 1  ;;  %v2476_v46 = vrot.slane %v2425_v42, 3  ;;  %v2473_v50 = vrot.slane %v2425_v42, 2 }
 0x388   :  { %11081 = vpow2.f32 %v9617_v43  ;;  %v9618_v45 = vmul.f32 -1.442695, %v2465_v44  ;;  %v9619_v47 = vmul.f32 -1.442695, %v2476_v46 }
 0x38a   :  { %11083 = vpow2.f32 %v9618_v45 }
 0x38b   :  { %11085 = vpow2.f32 %v9619_v47 }
 0x395   :  { %v11082_v48 = vpop.eup %11081 }
 0x396   :  { %v2461_v51 = vadd.f32 1.0, %v11082_v48 }
 0x397   :  { %v11084_v53 = vpop.eup %11083 }
 0x398   :  { %11087 = vrcp.f32 %v2461_v51  ;;  %v2470_v54 = vadd.f32 1.0, %v11084_v53  ;;  %v11086_v26 = vpop.eup %11085 }
 0x399   :  { %11089 = vtanh.f32 %v2473_v50  ;;  %v2346_v56 = vpop.f32.mrf.mxu0  ;;  %v2387_v57 = vpop.f32.mrf.mxu1  ;;  %v2481_v33 = vadd.f32 1.0, %v11086_v26  ;;  %v12335_v26 = vld [vmem:[#allocation9 + $0x44] ss:$16 sps:$4 sm:$0xff]  }
 0x39a   :  { %11091 = vrcp.f32 %v2470_v54 }
 0x39b   :  { %v2348_v59 = vpop.f32.mrf.mxu0  ;;  %v2389_v61 = vpop.f32.mrf.mxu1 }
 0x39c   :  { %v2432_v62 = vcombine.low %v2346_v56, %v2348_v59  ;;  %v2433_v63 = vcombine.low %v2387_v57, %v2389_v61  ;;  %v12299_v61 = vld [vmem:[#allocation9 + $0xa4] ss:$16 sps:$4 sm:$0xff]  }
 0x39d   :  { %v2350_v1 = vpop.f32.mrf.mxu0  ;;  %v2391_v2 = vpop.f32.mrf.mxu1 }
 0x39e   :  { %v2440_v3 = vrot.slane %v2432_v62, %v11965_v20  ;;  %v2447_v60 = vrot.slane %v2433_v63, %v11965_v20  ;;  %v12301_v62 = vld [vmem:[#allocation9 + $0xac] ss:$16 sps:$4 sm:$0xff]   ;;  %v12303_v63 = vld [vmem:[#allocation9 + $0xa0] ss:$16 sps:$4 sm:$0xff]   ;;  %v12305_v1 = vld [vmem:[#allocation9 + $0xa8] ss:$16 sps:$4 sm:$0xff]  }
 0x39f   :  { %v2351_v18 = vpop.f32.mrf.mxu0  ;;  %v2392_v36 = vpop.f32.mrf.mxu1  ;;  %v12311_v2 = vld [vmem:[#allocation9 + $0x84] ss:$16 sps:$4 sm:$0xff]  }
 0x3a0   :  { %v2448_v23 = vcombine.low %v2440_v3, %v2447_v60  ;;  %v12313_v3 = vld [vmem:[#allocation9 + $0x8c] ss:$16 sps:$4 sm:$0xff]   ;;  %v12315_v60 = vld [vmem:[#allocation9 + $0x80] ss:$16 sps:$4 sm:$0xff]   ;;  %v12317_v18 = vld [vmem:[#allocation9 + $0x88] ss:$16 sps:$4 sm:$0xff]  }
 0x3a1   :  { %v12323_v36 = vld [vmem:[#allocation9 + $0x64] ss:$16 sps:$4 sm:$0xff]  }
 0x3a2   :  { %v2455_v24 = vrot.slane %v2448_v23, %v11965_v20  ;;  %v12325_v23 = vld [vmem:[#allocation9 + $0x6c] ss:$16 sps:$4 sm:$0xff]  }
 0x3a4   :  { %v2457_v27 = vadd.f32 %v2455_v24, %v2427_v25  ;;  %v12327_v24 = vld [vmem:[#allocation9 + $0x60] ss:$16 sps:$4 sm:$0xff]   ;;  %v12329_v25 = vld [vmem:[#allocation9 + $0x68] ss:$16 sps:$4 sm:$0xff]  }
 0x3a5   :  { %v11088_v28 = vpop.eup %11087 }
 0x3a6   :  { %v11090_v29 = vpop.eup %11089  ;;  %v9620_v30 = vmul.f32 -1.442695, %v2457_v27  ;;  %v2496_v31 = vrot.slane %v2457_v27, 1  ;;  %v2507_v43 = vrot.slane %v2457_v27, 3  ;;  %v2504_v46 = vrot.slane %v2457_v27, 2 }
 0x3a7   :  { %v11092_v32 = vpop.eup %11091  ;;  %v2485_v38 = vmul.f32 %v11090_v29, %v11088_v28  ;;  %v12337_v27 = vld [vmem:[#allocation9 + $0x4c] ss:$16 sps:$4 sm:$0xff]   ;;  %v12339_v28 = vld [vmem:[#allocation9 + $0x40] ss:$16 sps:$4 sm:$0xff]   ;;  %v12341_v29 = vld [vmem:[#allocation9 + $0x48] ss:$16 sps:$4 sm:$0xff]  }
 0x3a8   :  { %11093 = vpow2.f32 %v9620_v30  ;;  %v9621_v34 = vmul.f32 -1.442695, %v2496_v31  ;;  %v2484_v5 = vmul.f32 %v11092_v32, %v12092_v17  ;;  %v9622_v44 = vmul.f32 -1.442695, %v2507_v43  ;;  %v12347_v30 = vld [vmem:[#allocation9 + $0x24] ss:$16 sps:$4 sm:$0xff]  }
 0x3a9   :  { %v12349_v31 = vld [vmem:[#allocation9 + $0x2c] ss:$16 sps:$4 sm:$0xff]   ;;  %v12351_v32 = vld [vmem:[#allocation9 + $0x20] ss:$16 sps:$4 sm:$0xff]   ;;  %v12365_v43 = vld [vmem:[#allocation9 + $0x8] ss:$16 sps:$4 sm:$0xff]  }
 0x3aa   :  { %11095 = vpow2.f32 %v9621_v34  ;;  %v12234_v42 = vadd.f32 %v2485_v38, %v2484_v5  ;;  %v12359_v34 = vld [vmem:[#allocation9 + $0x4] ss:$16 sps:$4 sm:$0xff]   ;;  %v12361_v5 = vld [vmem:[#allocation9 + $0xc] ss:$16 sps:$4 sm:$0xff]   ;;  %v12363_v38 = vld [vmem:[#allocation9] ss:$16 sps:$4 sm:$0xff]  }
 0x3ab   :  { %11097 = vrcp.f32 %v2481_v33  ;;  %v12353_v33 = vld [vmem:[#allocation9 + $0x28] ss:$16 sps:$4 sm:$0xff]  }
 0x3ac   :  { %11099 = vtanh.f32 %v12234_v42 }
 0x3ad   :  { %11101 = vpow2.f32 %v9622_v44  ;;  %v12371_v44 = vld [vmem:[#allocation11 + $0xe4] ss:$16 sps:$4 sm:$0xff]  }
 0x3b5   :  { %v11094_v45 = vpop.eup %11093 }
 0x3b6   :  { %v2492_v47 = vadd.f32 1.0, %v11094_v45  ;;  %v12373_v45 = vld [vmem:[#allocation11 + $0xec] ss:$16 sps:$4 sm:$0xff]  }
 0x3b7   :  { %v11096_v48 = vpop.eup %11095 }
 0x3b8   :  { %v11098_v50 = vpop.eup %11097  ;;  %11103 = vrcp.f32 %v2492_v47  ;;  %v2501_v51 = vadd.f32 1.0, %v11096_v48 }
 0x3b9   :  { %v11100_v53 = vpop.eup %11099  ;;  %11105 = vtanh.f32 %v2504_v46 }
 0x3ba   :  { %11107 = vrcp.f32 %v2501_v51  ;;  %v2488_v17 = vmul.f32 %v11100_v53, %v11098_v50  ;;  %v11102_v56 = vpop.eup %11101 }
 0x3bb   :  { %v2512_v59 = vadd.f32 1.0, %v11102_v56 }
 0x3bc   :  { %2520 = vst [vmem:[#allocation3 + $0x2] sm:$0x1] %v2488_v17  ;;  %v2522_v54 = vpack.c.bf16 %v2488_v17, %v2488_v17 }
 0x3bd   :  { %11109 = vrcp.f32 %v2512_v59 }
 0x3be   :  { %2748 = vmatmul.mubr.bf16.vlgmr.msra.gmra.mxu0 %v2522_v54  ;;  %2789 = vmatmul.mubr.bf16.vlgmr.msra.gmra.mxu1 %v2522_v54 }
 0x3bf   :  { %2991 = vmatpush1.bf16.msra.mxu0 %v12095_v6  ;;  %3032 = vmatpush1.bf16.msra.mxu1 %v12097_v7 }
 0x3c0   :  { %2992 = vmatprep.subr.bf16.mxu0 %v12099_v9  ;;  %3033 = vmatprep.subr.bf16.mxu1 %v12101_v10 }
 0x3c1   :  { %3022 = vmatprep.mubr.bf16.mxu0 %v13292_v41  ;;  %3063 = vmatprep.mubr.bf16.mxu1 %v13292_v41 }
 0x3c3   :  { %2993 = vmatpush1.bf16.msra.mxu0 %v12105_v11  ;;  %3034 = vmatpush1.bf16.msra.mxu1 %v12107_v12  ;;  %v13293_v12 = vld [vmem:[#allocation34_spill] sm:$0xff] }
 0x3c4   :  { %2994 = vmatprep.subr.bf16.mxu0 %v12111_v13  ;;  %3035 = vmatprep.subr.bf16.mxu1 %v12113_v14  ;;  %v13294_v13 = vld [vmem:[#allocation35_spill] sm:$0xff]  ;;  %v13295_v14 = vld [vmem:[#allocation36_spill] sm:$0xff] }
 0x3c5   :  { %v11104_v6 = vpop.eup %11103 }
 0x3c6   :  { %v11106_v57 = vpop.eup %11105 }
 0x3c7   :  { %v11108_v7 = vpop.eup %11107  ;;  %2995 = vmatpush1.bf16.msra.mxu0 %v12119_v15  ;;  %3036 = vmatpush1.bf16.msra.mxu1 %v12121_v16  ;;  %v2516_v10 = vmul.f32 %v11106_v57, %v11104_v6  ;;  %v13296_v15 = vld [vmem:[#allocation37_spill] sm:$0xff]  ;;  %v13297_v16 = vld [vmem:[#allocation38_spill] sm:$0xff] }
 0x3c8   :  { %2996 = vmatprep.subr.bf16.mxu0 %v12125_v58  ;;  %3037 = vmatprep.subr.bf16.mxu1 %v12127_v55  ;;  %v2515_v9 = vmul.f32 %v11108_v7, %v12142_v35  ;;  %v13298_v58 = vld [vmem:[#allocation39_spill] sm:$0xff]  ;;  %v13299_v55 = vld [vmem:[#allocation40_spill] sm:$0xff] }
 0x3c9   :  { %v12277_v35 = vld [vmem:[#allocation9 + $0xec] ss:$16 sps:$4 sm:$0xff]  }
 0x3ca   :  { %v12252_v11 = vadd.f32 %v2516_v10, %v2515_v9  ;;  %v3073_v10 = vld [vmem:[#allocation2 + $0x3] ss:$8 sm:$0xf] }
 0x3cb   :  { %2997 = vmatpush1.bf16.msra.mxu0 %v12131_v52  ;;  %3038 = vmatpush1.bf16.msra.mxu1 %v12133_v49  ;;  %v11110_v52 = vpop.eup %11109 }
 0x3cc   :  { %2998 = vmatprep.subr.bf16.mxu0 %v12137_v19  ;;  %3039 = vmatprep.subr.bf16.mxu1 %v12139_v8  ;;  %11111 = vtanh.f32 %v12252_v11  ;;  %v12275_v8 = vld [vmem:[#allocation9 + $0xe4] ss:$16 sps:$4 sm:$0xff]  }
 0x3cf   :  { %2999 = vmatpush1.bf16.msra.mxu0 %v12146_v0  ;;  %3040 = vmatpush1.bf16.msra.mxu1 %v13293_v12 }
 0x3d0   :  { %3000 = vmatprep.subr.bf16.mxu0 %v13294_v13  ;;  %3041 = vmatprep.subr.bf16.mxu1 %v13295_v14 }
 0x3d3   :  { %3001 = vmatpush1.bf16.msra.mxu0 %v13296_v15  ;;  %3042 = vmatpush1.bf16.msra.mxu1 %v13297_v16 }
 0x3d4   :  { %3002 = vmatprep.subr.bf16.mxu0 %v13298_v58  ;;  %3043 = vmatprep.subr.bf16.mxu1 %v13299_v55 }
 0x3d7   :  { %3003 = vmatpush1.bf16.msra.mxu0 %v12171_v21  ;;  %3044 = vmatpush1.bf16.msra.mxu1 %v12173_v22  ;;  %v12279_v21 = vld [vmem:[#allocation9 + $0xe0] ss:$16 sps:$4 sm:$0xff]  }
 0x3d8   :  { %3004 = vmatprep.subr.bf16.mxu0 %v12177_v4  ;;  %3045 = vmatprep.subr.bf16.mxu1 %v12179_v37  ;;  %v12281_v37 = vld [vmem:[#allocation9 + $0xe8] ss:$16 sps:$4 sm:$0xff]   ;;  %v12291_v22 = vld [vmem:[#allocation9 + $0xc0] ss:$16 sps:$4 sm:$0xff]  }
 0x3d9   :  { %v11112_v0 = vpop.eup %11111  ;;  %v12293_v4 = vld [vmem:[#allocation9 + $0xc8] ss:$16 sps:$4 sm:$0xff]  }
 0x3da   :  { %v2519_v49 = vmul.f32 %v11112_v0, %v11110_v52 }
 0x3db   :  { %3005 = vmatpush1.bf16.msra.mxu0 %v12183_v40  ;;  %3046 = vmatpush1.bf16.msra.mxu1 %v12185_v39  ;;  %v12287_v40 = vld [vmem:[#allocation9 + $0xc4] ss:$16 sps:$4 sm:$0xff]   ;;  %v12289_v39 = vld [vmem:[#allocation9 + $0xcc] ss:$16 sps:$4 sm:$0xff]  }
 0x3dc   :  { %2521 = vst [vmem:[#allocation3 + $0xd] sm:$0x1] %v2519_v49  ;;  %v2797_v19 = vpack.c.bf16 %v2519_v49, %v2519_v49  ;;  %3393 = vmatprep.subr.bf16.mxu0 %v12275_v8  ;;  %3434 = vmatprep.subr.bf16.mxu1 %v12277_v35 }
 0x3de   :  { %3023 = vmatmul.mubr.bf16.vlgmr.msra.gmra.mxu0 %v2797_v19  ;;  %3064 = vmatmul.mubr.bf16.vlgmr.msra.gmra.mxu1 %v2797_v19 }
 0x3df   :  { %3425 = vmatprep.mubr.bf16.mxu0 %v13292_v41  ;;  %3466 = vmatprep.mubr.bf16.mxu1 %v13292_v41 }
 0x3e0   :  { %3394 = vmatpush1.bf16.msra.mxu0 %v12279_v21  ;;  %3435 = vmatpush1.bf16.msra.mxu1 %v12281_v37 }
 0x3e1   :  { %3395 = vmatprep.subr.bf16.mxu0 %v12287_v40  ;;  %3436 = vmatprep.subr.bf16.mxu1 %v12289_v39 }
 0x3e4   :  { %3396 = vmatpush1.bf16.msra.mxu0 %v12291_v22  ;;  %3437 = vmatpush1.bf16.msra.mxu1 %v12293_v4 }
 0x3e5   :  { %3397 = vmatprep.subr.bf16.mxu0 %v12299_v61  ;;  %3438 = vmatprep.subr.bf16.mxu1 %v12301_v62 }
 0x3e8   :  { %3398 = vmatpush1.bf16.msra.mxu0 %v12303_v63  ;;  %3439 = vmatpush1.bf16.msra.mxu1 %v12305_v1 }
 0x3e9   :  { %3399 = vmatprep.subr.bf16.mxu0 %v12311_v2  ;;  %3440 = vmatprep.subr.bf16.mxu1 %v12313_v3 }
 0x3ec   :  { %3400 = vmatpush1.bf16.msra.mxu0 %v12315_v60  ;;  %3441 = vmatpush1.bf16.msra.mxu1 %v12317_v18 }
 0x3ed   :  { %3401 = vmatprep.subr.bf16.mxu0 %v12323_v36  ;;  %3442 = vmatprep.subr.bf16.mxu1 %v12325_v23 }
 0x3f0   :  { %3402 = vmatpush1.bf16.msra.mxu0 %v12327_v24  ;;  %3443 = vmatpush1.bf16.msra.mxu1 %v12329_v25 }
 0x3f1   :  { %3403 = vmatprep.subr.bf16.mxu0 %v12335_v26  ;;  %3444 = vmatprep.subr.bf16.mxu1 %v12337_v27 }
 0x3f4   :  { %3404 = vmatpush1.bf16.msra.mxu0 %v12339_v28  ;;  %3445 = vmatpush1.bf16.msra.mxu1 %v12341_v29 }
 0x3f5   :  { %3405 = vmatprep.subr.bf16.mxu0 %v12347_v30  ;;  %3446 = vmatprep.subr.bf16.mxu1 %v12349_v31 }
 0x3f8   :  { %3406 = vmatpush1.bf16.msra.mxu0 %v12351_v32  ;;  %3447 = vmatpush1.bf16.msra.mxu1 %v12353_v33 }
 0x3f9   :  { %3407 = vmatprep.subr.bf16.mxu0 %v12359_v34  ;;  %3448 = vmatprep.subr.bf16.mxu1 %v12361_v5 }
 0x3fc   :  { %3408 = vmatpush1.bf16.msra.mxu0 %v12363_v38  ;;  %3449 = vmatpush1.bf16.msra.mxu1 %v12365_v43 }
 0x3fd   :  { %3668 = vmatprep.subr.bf16.mxu0 %v12371_v44  ;;  %3709 = vmatprep.subr.bf16.mxu1 %v12373_v45 }
 0x47e   :  { %v2749_v46 = vpop.f32.mrf.mxu0  ;;  %v2790_v47 = vpop.f32.mrf.mxu1 }
 0x480   :  { %v2751_v48 = vpop.f32.mrf.mxu0  ;;  %v2792_v50 = vpop.f32.mrf.mxu1 }
 0x481   :  { %v3078_v51 = vcombine.low %v2749_v46, %v2751_v48  ;;  %v3079_v53 = vcombine.low %v2790_v47, %v2792_v50 }
 0x482   :  { %v2753_v17 = vpop.f32.mrf.mxu0  ;;  %v2794_v54 = vpop.f32.mrf.mxu1 }
 0x483   :  { %v3086_v56 = vrot.slane %v3078_v51, %v11965_v20  ;;  %v3093_v6 = vrot.slane %v3079_v53, %v11965_v20 }
 0x484   :  { %v2754_v57 = vpop.f32.mrf.mxu0  ;;  %v2795_v7 = vpop.f32.mrf.mxu1 }
 0x485   :  { %v3094_v59 = vcombine.low %v3086_v56, %v3093_v6 }
 0x487   :  { %v3101_v9 = vrot.slane %v3094_v59, %v11965_v20 }
 0x489   :  { %v3103_v12 = vadd.f32 %v3101_v9, %v3073_v10  ;;  %v3105_v10 = vld [vmem:[#allocation2 + $0x24] ss:$8 sm:$0xf] }
 0x48b   :  { %v9687_v13 = vmul.f32 -1.442695, %v3103_v12  ;;  %v3143_v14 = vrot.slane %v3103_v12, 1  ;;  %v3154_v16 = vrot.slane %v3103_v12, 3  ;;  %v3151_v52 = vrot.slane %v3103_v12, 2 }
 0x48d   :  { %11113 = vpow2.f32 %v9687_v13  ;;  %v9688_v15 = vmul.f32 -1.442695, %v3143_v14  ;;  %v9689_v58 = vmul.f32 -1.442695, %v3154_v16 }
 0x48f   :  { %11115 = vpow2.f32 %v9688_v15 }
 0x490   :  { %11117 = vpow2.f32 %v9689_v58 }
 0x49a   :  { %v11114_v55 = vpop.eup %11113 }
 0x49b   :  { %v3139_v0 = vadd.f32 1.0, %v11114_v55 }
 0x49c   :  { %v11116_v49 = vpop.eup %11115 }
 0x49d   :  { %11119 = vrcp.f32 %v3139_v0  ;;  %v3148_v19 = vadd.f32 1.0, %v11116_v49  ;;  %v11118_v12 = vpop.eup %11117 }
 0x49e   :  { %11121 = vtanh.f32 %v3151_v52  ;;  %v3024_v46 = vpop.f32.mrf.mxu0  ;;  %v3065_v47 = vpop.f32.mrf.mxu1  ;;  %v3159_v52 = vadd.f32 1.0, %v11118_v12  ;;  %v12397_v12 = vld [vmem:[#allocation11 + $0xc0] ss:$16 sps:$4 sm:$0xff]  }
 0x49f   :  { %11123 = vrcp.f32 %v3148_v19 }
 0x4a0   :  { %v3026_v48 = vpop.f32.mrf.mxu0  ;;  %v3067_v50 = vpop.f32.mrf.mxu1 }
 0x4a1   :  { %v3110_v51 = vcombine.low %v3024_v46, %v3026_v48  ;;  %v3111_v53 = vcombine.low %v3065_v47, %v3067_v50 }
 0x4a2   :  { %v3028_v17 = vpop.f32.mrf.mxu0  ;;  %v3069_v54 = vpop.f32.mrf.mxu1 }
 0x4a3   :  { %v3118_v56 = vrot.slane %v3110_v51, %v11965_v20  ;;  %v3125_v6 = vrot.slane %v3111_v53, %v11965_v20 }
 0x4a4   :  { %v3029_v57 = vpop.f32.mrf.mxu0  ;;  %v3070_v7 = vpop.f32.mrf.mxu1 }
 0x4a5   :  { %v3126_v59 = vcombine.low %v3118_v56, %v3125_v6  ;;  %v12387_v57 = vld [vmem:[#allocation11 + $0xe0] ss:$16 sps:$4 sm:$0xff]   ;;  %v12389_v7 = vld [vmem:[#allocation11 + $0xe8] ss:$16 sps:$4 sm:$0xff]  }
 0x4a7   :  { %v3133_v9 = vrot.slane %v3126_v59, %v11965_v20 }
 0x4a9   :  { %v3135_v13 = vadd.f32 %v3133_v9, %v3105_v10  ;;  %v12391_v9 = vld [vmem:[#allocation11 + $0xc4] ss:$16 sps:$4 sm:$0xff]   ;;  %v12393_v10 = vld [vmem:[#allocation11 + $0xcc] ss:$16 sps:$4 sm:$0xff]  }
 0x4aa   :  { %v11120_v14 = vpop.eup %11119 }
 0x4ab   :  { %v11122_v15 = vpop.eup %11121  ;;  %v9690_v16 = vmul.f32 -1.442695, %v3135_v13  ;;  %v3174_v58 = vrot.slane %v3135_v13, 1  ;;  %v3185_v47 = vrot.slane %v3135_v13, 3  ;;  %v3182_v51 = vrot.slane %v3135_v13, 2 }
 0x4ac   :  { %v11124_v55 = vpop.eup %11123  ;;  %v3163_v19 = vmul.f32 %v11122_v15, %v11120_v14  ;;  %v12399_v13 = vld [vmem:[#allocation11 + $0xc8] ss:$16 sps:$4 sm:$0xff]   ;;  %v12403_v14 = vld [vmem:[#allocation11 + $0xa4] ss:$16 sps:$4 sm:$0xff]   ;;  %v12405_v15 = vld [vmem:[#allocation11 + $0xac] ss:$16 sps:$4 sm:$0xff]  }
 0x4ad   :  { %11125 = vpow2.f32 %v9690_v16  ;;  %v9691_v0 = vmul.f32 -1.442695, %v3174_v58  ;;  %v3162_v49 = vmul.f32 %v11124_v55, %v12234_v42  ;;  %v9692_v48 = vmul.f32 -1.442695, %v3185_v47  ;;  %v12411_v16 = vld [vmem:[#allocation11 + $0xa0] ss:$16 sps:$4 sm:$0xff]  }
 0x4ae   :  { %v12413_v58 = vld [vmem:[#allocation11 + $0xa8] ss:$16 sps:$4 sm:$0xff]  }
 0x4af   :  { %11127 = vpow2.f32 %v9691_v0  ;;  %v12384_v46 = vadd.f32 %v3163_v19, %v3162_v49  ;;  %v12419_v0 = vld [vmem:[#allocation11 + $0x8c] ss:$16 sps:$4 sm:$0xff]  }
 0x4b0   :  { %11129 = vrcp.f32 %v3159_v52  ;;  %v12417_v52 = vld [vmem:[#allocation11 + $0x84] ss:$16 sps:$4 sm:$0xff]   ;;  %13300 = vst [vmem:[#allocation34_spill] sm:$0xff] %v12419_v0 }
 0x4b1   :  { %11131 = vtanh.f32 %v12384_v46 }
 0x4b2   :  { %11133 = vpow2.f32 %v9692_v48 }
 0x4ba   :  { %v11126_v50 = vpop.eup %11125 }
 0x4bb   :  { %v3170_v53 = vadd.f32 1.0, %v11126_v50  ;;  %v12423_v50 = vld [vmem:[#allocation11 + $0x80] ss:$16 sps:$4 sm:$0xff]  }
 0x4bc   :  { %v11128_v17 = vpop.eup %11127 }
 0x4bd   :  { %v11130_v54 = vpop.eup %11129  ;;  %11135 = vrcp.f32 %v3170_v53  ;;  %v3179_v56 = vadd.f32 1.0, %v11128_v17  ;;  %v12429_v53 = vld [vmem:[#allocation11 + $0x64] ss:$16 sps:$4 sm:$0xff]   ;;  %v12431_v17 = vld [vmem:[#allocation11 + $0x6c] ss:$16 sps:$4 sm:$0xff]  }
 0x4be   :  { %v11132_v6 = vpop.eup %11131  ;;  %11137 = vtanh.f32 %v3182_v51  ;;  %v12425_v51 = vld [vmem:[#allocation11 + $0x88] ss:$16 sps:$4 sm:$0xff]  }
 0x4bf   :  { %11139 = vrcp.f32 %v3179_v56  ;;  %v3166_v42 = vmul.f32 %v11132_v6, %v11130_v54  ;;  %v11134_v55 = vpop.eup %11133 }
 0x4c0   :  { %v3190_v48 = vadd.f32 1.0, %v11134_v55  ;;  %v12444_v55 = vld [vmem:[#allocation11 + $0x44] ss:$16 sps:$4 sm:$0xff]  }
 0x4c1   :  { %v3200_v59 = vpack.c.bf16 %v3166_v42, %v3166_v42  ;;  %v12438_v42 = vld [vmem:[#allocation11 + $0x60] ss:$16 sps:$4 sm:$0xff]   ;;  %13302 = vst [vmem:[#allocation36_spill] sm:$0xff] %v12444_v55 }
 0x4c2   :  { %11141 = vrcp.f32 %v3190_v48  ;;  %v12463_v48 = vld [vmem:[#allocation11 + $0x20] ss:$16 sps:$4 sm:$0xff]  }
 0x4c3   :  { %3426 = vmatmul.mubr.bf16.vlgmr.msra.gmra.mxu0 %v3200_v59  ;;  %3467 = vmatmul.mubr.bf16.vlgmr.msra.gmra.mxu1 %v3200_v59  ;;  %v12440_v59 = vld [vmem:[#allocation11 + $0x68] ss:$16 sps:$4 sm:$0xff]  }
 0x4c4   :  { %3669 = vmatpush1.bf16.msra.mxu0 %v12387_v57  ;;  %3710 = vmatpush1.bf16.msra.mxu1 %v12389_v7  ;;  %13301 = vst [vmem:[#allocation35_spill] sm:$0xff] %v12440_v59 }
 0x4c5   :  { %3670 = vmatprep.subr.bf16.mxu0 %v12391_v9  ;;  %3711 = vmatprep.subr.bf16.mxu1 %v12393_v10 }
 0x4c6   :  { %3700 = vmatprep.mubr.bf16.mxu0 %v13292_v41  ;;  %3741 = vmatprep.mubr.bf16.mxu1 %v13292_v41 }
 0x4c8   :  { %3671 = vmatpush1.bf16.msra.mxu0 %v12397_v12  ;;  %3712 = vmatpush1.bf16.msra.mxu1 %v12399_v13 }
 0x4c9   :  { %3672 = vmatprep.subr.bf16.mxu0 %v12403_v14  ;;  %3713 = vmatprep.subr.bf16.mxu1 %v12405_v15 }
 0x4ca   :  { %v11136_v49 = vpop.eup %11135 }
 0x4cb   :  { %v11138_v19 = vpop.eup %11137 }
 0x4cc   :  { %v11140_v47 = vpop.eup %11139  ;;  %3673 = vmatpush1.bf16.msra.mxu0 %v12411_v16  ;;  %3714 = vmatpush1.bf16.msra.mxu1 %v12413_v58  ;;  %v3194_v56 = vmul.f32 %v11138_v19, %v11136_v49  ;;  %v12453_v49 = vld [vmem:[#allocation11 + $0x48] ss:$16 sps:$4 sm:$0xff]   ;;  %v12457_v19 = vld [vmem:[#allocation11 + $0x24] ss:$16 sps:$4 sm:$0xff]  }
 0x4cd   :  { %3674 = vmatprep.subr.bf16.mxu0 %v12417_v52  ;;  %3715 = vmatprep.subr.bf16.mxu1 %v12419_v0  ;;  %v3193_v54 = vmul.f32 %v11140_v47, %v12252_v11  ;;  %v12446_v0 = vld [vmem:[#allocation11 + $0x4c] ss:$16 sps:$4 sm:$0xff]   ;;  %v12451_v11 = vld [vmem:[#allocation11 + $0x40] ss:$16 sps:$4 sm:$0xff]   ;;  %13305 = vst [vmem:[#allocation39_spill] sm:$0xff] %v12453_v49  ;;  %13306 = vst [vmem:[#allocation40_spill] sm:$0xff] %v12457_v19 }
 0x4ce   :  { %13303 = vst [vmem:[#allocation37_spill] sm:$0xff] %v12446_v0  ;;  %13304 = vst [vmem:[#allocation38_spill] sm:$0xff] %v12451_v11  ;;  %v12459_v47 = vld [vmem:[#allocation11 + $0x2c] ss:$16 sps:$4 sm:$0xff]  }
 0x4cf   :  { %v12434_v6 = vadd.f32 %v3194_v56, %v3193_v54  ;;  %13307 = vst [vmem:[#allocation41_spill] sm:$0xff] %v12459_v47  ;;  %v12465_v54 = vld [vmem:[#allocation11 + $0x28] ss:$16 sps:$4 sm:$0xff]   ;;  %v12469_v56 = vld [vmem:[#allocation11 + $0x4] ss:$16 sps:$4 sm:$0xff]  }
 0x4d0   :  { %3675 = vmatpush1.bf16.msra.mxu0 %v12423_v50  ;;  %3716 = vmatpush1.bf16.msra.mxu1 %v12425_v51 }
 0x4d1   :  { %3676 = vmatprep.subr.bf16.mxu0 %v12429_v53  ;;  %3717 = vmatprep.subr.bf16.mxu1 %v12431_v17  ;;  %11143 = vtanh.f32 %v12434_v6 }
 0x4d4   :  { %3677 = vmatpush1.bf16.msra.mxu0 %v12438_v42  ;;  %3718 = vmatpush1.bf16.msra.mxu1 %v12440_v59 }
 0x4d5   :  { %3678 = vmatprep.subr.bf16.mxu0 %v12444_v55  ;;  %3719 = vmatprep.subr.bf16.mxu1 %v12446_v0  ;;  %v12471_v55 = vld [vmem:[#allocation11 + $0xc] ss:$16 sps:$4 sm:$0xff]   ;;  %v12475_v0 = vld [vmem:[#allocation11] ss:$16 sps:$4 sm:$0xff]  }
 0x4d8   :  { %3679 = vmatpush1.bf16.msra.mxu0 %v12451_v11  ;;  %3720 = vmatpush1.bf16.msra.mxu1 %v12453_v49  ;;  %v12477_v11 = vld [vmem:[#allocation11 + $0x8] ss:$16 sps:$4 sm:$0xff]   ;;  %v11142_v49 = vpop.eup %11141 }
 0x4d9   :  { %3680 = vmatprep.subr.bf16.mxu0 %v12457_v19  ;;  %3721 = vmatprep.subr.bf16.mxu1 %v12459_v47 }
 0x4dc   :  { %3681 = vmatpush1.bf16.msra.mxu0 %v12463_v48  ;;  %3722 = vmatpush1.bf16.msra.mxu1 %v12465_v54 }
 0x4dd   :  { %3682 = vmatprep.subr.bf16.mxu0 %v12469_v56  ;;  %3723 = vmatprep.subr.bf16.mxu1 %v12471_v55 }
 0x4de   :  { %v11144_v19 = vpop.eup %11143 }
 0x4df   :  { %v3197_v59 = vmul.f32 %v11144_v19, %v11142_v49 }
 0x4e0   :  { %3683 = vmatpush1.bf16.msra.mxu0 %v12475_v0  ;;  %3724 = vmatpush1.bf16.msra.mxu1 %v12477_v11 }
 0x4e1   :  { %v3475_v47 = vpack.c.bf16 %v3197_v59, %v3197_v59  ;;  %4071 = vmatprep.subr.bf16.mxu0 %v12275_v8  ;;  %4112 = vmatprep.subr.bf16.mxu1 %v12277_v35 }
 0x4e3   :  { %3701 = vmatmul.mubr.bf16.vlgmr.msra.gmra.mxu0 %v3475_v47  ;;  %3742 = vmatmul.mubr.bf16.vlgmr.msra.gmra.mxu1 %v3475_v47 }
 0x4e4   :  { %4072 = vmatpush1.bf16.msra.mxu0 %v12279_v21  ;;  %4113 = vmatpush1.bf16.msra.mxu1 %v12281_v37 }
 0x4e5   :  { %4073 = vmatprep.subr.bf16.mxu0 %v12287_v40  ;;  %4114 = vmatprep.subr.bf16.mxu1 %v12289_v39 }
 0x4e6   :  { %4103 = vmatprep.mubr.bf16.mxu0 %v13292_v41  ;;  %4144 = vmatprep.mubr.bf16.mxu1 %v13292_v41 }
 0x4e8   :  { %4074 = vmatpush1.bf16.msra.mxu0 %v12291_v22  ;;  %4115 = vmatpush1.bf16.msra.mxu1 %v12293_v4 }
 0x4e9   :  { %4075 = vmatprep.subr.bf16.mxu0 %v12299_v61  ;;  %4116 = vmatprep.subr.bf16.mxu1 %v12301_v62 }
 0x4ec   :  { %4076 = vmatpush1.bf16.msra.mxu0 %v12303_v63  ;;  %4117 = vmatpush1.bf16.msra.mxu1 %v12305_v1 }
 0x4ed   :  { %4077 = vmatprep.subr.bf16.mxu0 %v12311_v2  ;;  %4118 = vmatprep.subr.bf16.mxu1 %v12313_v3 }
 0x4f0   :  { %4078 = vmatpush1.bf16.msra.mxu0 %v12315_v60  ;;  %4119 = vmatpush1.bf16.msra.mxu1 %v12317_v18  ;;  %v3751_v60 = vld [vmem:[#allocation2 + $0x4] ss:$8 sm:$0xf] }
 0x4f1   :  { %4079 = vmatprep.subr.bf16.mxu0 %v12323_v36  ;;  %4120 = vmatprep.subr.bf16.mxu1 %v12325_v23 }
 0x4f4   :  { %4080 = vmatpush1.bf16.msra.mxu0 %v12327_v24  ;;  %4121 = vmatpush1.bf16.msra.mxu1 %v12329_v25 }
 0x4f5   :  { %4081 = vmatprep.subr.bf16.mxu0 %v12335_v26  ;;  %4122 = vmatprep.subr.bf16.mxu1 %v12337_v27 }
 0x4f8   :  { %4082 = vmatpush1.bf16.msra.mxu0 %v12339_v28  ;;  %4123 = vmatpush1.bf16.msra.mxu1 %v12341_v29 }
 0x4f9   :  { %4083 = vmatprep.subr.bf16.mxu0 %v12347_v30  ;;  %4124 = vmatprep.subr.bf16.mxu1 %v12349_v31 }
 0x4fc   :  { %4084 = vmatpush1.bf16.msra.mxu0 %v12351_v32  ;;  %4125 = vmatpush1.bf16.msra.mxu1 %v12353_v33 }
 0x4fd   :  { %4085 = vmatprep.subr.bf16.mxu0 %v12359_v34  ;;  %4126 = vmatprep.subr.bf16.mxu1 %v12361_v5 }
 0x500   :  { %4086 = vmatpush1.bf16.msra.mxu0 %v12363_v38  ;;  %4127 = vmatpush1.bf16.msra.mxu1 %v12365_v43 }
 0x501   :  { %4346 = vmatprep.subr.bf16.mxu0 %v12371_v44  ;;  %4387 = vmatprep.subr.bf16.mxu1 %v12373_v45 }
 0x583   :  { %v3427_v8 = vpop.f32.mrf.mxu0  ;;  %v3468_v35 = vpop.f32.mrf.mxu1 }
 0x585   :  { %v3429_v21 = vpop.f32.mrf.mxu0  ;;  %v3470_v37 = vpop.f32.mrf.mxu1 }
 0x586   :  { %v3756_v40 = vcombine.low %v3427_v8, %v3429_v21  ;;  %v3757_v39 = vcombine.low %v3468_v35, %v3470_v37  ;;  %v3783_v21 = vld [vmem:[#allocation2 + $0x23] ss:$8 sm:$0xf] }
 0x587   :  { %v3431_v22 = vpop.f32.mrf.mxu0  ;;  %v3472_v4 = vpop.f32.mrf.mxu1 }
 0x588   :  { %v3764_v61 = vrot.slane %v3756_v40, %v11965_v20  ;;  %v3771_v62 = vrot.slane %v3757_v39, %v11965_v20 }
 0x589   :  { %v3432_v63 = vpop.f32.mrf.mxu0  ;;  %v3473_v1 = vpop.f32.mrf.mxu1 }
 0x58a   :  { %v3772_v2 = vcombine.low %v3764_v61, %v3771_v62 }
 0x58c   :  { %v3779_v3 = vrot.slane %v3772_v2, %v11965_v20 }
 0x58e   :  { %v3781_v18 = vadd.f32 %v3779_v3, %v3751_v60 }
 0x590   :  { %v9757_v36 = vmul.f32 -1.442695, %v3781_v18  ;;  %v3821_v23 = vrot.slane %v3781_v18, 1  ;;  %v3832_v25 = vrot.slane %v3781_v18, 3  ;;  %v3829_v28 = vrot.slane %v3781_v18, 2 }
 0x592   :  { %11145 = vpow2.f32 %v9757_v36  ;;  %v9758_v24 = vmul.f32 -1.442695, %v3821_v23  ;;  %v9759_v26 = vmul.f32 -1.442695, %v3832_v25 }
 0x594   :  { %11147 = vpow2.f32 %v9758_v24 }
 0x595   :  { %11149 = vpow2.f32 %v9759_v26 }
 0x59f   :  { %v11146_v27 = vpop.eup %11145 }
 0x5a0   :  { %v3817_v29 = vadd.f32 1.0, %v11146_v27 }
 0x5a1   :  { %v11148_v30 = vpop.eup %11147 }
 0x5a2   :  { %11151 = vrcp.f32 %v3817_v29  ;;  %v3826_v31 = vadd.f32 1.0, %v11148_v30  ;;  %v11150_v37 = vpop.eup %11149 }
 0x5a3   :  { %11153 = vtanh.f32 %v3829_v28  ;;  %v3702_v32 = vpop.f32.mrf.mxu0  ;;  %v3743_v33 = vpop.f32.mrf.mxu1  ;;  %v3837_v63 = vadd.f32 1.0, %v11150_v37  ;;  %v12621_v37 = vld [vmem:[#allocation9 + $0x68] ss:$16 sps:$4 sm:$0xff]  }
 0x5a4   :  { %11155 = vrcp.f32 %v3826_v31 }
 0x5a5   :  { %v3704_v34 = vpop.f32.mrf.mxu0  ;;  %v3745_v5 = vpop.f32.mrf.mxu1 }
 0x5a6   :  { %v3788_v38 = vcombine.low %v3702_v32, %v3704_v34  ;;  %v3789_v43 = vcombine.low %v3743_v33, %v3745_v5  ;;  %v12583_v34 = vld [vmem:[#allocation9 + $0xc0] ss:$16 sps:$4 sm:$0xff]   ;;  %v12585_v5 = vld [vmem:[#allocation9 + $0xc8] ss:$16 sps:$4 sm:$0xff]  }
 0x5a7   :  { %v3706_v44 = vpop.f32.mrf.mxu0  ;;  %v3747_v45 = vpop.f32.mrf.mxu1 }
 0x5a8   :  { %v3796_v59 = vrot.slane %v3788_v38, %v11965_v20  ;;  %v3803_v49 = vrot.slane %v3789_v43, %v11965_v20  ;;  %v12591_v38 = vld [vmem:[#allocation9 + $0xa4] ss:$16 sps:$4 sm:$0xff]   ;;  %v12593_v43 = vld [vmem:[#allocation9 + $0xac] ss:$16 sps:$4 sm:$0xff]   ;;  %v12595_v44 = vld [vmem:[#allocation9 + $0xa0] ss:$16 sps:$4 sm:$0xff]  }
 0x5a9   :  { %v3707_v19 = vpop.f32.mrf.mxu0  ;;  %v3748_v47 = vpop.f32.mrf.mxu1  ;;  %v12597_v45 = vld [vmem:[#allocation9 + $0xa8] ss:$16 sps:$4 sm:$0xff]  }
 0x5aa   :  { %v3804_v8 = vcombine.low %v3796_v59, %v3803_v49  ;;  %v12603_v59 = vld [vmem:[#allocation9 + $0x84] ss:$16 sps:$4 sm:$0xff]   ;;  %v12605_v49 = vld [vmem:[#allocation9 + $0x8c] ss:$16 sps:$4 sm:$0xff]   ;;  %v12607_v19 = vld [vmem:[#allocation9 + $0x80] ss:$16 sps:$4 sm:$0xff]  }
 0x5ab   :  { %v12609_v47 = vld [vmem:[#allocation9 + $0x88] ss:$16 sps:$4 sm:$0xff]  }
 0x5ac   :  { %v3811_v35 = vrot.slane %v3804_v8, %v11965_v20  ;;  %v12615_v8 = vld [vmem:[#allocation9 + $0x64] ss:$16 sps:$4 sm:$0xff]  }
 0x5ae   :  { %v3813_v40 = vadd.f32 %v3811_v35, %v3783_v21  ;;  %v12617_v35 = vld [vmem:[#allocation9 + $0x6c] ss:$16 sps:$4 sm:$0xff]   ;;  %v12619_v21 = vld [vmem:[#allocation9 + $0x60] ss:$16 sps:$4 sm:$0xff]  }
 0x5af   :  { %v11152_v39 = vpop.eup %11151 }
 0x5b0   :  { %v11154_v22 = vpop.eup %11153  ;;  %v9760_v4 = vmul.f32 -1.442695, %v3813_v40  ;;  %v3852_v61 = vrot.slane %v3813_v40, 1  ;;  %v3863_v18 = vrot.slane %v3813_v40, 3  ;;  %v3860_v24 = vrot.slane %v3813_v40, 2 }
 0x5b1   :  { %v11156_v62 = vpop.eup %11155  ;;  %v3841_v3 = vmul.f32 %v11154_v22, %v11152_v39  ;;  %v12627_v40 = vld [vmem:[#allocation9 + $0x44] ss:$16 sps:$4 sm:$0xff]   ;;  %v12629_v39 = vld [vmem:[#allocation9 + $0x4c] ss:$16 sps:$4 sm:$0xff]   ;;  %v12631_v22 = vld [vmem:[#allocation9 + $0x40] ss:$16 sps:$4 sm:$0xff]  }
 0x5b2   :  { %11157 = vpow2.f32 %v9760_v4  ;;  %v9761_v1 = vmul.f32 -1.442695, %v3852_v61  ;;  %v3840_v2 = vmul.f32 %v11156_v62, %v12384_v46  ;;  %v9762_v36 = vmul.f32 -1.442695, %v3863_v18  ;;  %v12633_v4 = vld [vmem:[#allocation9 + $0x48] ss:$16 sps:$4 sm:$0xff]  }
 0x5b3   :  { %v12639_v61 = vld [vmem:[#allocation9 + $0x24] ss:$16 sps:$4 sm:$0xff]   ;;  %v12641_v62 = vld [vmem:[#allocation9 + $0x2c] ss:$16 sps:$4 sm:$0xff]   ;;  %v12655_v18 = vld [vmem:[#allocation9] ss:$16 sps:$4 sm:$0xff]  }
 0x5b4   :  { %11159 = vpow2.f32 %v9761_v1  ;;  %v12526_v60 = vadd.f32 %v3841_v3, %v3840_v2  ;;  %v12645_v1 = vld [vmem:[#allocation9 + $0x28] ss:$16 sps:$4 sm:$0xff]   ;;  %v12651_v2 = vld [vmem:[#allocation9 + $0x4] ss:$16 sps:$4 sm:$0xff]   ;;  %v12653_v3 = vld [vmem:[#allocation9 + $0xc] ss:$16 sps:$4 sm:$0xff]  }
 0x5b5   :  { %11161 = vrcp.f32 %v3837_v63  ;;  %v12643_v63 = vld [vmem:[#allocation9 + $0x20] ss:$16 sps:$4 sm:$0xff]  }
 0x5b6   :  { %11163 = vtanh.f32 %v12526_v60 }
 0x5b7   :  { %11165 = vpow2.f32 %v9762_v36  ;;  %v12657_v36 = vld [vmem:[#allocation9 + $0x8] ss:$16 sps:$4 sm:$0xff]  }
 0x5bf   :  { %v11158_v23 = vpop.eup %11157 }
 0x5c0   :  { %v3848_v25 = vadd.f32 1.0, %v11158_v23  ;;  %v12663_v23 = vld [vmem:[#allocation11 + $0xe4] ss:$16 sps:$4 sm:$0xff]  }
 0x5c1   :  { %v11160_v26 = vpop.eup %11159 }
 0x5c2   :  { %v11162_v27 = vpop.eup %11161  ;;  %11167 = vrcp.f32 %v3848_v25  ;;  %v3857_v28 = vadd.f32 1.0, %v11160_v26 }
 0x5c3   :  { %v11164_v29 = vpop.eup %11163  ;;  %11169 = vtanh.f32 %v3860_v24  ;;  %v12665_v24 = vld [vmem:[#allocation11 + $0xec] ss:$16 sps:$4 sm:$0xff]  }
 0x5c4   :  { %11171 = vrcp.f32 %v3857_v28  ;;  %v3844_v46 = vmul.f32 %v11164_v29, %v11162_v27  ;;  %v11166_v31 = vpop.eup %11165 }
 0x5c5   :  { %v3868_v33 = vadd.f32 1.0, %v11166_v31 }
 0x5c6   :  { %v3878_v30 = vpack.c.bf16 %v3844_v46, %v3844_v46 }
 0x5c7   :  { %11173 = vrcp.f32 %v3868_v33 }
 0x5c8   :  { %4104 = vmatmul.mubr.bf16.vlgmr.msra.gmra.mxu0 %v3878_v30  ;;  %4145 = vmatmul.mubr.bf16.vlgmr.msra.gmra.mxu1 %v3878_v30 }
 0x5c9   :  { %4347 = vmatpush1.bf16.msra.mxu0 %v12387_v57  ;;  %4388 = vmatpush1.bf16.msra.mxu1 %v12389_v7 }
 0x5ca   :  { %4348 = vmatprep.subr.bf16.mxu0 %v12391_v9  ;;  %4389 = vmatprep.subr.bf16.mxu1 %v12393_v10  ;;  %v13308_v9 = vld [vmem:[#allocation34_spill] sm:$0xff] }
 0x5cb   :  { %4378 = vmatprep.mubr.bf16.mxu0 %v13292_v41  ;;  %4419 = vmatprep.mubr.bf16.mxu1 %v13292_v41 }
 0x5cd   :  { %4349 = vmatpush1.bf16.msra.mxu0 %v12397_v12  ;;  %4390 = vmatpush1.bf16.msra.mxu1 %v12399_v13 }
 0x5ce   :  { %4350 = vmatprep.subr.bf16.mxu0 %v12403_v14  ;;  %4391 = vmatprep.subr.bf16.mxu1 %v12405_v15  ;;  %v13309_v14 = vld [vmem:[#allocation35_spill] sm:$0xff]  ;;  %v13310_v15 = vld [vmem:[#allocation36_spill] sm:$0xff] }
 0x5cf   :  { %v11168_v57 = vpop.eup %11167 }
 0x5d0   :  { %v11170_v32 = vpop.eup %11169 }
 0x5d1   :  { %v11172_v7 = vpop.eup %11171  ;;  %4351 = vmatpush1.bf16.msra.mxu0 %v12411_v16  ;;  %4392 = vmatpush1.bf16.msra.mxu1 %v12413_v58  ;;  %v3872_v12 = vmul.f32 %v11170_v32, %v11168_v57  ;;  %v13311_v16 = vld [vmem:[#allocation37_spill] sm:$0xff]  ;;  %v13312_v58 = vld [vmem:[#allocation38_spill] sm:$0xff] }
 0x5d2   :  { %4352 = vmatprep.subr.bf16.mxu0 %v12417_v52  ;;  %4393 = vmatprep.subr.bf16.mxu1 %v13308_v9  ;;  %v3871_v10 = vmul.f32 %v11172_v7, %v12434_v6  ;;  %v13313_v52 = vld [vmem:[#allocation39_spill] sm:$0xff] }
 0x5d4   :  { %v12544_v13 = vadd.f32 %v3872_v12, %v3871_v10  ;;  %v4429_v12 = vld [vmem:[#allocation2 + $0x5] ss:$8 sm:$0xf] }
 0x5d5   :  { %4353 = vmatpush1.bf16.msra.mxu0 %v12423_v50  ;;  %4394 = vmatpush1.bf16.msra.mxu1 %v12425_v51  ;;  %v13314_v50 = vld [vmem:[#allocation40_spill] sm:$0xff]  ;;  %v13315_v51 = vld [vmem:[#allocation41_spill] sm:$0xff] }
 0x5d6   :  { %4354 = vmatprep.subr.bf16.mxu0 %v12429_v53  ;;  %4395 = vmatprep.subr.bf16.mxu1 %v12431_v17  ;;  %11175 = vtanh.f32 %v12544_v13  ;;  %v11174_v53 = vpop.eup %11173 }
 0x5d9   :  { %4355 = vmatpush1.bf16.msra.mxu0 %v12438_v42  ;;  %4396 = vmatpush1.bf16.msra.mxu1 %v13309_v14 }
 0x5da   :  { %4356 = vmatprep.subr.bf16.mxu0 %v13310_v15  ;;  %4397 = vmatprep.subr.bf16.mxu1 %v13311_v16 }
 0x5dd   :  { %4357 = vmatpush1.bf16.msra.mxu0 %v13312_v58  ;;  %4398 = vmatpush1.bf16.msra.mxu1 %v13313_v52 }
 0x5de   :  { %4358 = vmatprep.subr.bf16.mxu0 %v13314_v50  ;;  %4399 = vmatprep.subr.bf16.mxu1 %v13315_v51 }
 0x5e1   :  { %4359 = vmatpush1.bf16.msra.mxu0 %v12463_v48  ;;  %4400 = vmatpush1.bf16.msra.mxu1 %v12465_v54  ;;  %v12567_v48 = vld [vmem:[#allocation9 + $0xe4] ss:$16 sps:$4 sm:$0xff]   ;;  %v12569_v54 = vld [vmem:[#allocation9 + $0xec] ss:$16 sps:$4 sm:$0xff]  }
 0x5e2   :  { %4360 = vmatprep.subr.bf16.mxu0 %v12469_v56  ;;  %4401 = vmatprep.subr.bf16.mxu1 %v12471_v55  ;;  %v12571_v56 = vld [vmem:[#allocation9 + $0xe0] ss:$16 sps:$4 sm:$0xff]   ;;  %v12573_v55 = vld [vmem:[#allocation9 + $0xe8] ss:$16 sps:$4 sm:$0xff]  }
 0x5e3   :  { %v11176_v17 = vpop.eup %11175 }
 0x5e4   :  { %v3875_v6 = vmul.f32 %v11176_v17, %v11174_v53 }
 0x5e5   :  { %4361 = vmatpush1.bf16.msra.mxu0 %v12475_v0  ;;  %4402 = vmatpush1.bf16.msra.mxu1 %v12477_v11  ;;  %v12579_v0 = vld [vmem:[#allocation9 + $0xc4] ss:$16 sps:$4 sm:$0xff]   ;;  %v12581_v11 = vld [vmem:[#allocation9 + $0xcc] ss:$16 sps:$4 sm:$0xff]  }
 0x5e6   :  { %v4153_v42 = vpack.c.bf16 %v3875_v6, %v3875_v6  ;;  %4749 = vmatprep.subr.bf16.mxu0 %v12567_v48  ;;  %4790 = vmatprep.subr.bf16.mxu1 %v12569_v54 }
 0x5e8   :  { %4379 = vmatmul.mubr.bf16.vlgmr.msra.gmra.mxu0 %v4153_v42  ;;  %4420 = vmatmul.mubr.bf16.vlgmr.msra.gmra.mxu1 %v4153_v42 }
 0x5e9   :  { %4781 = vmatprep.mubr.bf16.mxu0 %v13292_v41  ;;  %4822 = vmatprep.mubr.bf16.mxu1 %v13292_v41 }
 0x5ea   :  { %4750 = vmatpush1.bf16.msra.mxu0 %v12571_v56  ;;  %4791 = vmatpush1.bf16.msra.mxu1 %v12573_v55 }
 0x5eb   :  { %4751 = vmatprep.subr.bf16.mxu0 %v12579_v0  ;;  %4792 = vmatprep.subr.bf16.mxu1 %v12581_v11 }
 0x5ee   :  { %4752 = vmatpush1.bf16.msra.mxu0 %v12583_v34  ;;  %4793 = vmatpush1.bf16.msra.mxu1 %v12585_v5 }
 0x5ef   :  { %4753 = vmatprep.subr.bf16.mxu0 %v12591_v38  ;;  %4794 = vmatprep.subr.bf16.mxu1 %v12593_v43 }
 0x5f2   :  { %4754 = vmatpush1.bf16.msra.mxu0 %v12595_v44  ;;  %4795 = vmatpush1.bf16.msra.mxu1 %v12597_v45 }
 0x5f3   :  { %4755 = vmatprep.subr.bf16.mxu0 %v12603_v59  ;;  %4796 = vmatprep.subr.bf16.mxu1 %v12605_v49 }
 0x5f6   :  { %4756 = vmatpush1.bf16.msra.mxu0 %v12607_v19  ;;  %4797 = vmatpush1.bf16.msra.mxu1 %v12609_v47 }
 0x5f7   :  { %4757 = vmatprep.subr.bf16.mxu0 %v12615_v8  ;;  %4798 = vmatprep.subr.bf16.mxu1 %v12617_v35 }
 0x5fa   :  { %4758 = vmatpush1.bf16.msra.mxu0 %v12619_v21  ;;  %4799 = vmatpush1.bf16.msra.mxu1 %v12621_v37 }
 0x5fb   :  { %4759 = vmatprep.subr.bf16.mxu0 %v12627_v40  ;;  %4800 = vmatprep.subr.bf16.mxu1 %v12629_v39 }
 0x5fe   :  { %4760 = vmatpush1.bf16.msra.mxu0 %v12631_v22  ;;  %4801 = vmatpush1.bf16.msra.mxu1 %v12633_v4 }
 0x5ff   :  { %4761 = vmatprep.subr.bf16.mxu0 %v12639_v61  ;;  %4802 = vmatprep.subr.bf16.mxu1 %v12641_v62 }
 0x602   :  { %4762 = vmatpush1.bf16.msra.mxu0 %v12643_v63  ;;  %4803 = vmatpush1.bf16.msra.mxu1 %v12645_v1 }
 0x603   :  { %4763 = vmatprep.subr.bf16.mxu0 %v12651_v2  ;;  %4804 = vmatprep.subr.bf16.mxu1 %v12653_v3 }
 0x606   :  { %4764 = vmatpush1.bf16.msra.mxu0 %v12655_v18  ;;  %4805 = vmatpush1.bf16.msra.mxu1 %v12657_v36 }
 0x607   :  { %5024 = vmatprep.subr.bf16.mxu0 %v12663_v23  ;;  %5065 = vmatprep.subr.bf16.mxu1 %v12665_v24 }
 0x688   :  { %v4105_v25 = vpop.f32.mrf.mxu0  ;;  %v4146_v26 = vpop.f32.mrf.mxu1 }
 0x68a   :  { %v4107_v27 = vpop.f32.mrf.mxu0  ;;  %v4148_v28 = vpop.f32.mrf.mxu1 }
 0x68b   :  { %v4434_v29 = vcombine.low %v4105_v25, %v4107_v27  ;;  %v4435_v46 = vcombine.low %v4146_v26, %v4148_v28 }
 0x68c   :  { %v4109_v30 = vpop.f32.mrf.mxu0  ;;  %v4150_v31 = vpop.f32.mrf.mxu1 }
 0x68d   :  { %v4442_v57 = vrot.slane %v4434_v29, %v11965_v20  ;;  %v4449_v32 = vrot.slane %v4435_v46, %v11965_v20 }
 0x68e   :  { %v4110_v7 = vpop.f32.mrf.mxu0  ;;  %v4151_v33 = vpop.f32.mrf.mxu1 }
 0x68f   :  { %v4450_v9 = vcombine.low %v4442_v57, %v4449_v32 }
 0x691   :  { %v4457_v10 = vrot.slane %v4450_v9, %v11965_v20 }
 0x693   :  { %v4459_v14 = vadd.f32 %v4457_v10, %v4429_v12  ;;  %v4461_v12 = vld [vmem:[#allocation2 + $0x22] ss:$8 sm:$0xf] }
 0x695   :  { %v9827_v15 = vmul.f32 -1.442695, %v4459_v14  ;;  %v4499_v16 = vrot.slane %v4459_v14, 1  ;;  %v4510_v52 = vrot.slane %v4459_v14, 3  ;;  %v4507_v53 = vrot.slane %v4459_v14, 2 }
 0x697   :  { %11177 = vpow2.f32 %v9827_v15  ;;  %v9828_v58 = vmul.f32 -1.442695, %v4499_v16  ;;  %v9829_v50 = vmul.f32 -1.442695, %v4510_v52 }
 0x699   :  { %11179 = vpow2.f32 %v9828_v58 }
 0x69a   :  { %11181 = vpow2.f32 %v9829_v50 }
 0x6a4   :  { %v11178_v51 = vpop.eup %11177 }
 0x6a5   :  { %v4495_v17 = vadd.f32 1.0, %v11178_v51 }
 0x6a6   :  { %v11180_v6 = vpop.eup %11179 }
 0x6a7   :  { %11183 = vrcp.f32 %v4495_v17  ;;  %v4504_v42 = vadd.f32 1.0, %v11180_v6  ;;  %v11182_v14 = vpop.eup %11181 }
 0x6a8   :  { %11185 = vtanh.f32 %v4507_v53  ;;  %v4380_v25 = vpop.f32.mrf.mxu0  ;;  %v4421_v26 = vpop.f32.mrf.mxu1  ;;  %v4515_v53 = vadd.f32 1.0, %v11182_v14  ;;  %v12689_v14 = vld [vmem:[#allocation11 + $0xc0] ss:$16 sps:$4 sm:$0xff]  }
 0x6a9   :  { %11187 = vrcp.f32 %v4504_v42 }
 0x6aa   :  { %v4382_v27 = vpop.f32.mrf.mxu0  ;;  %v4423_v28 = vpop.f32.mrf.mxu1 }
 0x6ab   :  { %v4466_v29 = vcombine.low %v4380_v25, %v4382_v27  ;;  %v4467_v46 = vcombine.low %v4421_v26, %v4423_v28 }
 0x6ac   :  { %v4384_v30 = vpop.f32.mrf.mxu0  ;;  %v4425_v31 = vpop.f32.mrf.mxu1 }
 0x6ad   :  { %v4474_v57 = vrot.slane %v4466_v29, %v11965_v20  ;;  %v4481_v32 = vrot.slane %v4467_v46, %v11965_v20 }
 0x6ae   :  { %v4385_v7 = vpop.f32.mrf.mxu0  ;;  %v4426_v33 = vpop.f32.mrf.mxu1 }
 0x6af   :  { %v4482_v9 = vcombine.low %v4474_v57, %v4481_v32  ;;  %v12679_v7 = vld [vmem:[#allocation11 + $0xe0] ss:$16 sps:$4 sm:$0xff]   ;;  %v12681_v33 = vld [vmem:[#allocation11 + $0xe8] ss:$16 sps:$4 sm:$0xff]  }
 0x6b1   :  { %v4489_v10 = vrot.slane %v4482_v9, %v11965_v20 }
 0x6b3   :  { %v4491_v15 = vadd.f32 %v4489_v10, %v4461_v12  ;;  %v12683_v10 = vld [vmem:[#allocation11 + $0xc4] ss:$16 sps:$4 sm:$0xff]   ;;  %v12685_v12 = vld [vmem:[#allocation11 + $0xcc] ss:$16 sps:$4 sm:$0xff]  }
 0x6b4   :  { %v11184_v16 = vpop.eup %11183 }
 0x6b5   :  { %v11186_v58 = vpop.eup %11185  ;;  %v9830_v52 = vmul.f32 -1.442695, %v4491_v15  ;;  %v4530_v50 = vrot.slane %v4491_v15, 1  ;;  %v4541_v26 = vrot.slane %v4491_v15, 3  ;;  %v4538_v29 = vrot.slane %v4491_v15, 2 }
 0x6b6   :  { %v11188_v51 = vpop.eup %11187  ;;  %v4519_v42 = vmul.f32 %v11186_v58, %v11184_v16  ;;  %v12691_v15 = vld [vmem:[#allocation11 + $0xc8] ss:$16 sps:$4 sm:$0xff]   ;;  %v12695_v16 = vld [vmem:[#allocation11 + $0xa4] ss:$16 sps:$4 sm:$0xff]   ;;  %v12697_v58 = vld [vmem:[#allocation11 + $0xac] ss:$16 sps:$4 sm:$0xff]  }
 0x6b7   :  { %11189 = vpow2.f32 %v9830_v52  ;;  %v9831_v17 = vmul.f32 -1.442695, %v4530_v50  ;;  %v4518_v6 = vmul.f32 %v11188_v51, %v12526_v60  ;;  %v9832_v27 = vmul.f32 -1.442695, %v4541_v26  ;;  %v12703_v52 = vld [vmem:[#allocation11 + $0xa0] ss:$16 sps:$4 sm:$0xff]  }
 0x6b8   :  { %v12705_v50 = vld [vmem:[#allocation11 + $0xa8] ss:$16 sps:$4 sm:$0xff]  }
 0x6b9   :  { %11191 = vpow2.f32 %v9831_v17  ;;  %v12676_v25 = vadd.f32 %v4519_v42, %v4518_v6  ;;  %v12711_v17 = vld [vmem:[#allocation11 + $0x8c] ss:$16 sps:$4 sm:$0xff]  }
 0x6ba   :  { %11193 = vrcp.f32 %v4515_v53  ;;  %v12709_v53 = vld [vmem:[#allocation11 + $0x84] ss:$16 sps:$4 sm:$0xff]   ;;  %13316 = vst [vmem:[#allocation34_spill] sm:$0xff] %v12711_v17 }
 0x6bb   :  { %11195 = vtanh.f32 %v12676_v25 }
 0x6bc   :  { %11197 = vpow2.f32 %v9832_v27 }
 0x6c4   :  { %v11190_v28 = vpop.eup %11189 }
 0x6c5   :  { %v4526_v46 = vadd.f32 1.0, %v11190_v28  ;;  %v12715_v28 = vld [vmem:[#allocation11 + $0x80] ss:$16 sps:$4 sm:$0xff]  }
 0x6c6   :  { %v11192_v30 = vpop.eup %11191 }
 0x6c7   :  { %v11194_v31 = vpop.eup %11193  ;;  %11199 = vrcp.f32 %v4526_v46  ;;  %v4535_v57 = vadd.f32 1.0, %v11192_v30  ;;  %v12721_v46 = vld [vmem:[#allocation11 + $0x64] ss:$16 sps:$4 sm:$0xff]   ;;  %v12723_v30 = vld [vmem:[#allocation11 + $0x6c] ss:$16 sps:$4 sm:$0xff]  }
 0x6c8   :  { %v11196_v32 = vpop.eup %11195  ;;  %11201 = vtanh.f32 %v4538_v29  ;;  %v12717_v29 = vld [vmem:[#allocation11 + $0x88] ss:$16 sps:$4 sm:$0xff]  }
 0x6c9   :  { %11203 = vrcp.f32 %v4535_v57  ;;  %v4522_v60 = vmul.f32 %v11196_v32, %v11194_v31  ;;  %v11198_v51 = vpop.eup %11197 }
 0x6ca   :  { %v4546_v27 = vadd.f32 1.0, %v11198_v51  ;;  %v12736_v51 = vld [vmem:[#allocation11 + $0x44] ss:$16 sps:$4 sm:$0xff]  }
 0x6cb   :  { %4554 = vst [vmem:[#allocation3 + $0x5] sm:$0x1] %v4522_v60  ;;  %v4556_v9 = vpack.c.bf16 %v4522_v60, %v4522_v60  ;;  %v12730_v60 = vld [vmem:[#allocation11 + $0x60] ss:$16 sps:$4 sm:$0xff]   ;;  %13318 = vst [vmem:[#allocation36_spill] sm:$0xff] %v12736_v51 }
 0x6cc   :  { %11205 = vrcp.f32 %v4546_v27  ;;  %v12755_v27 = vld [vmem:[#allocation11 + $0x20] ss:$16 sps:$4 sm:$0xff]  }
 0x6cd   :  { %4782 = vmatmul.mubr.bf16.vlgmr.msra.gmra.mxu0 %v4556_v9  ;;  %4823 = vmatmul.mubr.bf16.vlgmr.msra.gmra.mxu1 %v4556_v9  ;;  %v12732_v9 = vld [vmem:[#allocation11 + $0x68] ss:$16 sps:$4 sm:$0xff]  }
 0x6ce   :  { %5025 = vmatpush1.bf16.msra.mxu0 %v12679_v7  ;;  %5066 = vmatpush1.bf16.msra.mxu1 %v12681_v33  ;;  %13317 = vst [vmem:[#allocation35_spill] sm:$0xff] %v12732_v9 }
 0x6cf   :  { %5026 = vmatprep.subr.bf16.mxu0 %v12683_v10  ;;  %5067 = vmatprep.subr.bf16.mxu1 %v12685_v12 }
 0x6d0   :  { %5056 = vmatprep.mubr.bf16.mxu0 %v13292_v41  ;;  %5097 = vmatprep.mubr.bf16.mxu1 %v13292_v41 }
 0x6d2   :  { %5027 = vmatpush1.bf16.msra.mxu0 %v12689_v14  ;;  %5068 = vmatpush1.bf16.msra.mxu1 %v12691_v15 }
 0x6d3   :  { %5028 = vmatprep.subr.bf16.mxu0 %v12695_v16  ;;  %5069 = vmatprep.subr.bf16.mxu1 %v12697_v58 }
 0x6d4   :  { %v11200_v6 = vpop.eup %11199 }
 0x6d5   :  { %v11202_v42 = vpop.eup %11201 }
 0x6d6   :  { %v11204_v26 = vpop.eup %11203  ;;  %5029 = vmatpush1.bf16.msra.mxu0 %v12703_v52  ;;  %5070 = vmatpush1.bf16.msra.mxu1 %v12705_v50  ;;  %v4550_v57 = vmul.f32 %v11202_v42, %v11200_v6  ;;  %v12745_v6 = vld [vmem:[#allocation11 + $0x48] ss:$16 sps:$4 sm:$0xff]   ;;  %v12749_v42 = vld [vmem:[#allocation11 + $0x24] ss:$16 sps:$4 sm:$0xff]  }
 0x6d7   :  { %5030 = vmatprep.subr.bf16.mxu0 %v12709_v53  ;;  %5071 = vmatprep.subr.bf16.mxu1 %v12711_v17  ;;  %v4549_v31 = vmul.f32 %v11204_v26, %v12544_v13  ;;  %v12738_v17 = vld [vmem:[#allocation11 + $0x4c] ss:$16 sps:$4 sm:$0xff]   ;;  %v12743_v13 = vld [vmem:[#allocation11 + $0x40] ss:$16 sps:$4 sm:$0xff]   ;;  %13321 = vst [vmem:[#allocation39_spill] sm:$0xff] %v12745_v6  ;;  %13322 = vst [vmem:[#allocation40_spill] sm:$0xff] %v12749_v42 }
 0x6d8   :  { %13319 = vst [vmem:[#allocation37_spill] sm:$0xff] %v12738_v17  ;;  %13320 = vst [vmem:[#allocation38_spill] sm:$0xff] %v12743_v13  ;;  %v12751_v26 = vld [vmem:[#allocation11 + $0x2c] ss:$16 sps:$4 sm:$0xff]  }
 0x6d9   :  { %v12726_v32 = vadd.f32 %v4550_v57, %v4549_v31  ;;  %13323 = vst [vmem:[#allocation41_spill] sm:$0xff] %v12751_v26  ;;  %v12757_v31 = vld [vmem:[#allocation11 + $0x28] ss:$16 sps:$4 sm:$0xff]   ;;  %v12761_v57 = vld [vmem:[#allocation11 + $0x4] ss:$16 sps:$4 sm:$0xff]  }
 0x6da   :  { %5031 = vmatpush1.bf16.msra.mxu0 %v12715_v28  ;;  %5072 = vmatpush1.bf16.msra.mxu1 %v12717_v29 }
 0x6db   :  { %5032 = vmatprep.subr.bf16.mxu0 %v12721_v46  ;;  %5073 = vmatprep.subr.bf16.mxu1 %v12723_v30  ;;  %11207 = vtanh.f32 %v12726_v32 }
 0x6de   :  { %5033 = vmatpush1.bf16.msra.mxu0 %v12730_v60  ;;  %5074 = vmatpush1.bf16.msra.mxu1 %v12732_v9 }
 0x6df   :  { %5034 = vmatprep.subr.bf16.mxu0 %v12736_v51  ;;  %5075 = vmatprep.subr.bf16.mxu1 %v12738_v17  ;;  %v12763_v51 = vld [vmem:[#allocation11 + $0xc] ss:$16 sps:$4 sm:$0xff]   ;;  %v12767_v17 = vld [vmem:[#allocation11] ss:$16 sps:$4 sm:$0xff]  }
 0x6e2   :  { %5035 = vmatpush1.bf16.msra.mxu0 %v12743_v13  ;;  %5076 = vmatpush1.bf16.msra.mxu1 %v12745_v6  ;;  %v12769_v13 = vld [vmem:[#allocation11 + $0x8] ss:$16 sps:$4 sm:$0xff]   ;;  %v11206_v6 = vpop.eup %11205 }
 0x6e3   :  { %5036 = vmatprep.subr.bf16.mxu0 %v12749_v42  ;;  %5077 = vmatprep.subr.bf16.mxu1 %v12751_v26 }
 0x6e6   :  { %5037 = vmatpush1.bf16.msra.mxu0 %v12755_v27  ;;  %5078 = vmatpush1.bf16.msra.mxu1 %v12757_v31 }
 0x6e7   :  { %5038 = vmatprep.subr.bf16.mxu0 %v12761_v57  ;;  %5079 = vmatprep.subr.bf16.mxu1 %v12763_v51 }
 0x6e8   :  { %v11208_v42 = vpop.eup %11207 }
 0x6e9   :  { %v4553_v9 = vmul.f32 %v11208_v42, %v11206_v6 }
 0x6ea   :  { %5039 = vmatpush1.bf16.msra.mxu0 %v12767_v17  ;;  %5080 = vmatpush1.bf16.msra.mxu1 %v12769_v13 }
 0x6eb   :  { %4555 = vst [vmem:[#allocation3 + $0xa] sm:$0x1] %v4553_v9  ;;  %v4831_v26 = vpack.c.bf16 %v4553_v9, %v4553_v9  ;;  %5427 = vmatprep.subr.bf16.mxu0 %v12567_v48  ;;  %5468 = vmatprep.subr.bf16.mxu1 %v12569_v54 }
 0x6ed   :  { %5057 = vmatmul.mubr.bf16.vlgmr.msra.gmra.mxu0 %v4831_v26  ;;  %5098 = vmatmul.mubr.bf16.vlgmr.msra.gmra.mxu1 %v4831_v26 }
 0x6ee   :  { %5428 = vmatpush1.bf16.msra.mxu0 %v12571_v56  ;;  %5469 = vmatpush1.bf16.msra.mxu1 %v12573_v55 }
 0x6ef   :  { %5429 = vmatprep.subr.bf16.mxu0 %v12579_v0  ;;  %5470 = vmatprep.subr.bf16.mxu1 %v12581_v11 }
 0x6f0   :  { %5459 = vmatprep.mubr.bf16.mxu0 %v13292_v41  ;;  %5500 = vmatprep.mubr.bf16.mxu1 %v13292_v41 }
 0x6f2   :  { %5430 = vmatpush1.bf16.msra.mxu0 %v12583_v34  ;;  %5471 = vmatpush1.bf16.msra.mxu1 %v12585_v5 }
 0x6f3   :  { %5431 = vmatprep.subr.bf16.mxu0 %v12591_v38  ;;  %5472 = vmatprep.subr.bf16.mxu1 %v12593_v43 }
 0x6f6   :  { %5432 = vmatpush1.bf16.msra.mxu0 %v12595_v44  ;;  %5473 = vmatpush1.bf16.msra.mxu1 %v12597_v45 }
 0x6f7   :  { %5433 = vmatprep.subr.bf16.mxu0 %v12603_v59  ;;  %5474 = vmatprep.subr.bf16.mxu1 %v12605_v49 }
 0x6fa   :  { %5434 = vmatpush1.bf16.msra.mxu0 %v12607_v19  ;;  %5475 = vmatpush1.bf16.msra.mxu1 %v12609_v47  ;;  %v5107_v19 = vld [vmem:[#allocation2 + $0x6] ss:$8 sm:$0xf] }
 0x6fb   :  { %5435 = vmatprep.subr.bf16.mxu0 %v12615_v8  ;;  %5476 = vmatprep.subr.bf16.mxu1 %v12617_v35 }
 0x6fe   :  { %5436 = vmatpush1.bf16.msra.mxu0 %v12619_v21  ;;  %5477 = vmatpush1.bf16.msra.mxu1 %v12621_v37 }
 0x6ff   :  { %5437 = vmatprep.subr.bf16.mxu0 %v12627_v40  ;;  %5478 = vmatprep.subr.bf16.mxu1 %v12629_v39 }
 0x702   :  { %5438 = vmatpush1.bf16.msra.mxu0 %v12631_v22  ;;  %5479 = vmatpush1.bf16.msra.mxu1 %v12633_v4 }
 0x703   :  { %5439 = vmatprep.subr.bf16.mxu0 %v12639_v61  ;;  %5480 = vmatprep.subr.bf16.mxu1 %v12641_v62 }
 0x706   :  { %5440 = vmatpush1.bf16.msra.mxu0 %v12643_v63  ;;  %5481 = vmatpush1.bf16.msra.mxu1 %v12645_v1 }
 0x707   :  { %5441 = vmatprep.subr.bf16.mxu0 %v12651_v2  ;;  %5482 = vmatprep.subr.bf16.mxu1 %v12653_v3 }
 0x70a   :  { %5442 = vmatpush1.bf16.msra.mxu0 %v12655_v18  ;;  %5483 = vmatpush1.bf16.msra.mxu1 %v12657_v36 }
 0x70b   :  { %5702 = vmatprep.subr.bf16.mxu0 %v12663_v23  ;;  %5743 = vmatprep.subr.bf16.mxu1 %v12665_v24 }
 0x78d   :  { %v4783_v48 = vpop.f32.mrf.mxu0  ;;  %v4824_v54 = vpop.f32.mrf.mxu1 }
 0x78f   :  { %v4785_v56 = vpop.f32.mrf.mxu0  ;;  %v4826_v55 = vpop.f32.mrf.mxu1 }
 0x790   :  { %v5112_v0 = vcombine.low %v4783_v48, %v4785_v56  ;;  %v5113_v11 = vcombine.low %v4824_v54, %v4826_v55  ;;  %v5139_v56 = vld [vmem:[#allocation2 + $0x21] ss:$8 sm:$0xf] }
 0x791   :  { %v4787_v34 = vpop.f32.mrf.mxu0  ;;  %v4828_v5 = vpop.f32.mrf.mxu1 }
 0x792   :  { %v5120_v38 = vrot.slane %v5112_v0, %v11965_v20  ;;  %v5127_v43 = vrot.slane %v5113_v11, %v11965_v20 }
 0x793   :  { %v4788_v44 = vpop.f32.mrf.mxu0  ;;  %v4829_v45 = vpop.f32.mrf.mxu1 }
 0x794   :  { %v5128_v59 = vcombine.low %v5120_v38, %v5127_v43 }
 0x796   :  { %v5135_v49 = vrot.slane %v5128_v59, %v11965_v20 }
 0x798   :  { %v5137_v47 = vadd.f32 %v5135_v49, %v5107_v19 }
 0x79a   :  { %v9897_v8 = vmul.f32 -1.442695, %v5137_v47  ;;  %v5177_v35 = vrot.slane %v5137_v47, 1  ;;  %v5188_v37 = vrot.slane %v5137_v47, 3  ;;  %v5185_v22 = vrot.slane %v5137_v47, 2 }
 0x79c   :  { %11209 = vpow2.f32 %v9897_v8  ;;  %v9898_v21 = vmul.f32 -1.442695, %v5177_v35  ;;  %v9899_v40 = vmul.f32 -1.442695, %v5188_v37 }
 0x79e   :  { %11211 = vpow2.f32 %v9898_v21 }
 0x79f   :  { %11213 = vpow2.f32 %v9899_v40 }
 0x7a9   :  { %v11210_v39 = vpop.eup %11209 }
 0x7aa   :  { %v5173_v4 = vadd.f32 1.0, %v11210_v39 }
 0x7ab   :  { %v11212_v61 = vpop.eup %11211 }
 0x7ac   :  { %11215 = vrcp.f32 %v5173_v4  ;;  %v5182_v62 = vadd.f32 1.0, %v11212_v61  ;;  %v11214_v55 = vpop.eup %11213 }
 0x7ad   :  { %11217 = vtanh.f32 %v5185_v22  ;;  %v5058_v63 = vpop.f32.mrf.mxu0  ;;  %v5099_v1 = vpop.f32.mrf.mxu1  ;;  %v5193_v44 = vadd.f32 1.0, %v11214_v55 }
 0x7ae   :  { %11219 = vrcp.f32 %v5182_v62 }
 0x7af   :  { %v5060_v2 = vpop.f32.mrf.mxu0  ;;  %v5101_v3 = vpop.f32.mrf.mxu1 }
 0x7b0   :  { %v5144_v18 = vcombine.low %v5058_v63, %v5060_v2  ;;  %v5145_v36 = vcombine.low %v5099_v1, %v5101_v3  ;;  %v6015_v2 = vld [vmem:[#allocation12 + $0x1c0] sm:$0xff] }
 0x7b1   :  { %v5062_v23 = vpop.f32.mrf.mxu0  ;;  %v5103_v24 = vpop.f32.mrf.mxu1  ;;  %v6019_v3 = vld [vmem:[#allocation12 + $0x1e0] sm:$0xff] }
 0x7b2   :  { %v5152_v9 = vrot.slane %v5144_v18, %v11965_v20  ;;  %v5159_v6 = vrot.slane %v5145_v36, %v11965_v20  ;;  %v6016_v18 = vld [vmem:[#allocation12 + $0x1c8] sm:$0xff] }
 0x7b3   :  { %v5063_v42 = vpop.f32.mrf.mxu0  ;;  %v5104_v26 = vpop.f32.mrf.mxu1  ;;  %v6020_v36 = vld [vmem:[#allocation12 + $0x1e8] sm:$0xff] }
 0x7b4   :  { %v5160_v48 = vcombine.low %v5152_v9, %v5159_v6  ;;  %v10031_v23 = vcombine.low %v6016_v18, %v6020_v36  ;;  %v10032_v24 = vcombine.high %v6016_v18, %v6020_v36  ;;  %v6008_v9 = vld [vmem:[#allocation12 + $0x188] sm:$0xff]  ;;  %v6079_v36 = vld [vmem:[#allocation12 + $0x3c0] sm:$0xff] }
 0x7b6   :  { %v5167_v54 = vrot.slane %v5160_v48, %v11965_v20  ;;  %v5999_v48 = vld [vmem:[#allocation12 + $0x140] sm:$0xff] }
 0x7b8   :  { %v5169_v0 = vadd.f32 %v5167_v54, %v5139_v56  ;;  %v6003_v54 = vld [vmem:[#allocation12 + $0x160] sm:$0xff]  ;;  %v6000_v56 = vld [vmem:[#allocation12 + $0x148] sm:$0xff] }
 0x7b9   :  { %v11216_v11 = vpop.eup %11215  ;;  %v10014_v55 = vcombine.high %v5999_v48, %v6003_v54 }
 0x7ba   :  { %v11218_v34 = vpop.eup %11217  ;;  %v9900_v5 = vmul.f32 -1.442695, %v5169_v0  ;;  %v5208_v38 = vrot.slane %v5169_v0, 1  ;;  %v5219_v47 = vrot.slane %v5169_v0, 3  ;;  %v5216_v21 = vrot.slane %v5169_v0, 2  ;;  %v6004_v0 = vld [vmem:[#allocation12 + $0x168] sm:$0xff] }
 0x7bb   :  { %v11220_v43 = vpop.eup %11219  ;;  %v5197_v49 = vmul.f32 %v11218_v34, %v11216_v11  ;;  %v10013_v11 = vcombine.low %v5999_v48, %v6003_v54  ;;  %v10015_v34 = vcombine.low %v6000_v56, %v6004_v0  ;;  %v6076_v48 = vld [vmem:[#allocation12 + $0x3a8] sm:$0xff] }
 0x7bc   :  { %11221 = vpow2.f32 %v9900_v5  ;;  %v9901_v45 = vmul.f32 -1.442695, %v5208_v38  ;;  %v5196_v59 = vmul.f32 %v11220_v43, %v12676_v25  ;;  %v9902_v8 = vmul.f32 -1.442695, %v5219_v47  ;;  %v5991_v38 = vld [vmem:[#allocation12 + $0x100] sm:$0xff] }
 0x7bd   :  { %v10016_v5 = vcombine.high %v6000_v56, %v6004_v0  ;;  %v5995_v43 = vld [vmem:[#allocation12 + $0x120] sm:$0xff] }
 0x7be   :  { %11223 = vpow2.f32 %v9901_v45  ;;  %v12818_v19 = vadd.f32 %v5197_v49, %v5196_v59  ;;  %v10006_v45 = vcombine.high %v5991_v38, %v5995_v43  ;;  %v5996_v59 = vld [vmem:[#allocation12 + $0x128] sm:$0xff]  ;;  %v10005_v49 = vcombine.low %v5991_v38, %v5995_v43  ;;  %v6063_v0 = vld [vmem:[#allocation12 + $0x340] sm:$0xff] }
 0x7bf   :  { %11225 = vrcp.f32 %v5193_v44  ;;  %v5992_v44 = vld [vmem:[#allocation12 + $0x108] sm:$0xff] }
 0x7c0   :  { %11227 = vtanh.f32 %v12818_v19  ;;  %v10007_v47 = vcombine.low %v5992_v44, %v5996_v59  ;;  %v6068_v38 = vld [vmem:[#allocation12 + $0x368] sm:$0xff] }
 0x7c1   :  { %11229 = vpow2.f32 %v9902_v8  ;;  %v10008_v8 = vcombine.high %v5992_v44, %v5996_v59  ;;  %v6055_v59 = vld [vmem:[#allocation12 + $0x300] sm:$0xff] }
 0x7c9   :  { %v11222_v35 = vpop.eup %11221 }
 0x7ca   :  { %v5204_v37 = vadd.f32 1.0, %v11222_v35  ;;  %v5983_v35 = vld [vmem:[#allocation12 + $0xc0] sm:$0xff] }
 0x7cb   :  { %v11224_v40 = vpop.eup %11223 }
 0x7cc   :  { %v11226_v39 = vpop.eup %11225  ;;  %11231 = vrcp.f32 %v5204_v37  ;;  %v5213_v22 = vadd.f32 1.0, %v11224_v40  ;;  %v5984_v37 = vld [vmem:[#allocation12 + $0xc8] sm:$0xff] }
 0x7cd   :  { %v11228_v4 = vpop.eup %11227  ;;  %11233 = vtanh.f32 %v5216_v21  ;;  %v5987_v21 = vld [vmem:[#allocation12 + $0xe0] sm:$0xff] }
 0x7ce   :  { %11235 = vrcp.f32 %v5213_v22  ;;  %v5200_v25 = vmul.f32 %v11228_v4, %v11226_v39  ;;  %v11230_v62 = vpop.eup %11229  ;;  %v9998_v40 = vcombine.high %v5983_v35, %v5987_v21  ;;  %v5988_v39 = vld [vmem:[#allocation12 + $0xe8] sm:$0xff]  ;;  %v9997_v22 = vcombine.low %v5983_v35, %v5987_v21 }
 0x7cf   :  { %v5224_v1 = vadd.f32 1.0, %v11230_v62  ;;  %v9999_v4 = vcombine.low %v5984_v37, %v5988_v39  ;;  %v5979_v62 = vld [vmem:[#allocation12 + $0xa0] sm:$0xff]  ;;  %v6060_v35 = vld [vmem:[#allocation12 + $0x328] sm:$0xff] }
 0x7d0   :  { %v5234_v61 = vpack.c.bf16 %v5200_v25, %v5200_v25  ;;  %v10000_v25 = vcombine.high %v5984_v37, %v5988_v39  ;;  %v6047_v39 = vld [vmem:[#allocation12 + $0x2c0] sm:$0xff] }
 0x7d1   :  { %11237 = vrcp.f32 %v5224_v1 }
 0x7d2   :  { %5460 = vmatmul.mubr.bf16.vlgmr.msra.gmra.mxu0 %v5234_v61  ;;  %5501 = vmatmul.mubr.bf16.vlgmr.msra.gmra.mxu1 %v5234_v61  ;;  %v5975_v61 = vld [vmem:[#allocation12 + $0x80] sm:$0xff] }
 0x7d3   :  { %5703 = vmatpush1.bf16.msra.mxu0 %v12679_v7  ;;  %5744 = vmatpush1.bf16.msra.mxu1 %v12681_v33  ;;  %v9989_v1 = vcombine.low %v5975_v61, %v5979_v62 }
 0x7d4   :  { %5704 = vmatprep.subr.bf16.mxu0 %v12683_v10  ;;  %5745 = vmatprep.subr.bf16.mxu1 %v12685_v12  ;;  %v13324_v10 = vld [vmem:[#allocation34_spill] sm:$0xff] }
 0x7d5   :  { %5734 = vmatprep.mubr.bf16.mxu0 %v13292_v41  ;;  %5775 = vmatprep.mubr.bf16.mxu1 %v13292_v41 }
 0x7d7   :  { %5705 = vmatpush1.bf16.msra.mxu0 %v12689_v14  ;;  %5746 = vmatpush1.bf16.msra.mxu1 %v12691_v15 }
 0x7d8   :  { %5706 = vmatprep.subr.bf16.mxu0 %v12695_v16  ;;  %5747 = vmatprep.subr.bf16.mxu1 %v12697_v58  ;;  %v13325_v16 = vld [vmem:[#allocation35_spill] sm:$0xff]  ;;  %v13326_v58 = vld [vmem:[#allocation36_spill] sm:$0xff] }
 0x7d9   :  { %v11232_v7 = vpop.eup %11231 }
 0x7da   :  { %v11234_v63 = vpop.eup %11233 }
 0x7db   :  { %v11236_v33 = vpop.eup %11235  ;;  %5707 = vmatpush1.bf16.msra.mxu0 %v12703_v52  ;;  %5748 = vmatpush1.bf16.msra.mxu1 %v12705_v50  ;;  %v5228_v14 = vmul.f32 %v11234_v63, %v11232_v7  ;;  %v13327_v52 = vld [vmem:[#allocation37_spill] sm:$0xff]  ;;  %v13328_v50 = vld [vmem:[#allocation38_spill] sm:$0xff]  ;;  %v9990_v63 = vcombine.high %v5975_v61, %v5979_v62 }
 0x7dc   :  { %5708 = vmatprep.subr.bf16.mxu0 %v12709_v53  ;;  %5749 = vmatprep.subr.bf16.mxu1 %v13324_v10  ;;  %v5227_v12 = vmul.f32 %v11236_v33, %v12726_v32  ;;  %v13329_v53 = vld [vmem:[#allocation39_spill] sm:$0xff] }
 0x7dd   :  { %v5976_v7 = vld [vmem:[#allocation12 + $0x88] sm:$0xff] }
 0x7de   :  { %v12836_v15 = vadd.f32 %v5228_v14, %v5227_v12  ;;  %v5980_v33 = vld [vmem:[#allocation12 + $0xa8] sm:$0xff]  ;;  %v5967_v14 = vld [vmem:[#allocation12 + $0x40] sm:$0xff] }
 0x7df   :  { %5709 = vmatpush1.bf16.msra.mxu0 %v12715_v28  ;;  %5750 = vmatpush1.bf16.msra.mxu1 %v12717_v29  ;;  %v13330_v28 = vld [vmem:[#allocation40_spill] sm:$0xff]  ;;  %v13331_v29 = vld [vmem:[#allocation41_spill] sm:$0xff]  ;;  %v9991_v10 = vcombine.low %v5976_v7, %v5980_v33  ;;  %v9992_v12 = vcombine.high %v5976_v7, %v5980_v33  ;;  %v6052_v61 = vld [vmem:[#allocation12 + $0x2e8] sm:$0xff] }
 0x7e0   :  { %5710 = vmatprep.subr.bf16.mxu0 %v12721_v46  ;;  %5751 = vmatprep.subr.bf16.mxu1 %v12723_v30  ;;  %11239 = vtanh.f32 %v12836_v15  ;;  %v11238_v46 = vpop.eup %11237  ;;  %v6039_v33 = vld [vmem:[#allocation12 + $0x280] sm:$0xff] }
 0x7e3   :  { %5711 = vmatpush1.bf16.msra.mxu0 %v12730_v60  ;;  %5752 = vmatpush1.bf16.msra.mxu1 %v13325_v16  ;;  %v5971_v16 = vld [vmem:[#allocation12 + $0x60] sm:$0xff] }
 0x7e4   :  { %5712 = vmatprep.subr.bf16.mxu0 %v13326_v58  ;;  %5753 = vmatprep.subr.bf16.mxu1 %v13327_v52  ;;  %v5968_v58 = vld [vmem:[#allocation12 + $0x48] sm:$0xff]  ;;  %v9982_v52 = vcombine.high %v5967_v14, %v5971_v16 }
 0x7e7   :  { %5713 = vmatpush1.bf16.msra.mxu0 %v13328_v50  ;;  %5754 = vmatpush1.bf16.msra.mxu1 %v13329_v53  ;;  %v5972_v50 = vld [vmem:[#allocation12 + $0x68] sm:$0xff]  ;;  %v9981_v53 = vcombine.low %v5967_v14, %v5971_v16 }
 0x7e8   :  { %5714 = vmatprep.subr.bf16.mxu0 %v13330_v28  ;;  %5755 = vmatprep.subr.bf16.mxu1 %v13331_v29  ;;  %v9983_v28 = vcombine.low %v5968_v58, %v5972_v50  ;;  %v9984_v29 = vcombine.high %v5968_v58, %v5972_v50  ;;  %v6044_v14 = vld [vmem:[#allocation12 + $0x2a8] sm:$0xff]  ;;  %v6031_v50 = vld [vmem:[#allocation12 + $0x240] sm:$0xff] }
 0x7eb   :  { %5715 = vmatpush1.bf16.msra.mxu0 %v12755_v27  ;;  %5756 = vmatpush1.bf16.msra.mxu1 %v12757_v31  ;;  %v10030_v27 = vcombine.high %v6015_v2, %v6019_v3  ;;  %v10029_v31 = vcombine.low %v6015_v2, %v6019_v3  ;;  %v5964_v2 = vld [vmem:[#allocation12 + $0x28] sm:$0xff] }
 0x7ec   :  { %5716 = vmatprep.subr.bf16.mxu0 %v12761_v57  ;;  %5757 = vmatprep.subr.bf16.mxu1 %v12763_v51  ;;  %v6007_v51 = vld [vmem:[#allocation12 + $0x180] sm:$0xff] }
 0x7ed   :  { %v11240_v30 = vpop.eup %11239  ;;  %v6011_v57 = vld [vmem:[#allocation12 + $0x1a0] sm:$0xff] }
 0x7ee   :  { %v5231_v32 = vmul.f32 %v11240_v30, %v11238_v46  ;;  %v10021_v6 = vcombine.low %v6007_v51, %v6011_v57  ;;  %v5959_v46 = vld [vmem:[#allocation12] sm:$0xff] }
 0x7ef   :  { %5717 = vmatpush1.bf16.msra.mxu0 %v12767_v17  ;;  %5758 = vmatpush1.bf16.msra.mxu1 %v12769_v13  ;;  %v10022_v17 = vcombine.high %v6007_v51, %v6011_v57  ;;  %v6012_v13 = vld [vmem:[#allocation12 + $0x1a8] sm:$0xff]  ;;  %v5963_v30 = vld [vmem:[#allocation12 + $0x20] sm:$0xff] }
 0x7f0   :  { %v5509_v60 = vpack.c.bf16 %v5231_v32, %v5231_v32  ;;  %6769 = vmatprep.subr.bf16.mxu0 %v10030_v27  ;;  %6810 = vmatprep.subr.bf16.mxu1 %v10032_v24  ;;  %v10023_v42 = vcombine.low %v6008_v9, %v6012_v13  ;;  %v10024_v26 = vcombine.high %v6008_v9, %v6012_v13  ;;  %v5960_v32 = vld [vmem:[#allocation12 + $0x8] sm:$0xff]  ;;  %v6071_v13 = vld [vmem:[#allocation12 + $0x380] sm:$0xff] }
 0x7f1   :  { %v9973_v3 = vcombine.low %v5959_v46, %v5963_v30  ;;  %v9975_v18 = vcombine.low %v5960_v32, %v5964_v2  ;;  %v9976_v27 = vcombine.high %v5960_v32, %v5964_v2  ;;  %v6084_v51 = vld [vmem:[#allocation12 + $0x3e8] sm:$0xff]  ;;  %v6023_v2 = vld [vmem:[#allocation12 + $0x200] sm:$0xff] }
 0x7f2   :  { %5735 = vmatmul.mubr.bf16.vlgmr.msra.gmra.mxu0 %v5509_v60  ;;  %5776 = vmatmul.mubr.bf16.vlgmr.msra.gmra.mxu1 %v5509_v60  ;;  %v9974_v60 = vcombine.high %v5959_v46, %v5963_v30  ;;  %v6036_v46 = vld [vmem:[#allocation12 + $0x268] sm:$0xff] }
 0x7f3   :  { %6770 = vmatpush1.bf16.msra.mxu0 %v10029_v31  ;;  %6811 = vmatpush1.bf16.msra.mxu1 %v10031_v23  ;;  %v6083_v31 = vld [vmem:[#allocation12 + $0x3e0] sm:$0xff]  ;;  %v6080_v23 = vld [vmem:[#allocation12 + $0x3c8] sm:$0xff] }
 0x7f4   :  { %6771 = vmatprep.subr.bf16.mxu0 %v10022_v17  ;;  %6812 = vmatprep.subr.bf16.mxu1 %v10024_v26  ;;  %v10094_v24 = vcombine.high %v6079_v36, %v6083_v31  ;;  %v10093_v57 = vcombine.low %v6079_v36, %v6083_v31  ;;  %v10095_v9 = vcombine.low %v6080_v23, %v6084_v51  ;;  %v6028_v36 = vld [vmem:[#allocation12 + $0x228] sm:$0xff] }
 0x7f5   :  { %v10096_v17 = vcombine.high %v6080_v23, %v6084_v51  ;;  %v12857_v51 = vld [vmem:[#allocation12 + $0x1d0] sm:$0xff] }
 0x7f7   :  { %6772 = vmatpush1.bf16.msra.mxu0 %v10021_v6  ;;  %6813 = vmatpush1.bf16.msra.mxu1 %v10023_v42  ;;  %v6075_v6 = vld [vmem:[#allocation12 + $0x3a0] sm:$0xff]  ;;  %v6072_v42 = vld [vmem:[#allocation12 + $0x388] sm:$0xff] }
 0x7f8   :  { %6773 = vmatprep.subr.bf16.mxu0 %v10014_v55  ;;  %6814 = vmatprep.subr.bf16.mxu1 %v10016_v5  ;;  %v10086_v26 = vcombine.high %v6071_v13, %v6075_v6  ;;  %v10085_v54 = vcombine.low %v6071_v13, %v6075_v6  ;;  %v10087_v56 = vcombine.low %v6072_v42, %v6076_v48  ;;  %v12865_v13 = vld [vmem:[#allocation12 + $0x1f8] sm:$0xff] }
 0x7f9   :  { %v10088_v55 = vcombine.high %v6072_v42, %v6076_v48 }
 0x7fb   :  { %6774 = vmatpush1.bf16.msra.mxu0 %v10013_v11  ;;  %6815 = vmatpush1.bf16.msra.mxu1 %v10015_v34  ;;  %v6067_v11 = vld [vmem:[#allocation12 + $0x360] sm:$0xff]  ;;  %v6064_v34 = vld [vmem:[#allocation12 + $0x348] sm:$0xff] }
 0x7fc   :  { %6775 = vmatprep.subr.bf16.mxu0 %v10006_v45  ;;  %6816 = vmatprep.subr.bf16.mxu1 %v10008_v8  ;;  %v10078_v5 = vcombine.high %v6063_v0, %v6067_v11  ;;  %v10077_v43 = vcombine.low %v6063_v0, %v6067_v11  ;;  %v10079_v44 = vcombine.low %v6064_v34, %v6068_v38 }
 0x7fd   :  { %v10080_v45 = vcombine.high %v6064_v34, %v6068_v38 }
 0x7ff   :  { %6776 = vmatpush1.bf16.msra.mxu0 %v10005_v49  ;;  %6817 = vmatpush1.bf16.msra.mxu1 %v10007_v47  ;;  %v6059_v49 = vld [vmem:[#allocation12 + $0x320] sm:$0xff]  ;;  %v6056_v47 = vld [vmem:[#allocation12 + $0x308] sm:$0xff] }
 0x800   :  { %6777 = vmatprep.subr.bf16.mxu0 %v9998_v40  ;;  %6818 = vmatprep.subr.bf16.mxu1 %v10000_v25  ;;  %v10070_v8 = vcombine.high %v6055_v59, %v6059_v49  ;;  %v10069_v21 = vcombine.low %v6055_v59, %v6059_v49  ;;  %v10071_v37 = vcombine.low %v6056_v47, %v6060_v35 }
 0x801   :  { %v10072_v40 = vcombine.high %v6056_v47, %v6060_v35  ;;  %v5785_v47 = vld [vmem:[#allocation2 + $0x7] ss:$8 sm:$0xf] }
 0x803   :  { %6778 = vmatpush1.bf16.msra.mxu0 %v9997_v22  ;;  %6819 = vmatpush1.bf16.msra.mxu1 %v9999_v4  ;;  %v6051_v22 = vld [vmem:[#allocation12 + $0x2e0] sm:$0xff]  ;;  %v6048_v4 = vld [vmem:[#allocation12 + $0x2c8] sm:$0xff] }
 0x804   :  { %6779 = vmatprep.subr.bf16.mxu0 %v9990_v63  ;;  %6820 = vmatprep.subr.bf16.mxu1 %v9992_v12  ;;  %v10062_v25 = vcombine.high %v6047_v39, %v6051_v22  ;;  %v10061_v62 = vcombine.low %v6047_v39, %v6051_v22  ;;  %v10063_v7 = vcombine.low %v6048_v4, %v6052_v61 }
 0x805   :  { %v10064_v63 = vcombine.high %v6048_v4, %v6052_v61 }
 0x807   :  { %6780 = vmatpush1.bf16.msra.mxu0 %v9989_v1  ;;  %6821 = vmatpush1.bf16.msra.mxu1 %v9991_v10  ;;  %v6043_v1 = vld [vmem:[#allocation12 + $0x2a0] sm:$0xff]  ;;  %v6040_v10 = vld [vmem:[#allocation12 + $0x288] sm:$0xff] }
 0x808   :  { %6781 = vmatprep.subr.bf16.mxu0 %v9982_v52  ;;  %6822 = vmatprep.subr.bf16.mxu1 %v9984_v29  ;;  %v10054_v12 = vcombine.high %v6039_v33, %v6043_v1  ;;  %v10053_v16 = vcombine.low %v6039_v33, %v6043_v1  ;;  %v10055_v58 = vcombine.low %v6040_v10, %v6044_v14 }
 0x809   :  { %v10056_v52 = vcombine.high %v6040_v10, %v6044_v14 }
 0x80b   :  { %6782 = vmatpush1.bf16.msra.mxu0 %v9981_v53  ;;  %6823 = vmatpush1.bf16.msra.mxu1 %v9983_v28  ;;  %v6035_v53 = vld [vmem:[#allocation12 + $0x260] sm:$0xff]  ;;  %v6032_v28 = vld [vmem:[#allocation12 + $0x248] sm:$0xff] }
 0x80c   :  { %6783 = vmatprep.subr.bf16.mxu0 %v9974_v60  ;;  %6824 = vmatprep.subr.bf16.mxu1 %v9976_v27  ;;  %v10046_v29 = vcombine.high %v6031_v50, %v6035_v53  ;;  %v10045_v30 = vcombine.low %v6031_v50, %v6035_v53  ;;  %v10047_v32 = vcombine.low %v6032_v28, %v6036_v46 }
 0x80d   :  { %v10048_v60 = vcombine.high %v6032_v28, %v6036_v46  ;;  %v5817_v46 = vld [vmem:[#allocation2 + $0x20] ss:$8 sm:$0xf] }
 0x80f   :  { %6784 = vmatpush1.bf16.msra.mxu0 %v9973_v3  ;;  %6825 = vmatpush1.bf16.msra.mxu1 %v9975_v18  ;;  %v6027_v3 = vld [vmem:[#allocation12 + $0x220] sm:$0xff]  ;;  %v6024_v18 = vld [vmem:[#allocation12 + $0x208] sm:$0xff] }
 0x810   :  { %6785 = vmatprep.subr.bf16.mxu0 %v10094_v24  ;;  %6826 = vmatprep.subr.bf16.mxu1 %v10096_v17  ;;  %v10038_v27 = vcombine.high %v6023_v2, %v6027_v3  ;;  %v10037_v31 = vcombine.low %v6023_v2, %v6027_v3  ;;  %v10039_v23 = vcombine.low %v6024_v18, %v6028_v36 }
 0x811   :  { %v10040_v24 = vcombine.high %v6024_v18, %v6028_v36 }
 0x813   :  { %6786 = vmatpush2.bf16.msra.mxu0 %v10093_v57  ;;  %6827 = vmatpush2.bf16.msra.mxu1 %v10095_v9  ;;  %v12859_v57 = vld [vmem:[#allocation12 + $0x1f0] sm:$0xff]  ;;  %v12861_v9 = vld [vmem:[#allocation12 + $0x1d8] sm:$0xff] }
 0x814   :  { %6787 = vmatprep.subr.bf16.mxu0 %v10086_v26  ;;  %6828 = vmatprep.subr.bf16.mxu1 %v10088_v55  ;;  %v10034_v17 = vcombine.high %v12857_v51, %v12859_v57  ;;  %v10033_v6 = vcombine.low %v12857_v51, %v12859_v57  ;;  %v10035_v42 = vcombine.low %v12861_v9, %v12865_v13 }
 0x815   :  { %v10036_v26 = vcombine.high %v12861_v9, %v12865_v13 }
 0x817   :  { %6788 = vmatpush2.bf16.msra.mxu0 %v10085_v54  ;;  %6829 = vmatpush2.bf16.msra.mxu1 %v10087_v56 }
 0x818   :  { %6789 = vmatprep.subr.bf16.mxu0 %v10078_v5  ;;  %6830 = vmatprep.subr.bf16.mxu1 %v10080_v45 }
 0x81b   :  { %6790 = vmatpush2.bf16.msra.mxu0 %v10077_v43  ;;  %6831 = vmatpush2.bf16.msra.mxu1 %v10079_v44 }
 0x81c   :  { %6791 = vmatprep.subr.bf16.mxu0 %v10070_v8  ;;  %6832 = vmatprep.subr.bf16.mxu1 %v10072_v40 }
 0x81f   :  { %6792 = vmatpush2.bf16.msra.mxu0 %v10069_v21  ;;  %6833 = vmatpush2.bf16.msra.mxu1 %v10071_v37 }
 0x820   :  { %6793 = vmatprep.subr.bf16.mxu0 %v10062_v25  ;;  %6834 = vmatprep.subr.bf16.mxu1 %v10064_v63 }
 0x823   :  { %6794 = vmatpush2.bf16.msra.mxu0 %v10061_v62  ;;  %6835 = vmatpush2.bf16.msra.mxu1 %v10063_v7 }
 0x824   :  { %6795 = vmatprep.subr.bf16.mxu0 %v10054_v12  ;;  %6836 = vmatprep.subr.bf16.mxu1 %v10056_v52 }
 0x827   :  { %6796 = vmatpush2.bf16.msra.mxu0 %v10053_v16  ;;  %6837 = vmatpush2.bf16.msra.mxu1 %v10055_v58 }
 0x828   :  { %6797 = vmatprep.subr.bf16.mxu0 %v10046_v29  ;;  %6838 = vmatprep.subr.bf16.mxu1 %v10048_v60 }
 0x82b   :  { %6798 = vmatpush2.bf16.msra.mxu0 %v10045_v30  ;;  %6839 = vmatpush2.bf16.msra.mxu1 %v10047_v32 }
 0x82c   :  { %6799 = vmatprep.subr.bf16.mxu0 %v10038_v27  ;;  %6840 = vmatprep.subr.bf16.mxu1 %v10040_v24 }
 0x82f   :  { %6800 = vmatpush2.bf16.msra.mxu0 %v10037_v31  ;;  %6841 = vmatpush2.bf16.msra.mxu1 %v10039_v23 }
 0x830   :  { %6851 = vmatprep.subr.bf16.mxu0 %v10034_v17  ;;  %6892 = vmatprep.subr.bf16.mxu1 %v10036_v26 }
 0x892   :  { %v5461_v48 = vpop.f32.mrf.mxu0  ;;  %v5502_v54 = vpop.f32.mrf.mxu1 }
 0x894   :  { %v5463_v56 = vpop.f32.mrf.mxu0  ;;  %v5504_v55 = vpop.f32.mrf.mxu1 }
 0x895   :  { %v5790_v0 = vcombine.low %v5461_v48, %v5463_v56  ;;  %v5791_v11 = vcombine.low %v5502_v54, %v5504_v55 }
 0x896   :  { %v5465_v34 = vpop.f32.mrf.mxu0  ;;  %v5506_v5 = vpop.f32.mrf.mxu1 }
 0x897   :  { %v5798_v38 = vrot.slane %v5790_v0, %v11965_v20  ;;  %v5805_v43 = vrot.slane %v5791_v11, %v11965_v20 }
 0x898   :  { %v5466_v44 = vpop.f32.mrf.mxu0  ;;  %v5507_v45 = vpop.f32.mrf.mxu1 }
 0x899   :  { %v5806_v59 = vcombine.low %v5798_v38, %v5805_v43  ;;  %v5913_v38 = vld [vmem:[#allocation3 + $0x2] ss:$8 sm:$0x3]  ;;  %v5915_v43 = vld [vmem:[#allocation3 + $0x5] ss:$8 sm:$0x3] }
 0x89a   :  { %v13332_v44 = vld [vmem:[#allocation33_spill] sm:$0xff] }
 0x89b   :  { %v5813_v49 = vrot.slane %v5806_v59, %v11965_v20  ;;  %v5926_v45 = vrot.slane %v5913_v38, %v13332_v44  ;;  %v13333_v59 = vld [vmem:[#allocation32_spill] sm:$0xff] }
 0x89d   :  { %v5815_v8 = vadd.f32 %v5813_v49, %v5785_v47  ;;  %v5922_v49 = vrot.slane %v5913_v38, %v13333_v59 }
 0x89f   :  { %v9967_v35 = vmul.f32 -1.442695, %v5815_v8  ;;  %v5855_v21 = vrot.slane %v5815_v8, 1  ;;  %v5866_v40 = vrot.slane %v5815_v8, 3  ;;  %v5863_v4 = vrot.slane %v5815_v8, 2 }
 0x8a0   :  { %v5937_v8 = vrot.slane %v5915_v43, %v13332_v44 }
 0x8a1   :  { %11241 = vpow2.f32 %v9967_v35  ;;  %v9968_v37 = vmul.f32 -1.442695, %v5855_v21  ;;  %v9969_v39 = vmul.f32 -1.442695, %v5866_v40  ;;  %v5933_v35 = vrot.slane %v5915_v43, %v13333_v59 }
 0x8a3   :  { %11243 = vpow2.f32 %v9968_v37 }
 0x8a4   :  { %11245 = vpow2.f32 %v9969_v39 }
 0x8ae   :  { %v11242_v22 = vpop.eup %11241 }
 0x8af   :  { %v5851_v25 = vadd.f32 1.0, %v11242_v22  ;;  %v5953_v22 = vsel %vm5951_vm1, %v5926_v45, %v5937_v8  ;;  %v5969_v45 = vld [vmem:[#allocation12 + $0x50] sm:$0xff]  ;;  %v5970_v8 = vld [vmem:[#allocation12 + $0x58] sm:$0xff] }
 0x8b0   :  { %v11244_v61 = vpop.eup %11243 }
 0x8b1   :  { %11247 = vrcp.f32 %v5851_v25  ;;  %v5860_v62 = vadd.f32 1.0, %v11244_v61  ;;  %v11246_v30 = vpop.eup %11245  ;;  %v6009_v25 = vld [vmem:[#allocation12 + $0x190] sm:$0xff] }
 0x8b2   :  { %11249 = vtanh.f32 %v5863_v4  ;;  %v5736_v7 = vpop.f32.mrf.mxu0  ;;  %v5777_v63 = vpop.f32.mrf.mxu1  ;;  %v5871_v36 = vadd.f32 1.0, %v11246_v30  ;;  %v5952_v4 = vsel %vm5951_vm1, %v5922_v49, %v5933_v35  ;;  %v6006_v30 = vld [vmem:[#allocation12 + $0x178] sm:$0xff] }
 0x8b3   :  { %11251 = vrcp.f32 %v5860_v62  ;;  %v5974_v35 = vld [vmem:[#allocation12 + $0x78] sm:$0xff] }
 0x8b4   :  { %v5738_v33 = vpop.f32.mrf.mxu0  ;;  %v5779_v1 = vpop.f32.mrf.mxu1 }
 0x8b5   :  { %v5822_v10 = vcombine.low %v5736_v7, %v5738_v33  ;;  %v5823_v12 = vcombine.low %v5777_v63, %v5779_v1  ;;  %v6013_v63 = vld [vmem:[#allocation12 + $0x1b0] sm:$0xff]  ;;  %v6010_v33 = vld [vmem:[#allocation12 + $0x198] sm:$0xff] }
 0x8b6   :  { %v5740_v14 = vpop.f32.mrf.mxu0  ;;  %v5781_v16 = vpop.f32.mrf.mxu1  ;;  %v6014_v1 = vld [vmem:[#allocation12 + $0x1b8] sm:$0xff] }
 0x8b7   :  { %v5830_v58 = vrot.slane %v5822_v10, %v11965_v20  ;;  %v5837_v52 = vrot.slane %v5823_v12, %v11965_v20 }
 0x8b8   :  { %v5741_v50 = vpop.f32.mrf.mxu0  ;;  %v5782_v53 = vpop.f32.mrf.mxu1 }
 0x8b9   :  { %v5838_v28 = vcombine.low %v5830_v58, %v5837_v52  ;;  %v6001_v50 = vld [vmem:[#allocation12 + $0x150] sm:$0xff]  ;;  %v10026_v53 = vcombine.high %v6009_v25, %v6013_v63 }
 0x8bb   :  { %v5845_v29 = vrot.slane %v5838_v28, %v11965_v20  ;;  %v10028_v28 = vcombine.high %v6010_v33, %v6014_v1 }
 0x8bd   :  { %v5847_v32 = vadd.f32 %v5845_v29, %v5817_v46  ;;  %v6005_v29 = vld [vmem:[#allocation12 + $0x170] sm:$0xff]  ;;  %v6002_v46 = vld [vmem:[#allocation12 + $0x158] sm:$0xff] }
 0x8be   :  { %v11248_v60 = vpop.eup %11247  ;;  %v10017_v51 = vcombine.low %v6001_v50, %v6005_v29  ;;  %v10019_v57 = vcombine.low %v6002_v46, %v6006_v30 }
 0x8bf   :  { %v11250_v2 = vpop.eup %11249  ;;  %v9970_v3 = vmul.f32 -1.442695, %v5847_v32  ;;  %v5886_v18 = vrot.slane %v5847_v32, 1  ;;  %v5897_v26 = vrot.slane %v5847_v32, 3  ;;  %v5894_v56 = vrot.slane %v5847_v32, 2 }
 0x8c0   :  { %v11252_v27 = vpop.eup %11251  ;;  %v5875_v23 = vmul.f32 %v11250_v2, %v11248_v60  ;;  %v10027_v60 = vcombine.low %v6010_v33, %v6014_v1  ;;  %v10018_v2 = vcombine.high %v6001_v50, %v6005_v29  ;;  %v6081_v1 = vld [vmem:[#allocation12 + $0x3d0] sm:$0xff] }
 0x8c1   :  { %v5874_v31 = vmul.f32 %v11252_v27, %v12818_v19  ;;  %11253 = vpow2.f32 %v9970_v3  ;;  %v9971_v24 = vmul.f32 -1.442695, %v5886_v18  ;;  %v9972_v48 = vmul.f32 -1.442695, %v5897_v26  ;;  %v5993_v18 = vld [vmem:[#allocation12 + $0x110] sm:$0xff] }
 0x8c2   :  { %v10020_v3 = vcombine.high %v6002_v46, %v6006_v30  ;;  %v5997_v27 = vld [vmem:[#allocation12 + $0x130] sm:$0xff]  ;;  %v6074_v46 = vld [vmem:[#allocation12 + $0x398] sm:$0xff] }
 0x8c3   :  { %v5876_v17 = vadd.f32 %v5875_v23, %v5874_v31  ;;  %11255 = vpow2.f32 %v9971_v24  ;;  %v5998_v31 = vld [vmem:[#allocation12 + $0x138] sm:$0xff]  ;;  %v10010_v9 = vcombine.high %v5993_v18, %v5997_v27  ;;  %v6077_v29 = vld [vmem:[#allocation12 + $0x3b0] sm:$0xff] }
 0x8c4   :  { %11257 = vrcp.f32 %v5871_v36  ;;  %v5994_v36 = vld [vmem:[#allocation12 + $0x118] sm:$0xff] }
 0x8c5   :  { %11259 = vtanh.f32 %v5876_v17  ;;  %v10012_v13 = vcombine.high %v5994_v36, %v5998_v31  ;;  %v5986_v23 = vld [vmem:[#allocation12 + $0xd8] sm:$0xff]  ;;  %v10009_v17 = vcombine.low %v5993_v18, %v5997_v27  ;;  %v10011_v26 = vcombine.low %v5994_v36, %v5998_v31  ;;  %v6069_v18 = vld [vmem:[#allocation12 + $0x370] sm:$0xff] }
 0x8c6   :  { %11261 = vpow2.f32 %v9972_v48  ;;  %v5990_v24 = vld [vmem:[#allocation12 + $0xf8] sm:$0xff] }
 0x8c7   :  { %v6078_v30 = vld [vmem:[#allocation12 + $0x3b8] sm:$0xff] }
 0x8c8   :  { %v6066_v27 = vld [vmem:[#allocation12 + $0x358] sm:$0xff] }
 0x8c9   :  { %v6070_v36 = vld [vmem:[#allocation12 + $0x378] sm:$0xff] }
 0x8ce   :  { %v11254_v54 = vpop.eup %11253 }
 0x8cf   :  { %v5882_v55 = vadd.f32 1.0, %v11254_v54  ;;  %v10004_v54 = vcombine.high %v5986_v23, %v5990_v24 }
 0x8d0   :  { %v11256_v0 = vpop.eup %11255 }
 0x8d1   :  { %v11258_v11 = vpop.eup %11257  ;;  %11263 = vrcp.f32 %v5882_v55  ;;  %v5891_v34 = vadd.f32 1.0, %v11256_v0  ;;  %v5981_v55 = vld [vmem:[#allocation12 + $0xb0] sm:$0xff]  ;;  %v5978_v0 = vld [vmem:[#allocation12 + $0x98] sm:$0xff] }
 0x8d2   :  { %v11260_v5 = vpop.eup %11259  ;;  %11265 = vtanh.f32 %v5894_v56  ;;  %v5977_v56 = vld [vmem:[#allocation12 + $0x90] sm:$0xff] }
 0x8d3   :  { %v5878_v19 = vmul.f32 %v11260_v5, %v11258_v11  ;;  %11267 = vrcp.f32 %v5891_v34  ;;  %v11262_v21 = vpop.eup %11261  ;;  %v5982_v11 = vld [vmem:[#allocation12 + $0xb8] sm:$0xff]  ;;  %v10003_v5 = vcombine.low %v5986_v23, %v5990_v24  ;;  %v9994_v38 = vcombine.high %v5977_v56, %v5981_v55 }
 0x8d4   :  { %v5902_v12 = vadd.f32 1.0, %v11262_v21  ;;  %v9996_v43 = vcombine.high %v5978_v0, %v5982_v11  ;;  %v9993_v21 = vcombine.low %v5977_v56, %v5981_v55  ;;  %v6062_v23 = vld [vmem:[#allocation12 + $0x338] sm:$0xff]  ;;  %v6053_v56 = vld [vmem:[#allocation12 + $0x2f0] sm:$0xff] }
 0x8d5   :  { %5910 = vst [vmem:[#allocation3 + $0x7] sm:$0x1] %v5878_v19  ;;  %v6050_v55 = vld [vmem:[#allocation12 + $0x2d8] sm:$0xff] }
 0x8d6   :  { %11269 = vrcp.f32 %v5902_v12  ;;  %v6082_v12 = vld [vmem:[#allocation12 + $0x3d8] sm:$0xff] }
 0x8dc   :  { %v5917_v47 = vld [vmem:[#allocation3 + $0x7] ss:$8 sm:$0x3] }
 0x8dd   :  { %v5948_v37 = vrot.slane %v5917_v47, %v13332_v44  ;;  %v5944_v40 = vrot.slane %v5917_v47, %v13333_v59  ;;  %v5973_v47 = vld [vmem:[#allocation12 + $0x70] sm:$0xff] }
 0x8de   :  { %v11264_v39 = vpop.eup %11263 }
 0x8df   :  { %v11266_v61 = vpop.eup %11265  ;;  %v5956_v62 = vsel %vm5954_vm2, %v5953_v22, %v5948_v37  ;;  %v5955_v7 = vsel %vm5954_vm2, %v5952_v4, %v5944_v40  ;;  %v9995_v37 = vcombine.low %v5978_v0, %v5982_v11  ;;  %v9986_v40 = vcombine.high %v5969_v45, %v5973_v47  ;;  %v5961_v22 = vld [vmem:[#allocation12 + $0x10] sm:$0xff]  ;;  %v6054_v0 = vld [vmem:[#allocation12 + $0x2f8] sm:$0xff] }
 0x8e0   :  { %v11268_v10 = vpop.eup %11267  ;;  %v5958_v14 = vpack.c.bf16 %v5956_v62, %v5956_v62  ;;  %v12888_v16 = vpack.c.bf16 %v5955_v7, %v5955_v7  ;;  %v5906_v52 = vmul.f32 %v11266_v61, %v11264_v39  ;;  %v9988_v39 = vcombine.high %v5970_v8, %v5974_v35  ;;  %v5965_v4 = vld [vmem:[#allocation12 + $0x30] sm:$0xff]  ;;  %v5966_v61 = vld [vmem:[#allocation12 + $0x38] sm:$0xff] }
 0x8e1   :  { %v5905_v58 = vmul.f32 %v11268_v10, %v12836_v15  ;;  %v10025_v15 = vcombine.low %v6009_v25, %v6013_v63  ;;  %v5962_v25 = vld [vmem:[#allocation12 + $0x18] sm:$0xff]  ;;  %v9985_v62 = vcombine.low %v5969_v45, %v5973_v47  ;;  %v9987_v7 = vcombine.low %v5970_v8, %v5974_v35  ;;  %v6085_v10 = vld [vmem:[#allocation12 + $0x3f0] sm:$0xff] }
 0x8e2   :  { %6801 = vmatprep.mubr.bf16.mxu0 %v5958_v14  ;;  %6842 = vmatprep.mubr.bf16.mxu1 %v5958_v14  ;;  %v9978_v63 = vcombine.high %v5961_v22, %v5965_v4  ;;  %v9980_v33 = vcombine.high %v5962_v25, %v5966_v61  ;;  %v10098_v50 = vcombine.high %v6081_v1, %v6085_v10  ;;  %v6042_v45 = vld [vmem:[#allocation12 + $0x298] sm:$0xff] }
 0x8e3   :  { %v5907_v32 = vadd.f32 %v5906_v52, %v5905_v58  ;;  %6802 = vmatmul.mubr.bf16.vlgmr.msra.gmra.mxu0 %v12888_v16  ;;  %6843 = vmatmul.mubr.bf16.vlgmr.msra.gmra.mxu1 %v12888_v16  ;;  %v11270_v19 = vpop.eup %11269  ;;  %v9977_v58 = vcombine.low %v5961_v22, %v5965_v4  ;;  %v9979_v52 = vcombine.low %v5962_v25, %v5966_v61  ;;  %v6038_v22 = vld [vmem:[#allocation12 + $0x278] sm:$0xff] }
 0x8e4   :  { %6852 = vmatpush1.bf16.msra.mxu0 %v10033_v6  ;;  %6893 = vmatpush1.bf16.msra.mxu1 %v10035_v42  ;;  %v5985_v6 = vld [vmem:[#allocation12 + $0xd0] sm:$0xff]  ;;  %v10068_v19 = vcombine.high %v6050_v55, %v6054_v0  ;;  %v10067_v8 = vcombine.low %v6050_v55, %v6054_v0  ;;  %v12985_v55 = vld [vmem:[#allocation15 + $0x4] ss:$16 sps:$4 sm:$0xff]  }
 0x8e5   :  { %11271 = vtanh.f32 %v5907_v32  ;;  %6883 = vmatprep.mubr.bf16.mxu0 %v5958_v14  ;;  %6924 = vmatprep.mubr.bf16.mxu1 %v5958_v14  ;;  %v5989_v42 = vld [vmem:[#allocation12 + $0xf0] sm:$0xff]  ;;  %v6086_v14 = vld [vmem:[#allocation12 + $0x3f8] sm:$0xff]  ;;  %v10097_v32 = vcombine.low %v6081_v1, %v6085_v10 }
 0x8e6   :  { %6853 = vmatprep.subr.bf16.mxu0 %v10026_v53  ;;  %6894 = vmatprep.subr.bf16.mxu1 %v10028_v28  ;;  %v10002_v48 = vcombine.high %v5985_v6, %v5989_v42  ;;  %v10001_v34 = vcombine.low %v5985_v6, %v5989_v42  ;;  %v10100_v53 = vcombine.high %v6082_v12, %v6086_v14  ;;  %v6073_v28 = vld [vmem:[#allocation12 + $0x390] sm:$0xff]  ;;  %v6058_v42 = vld [vmem:[#allocation12 + $0x318] sm:$0xff] }
 0x8e7   :  { %v10089_v31 = vcombine.low %v6073_v28, %v6077_v29  ;;  %v6061_v6 = vld [vmem:[#allocation12 + $0x330] sm:$0xff]  ;;  %v6030_v1 = vld [vmem:[#allocation12 + $0x238] sm:$0xff] }
 0x8e8   :  { %6854 = vmatpush1.bf16.msra.mxu0 %v10025_v15  ;;  %6895 = vmatpush1.bf16.msra.mxu1 %v10027_v60  ;;  %v10099_v15 = vcombine.low %v6082_v12, %v6086_v14  ;;  %v10090_v60 = vcombine.high %v6073_v28, %v6077_v29  ;;  %v12901_v28 = vld [vmem:[#allocation15 + $0xec] ss:$16 sps:$4 sm:$0xff]   ;;  %v12903_v29 = vld [vmem:[#allocation15 + $0xe0] ss:$16 sps:$4 sm:$0xff]  }
 0x8e9   :  { %6855 = vmatprep.subr.bf16.mxu0 %v10018_v2  ;;  %6896 = vmatprep.subr.bf16.mxu1 %v10020_v3  ;;  %v10092_v2 = vcombine.high %v6074_v46, %v6078_v30  ;;  %v6065_v3 = vld [vmem:[#allocation12 + $0x350] sm:$0xff] }
 0x8ea   :  { %v10081_v24 = vcombine.low %v6065_v3, %v6069_v18  ;;  %v12987_v0 = vld [vmem:[#allocation15 + $0xc] ss:$16 sps:$4 sm:$0xff]  }
 0x8ec   :  { %6856 = vmatpush1.bf16.msra.mxu0 %v10017_v51  ;;  %6897 = vmatpush1.bf16.msra.mxu1 %v10019_v57  ;;  %v10091_v51 = vcombine.low %v6074_v46, %v6078_v30  ;;  %v10082_v57 = vcombine.high %v6065_v3, %v6069_v18  ;;  %v12905_v46 = vld [vmem:[#allocation15 + $0xe8] ss:$16 sps:$4 sm:$0xff]   ;;  %v12909_v30 = vld [vmem:[#allocation15 + $0xc4] ss:$16 sps:$4 sm:$0xff]   ;;  %v12925_v3 = vld [vmem:[#allocation15 + $0xac] ss:$16 sps:$4 sm:$0xff]  }
 0x8ed   :  { %6857 = vmatprep.subr.bf16.mxu0 %v10010_v9  ;;  %6898 = vmatprep.subr.bf16.mxu1 %v10012_v13  ;;  %v10084_v9 = vcombine.high %v6066_v27, %v6070_v36  ;;  %v6057_v13 = vld [vmem:[#allocation12 + $0x310] sm:$0xff] }
 0x8ee   :  { %v10073_v11 = vcombine.low %v6057_v13, %v6061_v6  ;;  %v12933_v18 = vld [vmem:[#allocation15 + $0xa8] ss:$16 sps:$4 sm:$0xff]  }
 0x8f0   :  { %6858 = vmatpush1.bf16.msra.mxu0 %v10009_v17  ;;  %6899 = vmatpush1.bf16.msra.mxu1 %v10011_v26  ;;  %v10083_v17 = vcombine.low %v6066_v27, %v6070_v36  ;;  %v10074_v26 = vcombine.high %v6057_v13, %v6061_v6  ;;  %v12937_v27 = vld [vmem:[#allocation15 + $0x84] ss:$16 sps:$4 sm:$0xff]   ;;  %v12939_v36 = vld [vmem:[#allocation15 + $0x8c] ss:$16 sps:$4 sm:$0xff]   ;;  %v12955_v13 = vld [vmem:[#allocation15 + $0x60] ss:$16 sps:$4 sm:$0xff]  }
 0x8f1   :  { %6859 = vmatprep.subr.bf16.mxu0 %v10002_v48  ;;  %6900 = vmatprep.subr.bf16.mxu1 %v10004_v54  ;;  %v10076_v48 = vcombine.high %v6058_v42, %v6062_v23  ;;  %v6049_v54 = vld [vmem:[#allocation12 + $0x2d0] sm:$0xff] }
 0x8f2   :  { %v11272_v49 = vpop.eup %11271  ;;  %v10065_v47 = vcombine.low %v6049_v54, %v6053_v56  ;;  %v12957_v6 = vld [vmem:[#allocation15 + $0x68] ss:$16 sps:$4 sm:$0xff]  }
 0x8f3   :  { %v6046_v49 = vld [vmem:[#allocation12 + $0x2b8] sm:$0xff] }
 0x8f4   :  { %6860 = vmatpush1.bf16.msra.mxu0 %v10001_v34  ;;  %6901 = vmatpush1.bf16.msra.mxu1 %v10003_v5  ;;  %v10075_v34 = vcombine.low %v6058_v42, %v6062_v23  ;;  %v10066_v5 = vcombine.high %v6049_v54, %v6053_v56  ;;  %v10059_v25 = vcombine.low %v6042_v45, %v6046_v49  ;;  %v12961_v42 = vld [vmem:[#allocation15 + $0x44] ss:$16 sps:$4 sm:$0xff]   ;;  %v12963_v23 = vld [vmem:[#allocation15 + $0x4c] ss:$16 sps:$4 sm:$0xff]   ;;  %v12979_v54 = vld [vmem:[#allocation15 + $0x20] ss:$16 sps:$4 sm:$0xff]  }
 0x8f5   :  { %6861 = vmatprep.subr.bf16.mxu0 %v9994_v38  ;;  %6902 = vmatprep.subr.bf16.mxu1 %v9996_v43  ;;  %v6041_v38 = vld [vmem:[#allocation12 + $0x290] sm:$0xff] }
 0x8f6   :  { %v6045_v43 = vld [vmem:[#allocation12 + $0x2b0] sm:$0xff] }
 0x8f7   :  { %v10058_v35 = vcombine.high %v6041_v38, %v6045_v43  ;;  %v10057_v4 = vcombine.low %v6041_v38, %v6045_v43  ;;  %v12981_v56 = vld [vmem:[#allocation15 + $0x28] ss:$16 sps:$4 sm:$0xff]   ;;  %v13003_v38 = vld [vmem:[#allocation17 + $0xe0] ss:$16 sps:$4 sm:$0xff]  }
 0x8f8   :  { %6862 = vmatpush1.bf16.msra.mxu0 %v9993_v21  ;;  %6903 = vmatpush1.bf16.msra.mxu1 %v9995_v37  ;;  %v10060_v21 = vcombine.high %v6042_v45, %v6046_v49  ;;  %v6033_v37 = vld [vmem:[#allocation12 + $0x250] sm:$0xff]  ;;  %v13009_v45 = vld [vmem:[#allocation17 + $0xc4] ss:$16 sps:$4 sm:$0xff]  }
 0x8f9   :  { %6863 = vmatprep.subr.bf16.mxu0 %v9986_v40  ;;  %6904 = vmatprep.subr.bf16.mxu1 %v9988_v39  ;;  %v6037_v40 = vld [vmem:[#allocation12 + $0x270] sm:$0xff]  ;;  %v6034_v39 = vld [vmem:[#allocation12 + $0x258] sm:$0xff] }
 0x8fa   :  { %v10050_v61 = vcombine.high %v6033_v37, %v6037_v40  ;;  %v10049_v10 = vcombine.low %v6033_v37, %v6037_v40  ;;  %v10051_v12 = vcombine.low %v6034_v39, %v6038_v22  ;;  %v13005_v43 = vld [vmem:[#allocation17 + $0xe8] ss:$16 sps:$4 sm:$0xff]   ;;  %v13011_v49 = vld [vmem:[#allocation17 + $0xcc] ss:$16 sps:$4 sm:$0xff]   ;;  %v13031_v37 = vld [vmem:[#allocation17 + $0xa0] ss:$16 sps:$4 sm:$0xff]  }
 0x8fb   :  { %v13033_v40 = vld [vmem:[#allocation17 + $0xa8] ss:$16 sps:$4 sm:$0xff]  }
 0x8fc   :  { %6864 = vmatpush1.bf16.msra.mxu0 %v9985_v62  ;;  %6905 = vmatpush1.bf16.msra.mxu1 %v9987_v7  ;;  %v10052_v62 = vcombine.high %v6034_v39, %v6038_v22  ;;  %v6025_v7 = vld [vmem:[#allocation12 + $0x210] sm:$0xff]  ;;  %v13037_v39 = vld [vmem:[#allocation17 + $0x84] ss:$16 sps:$4 sm:$0xff]  }
 0x8fd   :  { %6865 = vmatprep.subr.bf16.mxu0 %v9978_v63  ;;  %6906 = vmatprep.subr.bf16.mxu1 %v9980_v33  ;;  %v6029_v63 = vld [vmem:[#allocation12 + $0x230] sm:$0xff]  ;;  %v6026_v33 = vld [vmem:[#allocation12 + $0x218] sm:$0xff] }
 0x8fe   :  { %v10042_v14 = vcombine.high %v6025_v7, %v6029_v63  ;;  %v13039_v22 = vld [vmem:[#allocation17 + $0x8c] ss:$16 sps:$4 sm:$0xff]  }
 0x900   :  { %6866 = vmatpush1.bf16.msra.mxu0 %v9977_v58  ;;  %6907 = vmatpush1.bf16.msra.mxu1 %v9979_v52  ;;  %v10044_v58 = vcombine.high %v6026_v33, %v6030_v1  ;;  %v10041_v52 = vcombine.low %v6025_v7, %v6029_v63  ;;  %v13055_v7 = vld [vmem:[#allocation17 + $0x60] ss:$16 sps:$4 sm:$0xff]   ;;  %v13057_v63 = vld [vmem:[#allocation17 + $0x68] ss:$16 sps:$4 sm:$0xff]  }
 0x901   :  { %6867 = vmatprep.subr.bf16.mxu0 %v10098_v50  ;;  %6908 = vmatprep.subr.bf16.mxu1 %v10100_v53  ;;  %v10043_v50 = vcombine.low %v6026_v33, %v6030_v1  ;;  %v12899_v53 = vld [vmem:[#allocation15 + $0xe4] ss:$16 sps:$4 sm:$0xff]   ;;  %13334 = vst [vmem:[#allocation34_spill] sm:$0xff] %v13057_v63  ;;  %v13063_v1 = vld [vmem:[#allocation17 + $0x4c] ss:$16 sps:$4 sm:$0xff]  }
 0x902   :  { %v13061_v33 = vld [vmem:[#allocation17 + $0x44] ss:$16 sps:$4 sm:$0xff]   ;;  %13336 = vst [vmem:[#allocation36_spill] sm:$0xff] %v13063_v1 }
 0x903   :  { %13335 = vst [vmem:[#allocation35_spill] sm:$0xff] %v13061_v33 }
 0x904   :  { %6868 = vmatpush2.bf16.msra.mxu0 %v10097_v32  ;;  %6909 = vmatpush2.bf16.msra.mxu1 %v10099_v15  ;;  %v12911_v32 = vld [vmem:[#allocation15 + $0xcc] ss:$16 sps:$4 sm:$0xff]   ;;  %v12917_v15 = vld [vmem:[#allocation15 + $0xc0] ss:$16 sps:$4 sm:$0xff]  }
 0x905   :  { %6869 = vmatprep.subr.bf16.mxu0 %v10090_v60  ;;  %6910 = vmatprep.subr.bf16.mxu1 %v10092_v2  ;;  %v12919_v60 = vld [vmem:[#allocation15 + $0xc8] ss:$16 sps:$4 sm:$0xff]   ;;  %v12923_v2 = vld [vmem:[#allocation15 + $0xa4] ss:$16 sps:$4 sm:$0xff]  }
 0x908   :  { %6870 = vmatpush2.bf16.msra.mxu0 %v10089_v31  ;;  %6911 = vmatpush2.bf16.msra.mxu1 %v10091_v51  ;;  %v12943_v31 = vld [vmem:[#allocation15 + $0x80] ss:$16 sps:$4 sm:$0xff]   ;;  %v12945_v51 = vld [vmem:[#allocation15 + $0x88] ss:$16 sps:$4 sm:$0xff]  }
 0x909   :  { %6871 = vmatprep.subr.bf16.mxu0 %v10082_v57  ;;  %6912 = vmatprep.subr.bf16.mxu1 %v10084_v9  ;;  %v12949_v57 = vld [vmem:[#allocation15 + $0x64] ss:$16 sps:$4 sm:$0xff]   ;;  %v12951_v9 = vld [vmem:[#allocation15 + $0x6c] ss:$16 sps:$4 sm:$0xff]  }
 0x90c   :  { %6872 = vmatpush2.bf16.msra.mxu0 %v10081_v24  ;;  %6913 = vmatpush2.bf16.msra.mxu1 %v10083_v17  ;;  %v12967_v24 = vld [vmem:[#allocation15 + $0x40] ss:$16 sps:$4 sm:$0xff]   ;;  %v12969_v17 = vld [vmem:[#allocation15 + $0x48] ss:$16 sps:$4 sm:$0xff]  }
 0x90d   :  { %6873 = vmatprep.subr.bf16.mxu0 %v10074_v26  ;;  %6914 = vmatprep.subr.bf16.mxu1 %v10076_v48  ;;  %v12973_v26 = vld [vmem:[#allocation15 + $0x24] ss:$16 sps:$4 sm:$0xff]   ;;  %v12975_v48 = vld [vmem:[#allocation15 + $0x2c] ss:$16 sps:$4 sm:$0xff]  }
 0x910   :  { %6874 = vmatpush2.bf16.msra.mxu0 %v10073_v11  ;;  %6915 = vmatpush2.bf16.msra.mxu1 %v10075_v34  ;;  %v12991_v11 = vld [vmem:[#allocation15] ss:$16 sps:$4 sm:$0xff]   ;;  %v12993_v34 = vld [vmem:[#allocation15 + $0x8] ss:$16 sps:$4 sm:$0xff]  }
 0x911   :  { %6875 = vmatprep.subr.bf16.mxu0 %v10066_v5  ;;  %6916 = vmatprep.subr.bf16.mxu1 %v10068_v19  ;;  %v12997_v5 = vld [vmem:[#allocation17 + $0xe4] ss:$16 sps:$4 sm:$0xff]   ;;  %v12999_v19 = vld [vmem:[#allocation17 + $0xec] ss:$16 sps:$4 sm:$0xff]  }
 0x914   :  { %6876 = vmatpush2.bf16.msra.mxu0 %v10065_v47  ;;  %6917 = vmatpush2.bf16.msra.mxu1 %v10067_v8  ;;  %v13017_v47 = vld [vmem:[#allocation17 + $0xc0] ss:$16 sps:$4 sm:$0xff]   ;;  %v13019_v8 = vld [vmem:[#allocation17 + $0xc8] ss:$16 sps:$4 sm:$0xff]  }
 0x915   :  { %6877 = vmatprep.subr.bf16.mxu0 %v10058_v35  ;;  %6918 = vmatprep.subr.bf16.mxu1 %v10060_v21  ;;  %v13023_v35 = vld [vmem:[#allocation17 + $0xa4] ss:$16 sps:$4 sm:$0xff]   ;;  %v13025_v21 = vld [vmem:[#allocation17 + $0xac] ss:$16 sps:$4 sm:$0xff]  }
 0x918   :  { %6878 = vmatpush2.bf16.msra.mxu0 %v10057_v4  ;;  %6919 = vmatpush2.bf16.msra.mxu1 %v10059_v25  ;;  %v13043_v4 = vld [vmem:[#allocation17 + $0x80] ss:$16 sps:$4 sm:$0xff]   ;;  %v13045_v25 = vld [vmem:[#allocation17 + $0x88] ss:$16 sps:$4 sm:$0xff]  }
 0x919   :  { %6879 = vmatprep.subr.bf16.mxu0 %v10050_v61  ;;  %6920 = vmatprep.subr.bf16.mxu1 %v10052_v62  ;;  %v13049_v61 = vld [vmem:[#allocation17 + $0x64] ss:$16 sps:$4 sm:$0xff]   ;;  %v13051_v62 = vld [vmem:[#allocation17 + $0x6c] ss:$16 sps:$4 sm:$0xff]  }
 0x91c   :  { %6880 = vmatpush2.bf16.msra.mxu0 %v10049_v10  ;;  %6921 = vmatpush2.bf16.msra.mxu1 %v10051_v12  ;;  %v13067_v10 = vld [vmem:[#allocation17 + $0x40] ss:$16 sps:$4 sm:$0xff]   ;;  %v13069_v12 = vld [vmem:[#allocation17 + $0x48] ss:$16 sps:$4 sm:$0xff]  }
 0x91d   :  { %6881 = vmatprep.subr.bf16.mxu0 %v10042_v14  ;;  %6922 = vmatprep.subr.bf16.mxu1 %v10044_v58  ;;  %13337 = vst [vmem:[#allocation37_spill] sm:$0xff] %v13067_v10  ;;  %v13073_v14 = vld [vmem:[#allocation17 + $0x24] ss:$16 sps:$4 sm:$0xff]   ;;  %v13075_v58 = vld [vmem:[#allocation17 + $0x2c] ss:$16 sps:$4 sm:$0xff]  }
 0x920   :  { %6882 = vmatpush2.bf16.msra.mxu0 %v10041_v52  ;;  %6923 = vmatpush2.bf16.msra.mxu1 %v10043_v50  ;;  %v13079_v52 = vld [vmem:[#allocation17 + $0x20] ss:$16 sps:$4 sm:$0xff]   ;;  %v13081_v50 = vld [vmem:[#allocation17 + $0x28] ss:$16 sps:$4 sm:$0xff]  }
 0x921   :  { %7145 = vmatprep.subr.bf16.mxu0 %v12899_v53  ;;  %7186 = vmatprep.subr.bf16.mxu1 %v12901_v28 }
 0x923   :  { %6884 = vmatmul.mubr.bf16.vlgmr.msra.gmra.mxu0 %v12888_v16  ;;  %6925 = vmatmul.mubr.bf16.vlgmr.msra.gmra.mxu1 %v12888_v16  ;;  %v12931_v16 = vld [vmem:[#allocation15 + $0xa0] ss:$16 sps:$4 sm:$0xff]  }
 0x924   :  { %7146 = vmatpush1.bf16.msra.mxu0 %v12903_v29  ;;  %7187 = vmatpush1.bf16.msra.mxu1 %v12905_v46 }
 0x925   :  { %7147 = vmatprep.subr.bf16.mxu0 %v12909_v30  ;;  %7188 = vmatprep.subr.bf16.mxu1 %v12911_v32 }
 0x926   :  { %7177 = vmatprep.mubr.bf16.mxu0 %v13292_v41  ;;  %7218 = vmatprep.mubr.bf16.mxu1 %v13292_v41 }
 0x928   :  { %7148 = vmatpush1.bf16.msra.mxu0 %v12917_v15  ;;  %7189 = vmatpush1.bf16.msra.mxu1 %v12919_v60 }
 0x929   :  { %7149 = vmatprep.subr.bf16.mxu0 %v12923_v2  ;;  %7190 = vmatprep.subr.bf16.mxu1 %v12925_v3 }
 0x92c   :  { %7150 = vmatpush1.bf16.msra.mxu0 %v12931_v16  ;;  %7191 = vmatpush1.bf16.msra.mxu1 %v12933_v18 }
 0x92d   :  { %7151 = vmatprep.subr.bf16.mxu0 %v12937_v27  ;;  %7192 = vmatprep.subr.bf16.mxu1 %v12939_v36 }
 0x930   :  { %7152 = vmatpush1.bf16.msra.mxu0 %v12943_v31  ;;  %7193 = vmatpush1.bf16.msra.mxu1 %v12945_v51 }
 0x931   :  { %7153 = vmatprep.subr.bf16.mxu0 %v12949_v57  ;;  %7194 = vmatprep.subr.bf16.mxu1 %v12951_v9 }
 0x934   :  { %7154 = vmatpush1.bf16.msra.mxu0 %v12955_v13  ;;  %7195 = vmatpush1.bf16.msra.mxu1 %v12957_v6 }
 0x935   :  { %7155 = vmatprep.subr.bf16.mxu0 %v12961_v42  ;;  %7196 = vmatprep.subr.bf16.mxu1 %v12963_v23 }
 0x938   :  { %7156 = vmatpush1.bf16.msra.mxu0 %v12967_v24  ;;  %7197 = vmatpush1.bf16.msra.mxu1 %v12969_v17 }
 0x939   :  { %7157 = vmatprep.subr.bf16.mxu0 %v12973_v26  ;;  %7198 = vmatprep.subr.bf16.mxu1 %v12975_v48 }
 0x93c   :  { %7158 = vmatpush1.bf16.msra.mxu0 %v12979_v54  ;;  %7199 = vmatpush1.bf16.msra.mxu1 %v12981_v56 }
 0x93d   :  { %7159 = vmatprep.subr.bf16.mxu0 %v12985_v55  ;;  %7200 = vmatprep.subr.bf16.mxu1 %v12987_v0 }
 0x940   :  { %7160 = vmatpush1.bf16.msra.mxu0 %v12991_v11  ;;  %7201 = vmatpush1.bf16.msra.mxu1 %v12993_v34 }
 0x941   :  { %7419 = vmatprep.subr.bf16.mxu0 %v12997_v5  ;;  %7460 = vmatprep.subr.bf16.mxu1 %v12999_v19 }
 0x943   :  { %7178 = vmatmul.mubr.bf16.vlgmr.msra.gmra.mxu0 %v13292_v41  ;;  %7219 = vmatmul.mubr.bf16.vlgmr.msra.gmra.mxu1 %v13292_v41 }
 0x944   :  { %7420 = vmatpush1.bf16.msra.mxu0 %v13003_v38  ;;  %7461 = vmatpush1.bf16.msra.mxu1 %v13005_v43 }
 0x945   :  { %7421 = vmatprep.subr.bf16.mxu0 %v13009_v45  ;;  %7462 = vmatprep.subr.bf16.mxu1 %v13011_v49 }
 0x946   :  { %7451 = vmatprep.mubr.bf16.mxu0 %v13292_v41  ;;  %7492 = vmatprep.mubr.bf16.mxu1 %v13292_v41 }
 0x948   :  { %7422 = vmatpush1.bf16.msra.mxu0 %v13017_v47  ;;  %7463 = vmatpush1.bf16.msra.mxu1 %v13019_v8 }
 0x949   :  { %7423 = vmatprep.subr.bf16.mxu0 %v13023_v35  ;;  %7464 = vmatprep.subr.bf16.mxu1 %v13025_v21 }
 0x94c   :  { %7424 = vmatpush1.bf16.msra.mxu0 %v13031_v37  ;;  %7465 = vmatpush1.bf16.msra.mxu1 %v13033_v40 }
 0x94d   :  { %7425 = vmatprep.subr.bf16.mxu0 %v13037_v39  ;;  %7466 = vmatprep.subr.bf16.mxu1 %v13039_v22 }
 0x950   :  { %7426 = vmatpush1.bf16.msra.mxu0 %v13043_v4  ;;  %7467 = vmatpush1.bf16.msra.mxu1 %v13045_v25 }
 0x951   :  { %7427 = vmatprep.subr.bf16.mxu0 %v13049_v61  ;;  %7468 = vmatprep.subr.bf16.mxu1 %v13051_v62 }
 0x954   :  { %7428 = vmatpush1.bf16.msra.mxu0 %v13055_v7  ;;  %7469 = vmatpush1.bf16.msra.mxu1 %v13057_v63  ;;  %v13085_v63 = vld [vmem:[#allocation17 + $0x4] ss:$16 sps:$4 sm:$0xff]  }
 0x955   :  { %7429 = vmatprep.subr.bf16.mxu0 %v13061_v33  ;;  %7470 = vmatprep.subr.bf16.mxu1 %v13063_v1  ;;  %v13087_v33 = vld [vmem:[#allocation17 + $0xc] ss:$16 sps:$4 sm:$0xff]   ;;  %v13091_v1 = vld [vmem:[#allocation17] ss:$16 sps:$4 sm:$0xff]  }
 0x958   :  { %7430 = vmatpush1.bf16.msra.mxu0 %v13067_v10  ;;  %7471 = vmatpush1.bf16.msra.mxu1 %v13069_v12  ;;  %v13093_v10 = vld [vmem:[#allocation17 + $0x8] ss:$16 sps:$4 sm:$0xff]  }
 0x959   :  { %7431 = vmatprep.subr.bf16.mxu0 %v13073_v14  ;;  %7472 = vmatprep.subr.bf16.mxu1 %v13075_v58 }
 0x95c   :  { %7432 = vmatpush1.bf16.msra.mxu0 %v13079_v52  ;;  %7473 = vmatpush1.bf16.msra.mxu1 %v13081_v50 }
 0x95d   :  { %7433 = vmatprep.subr.bf16.mxu0 %v13085_v63  ;;  %7474 = vmatprep.subr.bf16.mxu1 %v13087_v33 }
 0x960   :  { %7434 = vmatpush1.bf16.msra.mxu0 %v13091_v1  ;;  %7475 = vmatpush1.bf16.msra.mxu1 %v13093_v10 }
 0x961   :  { %7821 = vmatprep.subr.bf16.mxu0 %v12899_v53  ;;  %7862 = vmatprep.subr.bf16.mxu1 %v12901_v28  ;;  %v6087_v53 = vld [vmem:[#allocation14] sm:$0xff] }
 0x962   :  { %v6092_v28 = vrot.slane %v6087_v53, %v13333_v59 }
 0x963   :  { %7452 = vmatmul.mubr.bf16.vlgmr.msra.gmra.mxu0 %v13292_v41  ;;  %7493 = vmatmul.mubr.bf16.vlgmr.msra.gmra.mxu1 %v13292_v41 }
 0x964   :  { %7822 = vmatpush1.bf16.msra.mxu0 %v12903_v29  ;;  %7863 = vmatpush1.bf16.msra.mxu1 %v12905_v46  ;;  %v13338_v29 = vld [vmem:[#allocation31_spill] sm:$0xff] }
 0x965   :  { %7823 = vmatprep.subr.bf16.mxu0 %v12909_v30  ;;  %7864 = vmatprep.subr.bf16.mxu1 %v12911_v32  ;;  %v13339_v46 = vsub.s32 2, %v13338_v29  ;;  %v6096_v32 = vrot.slane %v6087_v53, %v13332_v44  ;;  %v13341_v44 = vsub.s32 4, %v13338_v29 }
 0x966   :  { %7853 = vmatprep.mubr.bf16.mxu0 %v13292_v41  ;;  %7894 = vmatprep.mubr.bf16.mxu1 %v13292_v41 }
 0x967   :  { %v6100_v30 = vrot.slane %v6087_v53, %v13339_v46 }
 0x968   :  { %7824 = vmatpush1.bf16.msra.mxu0 %v12917_v15  ;;  %7865 = vmatpush1.bf16.msra.mxu1 %v12919_v60  ;;  %v13340_v15 = vsub.s32 3, %v13338_v29 }
 0x969   :  { %7825 = vmatprep.subr.bf16.mxu0 %v12923_v2  ;;  %7866 = vmatprep.subr.bf16.mxu1 %v12925_v3 }
 0x96a   :  { %v6104_v60 = vrot.slane %v6087_v53, %v13340_v15 }
 0x96c   :  { %7826 = vmatpush1.bf16.msra.mxu0 %v12931_v16  ;;  %7867 = vmatpush1.bf16.msra.mxu1 %v12933_v18 }
 0x96d   :  { %7827 = vmatprep.subr.bf16.mxu0 %v12937_v27  ;;  %7868 = vmatprep.subr.bf16.mxu1 %v12939_v36 }
 0x970   :  { %7828 = vmatpush1.bf16.msra.mxu0 %v12943_v31  ;;  %7869 = vmatpush1.bf16.msra.mxu1 %v12945_v51 }
 0x971   :  { %7829 = vmatprep.subr.bf16.mxu0 %v12949_v57  ;;  %7870 = vmatprep.subr.bf16.mxu1 %v12951_v9 }
 0x974   :  { %7830 = vmatpush1.bf16.msra.mxu0 %v12955_v13  ;;  %7871 = vmatpush1.bf16.msra.mxu1 %v12957_v6 }
 0x975   :  { %7831 = vmatprep.subr.bf16.mxu0 %v12961_v42  ;;  %7872 = vmatprep.subr.bf16.mxu1 %v12963_v23  ;;  %v6108_v23 = vrot.slane %v6087_v53, %v13341_v44 }
 0x978   :  { %7832 = vmatpush1.bf16.msra.mxu0 %v12967_v24  ;;  %7873 = vmatpush1.bf16.msra.mxu1 %v12969_v17  ;;  %v13342_v24 = vsub.s32 6, %v13338_v29 }
 0x979   :  { %7833 = vmatprep.subr.bf16.mxu0 %v12973_v26  ;;  %7874 = vmatprep.subr.bf16.mxu1 %v12975_v48  ;;  %v13343_v26 = vsub.s32 5, %v13338_v29 }
 0x97a   :  { %v6116_v17 = vrot.slane %v6087_v53, %v13342_v24 }
 0x97b   :  { %v6112_v48 = vrot.slane %v6087_v53, %v13343_v26 }
 0x97c   :  { %7834 = vmatpush1.bf16.msra.mxu0 %v12979_v54  ;;  %7875 = vmatpush1.bf16.msra.mxu1 %v12981_v56  ;;  %v13344_v54 = vsub.s32 7, %v13338_v29 }
 0x97d   :  { %7835 = vmatprep.subr.bf16.mxu0 %v12985_v55  ;;  %7876 = vmatprep.subr.bf16.mxu1 %v12987_v0 }
 0x97e   :  { %v6120_v56 = vrot.slane %v6087_v53, %v13344_v54 }
 0x980   :  { %7836 = vmatpush1.bf16.msra.mxu0 %v12991_v11  ;;  %7877 = vmatpush1.bf16.msra.mxu1 %v12993_v34 }
 0x981   :  { %8096 = vmatprep.subr.bf16.mxu0 %v12997_v5  ;;  %8137 = vmatprep.subr.bf16.mxu1 %v12999_v19 }
 0x9a3   :  { %v6803_v2 = vpop.f32.mrf.mxu0  ;;  %v6844_v3 = vpop.f32.mrf.mxu1 }
 0x9a4   :  { %v6804_v27 = vadd.f32 %v6803_v2, %v6092_v28  ;;  %v6845_v36 = vadd.f32 %v6844_v3, %v6100_v30 }
 0x9a5   :  { %v6805_v16 = vpop.f32.mrf.mxu0  ;;  %v6846_v18 = vpop.f32.mrf.mxu1 }
 0x9a6   :  { %v6806_v31 = vadd.f32 %v6805_v16, %v6096_v32  ;;  %v6847_v51 = vadd.f32 %v6846_v18, %v6104_v60 }
 0x9a7   :  { %v6807_v57 = vpop.f32.mrf.mxu0  ;;  %v6848_v9 = vpop.f32.mrf.mxu1 }
 0x9a8   :  { %v6941_v13 = vcombine.low %v6804_v27, %v6806_v31  ;;  %v6942_v59 = vcombine.low %v6845_v36, %v6847_v51 }
 0x9a9   :  { %v6808_v6 = vpop.f32.mrf.mxu0  ;;  %v6849_v42 = vpop.f32.mrf.mxu1 }
 0x9aa   :  { %6949 = vst [vmem:[#allocation4] sm:$0x77] %v6941_v13  ;;  %6950 = vst [vmem:[#allocation4 + $0x8] sm:$0x77] %v6942_v59 }
 0x9b1   :  { %v7501_v44 = vld [vmem:[#allocation4] ss:$4 sm:$0xf] }
 0x9e3   :  { %v6885_v55 = vpop.f32.mrf.mxu0  ;;  %v6926_v0 = vpop.f32.mrf.mxu1 }
 0x9e4   :  { %v6886_v5 = vadd.f32 %v6885_v55, %v6108_v23  ;;  %v6927_v19 = vadd.f32 %v6926_v0, %v6116_v17 }
 0x9e5   :  { %v6887_v11 = vpop.f32.mrf.mxu0  ;;  %v6928_v34 = vpop.f32.mrf.mxu1 }
 0x9e6   :  { %v6888_v28 = vadd.f32 %v6887_v11, %v6112_v48  ;;  %v6929_v46 = vadd.f32 %v6928_v34, %v6120_v56 }
 0x9e7   :  { %v6889_v30 = vpop.f32.mrf.mxu0  ;;  %v6930_v32 = vpop.f32.mrf.mxu1 }
 0x9e8   :  { %v6943_v15 = vcombine.low %v6886_v5, %v6888_v28  ;;  %v6944_v60 = vcombine.low %v6927_v19, %v6929_v46 }
 0x9e9   :  { %v6890_v2 = vpop.f32.mrf.mxu0  ;;  %v6931_v3 = vpop.f32.mrf.mxu1 }
 0x9ea   :  { %6951 = vst [vmem:[#allocation4 + $0x10] sm:$0x77] %v6943_v15  ;;  %6952 = vst [vmem:[#allocation4 + $0x18] sm:$0x77] %v6944_v60 }
 0xa03   :  { %v7179_v16 = vpop.f32.mrf.mxu0  ;;  %v7220_v18 = vpop.f32.mrf.mxu1 }
 0xa05   :  { %v7181_v29 = vpop.f32.mrf.mxu0  ;;  %v7222_v53 = vpop.f32.mrf.mxu1 }
 0xa06   :  { %v7506_v27 = vcombine.low %v7179_v16, %v7181_v29  ;;  %v7507_v36 = vcombine.low %v7220_v18, %v7222_v53 }
 0xa07   :  { %v7183_v31 = vpop.f32.mrf.mxu0  ;;  %v7224_v51 = vpop.f32.mrf.mxu1 }
 0xa08   :  { %v7514_v57 = vrot.slane %v7506_v27, %v11965_v20  ;;  %v7521_v9 = vrot.slane %v7507_v36, %v11965_v20  ;;  %v7533_v27 = vld [vmem:[#allocation4 + $0x12] ss:$4 sm:$0xf] }
 0xa09   :  { %v7184_v13 = vpop.f32.mrf.mxu0  ;;  %v7225_v59 = vpop.f32.mrf.mxu1 }
 0xa0a   :  { %v7522_v6 = vcombine.low %v7514_v57, %v7521_v9 }
 0xa0c   :  { %v7529_v42 = vrot.slane %v7522_v6, %v11965_v20 }
 0xa0e   :  { %v7531_v23 = vadd.f32 %v7529_v42, %v7501_v44 }
 0xa10   :  { %v10165_v24 = vmul.f32 -1.442695, %v7531_v23  ;;  %v7571_v17 = vrot.slane %v7531_v23, 1  ;;  %v7582_v48 = vrot.slane %v7531_v23, 3  ;;  %v7579_v55 = vrot.slane %v7531_v23, 2 }
 0xa12   :  { %11273 = vpow2.f32 %v10165_v24  ;;  %v10166_v26 = vmul.f32 -1.442695, %v7571_v17  ;;  %v10167_v54 = vmul.f32 -1.442695, %v7582_v48 }
 0xa14   :  { %11275 = vpow2.f32 %v10166_v26 }
 0xa15   :  { %11277 = vpow2.f32 %v10167_v54 }
 0xa1f   :  { %v11274_v56 = vpop.eup %11273 }
 0xa20   :  { %v7567_v0 = vadd.f32 1.0, %v11274_v56 }
 0xa21   :  { %v11276_v11 = vpop.eup %11275 }
 0xa22   :  { %11279 = vrcp.f32 %v7567_v0  ;;  %v7576_v34 = vadd.f32 1.0, %v11276_v11  ;;  %v11278_v36 = vpop.eup %11277 }
 0xa23   :  { %11281 = vtanh.f32 %v7579_v55  ;;  %v7453_v5 = vpop.f32.mrf.mxu0  ;;  %v7494_v19 = vpop.f32.mrf.mxu1  ;;  %v7587_v6 = vadd.f32 1.0, %v11278_v36  ;;  %v10920_v36 = vld [vmem:[#allocation15 + $0x48] ss:$16 sps:$4 sm:$0xff]  }
 0xa24   :  { %11283 = vrcp.f32 %v7576_v34 }
 0xa25   :  { %v7455_v28 = vpop.f32.mrf.mxu0  ;;  %v7496_v46 = vpop.f32.mrf.mxu1 }
 0xa26   :  { %v7538_v30 = vcombine.low %v7453_v5, %v7455_v28  ;;  %v7539_v32 = vcombine.low %v7494_v19, %v7496_v46 }
 0xa27   :  { %v7457_v15 = vpop.f32.mrf.mxu0  ;;  %v7498_v60 = vpop.f32.mrf.mxu1 }
 0xa28   :  { %v7546_v2 = vrot.slane %v7538_v30, %v11965_v20  ;;  %v7553_v3 = vrot.slane %v7539_v32, %v11965_v20  ;;  %v10910_v32 = vld [vmem:[#allocation15 + $0x8c] ss:$16 sps:$4 sm:$0xff]   ;;  %v10905_v15 = vld [vmem:[#allocation15 + $0x80] ss:$16 sps:$4 sm:$0xff]   ;;  %v10908_v60 = vld [vmem:[#allocation15 + $0x88] ss:$16 sps:$4 sm:$0xff]  }
 0xa29   :  { %v7458_v16 = vpop.f32.mrf.mxu0  ;;  %v7499_v18 = vpop.f32.mrf.mxu1 }
 0xa2a   :  { %v7554_v29 = vcombine.low %v7546_v2, %v7553_v3  ;;  %v10913_v2 = vld [vmem:[#allocation15 + $0x64] ss:$16 sps:$4 sm:$0xff]   ;;  %v10916_v3 = vld [vmem:[#allocation15 + $0x6c] ss:$16 sps:$4 sm:$0xff]   ;;  %v10911_v16 = vld [vmem:[#allocation15 + $0x60] ss:$16 sps:$4 sm:$0xff]  }
 0xa2b   :  { %v10914_v18 = vld [vmem:[#allocation15 + $0x68] ss:$16 sps:$4 sm:$0xff]  }
 0xa2c   :  { %v7561_v53 = vrot.slane %v7554_v29, %v11965_v20  ;;  %v10919_v29 = vld [vmem:[#allocation15 + $0x44] ss:$16 sps:$4 sm:$0xff]  }
 0xa2e   :  { %v7563_v31 = vadd.f32 %v7561_v53, %v7533_v27  ;;  %v10922_v53 = vld [vmem:[#allocation15 + $0x4c] ss:$16 sps:$4 sm:$0xff]   ;;  %v10917_v27 = vld [vmem:[#allocation15 + $0x40] ss:$16 sps:$4 sm:$0xff]  }
 0xa2f   :  { %v11280_v51 = vpop.eup %11279 }
 0xa30   :  { %v11282_v57 = vpop.eup %11281  ;;  %v10168_v9 = vmul.f32 -1.442695, %v7563_v31  ;;  %v7602_v13 = vrot.slane %v7563_v31, 1  ;;  %v7613_v17 = vrot.slane %v7563_v31, 3  ;;  %v7610_v54 = vrot.slane %v7563_v31, 2 }
 0xa31   :  { %v11284_v59 = vpop.eup %11283  ;;  %v7591_v23 = vmul.f32 %v11282_v57, %v11280_v51  ;;  %v10925_v31 = vld [vmem:[#allocation15 + $0x24] ss:$16 sps:$4 sm:$0xff]   ;;  %v10928_v51 = vld [vmem:[#allocation15 + $0x2c] ss:$16 sps:$4 sm:$0xff]   ;;  %v10923_v57 = vld [vmem:[#allocation15 + $0x20] ss:$16 sps:$4 sm:$0xff]  }
 0xa32   :  { %v7590_v42 = vmul.f32 0.0, %v11284_v59  ;;  %11285 = vpow2.f32 %v10168_v9  ;;  %v10169_v44 = vmul.f32 -1.442695, %v7602_v13  ;;  %v10170_v26 = vmul.f32 -1.442695, %v7613_v17 }
 0xa33   :  { %v10926_v9 = vld [vmem:[#allocation15 + $0x28] ss:$16 sps:$4 sm:$0xff]   ;;  %v10931_v13 = vld [vmem:[#allocation15 + $0x4] ss:$16 sps:$4 sm:$0xff]   ;;  %v10934_v59 = vld [vmem:[#allocation15 + $0xc] ss:$16 sps:$4 sm:$0xff]  }
 0xa34   :  { %11287 = vpow2.f32 %v10169_v44  ;;  %v13157_v24 = vadd.f32 %v7591_v23, %v7590_v42  ;;  %v10932_v42 = vld [vmem:[#allocation15 + $0x8] ss:$16 sps:$4 sm:$0xff]   ;;  %v10937_v44 = vld [vmem:[#allocation17 + $0xe4] ss:$16 sps:$4 sm:$0xff]   ;;  %v10940_v23 = vld [vmem:[#allocation17 + $0xec] ss:$16 sps:$4 sm:$0xff]  }
 0xa35   :  { %11289 = vrcp.f32 %v7587_v6  ;;  %v10929_v6 = vld [vmem:[#allocation15] ss:$16 sps:$4 sm:$0xff]  }
 0xa36   :  { %11291 = vtanh.f32 %v13157_v24 }
 0xa37   :  { %11293 = vpow2.f32 %v10170_v26 }
 0xa3f   :  { %v11286_v48 = vpop.eup %11285 }
 0xa40   :  { %v7598_v56 = vadd.f32 1.0, %v11286_v48 }
 0xa41   :  { %v11288_v55 = vpop.eup %11287 }
 0xa42   :  { %v11290_v0 = vpop.eup %11289  ;;  %11295 = vrcp.f32 %v7598_v56  ;;  %v7607_v11 = vadd.f32 1.0, %v11288_v55 }
 0xa43   :  { %v11292_v34 = vpop.eup %11291  ;;  %11297 = vtanh.f32 %v7610_v54 }
 0xa44   :  { %11299 = vrcp.f32 %v7607_v11  ;;  %v7594_v5 = vmul.f32 %v11292_v34, %v11290_v0  ;;  %v11294_v28 = vpop.eup %11293 }
 0xa45   :  { %v7618_v30 = vadd.f32 1.0, %v11294_v28 }
 0xa46   :  { %7626 = vst [vmem:[#allocation5] sm:$0x1] %v7594_v5  ;;  %v7628_v19 = vpack.c.bf16 %v7594_v5, %v7594_v5 }
 0xa47   :  { %11301 = vrcp.f32 %v7618_v30 }
 0xa48   :  { %7854 = vmatmul.mubr.bf16.vlgmr.msra.gmra.mxu0 %v7628_v19  ;;  %7895 = vmatmul.mubr.bf16.vlgmr.msra.gmra.mxu1 %v7628_v19 }
 0xa49   :  { %8097 = vmatpush1.bf16.msra.mxu0 %v13003_v38  ;;  %8138 = vmatpush1.bf16.msra.mxu1 %v13005_v43 }
 0xa4a   :  { %8098 = vmatprep.subr.bf16.mxu0 %v13009_v45  ;;  %8139 = vmatprep.subr.bf16.mxu1 %v13011_v49 }
 0xa4b   :  { %8128 = vmatprep.mubr.bf16.mxu0 %v13292_v41  ;;  %8169 = vmatprep.mubr.bf16.mxu1 %v13292_v41 }
 0xa4d   :  { %8099 = vmatpush1.bf16.msra.mxu0 %v13017_v47  ;;  %8140 = vmatpush1.bf16.msra.mxu1 %v13019_v8  ;;  %v13345_v8 = vld [vmem:[#allocation34_spill] sm:$0xff] }
 0xa4e   :  { %8100 = vmatprep.subr.bf16.mxu0 %v13023_v35  ;;  %8141 = vmatprep.subr.bf16.mxu1 %v13025_v21  ;;  %v13346_v35 = vld [vmem:[#allocation35_spill] sm:$0xff]  ;;  %v13347_v21 = vld [vmem:[#allocation36_spill] sm:$0xff] }
 0xa4f   :  { %v11296_v38 = vpop.eup %11295 }
 0xa50   :  { %v11298_v46 = vpop.eup %11297 }
 0xa51   :  { %v11300_v43 = vpop.eup %11299  ;;  %8101 = vmatpush1.bf16.msra.mxu0 %v13031_v37  ;;  %8142 = vmatpush1.bf16.msra.mxu1 %v13033_v40  ;;  %v7622_v49 = vmul.f32 %v11298_v46, %v11296_v38  ;;  %v13348_v37 = vld [vmem:[#allocation37_spill] sm:$0xff] }
 0xa52   :  { %v7621_v45 = vmul.f32 0.0, %v11300_v43  ;;  %8102 = vmatprep.subr.bf16.mxu0 %v13037_v39  ;;  %8143 = vmatprep.subr.bf16.mxu1 %v13039_v22  ;;  %v8179_v43 = vld [vmem:[#allocation4 + $0x1] ss:$4 sm:$0xf] }
 0xa54   :  { %v13174_v47 = vadd.f32 %v7622_v49, %v7621_v45  ;;  %v11302_v40 = vpop.eup %11301 }
 0xa55   :  { %8103 = vmatpush1.bf16.msra.mxu0 %v13043_v4  ;;  %8144 = vmatpush1.bf16.msra.mxu1 %v13045_v25  ;;  %v10889_v25 = vld [vmem:[#allocation15 + $0xe4] ss:$16 sps:$4 sm:$0xff]  }
 0xa56   :  { %8104 = vmatprep.subr.bf16.mxu0 %v13049_v61  ;;  %8145 = vmatprep.subr.bf16.mxu1 %v13051_v62  ;;  %11303 = vtanh.f32 %v13174_v47  ;;  %v10892_v61 = vld [vmem:[#allocation15 + $0xec] ss:$16 sps:$4 sm:$0xff]   ;;  %v10887_v62 = vld [vmem:[#allocation15 + $0xe0] ss:$16 sps:$4 sm:$0xff]  }
 0xa59   :  { %8105 = vmatpush1.bf16.msra.mxu0 %v13055_v7  ;;  %8146 = vmatpush1.bf16.msra.mxu1 %v13345_v8  ;;  %v10890_v7 = vld [vmem:[#allocation15 + $0xe8] ss:$16 sps:$4 sm:$0xff]  }
 0xa5a   :  { %8106 = vmatprep.subr.bf16.mxu0 %v13346_v35  ;;  %8147 = vmatprep.subr.bf16.mxu1 %v13347_v21 }
 0xa5d   :  { %8107 = vmatpush1.bf16.msra.mxu0 %v13348_v37  ;;  %8148 = vmatpush1.bf16.msra.mxu1 %v13069_v12  ;;  %v10901_v12 = vld [vmem:[#allocation15 + $0xa4] ss:$16 sps:$4 sm:$0xff]  }
 0xa5e   :  { %8108 = vmatprep.subr.bf16.mxu0 %v13073_v14  ;;  %8149 = vmatprep.subr.bf16.mxu1 %v13075_v58  ;;  %v10904_v14 = vld [vmem:[#allocation15 + $0xac] ss:$16 sps:$4 sm:$0xff]   ;;  %v10899_v58 = vld [vmem:[#allocation15 + $0xa0] ss:$16 sps:$4 sm:$0xff]  }
 0xa61   :  { %8109 = vmatpush1.bf16.msra.mxu0 %v13079_v52  ;;  %8150 = vmatpush1.bf16.msra.mxu1 %v13081_v50  ;;  %v10902_v52 = vld [vmem:[#allocation15 + $0xa8] ss:$16 sps:$4 sm:$0xff]   ;;  %v10907_v50 = vld [vmem:[#allocation15 + $0x84] ss:$16 sps:$4 sm:$0xff]  }
 0xa62   :  { %8110 = vmatprep.subr.bf16.mxu0 %v13085_v63  ;;  %8151 = vmatprep.subr.bf16.mxu1 %v13087_v33  ;;  %v10895_v63 = vld [vmem:[#allocation15 + $0xc4] ss:$16 sps:$4 sm:$0xff]   ;;  %v10898_v33 = vld [vmem:[#allocation15 + $0xcc] ss:$16 sps:$4 sm:$0xff]  }
 0xa63   :  { %v11304_v39 = vpop.eup %11303 }
 0xa64   :  { %v7625_v22 = vmul.f32 %v11304_v39, %v11302_v40 }
 0xa65   :  { %8111 = vmatpush1.bf16.msra.mxu0 %v13091_v1  ;;  %8152 = vmatpush1.bf16.msra.mxu1 %v13093_v10  ;;  %v10893_v1 = vld [vmem:[#allocation15 + $0xc0] ss:$16 sps:$4 sm:$0xff]   ;;  %v10896_v10 = vld [vmem:[#allocation15 + $0xc8] ss:$16 sps:$4 sm:$0xff]  }
 0xa66   :  { %7627 = vst [vmem:[#allocation5 + $0x6] sm:$0x1] %v7625_v22  ;;  %v7903_v4 = vpack.c.bf16 %v7625_v22, %v7625_v22  ;;  %8499 = vmatprep.subr.bf16.mxu0 %v10889_v25  ;;  %8540 = vmatprep.subr.bf16.mxu1 %v10892_v61 }
 0xa68   :  { %8129 = vmatmul.mubr.bf16.vlgmr.msra.gmra.mxu0 %v7903_v4  ;;  %8170 = vmatmul.mubr.bf16.vlgmr.msra.gmra.mxu1 %v7903_v4 }
 0xa69   :  { %8531 = vmatprep.mubr.bf16.mxu0 %v13292_v41  ;;  %8572 = vmatprep.mubr.bf16.mxu1 %v13292_v41 }
 0xa6a   :  { %8500 = vmatpush1.bf16.msra.mxu0 %v10887_v62  ;;  %8541 = vmatpush1.bf16.msra.mxu1 %v10890_v7 }
 0xa6b   :  { %8501 = vmatprep.subr.bf16.mxu0 %v10895_v63  ;;  %8542 = vmatprep.subr.bf16.mxu1 %v10898_v33 }
 0xa6e   :  { %8502 = vmatpush1.bf16.msra.mxu0 %v10893_v1  ;;  %8543 = vmatpush1.bf16.msra.mxu1 %v10896_v10 }
 0xa6f   :  { %8503 = vmatprep.subr.bf16.mxu0 %v10901_v12  ;;  %8544 = vmatprep.subr.bf16.mxu1 %v10904_v14 }
 0xa72   :  { %8504 = vmatpush1.bf16.msra.mxu0 %v10899_v58  ;;  %8545 = vmatpush1.bf16.msra.mxu1 %v10902_v52 }
 0xa73   :  { %8505 = vmatprep.subr.bf16.mxu0 %v10907_v50  ;;  %8546 = vmatprep.subr.bf16.mxu1 %v10910_v32 }
 0xa76   :  { %8506 = vmatpush1.bf16.msra.mxu0 %v10905_v15  ;;  %8547 = vmatpush1.bf16.msra.mxu1 %v10908_v60  ;;  %v8211_v15 = vld [vmem:[#allocation4 + $0x11] ss:$4 sm:$0xf] }
 0xa77   :  { %8507 = vmatprep.subr.bf16.mxu0 %v10913_v2  ;;  %8548 = vmatprep.subr.bf16.mxu1 %v10916_v3 }
 0xa7a   :  { %8508 = vmatpush1.bf16.msra.mxu0 %v10911_v16  ;;  %8549 = vmatpush1.bf16.msra.mxu1 %v10914_v18 }
 0xa7b   :  { %8509 = vmatprep.subr.bf16.mxu0 %v10919_v29  ;;  %8550 = vmatprep.subr.bf16.mxu1 %v10922_v53 }
 0xa7e   :  { %8510 = vmatpush1.bf16.msra.mxu0 %v10917_v27  ;;  %8551 = vmatpush1.bf16.msra.mxu1 %v10920_v36 }
 0xa7f   :  { %8511 = vmatprep.subr.bf16.mxu0 %v10925_v31  ;;  %8552 = vmatprep.subr.bf16.mxu1 %v10928_v51 }
 0xa82   :  { %8512 = vmatpush1.bf16.msra.mxu0 %v10923_v57  ;;  %8553 = vmatpush1.bf16.msra.mxu1 %v10926_v9 }
 0xa83   :  { %8513 = vmatprep.subr.bf16.mxu0 %v10931_v13  ;;  %8554 = vmatprep.subr.bf16.mxu1 %v10934_v59 }
 0xa86   :  { %8514 = vmatpush1.bf16.msra.mxu0 %v10929_v6  ;;  %8555 = vmatpush1.bf16.msra.mxu1 %v10932_v42 }
 0xa87   :  { %8774 = vmatprep.subr.bf16.mxu0 %v10937_v44  ;;  %8815 = vmatprep.subr.bf16.mxu1 %v10940_v23 }
 0xb08   :  { %v7855_v17 = vpop.f32.mrf.mxu0  ;;  %v7896_v26 = vpop.f32.mrf.mxu1 }
 0xb0a   :  { %v7857_v48 = vpop.f32.mrf.mxu0  ;;  %v7898_v54 = vpop.f32.mrf.mxu1 }
 0xb0b   :  { %v8184_v56 = vcombine.low %v7855_v17, %v7857_v48  ;;  %v8185_v55 = vcombine.low %v7896_v26, %v7898_v54  ;;  %v10935_v48 = vld [vmem:[#allocation17 + $0xe0] ss:$16 sps:$4 sm:$0xff]   ;;  %v10938_v54 = vld [vmem:[#allocation17 + $0xe8] ss:$16 sps:$4 sm:$0xff]  }
 0xb0c   :  { %v7859_v0 = vpop.f32.mrf.mxu0  ;;  %v7900_v11 = vpop.f32.mrf.mxu1 }
 0xb0d   :  { %v8192_v34 = vrot.slane %v8184_v56, %v11965_v20  ;;  %v8199_v5 = vrot.slane %v8185_v55, %v11965_v20  ;;  %v10943_v55 = vld [vmem:[#allocation17 + $0xc4] ss:$16 sps:$4 sm:$0xff]   ;;  %v10946_v0 = vld [vmem:[#allocation17 + $0xcc] ss:$16 sps:$4 sm:$0xff]   ;;  %v10941_v11 = vld [vmem:[#allocation17 + $0xc0] ss:$16 sps:$4 sm:$0xff]  }
 0xb0e   :  { %v7860_v19 = vpop.f32.mrf.mxu0  ;;  %v7901_v28 = vpop.f32.mrf.mxu1 }
 0xb0f   :  { %v8200_v38 = vcombine.low %v8192_v34, %v8199_v5  ;;  %v10944_v34 = vld [vmem:[#allocation17 + $0xc8] ss:$16 sps:$4 sm:$0xff]   ;;  %v10949_v5 = vld [vmem:[#allocation17 + $0xa4] ss:$16 sps:$4 sm:$0xff]   ;;  %v10952_v19 = vld [vmem:[#allocation17 + $0xac] ss:$16 sps:$4 sm:$0xff]  }
 0xb10   :  { %v10947_v28 = vld [vmem:[#allocation17 + $0xa0] ss:$16 sps:$4 sm:$0xff]  }
 0xb11   :  { %v8207_v46 = vrot.slane %v8200_v38, %v11965_v20  ;;  %v10950_v38 = vld [vmem:[#allocation17 + $0xa8] ss:$16 sps:$4 sm:$0xff]  }
 0xb13   :  { %v8209_v30 = vadd.f32 %v8207_v46, %v8179_v43  ;;  %v10955_v43 = vld [vmem:[#allocation17 + $0x84] ss:$16 sps:$4 sm:$0xff]  }
 0xb15   :  { %v10235_v45 = vmul.f32 -1.442695, %v8209_v30  ;;  %v8249_v49 = vrot.slane %v8209_v30, 1  ;;  %v8260_v35 = vrot.slane %v8209_v30, 3  ;;  %v8257_v40 = vrot.slane %v8209_v30, 2 }
 0xb16   :  { %v10958_v30 = vld [vmem:[#allocation17 + $0x8c] ss:$16 sps:$4 sm:$0xff]  }
 0xb17   :  { %11305 = vpow2.f32 %v10235_v45  ;;  %v10236_v8 = vmul.f32 -1.442695, %v8249_v49  ;;  %v10237_v21 = vmul.f32 -1.442695, %v8260_v35 }
 0xb19   :  { %11307 = vpow2.f32 %v10236_v8 }
 0xb1a   :  { %11309 = vpow2.f32 %v10237_v21  ;;  %v10953_v21 = vld [vmem:[#allocation17 + $0x80] ss:$16 sps:$4 sm:$0xff]  }
 0xb24   :  { %v11306_v37 = vpop.eup %11305 }
 0xb25   :  { %v8245_v39 = vadd.f32 1.0, %v11306_v37  ;;  %v10956_v37 = vld [vmem:[#allocation17 + $0x88] ss:$16 sps:$4 sm:$0xff]  }
 0xb26   :  { %v11308_v22 = vpop.eup %11307 }
 0xb27   :  { %11311 = vrcp.f32 %v8245_v39  ;;  %v8254_v4 = vadd.f32 1.0, %v11308_v22  ;;  %v11310_v60 = vpop.eup %11309 }
 0xb28   :  { %11313 = vtanh.f32 %v8257_v40  ;;  %v8130_v25 = vpop.f32.mrf.mxu0  ;;  %v8171_v61 = vpop.f32.mrf.mxu1  ;;  %v8265_v27 = vadd.f32 1.0, %v11310_v60  ;;  %v10964_v40 = vld [vmem:[#allocation17 + $0x6c] ss:$16 sps:$4 sm:$0xff]  }
 0xb29   :  { %11315 = vrcp.f32 %v8254_v4 }
 0xb2a   :  { %v8132_v62 = vpop.f32.mrf.mxu0  ;;  %v8173_v7 = vpop.f32.mrf.mxu1 }
 0xb2b   :  { %v8216_v63 = vcombine.low %v8130_v25, %v8132_v62  ;;  %v8217_v33 = vcombine.low %v8171_v61, %v8173_v7  ;;  %v10959_v25 = vld [vmem:[#allocation17 + $0x60] ss:$16 sps:$4 sm:$0xff]   ;;  %v10962_v61 = vld [vmem:[#allocation17 + $0x68] ss:$16 sps:$4 sm:$0xff]   ;;  %v10967_v62 = vld [vmem:[#allocation17 + $0x44] ss:$16 sps:$4 sm:$0xff]  }
 0xb2c   :  { %v8134_v1 = vpop.f32.mrf.mxu0  ;;  %v8175_v10 = vpop.f32.mrf.mxu1  ;;  %v10970_v7 = vld [vmem:[#allocation17 + $0x4c] ss:$16 sps:$4 sm:$0xff]  }
 0xb2d   :  { %v8224_v12 = vrot.slane %v8216_v63, %v11965_v20  ;;  %v8231_v14 = vrot.slane %v8217_v33, %v11965_v20  ;;  %v10965_v63 = vld [vmem:[#allocation17 + $0x40] ss:$16 sps:$4 sm:$0xff]   ;;  %v10968_v33 = vld [vmem:[#allocation17 + $0x48] ss:$16 sps:$4 sm:$0xff]   ;;  %v10976_v1 = vld [vmem:[#allocation17 + $0x2c] ss:$16 sps:$4 sm:$0xff]  }
 0xb2e   :  { %v8135_v58 = vpop.f32.mrf.mxu0  ;;  %v8176_v52 = vpop.f32.mrf.mxu1  ;;  %v10971_v10 = vld [vmem:[#allocation17 + $0x20] ss:$16 sps:$4 sm:$0xff]  }
 0xb2f   :  { %v8232_v50 = vcombine.low %v8224_v12, %v8231_v14  ;;  %v10974_v12 = vld [vmem:[#allocation17 + $0x28] ss:$16 sps:$4 sm:$0xff]   ;;  %v10979_v14 = vld [vmem:[#allocation17 + $0x4] ss:$16 sps:$4 sm:$0xff]   ;;  %v10982_v58 = vld [vmem:[#allocation17 + $0xc] ss:$16 sps:$4 sm:$0xff]  }
 0xb30   :  { %v10977_v52 = vld [vmem:[#allocation17] ss:$16 sps:$4 sm:$0xff]  }
 0xb31   :  { %v8239_v32 = vrot.slane %v8232_v50, %v11965_v20  ;;  %v10980_v50 = vld [vmem:[#allocation17 + $0x8] ss:$16 sps:$4 sm:$0xff]  }
 0xb33   :  { %v8241_v2 = vadd.f32 %v8239_v32, %v8211_v15 }
 0xb34   :  { %v11312_v3 = vpop.eup %11311 }
 0xb35   :  { %v11314_v16 = vpop.eup %11313  ;;  %v10238_v18 = vmul.f32 -1.442695, %v8241_v2  ;;  %v8280_v29 = vrot.slane %v8241_v2, 1  ;;  %v8291_v9 = vrot.slane %v8241_v2, 3  ;;  %v8288_v6 = vrot.slane %v8241_v2, 2 }
 0xb36   :  { %v11316_v53 = vpop.eup %11315  ;;  %v8269_v51 = vmul.f32 %v11314_v16, %v11312_v3  ;;  %v10983_v3 = vld [vmem:[#allocation20 + $0x78] sm:$0xff]  }
 0xb37   :  { %11317 = vpow2.f32 %v10238_v18  ;;  %v10239_v36 = vmul.f32 -1.442695, %v8280_v29  ;;  %v8268_v31 = vmul.f32 %v11316_v53, %v13157_v24  ;;  %v10240_v13 = vmul.f32 -1.442695, %v8291_v9  ;;  %v10984_v16 = vld [vmem:[#allocation20 + $0x38] sm:$0xff]   ;;  %v10985_v18 = vld [vmem:[#allocation20 + $0x70] sm:$0xff]  }
 0xb38   :  { %v10986_v29 = vld [vmem:[#allocation20 + $0x30] sm:$0xff]   ;;  %v10987_v53 = vld [vmem:[#allocation20 + $0x68] sm:$0xff]   ;;  %v10992_v9 = vld [vmem:[#allocation20 + $0x18] sm:$0xff]  }
 0xb39   :  { %11319 = vpow2.f32 %v10239_v36  ;;  %v13204_v57 = vadd.f32 %v8269_v51, %v8268_v31  ;;  %v10989_v36 = vld [vmem:[#allocation20 + $0x60] sm:$0xff]   ;;  %v10991_v51 = vld [vmem:[#allocation20 + $0x58] sm:$0xff]  }
 0xb3a   :  { %11321 = vrcp.f32 %v8265_v27  ;;  %v10988_v27 = vld [vmem:[#allocation20 + $0x28] sm:$0xff]   ;;  %v10990_v31 = vld [vmem:[#allocation20 + $0x20] sm:$0xff]  }
 0xb3b   :  { %11323 = vtanh.f32 %v13204_v57 }
 0xb3c   :  { %11325 = vpow2.f32 %v10240_v13  ;;  %v10993_v13 = vld [vmem:[#allocation20 + $0x50] sm:$0xff]  }
 0xb44   :  { %v11318_v59 = vpop.eup %11317 }
 0xb45   :  { %v8276_v42 = vadd.f32 1.0, %v11318_v59  ;;  %v10994_v59 = vld [vmem:[#allocation20 + $0x10] sm:$0xff]  }
 0xb46   :  { %v11320_v44 = vpop.eup %11319 }
 0xb47   :  { %v11322_v23 = vpop.eup %11321  ;;  %11327 = vrcp.f32 %v8276_v42  ;;  %v8285_v17 = vadd.f32 1.0, %v11320_v44  ;;  %v10996_v42 = vld [vmem:[#allocation20 + $0x8] sm:$0xff]   ;;  %v10997_v44 = vld [vmem:[#allocation18 + $0x78] sm:$0xff]  }
 0xb48   :  { %v11324_v26 = vpop.eup %11323  ;;  %11329 = vtanh.f32 %v8288_v6  ;;  %v10995_v6 = vld [vmem:[#allocation20 + $0x48] sm:$0xff]  }
 0xb49   :  { %11331 = vrcp.f32 %v8285_v17  ;;  %v8272_v24 = vmul.f32 %v11324_v26, %v11322_v23  ;;  %v11326_v46 = vpop.eup %11325  ;;  %v10998_v23 = vld [vmem:[#allocation18 + $0x38] sm:$0xff]   ;;  %v10999_v17 = vld [vmem:[#allocation20 + $0x40] sm:$0xff]  }
 0xb4a   :  { %v8296_v35 = vadd.f32 1.0, %v11326_v46  ;;  %v11000_v26 = vld [vmem:[#allocation20] sm:$0xff]  }
 0xb4b   :  { %8304 = vst [vmem:[#allocation5 + $0x1] sm:$0x1] %v8272_v24  ;;  %v8306_v56 = vpack.c.bf16 %v8272_v24, %v8272_v24  ;;  %v11001_v24 = vld [vmem:[#allocation18 + $0x70] sm:$0xff]   ;;  %v11014_v46 = vld [vmem:[#allocation18 + $0x40] sm:$0xff]  }
 0xb4c   :  { %11333 = vrcp.f32 %v8296_v35 }
 0xb4d   :  { %8532 = vmatmul.mubr.bf16.vlgmr.msra.gmra.mxu0 %v8306_v56  ;;  %8573 = vmatmul.mubr.bf16.vlgmr.msra.gmra.mxu1 %v8306_v56  ;;  %v11005_v56 = vld [vmem:[#allocation18 + $0x28] sm:$0xff]  }
 0xb4e   :  { %8775 = vmatpush1.bf16.msra.mxu0 %v10935_v48  ;;  %8816 = vmatpush1.bf16.msra.mxu1 %v10938_v54  ;;  %v11003_v48 = vld [vmem:[#allocation18 + $0x30] sm:$0xff]   ;;  %v11004_v54 = vld [vmem:[#allocation18 + $0x68] sm:$0xff]  }
 0xb4f   :  { %8776 = vmatprep.subr.bf16.mxu0 %v10943_v55  ;;  %8817 = vmatprep.subr.bf16.mxu1 %v10946_v0  ;;  %v11006_v55 = vld [vmem:[#allocation18 + $0x60] sm:$0xff]  }
 0xb50   :  { %8806 = vmatprep.mubr.bf16.mxu0 %v13292_v41  ;;  %8847 = vmatprep.mubr.bf16.mxu1 %v13292_v41  ;;  %v10961_v41 = vld [vmem:[#allocation17 + $0x64] ss:$16 sps:$4 sm:$0xff]  }
 0xb51   :  { %v11007_v0 = vld [vmem:[#allocation18 + $0x20] sm:$0xff]  }
 0xb52   :  { %8777 = vmatpush1.bf16.msra.mxu0 %v10941_v11  ;;  %8818 = vmatpush1.bf16.msra.mxu1 %v10944_v34  ;;  %v11008_v11 = vld [vmem:[#allocation18 + $0x58] sm:$0xff]  }
 0xb53   :  { %8778 = vmatprep.subr.bf16.mxu0 %v10949_v5  ;;  %8819 = vmatprep.subr.bf16.mxu1 %v10952_v19  ;;  %v11009_v34 = vld [vmem:[#allocation18 + $0x18] sm:$0xff]   ;;  %v11010_v5 = vld [vmem:[#allocation18 + $0x50] sm:$0xff]  }
 0xb54   :  { %v11328_v45 = vpop.eup %11327  ;;  %v11011_v19 = vld [vmem:[#allocation18 + $0x10] sm:$0xff]  }
 0xb55   :  { %v11330_v49 = vpop.eup %11329 }
 0xb56   :  { %v11332_v8 = vpop.eup %11331  ;;  %8779 = vmatpush1.bf16.msra.mxu0 %v10947_v28  ;;  %8820 = vmatpush1.bf16.msra.mxu1 %v10950_v38  ;;  %v8300_v22 = vmul.f32 %v11330_v49, %v11328_v45  ;;  %v11012_v28 = vld [vmem:[#allocation18 + $0x48] sm:$0xff]  }
 0xb57   :  { %8780 = vmatprep.subr.bf16.mxu0 %v10955_v43  ;;  %8821 = vmatprep.subr.bf16.mxu1 %v10958_v30  ;;  %v8299_v39 = vmul.f32 %v11332_v8, %v13174_v47  ;;  %v10973_v47 = vld [vmem:[#allocation17 + $0x24] ss:$16 sps:$4 sm:$0xff]   ;;  %v11013_v38 = vld [vmem:[#allocation18 + $0x8] sm:$0xff]  }
 0xb58   :  { %v11015_v43 = vld [vmem:[#allocation18] sm:$0xff]  }
 0xb59   :  { %v13210_v4 = vadd.f32 %v8300_v22, %v8299_v39  ;;  %v11334_v32 = vpop.eup %11333 }
 0xb5a   :  { %8781 = vmatpush1.bf16.msra.mxu0 %v10953_v21  ;;  %8822 = vmatpush1.bf16.msra.mxu1 %v10956_v37 }
 0xb5b   :  { %8782 = vmatprep.subr.bf16.mxu0 %v10961_v41  ;;  %8823 = vmatprep.subr.bf16.mxu1 %v10964_v40  ;;  %11335 = vtanh.f32 %v13210_v4 }
 0xb5e   :  { %8783 = vmatpush1.bf16.msra.mxu0 %v10959_v25  ;;  %8824 = vmatpush1.bf16.msra.mxu1 %v10962_v61 }
 0xb5f   :  { %8784 = vmatprep.subr.bf16.mxu0 %v10967_v62  ;;  %8825 = vmatprep.subr.bf16.mxu1 %v10970_v7  ;;  %v8857_v7 = vld [vmem:[#allocation4 + $0x2] ss:$4 sm:$0xf] }
 0xb62   :  { %8785 = vmatpush1.bf16.msra.mxu0 %v10965_v63  ;;  %8826 = vmatpush1.bf16.msra.mxu1 %v10968_v33 }
 0xb63   :  { %8786 = vmatprep.subr.bf16.mxu0 %v10973_v47  ;;  %8827 = vmatprep.subr.bf16.mxu1 %v10976_v1 }
 0xb66   :  { %8787 = vmatpush1.bf16.msra.mxu0 %v10971_v10  ;;  %8828 = vmatpush1.bf16.msra.mxu1 %v10974_v12 }
 0xb67   :  { %8788 = vmatprep.subr.bf16.mxu0 %v10979_v14  ;;  %8829 = vmatprep.subr.bf16.mxu1 %v10982_v58 }
 0xb68   :  { %v11336_v15 = vpop.eup %11335 }
 0xb69   :  { %v8303_v60 = vmul.f32 %v11336_v15, %v11334_v32 }
 0xb6a   :  { %8789 = vmatpush1.bf16.msra.mxu0 %v10977_v52  ;;  %8830 = vmatpush1.bf16.msra.mxu1 %v10980_v50 }
 0xb6b   :  { %8305 = vst [vmem:[#allocation5 + $0x5] sm:$0x1] %v8303_v60  ;;  %v8581_v2 = vpack.c.bf16 %v8303_v60, %v8303_v60  ;;  %10344 = vmatprep.subr.bf16.mxu0 %v10983_v3  ;;  %10366 = vmatprep.subr.bf16.mxu1 %v10997_v44 }
 0xb6d   :  { %8807 = vmatmul.mubr.bf16.vlgmr.msra.gmra.mxu0 %v8581_v2  ;;  %8848 = vmatmul.mubr.bf16.vlgmr.msra.gmra.mxu1 %v8581_v2 }
 0xb6e   :  { %10345 = vmatpush3.bf16.msra.mxu0 %v10984_v16  ;;  %10367 = vmatpush3.bf16.msra.mxu1 %v10998_v23 }
 0xb6f   :  { %10346 = vmatprep.subr.bf16.mxu0 %v10985_v18  ;;  %10368 = vmatprep.subr.bf16.mxu1 %v11001_v24 }
 0xb72   :  { %10347 = vmatpush3.bf16.msra.mxu0 %v10986_v29  ;;  %10369 = vmatpush3.bf16.msra.mxu1 %v11003_v48 }
 0xb73   :  { %10348 = vmatprep.subr.bf16.mxu0 %v10987_v53  ;;  %10370 = vmatprep.subr.bf16.mxu1 %v11004_v54 }
 0xb76   :  { %10349 = vmatpush3.bf16.msra.mxu0 %v10988_v27  ;;  %10371 = vmatpush3.bf16.msra.mxu1 %v11005_v56 }
 0xb77   :  { %10350 = vmatprep.subr.bf16.mxu0 %v10989_v36  ;;  %10372 = vmatprep.subr.bf16.mxu1 %v11006_v55 }
 0xb7a   :  { %10351 = vmatpush3.bf16.msra.mxu0 %v10990_v31  ;;  %10373 = vmatpush3.bf16.msra.mxu1 %v11007_v0 }
 0xb7b   :  { %10352 = vmatprep.subr.bf16.mxu0 %v10991_v51  ;;  %10374 = vmatprep.subr.bf16.mxu1 %v11008_v11 }
 0xb7e   :  { %10353 = vmatpush3.bf16.msra.mxu0 %v10992_v9  ;;  %10375 = vmatpush3.bf16.msra.mxu1 %v11009_v34 }
 0xb7f   :  { %10354 = vmatprep.subr.bf16.mxu0 %v10993_v13  ;;  %10376 = vmatprep.subr.bf16.mxu1 %v11010_v5 }
 0xb82   :  { %10355 = vmatpush3.bf16.msra.mxu0 %v10994_v59  ;;  %10377 = vmatpush3.bf16.msra.mxu1 %v11011_v19  ;;  %v8889_v59 = vld [vmem:[#allocation4 + $0x10] ss:$4 sm:$0xf] }
 0xb83   :  { %10356 = vmatprep.subr.bf16.mxu0 %v10995_v6  ;;  %10378 = vmatprep.subr.bf16.mxu1 %v11012_v28 }
 0xb86   :  { %10357 = vmatpush3.bf16.msra.mxu0 %v10996_v42  ;;  %10379 = vmatpush3.bf16.msra.mxu1 %v11013_v38 }
 0xb87   :  { %10358 = vmatprep.subr.bf16.mxu0 %v10999_v17  ;;  %10380 = vmatprep.subr.bf16.mxu1 %v11014_v46 }
 0xb8a   :  { %10359 = vmatpush3.bf16.msra.mxu0 %v11000_v26  ;;  %10381 = vmatpush3.bf16.msra.mxu1 %v11015_v43 }
 0xc0d   :  { %v8533_v30 = vpop.f32.mrf.mxu0  ;;  %v8574_v45 = vpop.f32.mrf.mxu1 }
 0xc0f   :  { %v8535_v49 = vpop.f32.mrf.mxu0  ;;  %v8576_v8 = vpop.f32.mrf.mxu1 }
 0xc10   :  { %v8862_v35 = vcombine.low %v8533_v30, %v8535_v49  ;;  %v8863_v21 = vcombine.low %v8574_v45, %v8576_v8 }
 0xc11   :  { %v8537_v37 = vpop.f32.mrf.mxu0  ;;  %v8578_v41 = vpop.f32.mrf.mxu1 }
 0xc12   :  { %v8870_v40 = vrot.slane %v8862_v35, %v11965_v20  ;;  %v8877_v39 = vrot.slane %v8863_v21, %v11965_v20 }
 0xc13   :  { %v8538_v22 = vpop.f32.mrf.mxu0  ;;  %v8579_v25 = vpop.f32.mrf.mxu1 }
 0xc14   :  { %v8878_v61 = vcombine.low %v8870_v40, %v8877_v39 }
 0xc16   :  { %v8885_v62 = vrot.slane %v8878_v61, %v11965_v20 }
 0xc18   :  { %v8887_v63 = vadd.f32 %v8885_v62, %v8857_v7 }
 0xc1a   :  { %v10305_v33 = vmul.f32 -1.442695, %v8887_v63  ;;  %v8927_v47 = vrot.slane %v8887_v63, 1  ;;  %v8938_v10 = vrot.slane %v8887_v63, 3  ;;  %v8935_v58 = vrot.slane %v8887_v63, 2 }
 0xc1c   :  { %11337 = vpow2.f32 %v10305_v33  ;;  %v10306_v1 = vmul.f32 -1.442695, %v8927_v47  ;;  %v10307_v12 = vmul.f32 -1.442695, %v8938_v10 }
 0xc1e   :  { %11339 = vpow2.f32 %v10306_v1 }
 0xc1f   :  { %11341 = vpow2.f32 %v10307_v12 }
 0xc29   :  { %v11338_v14 = vpop.eup %11337 }
 0xc2a   :  { %v8923_v52 = vadd.f32 1.0, %v11338_v14 }
 0xc2b   :  { %v11340_v50 = vpop.eup %11339 }
 0xc2c   :  { %11343 = vrcp.f32 %v8923_v52  ;;  %v8932_v32 = vadd.f32 1.0, %v11340_v50  ;;  %v11342_v6 = vpop.eup %11341 }
 0xc2d   :  { %11345 = vtanh.f32 %v8935_v58  ;;  %v8808_v15 = vpop.f32.mrf.mxu0  ;;  %v8849_v60 = vpop.f32.mrf.mxu1  ;;  %v8943_v48 = vadd.f32 1.0, %v11342_v6 }
 0xc2e   :  { %11347 = vrcp.f32 %v8932_v32 }
 0xc2f   :  { %v8810_v2 = vpop.f32.mrf.mxu0  ;;  %v8851_v3 = vpop.f32.mrf.mxu1 }
 0xc30   :  { %v8894_v16 = vcombine.low %v8808_v15, %v8810_v2  ;;  %v8895_v18 = vcombine.low %v8849_v60, %v8851_v3 }
 0xc31   :  { %v8812_v29 = vpop.f32.mrf.mxu0  ;;  %v8853_v53 = vpop.f32.mrf.mxu1 }
 0xc32   :  { %v8902_v27 = vrot.slane %v8894_v16, %v11965_v20  ;;  %v8909_v36 = vrot.slane %v8895_v18, %v11965_v20  ;;  %v13349_v29 = vlaneseq }
 0xc33   :  { %v8813_v31 = vpop.f32.mrf.mxu0  ;;  %v8854_v51 = vpop.f32.mrf.mxu1 }
 0xc34   :  { %v8910_v9 = vcombine.low %v8902_v27, %v8909_v36  ;;  %v9357_v53 = vand.u32 127, %v13349_v29  ;;  %v10343_v51 = vld [vmem:[#allocation21] ss:$0 sm:$0xff] }
 0xc36   :  { %v8917_v13 = vrot.slane %v8910_v9, %v11965_v20  ;;  %vm9358_vm3 = vcmp.lt.s32.totalorder %v9357_v53, 4 }
 0xc38   :  { %v8919_v42 = vadd.f32 %v8917_v13, %v8889_v59 }
 0xc39   :  { %v11344_v44 = vpop.eup %11343 }
 0xc3a   :  { %v11346_v23 = vpop.eup %11345  ;;  %v10308_v17 = vmul.f32 -1.442695, %v8919_v42  ;;  %v8958_v26 = vrot.slane %v8919_v42, 1  ;;  %v8969_v11 = vrot.slane %v8919_v42, 3  ;;  %v8966_v5 = vrot.slane %v8919_v42, 2 }
 0xc3b   :  { %v11348_v24 = vpop.eup %11347  ;;  %v8947_v56 = vmul.f32 %v11346_v23, %v11344_v44 }
 0xc3c   :  { %v8946_v54 = vmul.f32 %v11348_v24, %v13204_v57  ;;  %11349 = vpow2.f32 %v10308_v17  ;;  %v10309_v55 = vmul.f32 -1.442695, %v8958_v26  ;;  %v10310_v20 = vmul.f32 -1.442695, %v8969_v11 }
 0xc3e   :  { %v8948_v0 = vadd.f32 %v8947_v56, %v8946_v54  ;;  %11351 = vpow2.f32 %v10309_v55 }
 0xc3f   :  { %11353 = vrcp.f32 %v8943_v48 }
 0xc40   :  { %11355 = vtanh.f32 %v8948_v0 }
 0xc41   :  { %11357 = vpow2.f32 %v10310_v20 }
 0xc49   :  { %v11350_v34 = vpop.eup %11349 }
 0xc4a   :  { %v8954_v19 = vadd.f32 1.0, %v11350_v34 }
 0xc4b   :  { %v11352_v28 = vpop.eup %11351 }
 0xc4c   :  { %v11354_v38 = vpop.eup %11353  ;;  %11359 = vrcp.f32 %v8954_v19  ;;  %v8963_v46 = vadd.f32 1.0, %v11352_v28 }
 0xc4d   :  { %v11356_v43 = vpop.eup %11355  ;;  %11361 = vtanh.f32 %v8966_v5 }
 0xc4e   :  { %v8950_v57 = vmul.f32 %v11356_v43, %v11354_v38  ;;  %11363 = vrcp.f32 %v8963_v46  ;;  %v11358_v45 = vpop.eup %11357 }
 0xc4f   :  { %v8974_v39 = vadd.f32 1.0, %v11358_v45 }
 0xc50   :  { %8982 = vst [vmem:[#allocation5 + $0x2] sm:$0x1] %v8950_v57 }
 0xc51   :  { %11365 = vrcp.f32 %v8974_v39 }
 0xc57   :  { %v8990_v30 = vld [vmem:[#allocation5] sm:$0x66] }
 0xc58   :  { %v8992_v49 = vcombine.high %v8990_v30, %v8990_v30  ;;  %v8994_v8 = vpack.c.bf16 %v8990_v30, %v8990_v30 }
 0xc59   :  { %v11360_v35 = vpop.eup %11359 }
 0xc5a   :  { %v11362_v21 = vpop.eup %11361  ;;  %v8995_v37 = vpack.c.bf16 %v8992_v49, %v8992_v49  ;;  %v9063_v41 = vshll.u32 %v8994_v8, 16  ;;  %v9061_v47 = vshrl.u32 %v8994_v8, 16 }
 0xc5b   :  { %v11364_v40 = vpop.eup %11363  ;;  %v8978_v25 = vmul.f32 %v11362_v21, %v11360_v35 }
 0xc5c   :  { %v8977_v22 = vmul.f32 %v11364_v40, %v13210_v4  ;;  %v9070_v61 = vshll.u32 %v8995_v37, 16  ;;  %v9065_v62 = vrot.slane %v9063_v41, 1  ;;  %v9068_v63 = vshrl.u32 %v8995_v37, 16 }
 0xc5e   :  { %v8979_v7 = vadd.f32 %v8978_v25, %v8977_v22  ;;  %v9072_v33 = vrot.slane %v9070_v61, 1  ;;  %v9066_v10 = vor.u32 %v9065_v62, %v9061_v47  ;;  %v11366_v12 = vpop.eup %11365 }
 0xc60   :  { %11367 = vtanh.f32 %v8979_v7  ;;  %v9073_v1 = vor.u32 %v9072_v33, %v9068_v63 }
 0xc62   :  { %9204 = vmatprep.mubr.bf16.mxu0 %v9073_v1 }
 0xc63   :  { %9205 = vmatmul.mubr.bf16.vlgmr.msra.gmra.mxu0 %v9066_v10 }
 0xc6d   :  { %v11368_v14 = vpop.eup %11367 }
 0xc6e   :  { %v8981_v58 = vmul.f32 %v11368_v14, %v11366_v12 }
 0xc70   :  { %8983 = vst [vmem:[#allocation5 + $0x4] sm:$0x1] %v8981_v58 }
 0xc77   :  { %v8984_v52 = vld [vmem:[#allocation5] sm:$0x33] }
 0xc78   :  { %v8986_v50 = vcombine.high %v8984_v52, %v8984_v52  ;;  %v8988_v32 = vpack.c.bf16 %v8984_v52, %v8984_v52 }
 0xc7a   :  { %v8989_v4 = vpack.c.bf16 %v8986_v50, %v8986_v50 }
 0xc7c   :  { %9340 = vmatprep.mubr.bf16.mxu1 %v8989_v4 }
 0xc7d   :  { %9341 = vmatmul.mubr.bf16.vlgmr.msra.gmra.mxu1 %v8988_v32 }
 0xd23   :  { %v10360_v15 = vpop.f32.mrf.mxu0 }
 0xd25   :  { %v10361_v60 = vpop.f32.mrf.mxu0 }
 0xd26   :  { %v10362_v27 = vadd.f32 %v10361_v60, %v10360_v15 }
 0xd27   :  { %v10363_v2 = vpop.f32.mrf.mxu0 }
 0xd29   :  { %v10364_v3 = vpop.f32.mrf.mxu0 }
 0xd3d   :  { %v10382_v16 = vpop.f32.mrf.mxu1 }
 0xd3f   :  { %v10383_v18 = vpop.f32.mrf.mxu1 }
 0xd40   :  { %v10384_v36 = vadd.f32 %v10383_v18, %v10382_v16 }
 0xd41   :  { %v10385_v31 = vpop.f32.mrf.mxu1 }
 0xd42   :  { %v9343_v9 = vadd.f32 %v10384_v36, %v10362_v27 }
 0xd43   :  { %v10386_v13 = vpop.f32.mrf.mxu1 }
 0xd44   :  { %v9355_v59 = vadd.f32 %v10343_v51, %v9343_v9 }
 0xd46   :  { %v9359_v6 = vsel %vm9358_vm3, %v9355_v59, -1e+30 }
 0xd47   :  { %v9360_v42 = vsel %vm5954_vm2, %v9359_v6, -inf }
 0xd48   :  { %9361 = vmax.xlane.f32.xlu0 %v9360_v42 }
 0xdd1   :  { %v9362_v44 = vpop.xlane.xlu0 %9361 }
 0xdd2   :  { %v9363_v23 = vsub.f32 %v9359_v6, %v9362_v44 }
 0xdd4   :  { %v9364_v17 = vmul.f32 1.442695, %v9363_v23 }
 0xdd6   :  { %11369 = vpow2.f32 %v9364_v17 }
 0xde3   :  { %v11370_v26 = vpop.eup %11369 }
 0xde4   :  { %v9366_v24 = vsel %vm5954_vm2, %v11370_v26, 0.0 }
 0xde5   :  { %9367 = vadd.xlane.f32.xlu0 %v9366_v24 }
 0xe6e   :  { %v9368_v48 = vpop.xlane.xlu0 %9367 }
 0xe6f   :  { %11371 = vlog2.f32 %v9368_v48 }
 0xe7c   :  { %v11372_v54 = vpop.eup %11371 }
 0xe7d   :  { %v9370_v56 = vmul.f32 0.6931472, %v11372_v54 }
 0xe7f   :  { %v9371_v55 = vsub.f32 %v9363_v23, %v9370_v56 }
 0xe81   :  { %9372 = vst [vmem:[#allocation23] sm:$0x3] %v9371_v55 }
 0xe82   :  { %11614 = shalt.err (!%p11611_p12)
}
 0xe83   :  { %9382 = dma.vmem_to_hbm [thread:$0]  %s9380_s26, 32, %s13239_s12, [#allocation8]  }
 0xe84   :  { %11635 = dma.done.wait [#allocation8], 32  }
 0xe85   :  { %11636 = vsyncadd [#allocation8], 4294967264 }
 0xe86   :  { %9386 = vsyncpa [#allocation7], 1 }
 0xe87   :  { %9387 = vsyncpa [#allocation10], 1 }
 0xe88   :  { %9388 = vsyncpa [#allocation13], 1 }
 0xe89   :  { %9389 = vsyncpa [#allocation16], 1 }
 0xe8a   :  { %9390 = vsyncpa [#allocation19], 1 }
 0xe8b   :  { %9391 = vsyncpa [#allocation22], 1 }
 0xe8c   :  { %9392 = vsyncpa [#allocation8], 1 }

</bundles_post_ra>
